<compile_context>
chip_gen: v6e
topology: v6e:2x2x1
jax: 0.10.0
libtpu: 0.0.40
codegen_flags: <defaults>
</compile_context>

<pallas_src>
import functools

import jax
import jax.numpy as jnp
from jax import lax
from jax.experimental import pallas as pl
from jax.experimental.pallas import tpu as pltpu

NEG_SLOPE = 0.05                 # LeakyReLU slope used by RFDB's activation('lrelu', 0.05)
ACT_DTYPE = jnp.bfloat16         # storage / matmul-operand dtype (f32 accumulation everywhere)
VMEM_LIMIT = 32 * 1024 * 1024    # safe on v5e/v6e/v7x; blocks below are sized well under this


def _apply_act(y, act):
    if act == "lrelu":
        return jnp.where(y >= 0, y, NEG_SLOPE * y)
    if act == "relu":
        return jnp.maximum(y, 0.0)
    if act == "sigmoid":
        return jax.nn.sigmoid(y)
    return y


def _pick_m_tile(m, max_tile=2048):
    """Largest multiple of 128 that divides m (<= max_tile); fall back to the full extent."""
    if m % 128 == 0:
        t = min(max_tile, m)
        t -= t % 128
        while m % t:
            t -= 128
        return t
    return m


def _pick_row_tile(h, max_rows):
    """Row-tile height: whole image if small, else a divisor of h that is a multiple of 8."""
    if h <= max_rows:
        return h
    for t in range(max_rows, 7, -1):
        if h % t == 0 and t % 8 == 0:
            return t
    return h


def _row_tiling(Cin, H, W):
    """Shared row-tile parameters for the 3x3-conv style kernels."""
    max_rows = max(1, min(256, (1 << 20) // max(1, 2 * Cin * (W + 2))))
    th = _pick_row_tile(H, max_rows)
    nH = H // th
    flat = (nH == 1) or (th * W) % 128 == 0     # lane-dense flat-spatial stores when legal
    return th, nH, flat


def _halo_windows(x, th, nH):
    """Pad (N,C,H,W) by 1 and expose (N, nH, C, th+2, W+2) row windows with a 1-row halo."""
    xp = jnp.pad(x, ((0, 0), (0, 0), (1, 1), (1, 1)))             # (N, C, H+2, W+2)
    if nH == 1:
        return xp[:, None]                                        # free reshape, no copy
    # TODO(synk): overlapping-halo reads straight from `xp` (element-indexed row offsets)
    # would avoid this small duplicated-rows copy; explicit windows keep the BlockSpecs
    # plain Blocked and portable.
    return jnp.stack([xp[:, :, r * th:r * th + th + 2, :] for r in range(nH)], axis=1)


# --------------------------------------------------------------------------------------
# 1x1 conv (pointwise): tiled matmul, channels-first, lane-dense output
# --------------------------------------------------------------------------------------
def _pointwise_kernel(x_ref, w_ref, b_ref, o_ref, *, act):
    y = jnp.dot(w_ref[...], x_ref[0], preferred_element_type=jnp.float32)
    y = y + b_ref[...]
    o_ref[0] = _apply_act(y, act).astype(o_ref.dtype)


def pointwise_conv(x, w, b, act=None, out_dtype=None):
    """x: (N, Cin, H, W);  w: (Cout, Cin) bf16;  b: (Cout, 1) f32."""
    N, Cin, H, W = x.shape
    Cout = w.shape[0]
    M = H * W
    tm = _pick_m_tile(M)
    out_dtype = out_dtype or ACT_DTYPE
    y = pl.pallas_call(
        functools.partial(_pointwise_kernel, act=act),
        out_shape=jax.ShapeDtypeStruct((N, Cout, M), out_dtype),
        grid=(N, M // tm),
        in_specs=[
            pl.BlockSpec((1, Cin, tm), lambda n, m: (n, 0, m)),
            pl.BlockSpec((Cout, Cin), lambda n, m: (0, 0)),
            pl.BlockSpec((Cout, 1), lambda n, m: (0, 0)),
        ],
        out_specs=pl.BlockSpec((1, Cout, tm), lambda n, m: (n, 0, m)),
        compiler_params=pltpu.CompilerParams(
            dimension_semantics=("parallel", "parallel"),
            vmem_limit_bytes=VMEM_LIMIT),
    )(x.reshape(N, Cin, M), w, b)
    return y.reshape(N, Cout, H, W)


# --------------------------------------------------------------------------------------
# 3x3 conv (stride 1, pad 1), row-tiled with halo, single K=9*Cin dot,
# fused residual-from-input + activation + optional 1x1 "distill" branch.
# --------------------------------------------------------------------------------------
def _conv3x3_kernel(*refs, th, W, Cin, Cout, residual, act, distill, act_d, flat_out):
    if distill:
        xw_ref, w_ref, b_ref, wd_ref, bd_ref, o_ref, od_ref = refs
    else:
        xw_ref, w_ref, b_ref, o_ref = refs

    xp = xw_ref[0, 0]                                             # (Cin, th+2, W+2)
    taps = [xp[:, dy:dy + th, dx:dx + W] for dy in range(3) for dx in range(3)]
    patches = jnp.concatenate(taps, axis=0).reshape(9 * Cin, th * W)
    acc = jnp.dot(w_ref[...], patches, preferred_element_type=jnp.float32)  # (Cout, th*W)
    acc = acc + b_ref[...]

    if residual or distill:
        x_in = xp[:, 1:1 + th, 1:1 + W].reshape(Cin, th * W)
    if residual:
        acc = acc + x_in.astype(jnp.float32)
    y = _apply_act(acc, act)
    if flat_out:
        o_ref[0] = y.astype(o_ref.dtype)
    else:
        o_ref[0] = y.reshape(Cout, th, W).astype(o_ref.dtype)

    if distill:
        dc = wd_ref.shape[0]
        d = jnp.dot(wd_ref[...], x_in, preferred_element_type=jnp.float32) + bd_ref[...]
        d = _apply_act(d, act_d)
        if flat_out:
            od_ref[0] = d.astype(od_ref.dtype)
        else:
            od_ref[0] = d.reshape(dc, th, W).astype(od_ref.dtype)


def conv3x3(x, conv_params, distill_params=None, residual=False, act="lrelu",
            act_d="lrelu", out_dtype=None):
    """x: (N, Cin, H, W).  conv_params: ((Cout, 9*Cin) bf16, (Cout, 1) f32).
    distill_params: optional ((dc, Cin) bf16, (dc, 1) f32) 1x1 conv reading the same input."""
    w3, b3 = conv_params
    N, Cin, H, W = x.shape
    Cout = w3.shape[0]
    out_dtype = out_dtype or ACT_DTYPE

    th, nH, flat_out = _row_tiling(Cin, H, W)
    xw = _halo_windows(x, th, nH)                                 # (N, nH, Cin, th+2, W+2)

    in_specs = [
        pl.BlockSpec((1, 1, Cin, th + 2, W + 2), lambda n, r: (n, r, 0, 0, 0)),
        pl.BlockSpec((Cout, 9 * Cin), lambda n, r: (0, 0)),
        pl.BlockSpec((Cout, 1), lambda n, r: (0, 0)),
    ]
    args = [xw, w3, b3]

    if flat_out:
        out_shapes = [jax.ShapeDtypeStruct((N, Cout, H * W), out_dtype)]
        out_specs = [pl.BlockSpec((1, Cout, th * W), lambda n, r: (n, 0, r))]
    else:
        out_shapes = [jax.ShapeDtypeStruct((N, Cout, H, W), out_dtype)]
        out_specs = [pl.BlockSpec((1, Cout, th, W), lambda n, r: (n, 0, r, 0))]

    has_distill = distill_params is not None
    if has_distill:
        wd, bd = distill_params
        dc = wd.shape[0]
        in_specs += [pl.BlockSpec((dc, Cin), lambda n, r: (0, 0)),
                     pl.BlockSpec((dc, 1), lambda n, r: (0, 0))]
        args += [wd, bd]
        if flat_out:
            out_shapes.append(jax.ShapeDtypeStruct((N, dc, H * W), out_dtype))
            out_specs.append(pl.BlockSpec((1, dc, th * W), lambda n, r: (n, 0, r)))
        else:
            out_shapes.append(jax.ShapeDtypeStruct((N, dc, H, W), out_dtype))
            out_specs.append(pl.BlockSpec((1, dc, th, W), lambda n, r: (n, 0, r, 0)))

    kernel = functools.partial(_conv3x3_kernel, th=th, W=W, Cin=Cin, Cout=Cout,
                               residual=residual, act=act, distill=has_distill,
                               act_d=act_d, flat_out=flat_out)
    outs = pl.pallas_call(
        kernel,
        out_shape=tuple(out_shapes),
        grid=(N, nH),
        in_specs=in_specs,
        out_specs=tuple(out_specs),
        compiler_params=pltpu.CompilerParams(
            dimension_semantics=("parallel", "parallel"),
            vmem_limit_bytes=VMEM_LIMIT),
    )(*args)

    r_out = outs[0].reshape(N, Cout, H, W)
    if has_distill:
        return r_out, outs[1].reshape(N, wd.shape[0], H, W)
    return r_out


# --------------------------------------------------------------------------------------
# Fused c4 (3x3 + lrelu) + channel-concat + c5 (1x1) + ESA conv1 (1x1):
# r4 and the concatenated tensor never hit HBM; c5 is produced and immediately reused for
# conv1 inside the same kernel.  Row-tiled with a 1-row halo (same scheme as conv3x3).
# --------------------------------------------------------------------------------------
def _c4_cat_c5_c1_kernel(xw_ref, d1_ref, d2_ref, d3_ref,
                         w4_ref, b4_ref, w5_ref, b5_ref, w1_ref, b1_ref,
                         c5_ref, c1_ref, *, th, W, Cin, flat):
    xp = xw_ref[0, 0]                                             # (Cin, th+2, W+2)
    taps = [xp[:, dy:dy + th, dx:dx + W] for dy in range(3) for dx in range(3)]
    patches = jnp.concatenate(taps, axis=0).reshape(9 * Cin, th * W)
    r4 = jnp.dot(w4_ref[...], patches, preferred_element_type=jnp.float32) + b4_ref[...]
    r4 = _apply_act(r4, "lrelu")                                  # (dc, th*W) f32

    def load_flat(ref):
        d = ref[0]
        return d if flat else d.reshape(d.shape[0], th * W)

    d1 = load_flat(d1_ref)
    d2 = load_flat(d2_ref)
    d3 = load_flat(d3_ref)
    src = jnp.concatenate([d1, d2, d3, r4.astype(d1.dtype)], axis=0)   # (4*dc, th*W)

    c5 = jnp.dot(w5_ref[...], src, preferred_element_type=jnp.float32) + b5_ref[...]
    c1 = jnp.dot(w1_ref[...], c5.astype(w1_ref.dtype),
                 preferred_element_type=jnp.float32) + b1_ref[...]
    if flat:
        c5_ref[0] = c5.astype(c5_ref.dtype)
        c1_ref[0] = c1.astype(c1_ref.dtype)
    else:
        c5_ref[0] = c5.reshape(c5.shape[0], th, W).astype(c5_ref.dtype)
        c1_ref[0] = c1.reshape(c1.shape[0], th, W).astype(c1_ref.dtype)


def c4_concat_c5_conv1(r3, d1, d2, d3, c4_params, c5_params, conv1_params):
    w4, b4 = c4_params          # (dc, 9*Cin) bf16, (dc, 1) f32
    w5, b5 = c5_params          # (C, 4*dc)   bf16, (C, 1)  f32
    w1, b1 = conv1_params       # (f, C)      bf16, (f, 1)  f32
    N, Cin, H, W = r3.shape
    dc = d1.shape[1]
    C = w5.shape[0]
    f = w1.shape[0]

    th, nH, flat = _row_tiling(Cin, H, W)
    xw = _halo_windows(r3, th, nH)                                # (N, nH, Cin, th+2, W+2)

    if flat:
        d_args = [a.reshape(N, dc, H * W) for a in (d1, d2, d3)]  # metadata-only reshape
        d_spec = pl.BlockSpec((1, dc, th * W), lambda n, r: (n, 0, r))
        out_shapes = (jax.ShapeDtypeStruct((N, C, H * W), ACT_DTYPE),
                      jax.ShapeDtypeStruct((N, f, H * W), ACT_DTYPE))
        out_specs = (pl.BlockSpec((1, C, th * W), lambda n, r: (n, 0, r)),
                     pl.BlockSpec((1, f, th * W), lambda n, r: (n, 0, r)))
    else:
        d_args = [d1, d2, d3]
        d_spec = pl.BlockSpec((1, dc, th, W), lambda n, r: (n, 0, r, 0))
        out_shapes = (jax.ShapeDtypeStruct((N, C, H, W), ACT_DTYPE),
                      jax.ShapeDtypeStruct((N, f, H, W), ACT_DTYPE))
        out_specs = (pl.BlockSpec((1, C, th, W), lambda n, r: (n, 0, r, 0)),
                     pl.BlockSpec((1, f, th, W), lambda n, r: (n, 0, r, 0)))

    kernel = functools.partial(_c4_cat_c5_c1_kernel, th=th, W=W, Cin=Cin, flat=flat)
    c5_out, c1_out = pl.pallas_call(
        kernel,
        out_shape=out_shapes,
        grid=(N, nH),
        in_specs=[pl.BlockSpec((1, 1, Cin, th + 2, W + 2), lambda n, r: (n, r, 0, 0, 0)),
                  d_spec, d_spec, d_spec,
                  pl.BlockSpec((dc, 9 * Cin), lambda n, r: (0, 0)),
                  pl.BlockSpec((dc, 1), lambda n, r: (0, 0)),
                  pl.BlockSpec((C, 4 * dc), lambda n, r: (0, 0)),
                  pl.BlockSpec((C, 1), lambda n, r: (0, 0)),
                  pl.BlockSpec((f, C), lambda n, r: (0, 0)),
                  pl.BlockSpec((f, 1), lambda n, r: (0, 0))],
        out_specs=out_specs,
        compiler_params=pltpu.CompilerParams(
            dimension_semantics=("parallel", "parallel"),
            vmem_limit_bytes=VMEM_LIMIT),
    )(xw, *d_args, w4, b4, w5, b5, w1, b1)
    return c5_out.reshape(N, C, H, W), c1_out.reshape(N, f, H, W)


# --------------------------------------------------------------------------------------
# ESA conv2: 3x3 conv, stride 2, no padding. im2col in JAX feeding the tiled matmul kernel.
# --------------------------------------------------------------------------------------
def conv3x3_s2(x, conv_params):
    # TODO(synk): the stride-2 im2col (9 strided slices + concat) stays in plain JAX; it only
    # touches the small ESA branch.  Moving it in-kernel would need strided ref reads.
    w, b = conv_params          # (Cout, 9*Cin) bf16, (Cout, 1) f32
    N, Cin, H, W = x.shape
    Ho, Wo = (H - 3) // 2 + 1, (W - 3) // 2 + 1
    cols = []
    for dy in range(3):
        for dx in range(3):
            cols.append(x[:, :, dy:dy + 2 * Ho - 1:2, dx:dx + 2 * Wo - 1:2])
    patches = jnp.concatenate(cols, axis=1)                       # (N, 9*Cin, Ho, Wo)
    return pointwise_conv(patches, w, b, act=None)


# --------------------------------------------------------------------------------------
# ESA tail: cf = conv_f(c1_);  c4 = conv4(c3_up + cf);  out = c5 * sigmoid(c4)   (one kernel)
# --------------------------------------------------------------------------------------
def _esa_tail_kernel(c1_ref, c3_ref, x_ref, wf_ref, bf_ref, w4_ref, b4_ref, o_ref):
    cf = jnp.dot(wf_ref[...], c1_ref[0], preferred_element_type=jnp.float32) + bf_ref[...]
    s = c3_ref[0].astype(jnp.float32) + cf
    c4 = jnp.dot(w4_ref[...], s.astype(w4_ref.dtype),
                 preferred_element_type=jnp.float32) + b4_ref[...]
    o_ref[0] = (x_ref[0].astype(jnp.float32) * jax.nn.sigmoid(c4)).astype(o_ref.dtype)


def esa_tail(c1_, c3_up, c5, conv_f_params, conv4_params, out_dtype=jnp.float32):
    w_f, b_f = conv_f_params    # (f, f) bf16, (f, 1) f32
    w4, b4 = conv4_params       # (C, f) bf16, (C, 1) f32
    N, f, H, W = c1_.shape
    C = w4.shape[0]
    M = H * W
    tm = _pick_m_tile(M)
    out = pl.pallas_call(
        _esa_tail_kernel,
        out_shape=jax.ShapeDtypeStruct((N, C, M), out_dtype),
        grid=(N, M // tm),
        in_specs=[pl.BlockSpec((1, f, tm), lambda n, m: (n, 0, m)),
                  pl.BlockSpec((1, f, tm), lambda n, m: (n, 0, m)),
                  pl.BlockSpec((1, C, tm), lambda n, m: (n, 0, m)),
                  pl.BlockSpec((f, f), lambda n, m: (0, 0)),
                  pl.BlockSpec((f, 1), lambda n, m: (0, 0)),
                  pl.BlockSpec((C, f), lambda n, m: (0, 0)),
                  pl.BlockSpec((C, 1), lambda n, m: (0, 0))],
        out_specs=pl.BlockSpec((1, C, tm), lambda n, m: (n, 0, m)),
        compiler_params=pltpu.CompilerParams(
            dimension_semantics=("parallel", "parallel"),
            vmem_limit_bytes=VMEM_LIMIT),
    )(c1_.reshape(N, f, M), c3_up.reshape(N, f, M), c5.reshape(N, C, M), w_f, b_f, w4, b4)
    return out.reshape(N, C, H, W)


# --------------------------------------------------------------------------------------
# Tiny plain-JAX glue on tiny maps
# --------------------------------------------------------------------------------------
def max_pool2d_nchw(x, k, s):
    # TODO(synk): F.max_pool2d(k=7, s=3) stays in plain JAX (operates on a 7x7 ESA map).
    y = lax.reduce_window(x.astype(jnp.float32), -jnp.inf, lax.max,
                          (1, 1, k, k), (1, 1, s, s), "VALID")
    return y.astype(x.dtype)


def bilinear_resize_nchw(x, out_h, out_w):
    # TODO(synk): F.interpolate(bilinear, align_corners=False) stays in plain JAX (tiny map).
    N, C, H, W = x.shape
    if H == out_h and W == out_w:
        return x

    def coords(in_size, out_size):
        i = jnp.arange(out_size, dtype=jnp.float32)
        src = (i + 0.5) * (in_size / out_size) - 0.5
        src = jnp.clip(src, 0.0, in_size - 1.0)
        i0 = jnp.floor(src).astype(jnp.int32)
        i1 = jnp.minimum(i0 + 1, in_size - 1)
        return i0, i1, src - i0.astype(jnp.float32)

    y0, y1, fy = coords(H, out_h)
    x0, x1, fx = coords(W, out_w)
    fy = fy[None, None, :, None]
    fx = fx[None, None, None, :]

    def g(r, c):
        return x[:, :, r][:, :, :, c]

    top = g(y0, x0) * (1 - fx) + g(y0, x1) * fx
    bot = g(y1, x0) * (1 - fx) + g(y1, x1) * fx
    return top * (1 - fy) + bot * fy


# --------------------------------------------------------------------------------------
# RFDB forward (NCHW in / NCHW out, matching the PyTorch module)
# --------------------------------------------------------------------------------------
def rfdb_forward(x_nchw, packed):
    p = packed
    x = x_nchw.astype(ACT_DTYPE)          # channels-first: spatial dims sit on the lane axis
    N, C, H, W = x.shape

    # distillation stages: each kernel reads its input once, emits refined + distilled outputs
    r1, d1 = conv3x3(x, p["c1_r"], distill_params=p["c1_d"], residual=True, act="lrelu")
    r2, d2 = conv3x3(r1, p["c2_r"], distill_params=p["c2_d"], residual=True, act="lrelu")
    r3, d3 = conv3x3(r2, p["c3_r"], distill_params=p["c3_d"], residual=True, act="lrelu")

    # fused: c4 (3x3 + lrelu) -> concat([d1,d2,d3,r4]) -> c5 (1x1) -> ESA conv1 (1x1)
    c5, c1_ = c4_concat_c5_conv1(r3, d1, d2, d3, p["c4"], p["c5"], p["esa_conv1"])

    # ----------------------------- ESA -----------------------------
    c1 = conv3x3_s2(c1_, p["esa_conv2"])
    v_max = max_pool2d_nchw(c1, 7, 3)
    v_range = conv3x3(v_max, p["esa_conv_max"], act="relu")
    c3 = conv3x3(v_range, p["esa_conv3"], act="relu")
    c3 = conv3x3(c3, p["esa_conv3_"], act=None)
    c3_up = bilinear_resize_nchw(c3.astype(jnp.float32), H, W).astype(ACT_DTYPE)
    out = esa_tail(c1_, c3_up, c5, p["esa_conv_f"], p["esa_conv4"])   # conv_f+conv4+sigmoid+gate
    return out                                                        # (N, C, H, W) float32


# --------------------------------------------------------------------------------------
# Parameters: init in PyTorch layouts, then pack into kernel layouts (bf16 weights, f32 bias)
# --------------------------------------------------------------------------------------
def init_params(key, in_channels):
    dc = in_channels // 2
    rc = in_channels
    f = in_channels // 4
    specs = {
        "c1_d": (1, in_channels, dc), "c1_r": (3, in_channels, rc),
        "c2_d": (1, rc, dc), "c2_r": (3, rc, rc),
        "c3_d": (1, rc, dc), "c3_r": (3, rc, rc),
        "c4": (3, rc, dc), "c5": (1, dc * 4, in_channels),
        "esa_conv1": (1, in_channels, f), "esa_conv_f": (1, f, f),
        "esa_conv_max": (3, f, f), "esa_conv2": (3, f, f),
        "esa_conv3": (3, f, f), "esa_conv3_": (3, f, f),
        "esa_conv4": (1, f, in_channels),
    }
    params = {}
    keys = jax.random.split(key, len(specs))
    for k_, (name, (ks, cin, cout)) in zip(keys, sorted(specs.items())):
        kw, kb = jax.random.split(k_)
        if ks == 1:
            w = jax.random.normal(kw, (cout, cin), jnp.float32) * 0.2          # (Cout, Cin)
        else:
            w = jax.random.normal(kw, (cout, cin, 3, 3), jnp.float32) * 0.2    # OIHW
        b = jax.random.normal(kb, (cout,), jnp.float32) * 0.1
        params[name] = (w, b)
    return params


def prepare_params(params):
    """Pack: 3x3 weights -> (Cout, 9*Cin) with tap-major ((ky*3+kx)*Cin + ci) ordering;
    1x1 weights -> (Cout, Cin); matmul weights bf16; biases f32 shaped (Cout, 1)."""
    packed = {}
    for name, (w, b) in params.items():
        if w.ndim == 4:                                        # OIHW (Cout, Cin, 3, 3)
            cout, cin = w.shape[0], w.shape[1]
            wk = jnp.transpose(w, (0, 2, 3, 1)).reshape(cout, 9 * cin)
        else:
            wk = w
        packed[name] = (wk.astype(ACT_DTYPE), b.reshape(-1, 1).astype(jnp.float32))
    return packed


if __name__ == "__main__":
    in_channels = 8               # -> dc = 4, rc = 8, ESA f = 2
    key = jax.random.PRNGKey(0)
    kx, kp = jax.random.split(key)
    x = jax.random.normal(kx, (2, in_channels, 16, 16), jnp.float32)   # NCHW, like PyTorch
    params = init_params(kp, in_channels)
    packed = prepare_params(params)

    fwd = jax.jit(functools.partial(rfdb_forward, packed=packed))
    out = fwd(x)
    jax.block_until_ready(out)

    assert out.shape == x.shape, (out.shape, x.shape)
    assert bool(jnp.all(jnp.isfinite(out)))
    print("KERNEL_OK")
</pallas_src>

<mosaic_0001>
module attributes {stable_mosaic.version = 11 : i64} {
  func.func @_conv3x3_kernel(%arg0: i32, %arg1: i32, %arg2: memref<1x1x8x18x18xbf16, #tpu.memory_space<vmem>>, %arg3: memref<8x72xbf16, #tpu.memory_space<vmem>>, %arg4: memref<8x1xf32, #tpu.memory_space<vmem>>, %arg5: memref<4x8xbf16, #tpu.memory_space<vmem>>, %arg6: memref<4x1xf32, #tpu.memory_space<vmem>>, %arg7: memref<1x8x256xbf16, #tpu.memory_space<vmem>>, %arg8: memref<1x4x256xbf16, #tpu.memory_space<vmem>>) attributes {dimension_semantics = [#tpu.dimension_semantics<parallel>, #tpu.dimension_semantics<parallel>], iteration_bounds = array<i64: 2, 1>, scalar_prefetch = 0 : i64, scratch_operands = 0 : i64, tpu.core_type = #tpu.core_type<tc>, window_params = [{transform_indices = @transform_0, window_bounds = array<i64: 1, 1, 8, 18, 18>}, {pipeline_mode = #tpu.pipeline_mode<synchronous>, transform_indices = @transform_1, window_bounds = array<i64: 8, 72>}, {pipeline_mode = #tpu.pipeline_mode<synchronous>, transform_indices = @transform_2, window_bounds = array<i64: 8, 1>}, {pipeline_mode = #tpu.pipeline_mode<synchronous>, transform_indices = @transform_3, window_bounds = array<i64: 4, 8>}, {pipeline_mode = #tpu.pipeline_mode<synchronous>, transform_indices = @transform_4, window_bounds = array<i64: 4, 1>}, {transform_indices = @transform_5, window_bounds = array<i64: 1, 8, 256>}, {transform_indices = @transform_6, window_bounds = array<i64: 1, 4, 256>}]} {
    %c0 = arith.constant 0 : index
    %c0_0 = arith.constant 0 : index
    %c0_1 = arith.constant 0 : index
    %c0_2 = arith.constant 0 : index
    %c0_3 = arith.constant 0 : index
    %0 = vector.load %arg2[%c0, %c0_0, %c0_1, %c0_2, %c0_3] : memref<1x1x8x18x18xbf16, #tpu.memory_space<vmem>>, vector<1x1x8x18x18xbf16>
    %1 = vector.shape_cast %0 : vector<1x1x8x18x18xbf16> to vector<8x18x18xbf16>
    %2 = vector.extract_strided_slice %1 {offsets = [0, 0, 0], sizes = [8, 16, 16], strides = [1, 1, 1]} : vector<8x18x18xbf16> to vector<8x16x16xbf16>
    %3 = vector.extract_strided_slice %1 {offsets = [0, 0, 1], sizes = [8, 16, 16], strides = [1, 1, 1]} : vector<8x18x18xbf16> to vector<8x16x16xbf16>
    %4 = vector.extract_strided_slice %1 {offsets = [0, 0, 2], sizes = [8, 16, 16], strides = [1, 1, 1]} : vector<8x18x18xbf16> to vector<8x16x16xbf16>
    %5 = vector.extract_strided_slice %1 {offsets = [0, 1, 0], sizes = [8, 16, 16], strides = [1, 1, 1]} : vector<8x18x18xbf16> to vector<8x16x16xbf16>
    %6 = vector.extract_strided_slice %1 {offsets = [0, 1, 1], sizes = [8, 16, 16], strides = [1, 1, 1]} : vector<8x18x18xbf16> to vector<8x16x16xbf16>
    %7 = vector.extract_strided_slice %1 {offsets = [0, 1, 2], sizes = [8, 16, 16], strides = [1, 1, 1]} : vector<8x18x18xbf16> to vector<8x16x16xbf16>
    %8 = vector.extract_strided_slice %1 {offsets = [0, 2, 0], sizes = [8, 16, 16], strides = [1, 1, 1]} : vector<8x18x18xbf16> to vector<8x16x16xbf16>
    %9 = vector.extract_strided_slice %1 {offsets = [0, 2, 1], sizes = [8, 16, 16], strides = [1, 1, 1]} : vector<8x18x18xbf16> to vector<8x16x16xbf16>
    %10 = vector.extract_strided_slice %1 {offsets = [0, 2, 2], sizes = [8, 16, 16], strides = [1, 1, 1]} : vector<8x18x18xbf16> to vector<8x16x16xbf16>
    %11 = tpu.concatenate %2, %3, %4, %5, %6, %7, %8, %9, %10 in 0 : vector<8x16x16xbf16>, vector<8x16x16xbf16>, vector<8x16x16xbf16>, vector<8x16x16xbf16>, vector<8x16x16xbf16>, vector<8x16x16xbf16>, vector<8x16x16xbf16>, vector<8x16x16xbf16>, vector<8x16x16xbf16> -> vector<72x16x16xbf16>
    %12 = vector.shape_cast %11 : vector<72x16x16xbf16> to vector<72x256xbf16>
    %c0_4 = arith.constant 0 : index
    %c0_5 = arith.constant 0 : index
    %13 = vector.load %arg3[%c0_4, %c0_5] : memref<8x72xbf16, #tpu.memory_space<vmem>>, vector<8x72xbf16>
    %cst = arith.constant dense<0.000000e+00> : vector<8x256xf32>
    %14 = tpu.matmul %13, %12, %cst {dimension_numbers = #tpu.dot_dimension_numbers<[1], [0], [0], [1], [0, 0, 1, 1], [], []>} : vector<8x72xbf16>, vector<72x256xbf16>, vector<8x256xf32> -> vector<8x256xf32>
    %c0_6 = arith.constant 0 : index
    %c0_7 = arith.constant 0 : index
    %15 = vector.load %arg4[%c0_6, %c0_7] : memref<8x1xf32, #tpu.memory_space<vmem>>, vector<8x1xf32>
    %16 = vector.broadcast %15 : vector<8x1xf32> to vector<8x256xf32>
    %17 = arith.addf %14, %16 : vector<8x256xf32>
    %18 = vector.extract_strided_slice %1 {offsets = [0, 1, 1], sizes = [8, 16, 16], strides = [1, 1, 1]} : vector<8x18x18xbf16> to vector<8x16x16xbf16>
    %19 = vector.shape_cast %18 : vector<8x16x16xbf16> to vector<8x256xbf16>
    %20 = arith.extf %19 : vector<8x256xbf16> to vector<8x256xf32>
    %21 = arith.addf %17, %20 : vector<8x256xf32>
    %cst_8 = arith.constant 0.000000e+00 : f32
    %22 = vector.broadcast %cst_8 : f32 to vector<8x256xf32>
    %23 = arith.cmpf oge, %21, %22 : vector<8x256xf32>
    %cst_9 = arith.constant 5.000000e-02 : f32
    %24 = vector.broadcast %cst_9 : f32 to vector<8x256xf32>
    %25 = arith.mulf %24, %21 : vector<8x256xf32>
    %26 = arith.select %23, %21, %25 : vector<8x256xi1>, vector<8x256xf32>
    %27 = arith.truncf %26 : vector<8x256xf32> to vector<8x256xbf16>
    %c0_10 = arith.constant 0 : index
    %c0_11 = arith.constant 0 : index
    %c0_12 = arith.constant 0 : index
    %28 = vector.load %arg7[%c0_10, %c0_11, %c0_12] : memref<1x8x256xbf16, #tpu.memory_space<vmem>>, vector<1x8x256xbf16>
    %29 = vector.shape_cast %28 : vector<1x8x256xbf16> to vector<8x256xbf16>
    %30 = vector.shape_cast %27 : vector<8x256xbf16> to vector<1x8x256xbf16>
    tpu.vector_store %arg7[%c0_10, %c0_11, %c0_12], %30 {strides = array<i32>} : memref<1x8x256xbf16, #tpu.memory_space<vmem>>, vector<1x8x256xbf16>,
    %c0_13 = arith.constant 0 : index
    %c0_14 = arith.constant 0 : index
    %31 = vector.load %arg5[%c0_13, %c0_14] : memref<4x8xbf16, #tpu.memory_space<vmem>>, vector<4x8xbf16>
    %cst_15 = arith.constant dense<0.000000e+00> : vector<4x256xf32>
    %32 = tpu.matmul %31, %19, %cst_15 {dimension_numbers = #tpu.dot_dimension_numbers<[1], [0], [0], [1], [0, 0, 1, 1], [], []>} : vector<4x8xbf16>, vector<8x256xbf16>, vector<4x256xf32> -> vector<4x256xf32>
    %c0_16 = arith.constant 0 : index
    %c0_17 = arith.constant 0 : index
    %33 = vector.load %arg6[%c0_16, %c0_17] : memref<4x1xf32, #tpu.memory_space<vmem>>, vector<4x1xf32>
    %34 = vector.broadcast %33 : vector<4x1xf32> to vector<4x256xf32>
    %35 = arith.addf %32, %34 : vector<4x256xf32>
    %cst_18 = arith.constant 0.000000e+00 : f32
    %36 = vector.broadcast %cst_18 : f32 to vector<4x256xf32>
    %37 = arith.cmpf oge, %35, %36 : vector<4x256xf32>
    %cst_19 = arith.constant 5.000000e-02 : f32
    %38 = vector.broadcast %cst_19 : f32 to vector<4x256xf32>
    %39 = arith.mulf %38, %35 : vector<4x256xf32>
    %40 = arith.select %37, %35, %39 : vector<4x256xi1>, vector<4x256xf32>
    %41 = arith.truncf %40 : vector<4x256xf32> to vector<4x256xbf16>
    %c0_20 = arith.constant 0 : index
    %c0_21 = arith.constant 0 : index
    %c0_22 = arith.constant 0 : index
    %42 = vector.load %arg8[%c0_20, %c0_21, %c0_22] : memref<1x4x256xbf16, #tpu.memory_space<vmem>>, vector<1x4x256xbf16>
    %43 = vector.shape_cast %42 : vector<1x4x256xbf16> to vector<4x256xbf16>
    %44 = vector.shape_cast %41 : vector<4x256xbf16> to vector<1x4x256xbf16>
    tpu.vector_store %arg8[%c0_20, %c0_21, %c0_22], %44 {strides = array<i32>} : memref<1x4x256xbf16, #tpu.memory_space<vmem>>, vector<1x4x256xbf16>,
    return
  }
  func.func @transform_0(%arg0: i32, %arg1: i32) -> (i32, i32, i32, i32, i32) {
    %c0_i32 = arith.constant 0 : i32
    %c0_i32_0 = arith.constant 0 : i32
    %c0_i32_1 = arith.constant 0 : i32
    %c0_i32_2 = arith.constant 0 : i32
    return %arg0, %arg1, %c0_i32, %c0_i32_0, %c0_i32_1 : i32, i32, i32, i32, i32
  }
  func.func @transform_1(%arg0: i32, %arg1: i32) -> (i32, i32) {
    %c0_i32 = arith.constant 0 : i32
    %c0_i32_0 = arith.constant 0 : i32
    %c0_i32_1 = arith.constant 0 : i32
    return %c0_i32, %c0_i32_0 : i32, i32
  }
  func.func @transform_2(%arg0: i32, %arg1: i32) -> (i32, i32) {
    %c0_i32 = arith.constant 0 : i32
    %c0_i32_0 = arith.constant 0 : i32
    %c0_i32_1 = arith.constant 0 : i32
    return %c0_i32, %c0_i32_0 : i32, i32
  }
  func.func @transform_3(%arg0: i32, %arg1: i32) -> (i32, i32) {
    %c0_i32 = arith.constant 0 : i32
    %c0_i32_0 = arith.constant 0 : i32
    %c0_i32_1 = arith.constant 0 : i32
    return %c0_i32, %c0_i32_0 : i32, i32
  }
  func.func @transform_4(%arg0: i32, %arg1: i32) -> (i32, i32) {
    %c0_i32 = arith.constant 0 : i32
    %c0_i32_0 = arith.constant 0 : i32
    %c0_i32_1 = arith.constant 0 : i32
    return %c0_i32, %c0_i32_0 : i32, i32
  }
  func.func @transform_5(%arg0: i32, %arg1: i32) -> (i32, i32, i32) {
    %c0_i32 = arith.constant 0 : i32
    %c0_i32_0 = arith.constant 0 : i32
    return %arg0, %c0_i32, %arg1 : i32, i32, i32
  }
  func.func @transform_6(%arg0: i32, %arg1: i32) -> (i32, i32, i32) {
    %c0_i32 = arith.constant 0 : i32
    %c0_i32_0 = arith.constant 0 : i32
    return %arg0, %c0_i32, %arg1 : i32, i32, i32
  }
}

module attributes {stable_mosaic.version = 11 : i64} {
  func.func @_c4_cat_c5_c1_kernel(%arg0: i32, %arg1: i32, %arg2: memref<1x1x8x18x18xbf16, #tpu.memory_space<vmem>>, %arg3: memref<1x4x256xbf16, #tpu.memory_space<vmem>>, %arg4: memref<1x4x256xbf16, #tpu.memory_space<vmem>>, %arg5: memref<1x4x256xbf16, #tpu.memory_space<vmem>>, %arg6: memref<4x72xbf16, #tpu.memory_space<vmem>>, %arg7: memref<4x1xf32, #tpu.memory_space<vmem>>, %arg8: memref<8x16xbf16, #tpu.memory_space<vmem>>, %arg9: memref<8x1xf32, #tpu.memory_space<vmem>>, %arg10: memref<2x8xbf16, #tpu.memory_space<vmem>>, %arg11: memref<2x1xf32, #tpu.memory_space<vmem>>, %arg12: memref<1x8x256xbf16, #tpu.memory_space<vmem>>, %arg13: memref<1x2x256xbf16, #tpu.memory_space<vmem>>) attributes {dimension_semantics = [#tpu.dimension_semantics<parallel>, #tpu.dimension_semantics<parallel>], iteration_bounds = array<i64: 2, 1>, scalar_prefetch = 0 : i64, scratch_operands = 0 : i64, tpu.core_type = #tpu.core_type<tc>, window_params = [{transform_indices = @transform_0, window_bounds = array<i64: 1, 1, 8, 18, 18>}, {transform_indices = @transform_1, window_bounds = array<i64: 1, 4, 256>}, {transform_indices = @transform_2, window_bounds = array<i64: 1, 4, 256>}, {transform_indices = @transform_3, window_bounds = array<i64: 1, 4, 256>}, {pipeline_mode = #tpu.pipeline_mode<synchronous>, transform_indices = @transform_4, window_bounds = array<i64: 4, 72>}, {pipeline_mode = #tpu.pipeline_mode<synchronous>, transform_indices = @transform_5, window_bounds = array<i64: 4, 1>}, {pipeline_mode = #tpu.pipeline_mode<synchronous>, transform_indices = @transform_6, window_bounds = array<i64: 8, 16>}, {pipeline_mode = #tpu.pipeline_mode<synchronous>, transform_indices = @transform_7, window_bounds = array<i64: 8, 1>}, {pipeline_mode = #tpu.pipeline_mode<synchronous>, transform_indices = @transform_8, window_bounds = array<i64: 2, 8>}, {pipeline_mode = #tpu.pipeline_mode<synchronous>, transform_indices = @transform_9, window_bounds = array<i64: 2, 1>}, {transform_indices = @transform_10, window_bounds = array<i64: 1, 8, 256>}, {transform_indices = @transform_11, window_bounds = array<i64: 1, 2, 256>}]} {
    %c0 = arith.constant 0 : index
    %c0_0 = arith.constant 0 : index
    %c0_1 = arith.constant 0 : index
    %c0_2 = arith.constant 0 : index
    %c0_3 = arith.constant 0 : index
    %0 = vector.load %arg2[%c0, %c0_0, %c0_1, %c0_2, %c0_3] : memref<1x1x8x18x18xbf16, #tpu.memory_space<vmem>>, vector<1x1x8x18x18xbf16>
    %1 = vector.shape_cast %0 : vector<1x1x8x18x18xbf16> to vector<8x18x18xbf16>
    %2 = vector.extract_strided_slice %1 {offsets = [0, 0, 0], sizes = [8, 16, 16], strides = [1, 1, 1]} : vector<8x18x18xbf16> to vector<8x16x16xbf16>
    %3 = vector.extract_strided_slice %1 {offsets = [0, 0, 1], sizes = [8, 16, 16], strides = [1, 1, 1]} : vector<8x18x18xbf16> to vector<8x16x16xbf16>
    %4 = vector.extract_strided_slice %1 {offsets = [0, 0, 2], sizes = [8, 16, 16], strides = [1, 1, 1]} : vector<8x18x18xbf16> to vector<8x16x16xbf16>
    %5 = vector.extract_strided_slice %1 {offsets = [0, 1, 0], sizes = [8, 16, 16], strides = [1, 1, 1]} : vector<8x18x18xbf16> to vector<8x16x16xbf16>
    %6 = vector.extract_strided_slice %1 {offsets = [0, 1, 1], sizes = [8, 16, 16], strides = [1, 1, 1]} : vector<8x18x18xbf16> to vector<8x16x16xbf16>
    %7 = vector.extract_strided_slice %1 {offsets = [0, 1, 2], sizes = [8, 16, 16], strides = [1, 1, 1]} : vector<8x18x18xbf16> to vector<8x16x16xbf16>
    %8 = vector.extract_strided_slice %1 {offsets = [0, 2, 0], sizes = [8, 16, 16], strides = [1, 1, 1]} : vector<8x18x18xbf16> to vector<8x16x16xbf16>
    %9 = vector.extract_strided_slice %1 {offsets = [0, 2, 1], sizes = [8, 16, 16], strides = [1, 1, 1]} : vector<8x18x18xbf16> to vector<8x16x16xbf16>
    %10 = vector.extract_strided_slice %1 {offsets = [0, 2, 2], sizes = [8, 16, 16], strides = [1, 1, 1]} : vector<8x18x18xbf16> to vector<8x16x16xbf16>
    %11 = tpu.concatenate %2, %3, %4, %5, %6, %7, %8, %9, %10 in 0 : vector<8x16x16xbf16>, vector<8x16x16xbf16>, vector<8x16x16xbf16>, vector<8x16x16xbf16>, vector<8x16x16xbf16>, vector<8x16x16xbf16>, vector<8x16x16xbf16>, vector<8x16x16xbf16>, vector<8x16x16xbf16> -> vector<72x16x16xbf16>
    %12 = vector.shape_cast %11 : vector<72x16x16xbf16> to vector<72x256xbf16>
    %c0_4 = arith.constant 0 : index
    %c0_5 = arith.constant 0 : index
    %13 = vector.load %arg6[%c0_4, %c0_5] : memref<4x72xbf16, #tpu.memory_space<vmem>>, vector<4x72xbf16>
    %cst = arith.constant dense<0.000000e+00> : vector<4x256xf32>
    %14 = tpu.matmul %13, %12, %cst {dimension_numbers = #tpu.dot_dimension_numbers<[1], [0], [0], [1], [0, 0, 1, 1], [], []>} : vector<4x72xbf16>, vector<72x256xbf16>, vector<4x256xf32> -> vector<4x256xf32>
    %c0_6 = arith.constant 0 : index
    %c0_7 = arith.constant 0 : index
    %15 = vector.load %arg7[%c0_6, %c0_7] : memref<4x1xf32, #tpu.memory_space<vmem>>, vector<4x1xf32>
    %16 = vector.broadcast %15 : vector<4x1xf32> to vector<4x256xf32>
    %17 = arith.addf %14, %16 : vector<4x256xf32>
    %cst_8 = arith.constant 0.000000e+00 : f32
    %18 = vector.broadcast %cst_8 : f32 to vector<4x256xf32>
    %19 = arith.cmpf oge, %17, %18 : vector<4x256xf32>
    %cst_9 = arith.constant 5.000000e-02 : f32
    %20 = vector.broadcast %cst_9 : f32 to vector<4x256xf32>
    %21 = arith.mulf %20, %17 : vector<4x256xf32>
    %22 = arith.select %19, %17, %21 : vector<4x256xi1>, vector<4x256xf32>
    %c0_10 = arith.constant 0 : index
    %c0_11 = arith.constant 0 : index
    %c0_12 = arith.constant 0 : index
    %23 = vector.load %arg3[%c0_10, %c0_11, %c0_12] : memref<1x4x256xbf16, #tpu.memory_space<vmem>>, vector<1x4x256xbf16>
    %24 = vector.shape_cast %23 : vector<1x4x256xbf16> to vector<4x256xbf16>
    %c0_13 = arith.constant 0 : index
    %c0_14 = arith.constant 0 : index
    %c0_15 = arith.constant 0 : index
    %25 = vector.load %arg4[%c0_13, %c0_14, %c0_15] : memref<1x4x256xbf16, #tpu.memory_space<vmem>>, vector<1x4x256xbf16>
    %26 = vector.shape_cast %25 : vector<1x4x256xbf16> to vector<4x256xbf16>
    %c0_16 = arith.constant 0 : index
    %c0_17 = arith.constant 0 : index
    %c0_18 = arith.constant 0 : index
    %27 = vector.load %arg5[%c0_16, %c0_17, %c0_18] : memref<1x4x256xbf16, #tpu.memory_space<vmem>>, vector<1x4x256xbf16>
    %28 = vector.shape_cast %27 : vector<1x4x256xbf16> to vector<4x256xbf16>
    %29 = arith.truncf %22 : vector<4x256xf32> to vector<4x256xbf16>
    %30 = tpu.concatenate %24, %26, %28, %29 in 0 : vector<4x256xbf16>, vector<4x256xbf16>, vector<4x256xbf16>, vector<4x256xbf16> -> vector<16x256xbf16>
    %c0_19 = arith.constant 0 : index
    %c0_20 = arith.constant 0 : index
    %31 = vector.load %arg8[%c0_19, %c0_20] : memref<8x16xbf16, #tpu.memory_space<vmem>>, vector<8x16xbf16>
    %cst_21 = arith.constant dense<0.000000e+00> : vector<8x256xf32>
    %32 = tpu.matmul %31, %30, %cst_21 {dimension_numbers = #tpu.dot_dimension_numbers<[1], [0], [0], [1], [0, 0, 1, 1], [], []>} : vector<8x16xbf16>, vector<16x256xbf16>, vector<8x256xf32> -> vector<8x256xf32>
    %c0_22 = arith.constant 0 : index
    %c0_23 = arith.constant 0 : index
    %33 = vector.load %arg9[%c0_22, %c0_23] : memref<8x1xf32, #tpu.memory_space<vmem>>, vector<8x1xf32>
    %34 = vector.broadcast %33 : vector<8x1xf32> to vector<8x256xf32>
    %35 = arith.addf %32, %34 : vector<8x256xf32>
    %c0_24 = arith.constant 0 : index
    %c0_25 = arith.constant 0 : index
    %36 = vector.load %arg10[%c0_24, %c0_25] : memref<2x8xbf16, #tpu.memory_space<vmem>>, vector<2x8xbf16>
    %37 = arith.truncf %35 : vector<8x256xf32> to vector<8x256xbf16>
    %cst_26 = arith.constant dense<0.000000e+00> : vector<2x256xf32>
    %38 = tpu.matmul %36, %37, %cst_26 {dimension_numbers = #tpu.dot_dimension_numbers<[1], [0], [0], [1], [0, 0, 1, 1], [], []>} : vector<2x8xbf16>, vector<8x256xbf16>, vector<2x256xf32> -> vector<2x256xf32>
    %c0_27 = arith.constant 0 : index
    %c0_28 = arith.constant 0 : index
    %39 = vector.load %arg11[%c0_27, %c0_28] : memref<2x1xf32, #tpu.memory_space<vmem>>, vector<2x1xf32>
    %40 = vector.broadcast %39 : vector<2x1xf32> to vector<2x256xf32>
    %41 = arith.addf %38, %40 : vector<2x256xf32>
    %42 = arith.truncf %35 : vector<8x256xf32> to vector<8x256xbf16>
    %c0_29 = arith.constant 0 : index
    %c0_30 = arith.constant 0 : index
    %c0_31 = arith.constant 0 : index
    %43 = vector.load %arg12[%c0_29, %c0_30, %c0_31] : memref<1x8x256xbf16, #tpu.memory_space<vmem>>, vector<1x8x256xbf16>
    %44 = vector.shape_cast %43 : vector<1x8x256xbf16> to vector<8x256xbf16>
    %45 = vector.shape_cast %42 : vector<8x256xbf16> to vector<1x8x256xbf16>
    tpu.vector_store %arg12[%c0_29, %c0_30, %c0_31], %45 {strides = array<i32>} : memref<1x8x256xbf16, #tpu.memory_space<vmem>>, vector<1x8x256xbf16>,
    %46 = arith.truncf %41 : vector<2x256xf32> to vector<2x256xbf16>
    %c0_32 = arith.constant 0 : index
    %c0_33 = arith.constant 0 : index
    %c0_34 = arith.constant 0 : index
    %47 = vector.load %arg13[%c0_32, %c0_33, %c0_34] : memref<1x2x256xbf16, #tpu.memory_space<vmem>>, vector<1x2x256xbf16>
    %48 = vector.shape_cast %47 : vector<1x2x256xbf16> to vector<2x256xbf16>
    %49 = vector.shape_cast %46 : vector<2x256xbf16> to vector<1x2x256xbf16>
    tpu.vector_store %arg13[%c0_32, %c0_33, %c0_34], %49 {strides = array<i32>} : memref<1x2x256xbf16, #tpu.memory_space<vmem>>, vector<1x2x256xbf16>,
    return
  }
  func.func @transform_0(%arg0: i32, %arg1: i32) -> (i32, i32, i32, i32, i32) {
    %c0_i32 = arith.constant 0 : i32
    %c0_i32_0 = arith.constant 0 : i32
    %c0_i32_1 = arith.constant 0 : i32
    %c0_i32_2 = arith.constant 0 : i32
    return %arg0, %arg1, %c0_i32, %c0_i32_0, %c0_i32_1 : i32, i32, i32, i32, i32
  }
  func.func @transform_1(%arg0: i32, %arg1: i32) -> (i32, i32, i32) {
    %c0_i32 = arith.constant 0 : i32
    %c0_i32_0 = arith.constant 0 : i32
    return %arg0, %c0_i32, %arg1 : i32, i32, i32
  }
  func.func @transform_2(%arg0: i32, %arg1: i32) -> (i32, i32, i32) {
    %c0_i32 = arith.constant 0 : i32
    %c0_i32_0 = arith.constant 0 : i32
    return %arg0, %c0_i32, %arg1 : i32, i32, i32
  }
  func.func @transform_3(%arg0: i32, %arg1: i32) -> (i32, i32, i32) {
    %c0_i32 = arith.constant 0 : i32
    %c0_i32_0 = arith.constant 0 : i32
    return %arg0, %c0_i32, %arg1 : i32, i32, i32
  }
  func.func @transform_4(%arg0: i32, %arg1: i32) -> (i32, i32) {
    %c0_i32 = arith.constant 0 : i32
    %c0_i32_0 = arith.constant 0 : i32
    %c0_i32_1 = arith.constant 0 : i32
    return %c0_i32, %c0_i32_0 : i32, i32
  }
  func.func @transform_5(%arg0: i32, %arg1: i32) -> (i32, i32) {
    %c0_i32 = arith.constant 0 : i32
    %c0_i32_0 = arith.constant 0 : i32
    %c0_i32_1 = arith.constant 0 : i32
    return %c0_i32, %c0_i32_0 : i32, i32
  }
  func.func @transform_6(%arg0: i32, %arg1: i32) -> (i32, i32) {
    %c0_i32 = arith.constant 0 : i32
    %c0_i32_0 = arith.constant 0 : i32
    %c0_i32_1 = arith.constant 0 : i32
    return %c0_i32, %c0_i32_0 : i32, i32
  }
  func.func @transform_7(%arg0: i32, %arg1: i32) -> (i32, i32) {
    %c0_i32 = arith.constant 0 : i32
    %c0_i32_0 = arith.constant 0 : i32
    %c0_i32_1 = arith.constant 0 : i32
    return %c0_i32, %c0_i32_0 : i32, i32
  }
  func.func @transform_8(%arg0: i32, %arg1: i32) -> (i32, i32) {
    %c0_i32 = arith.constant 0 : i32
    %c0_i32_0 = arith.constant 0 : i32
    %c0_i32_1 = arith.constant 0 : i32
    return %c0_i32, %c0_i32_0 : i32, i32
  }
  func.func @transform_9(%arg0: i32, %arg1: i32) -> (i32, i32) {
    %c0_i32 = arith.constant 0 : i32
    %c0_i32_0 = arith.constant 0 : i32
    %c0_i32_1 = arith.constant 0 : i32
    return %c0_i32, %c0_i32_0 : i32, i32
  }
  func.func @transform_10(%arg0: i32, %arg1: i32) -> (i32, i32, i32) {
    %c0_i32 = arith.constant 0 : i32
    %c0_i32_0 = arith.constant 0 : i32
    return %arg0, %c0_i32, %arg1 : i32, i32, i32
  }
  func.func @transform_11(%arg0: i32, %arg1: i32) -> (i32, i32, i32) {
    %c0_i32 = arith.constant 0 : i32
    %c0_i32_0 = arith.constant 0 : i32
    return %arg0, %c0_i32, %arg1 : i32, i32, i32
  }
}

module attributes {stable_mosaic.version = 11 : i64} {
  func.func @_pointwise_kernel(%arg0: i32, %arg1: i32, %arg2: memref<1x18x49xbf16, #tpu.memory_space<vmem>>, %arg3: memref<2x18xbf16, #tpu.memory_space<vmem>>, %arg4: memref<2x1xf32, #tpu.memory_space<vmem>>, %arg5: memref<1x2x49xbf16, #tpu.memory_space<vmem>>) attributes {dimension_semantics = [#tpu.dimension_semantics<parallel>, #tpu.dimension_semantics<parallel>], iteration_bounds = array<i64: 2, 1>, scalar_prefetch = 0 : i64, scratch_operands = 0 : i64, tpu.core_type = #tpu.core_type<tc>, window_params = [{transform_indices = @transform_0, window_bounds = array<i64: 1, 18, 49>}, {pipeline_mode = #tpu.pipeline_mode<synchronous>, transform_indices = @transform_1, window_bounds = array<i64: 2, 18>}, {pipeline_mode = #tpu.pipeline_mode<synchronous>, transform_indices = @transform_2, window_bounds = array<i64: 2, 1>}, {transform_indices = @transform_3, window_bounds = array<i64: 1, 2, 49>}]} {
    %c0 = arith.constant 0 : index
    %c0_0 = arith.constant 0 : index
    %0 = vector.load %arg3[%c0, %c0_0] : memref<2x18xbf16, #tpu.memory_space<vmem>>, vector<2x18xbf16>
    %c0_1 = arith.constant 0 : index
    %c0_2 = arith.constant 0 : index
    %c0_3 = arith.constant 0 : index
    %1 = vector.load %arg2[%c0_1, %c0_2, %c0_3] : memref<1x18x49xbf16, #tpu.memory_space<vmem>>, vector<1x18x49xbf16>
    %2 = vector.shape_cast %1 : vector<1x18x49xbf16> to vector<18x49xbf16>
    %cst = arith.constant dense<0.000000e+00> : vector<2x49xf32>
    %3 = tpu.matmul %0, %2, %cst {dimension_numbers = #tpu.dot_dimension_numbers<[1], [0], [0], [1], [0, 0, 1, 1], [], []>} : vector<2x18xbf16>, vector<18x49xbf16>, vector<2x49xf32> -> vector<2x49xf32>
    %c0_4 = arith.constant 0 : index
    %c0_5 = arith.constant 0 : index
    %4 = vector.load %arg4[%c0_4, %c0_5] : memref<2x1xf32, #tpu.memory_space<vmem>>, vector<2x1xf32>
    %5 = vector.broadcast %4 : vector<2x1xf32> to vector<2x49xf32>
    %6 = arith.addf %3, %5 : vector<2x49xf32>
    %7 = arith.truncf %6 : vector<2x49xf32> to vector<2x49xbf16>
    %c0_6 = arith.constant 0 : index
    %c0_7 = arith.constant 0 : index
    %c0_8 = arith.constant 0 : index
    %8 = vector.load %arg5[%c0_6, %c0_7, %c0_8] : memref<1x2x49xbf16, #tpu.memory_space<vmem>>, vector<1x2x49xbf16>
    %9 = vector.shape_cast %8 : vector<1x2x49xbf16> to vector<2x49xbf16>
    %10 = vector.shape_cast %7 : vector<2x49xbf16> to vector<1x2x49xbf16>
    tpu.vector_store %arg5[%c0_6, %c0_7, %c0_8], %10 {strides = array<i32>} : memref<1x2x49xbf16, #tpu.memory_space<vmem>>, vector<1x2x49xbf16>,
    return
  }
  func.func @transform_0(%arg0: i32, %arg1: i32) -> (i32, i32, i32) {
    %c0_i32 = arith.constant 0 : i32
    %c0_i32_0 = arith.constant 0 : i32
    return %arg0, %c0_i32, %arg1 : i32, i32, i32
  }
  func.func @transform_1(%arg0: i32, %arg1: i32) -> (i32, i32) {
    %c0_i32 = arith.constant 0 : i32
    %c0_i32_0 = arith.constant 0 : i32
    %c0_i32_1 = arith.constant 0 : i32
    return %c0_i32, %c0_i32_0 : i32, i32
  }
  func.func @transform_2(%arg0: i32, %arg1: i32) -> (i32, i32) {
    %c0_i32 = arith.constant 0 : i32
    %c0_i32_0 = arith.constant 0 : i32
    %c0_i32_1 = arith.constant 0 : i32
    return %c0_i32, %c0_i32_0 : i32, i32
  }
  func.func @transform_3(%arg0: i32, %arg1: i32) -> (i32, i32, i32) {
    %c0_i32 = arith.constant 0 : i32
    %c0_i32_0 = arith.constant 0 : i32
    return %arg0, %c0_i32, %arg1 : i32, i32, i32
  }
}

module attributes {stable_mosaic.version = 11 : i64} {
  func.func @_conv3x3_kernel(%arg0: i32, %arg1: i32, %arg2: memref<1x1x2x3x3xbf16, #tpu.memory_space<vmem>>, %arg3: memref<2x18xbf16, #tpu.memory_space<vmem>>, %arg4: memref<2x1xf32, #tpu.memory_space<vmem>>, %arg5: memref<1x2x1xbf16, #tpu.memory_space<vmem>>) attributes {dimension_semantics = [#tpu.dimension_semantics<parallel>, #tpu.dimension_semantics<parallel>], iteration_bounds = array<i64: 2, 1>, scalar_prefetch = 0 : i64, scratch_operands = 0 : i64, tpu.core_type = #tpu.core_type<tc>, window_params = [{transform_indices = @transform_0, window_bounds = array<i64: 1, 1, 2, 3, 3>}, {pipeline_mode = #tpu.pipeline_mode<synchronous>, transform_indices = @transform_1, window_bounds = array<i64: 2, 18>}, {pipeline_mode = #tpu.pipeline_mode<synchronous>, transform_indices = @transform_2, window_bounds = array<i64: 2, 1>}, {transform_indices = @transform_3, window_bounds = array<i64: 1, 2, 1>}]} {
    %c0 = arith.constant 0 : index
    %c0_0 = arith.constant 0 : index
    %c0_1 = arith.constant 0 : index
    %c0_2 = arith.constant 0 : index
    %c0_3 = arith.constant 0 : index
    %0 = vector.load %arg2[%c0, %c0_0, %c0_1, %c0_2, %c0_3] : memref<1x1x2x3x3xbf16, #tpu.memory_space<vmem>>, vector<1x1x2x3x3xbf16>
    %1 = vector.shape_cast %0 : vector<1x1x2x3x3xbf16> to vector<2x3x3xbf16>
    %2 = vector.extract_strided_slice %1 {offsets = [0, 0, 0], sizes = [2, 1, 1], strides = [1, 1, 1]} : vector<2x3x3xbf16> to vector<2x1x1xbf16>
    %3 = vector.extract_strided_slice %1 {offsets = [0, 0, 1], sizes = [2, 1, 1], strides = [1, 1, 1]} : vector<2x3x3xbf16> to vector<2x1x1xbf16>
    %4 = vector.extract_strided_slice %1 {offsets = [0, 0, 2], sizes = [2, 1, 1], strides = [1, 1, 1]} : vector<2x3x3xbf16> to vector<2x1x1xbf16>
    %5 = vector.extract_strided_slice %1 {offsets = [0, 1, 0], sizes = [2, 1, 1], strides = [1, 1, 1]} : vector<2x3x3xbf16> to vector<2x1x1xbf16>
    %6 = vector.extract_strided_slice %1 {offsets = [0, 1, 1], sizes = [2, 1, 1], strides = [1, 1, 1]} : vector<2x3x3xbf16> to vector<2x1x1xbf16>
    %7 = vector.extract_strided_slice %1 {offsets = [0, 1, 2], sizes = [2, 1, 1], strides = [1, 1, 1]} : vector<2x3x3xbf16> to vector<2x1x1xbf16>
    %8 = vector.extract_strided_slice %1 {offsets = [0, 2, 0], sizes = [2, 1, 1], strides = [1, 1, 1]} : vector<2x3x3xbf16> to vector<2x1x1xbf16>
    %9 = vector.extract_strided_slice %1 {offsets = [0, 2, 1], sizes = [2, 1, 1], strides = [1, 1, 1]} : vector<2x3x3xbf16> to vector<2x1x1xbf16>
    %10 = vector.extract_strided_slice %1 {offsets = [0, 2, 2], sizes = [2, 1, 1], strides = [1, 1, 1]} : vector<2x3x3xbf16> to vector<2x1x1xbf16>
    %11 = tpu.concatenate %2, %3, %4, %5, %6, %7, %8, %9, %10 in 0 : vector<2x1x1xbf16>, vector<2x1x1xbf16>, vector<2x1x1xbf16>, vector<2x1x1xbf16>, vector<2x1x1xbf16>, vector<2x1x1xbf16>, vector<2x1x1xbf16>, vector<2x1x1xbf16>, vector<2x1x1xbf16> -> vector<18x1x1xbf16>
    %12 = vector.shape_cast %11 : vector<18x1x1xbf16> to vector<18x1xbf16>
    %c0_4 = arith.constant 0 : index
    %c0_5 = arith.constant 0 : index
    %13 = vector.load %arg3[%c0_4, %c0_5] : memref<2x18xbf16, #tpu.memory_space<vmem>>, vector<2x18xbf16>
    %cst = arith.constant dense<0.000000e+00> : vector<2x1xf32>
    %14 = tpu.matmul %13, %12, %cst {dimension_numbers = #tpu.dot_dimension_numbers<[1], [0], [0], [1], [0, 0, 1, 1], [], []>} : vector<2x18xbf16>, vector<18x1xbf16>, vector<2x1xf32> -> vector<2x1xf32>
    %c0_6 = arith.constant 0 : index
    %c0_7 = arith.constant 0 : index
    %15 = vector.load %arg4[%c0_6, %c0_7] : memref<2x1xf32, #tpu.memory_space<vmem>>, vector<2x1xf32>
    %16 = arith.addf %14, %15 : vector<2x1xf32>
    %17 = arith.truncf %16 : vector<2x1xf32> to vector<2x1xbf16>
    %c0_8 = arith.constant 0 : index
    %c0_9 = arith.constant 0 : index
    %c0_10 = arith.constant 0 : index
    %18 = vector.load %arg5[%c0_8, %c0_9, %c0_10] : memref<1x2x1xbf16, #tpu.memory_space<vmem>>, vector<1x2x1xbf16>
    %19 = vector.shape_cast %18 : vector<1x2x1xbf16> to vector<2x1xbf16>
    %20 = vector.shape_cast %17 : vector<2x1xbf16> to vector<1x2x1xbf16>
    tpu.vector_store %arg5[%c0_8, %c0_9, %c0_10], %20 {strides = array<i32>} : memref<1x2x1xbf16, #tpu.memory_space<vmem>>, vector<1x2x1xbf16>,
    return
  }
  func.func @transform_0(%arg0: i32, %arg1: i32) -> (i32, i32, i32, i32, i32) {
    %c0_i32 = arith.constant 0 : i32
    %c0_i32_0 = arith.constant 0 : i32
    %c0_i32_1 = arith.constant 0 : i32
    %c0_i32_2 = arith.constant 0 : i32
    return %arg0, %arg1, %c0_i32, %c0_i32_0, %c0_i32_1 : i32, i32, i32, i32, i32
  }
  func.func @transform_1(%arg0: i32, %arg1: i32) -> (i32, i32) {
    %c0_i32 = arith.constant 0 : i32
    %c0_i32_0 = arith.constant 0 : i32
    %c0_i32_1 = arith.constant 0 : i32
    return %c0_i32, %c0_i32_0 : i32, i32
  }
  func.func @transform_2(%arg0: i32, %arg1: i32) -> (i32, i32) {
    %c0_i32 = arith.constant 0 : i32
    %c0_i32_0 = arith.constant 0 : i32
    %c0_i32_1 = arith.constant 0 : i32
    return %c0_i32, %c0_i32_0 : i32, i32
  }
  func.func @transform_3(%arg0: i32, %arg1: i32) -> (i32, i32, i32) {
    %c0_i32 = arith.constant 0 : i32
    %c0_i32_0 = arith.constant 0 : i32
    return %arg0, %c0_i32, %arg1 : i32, i32, i32
  }
}

module attributes {stable_mosaic.version = 11 : i64} {
  func.func @_esa_tail_kernel(%arg0: i32, %arg1: i32, %arg2: memref<1x2x256xbf16, #tpu.memory_space<vmem>>, %arg3: memref<1x2x256xbf16, #tpu.memory_space<vmem>>, %arg4: memref<1x8x256xbf16, #tpu.memory_space<vmem>>, %arg5: memref<2x2xbf16, #tpu.memory_space<vmem>>, %arg6: memref<2x1xf32, #tpu.memory_space<vmem>>, %arg7: memref<8x2xbf16, #tpu.memory_space<vmem>>, %arg8: memref<8x1xf32, #tpu.memory_space<vmem>>, %arg9: memref<1x8x256xf32, #tpu.memory_space<vmem>>) attributes {dimension_semantics = [#tpu.dimension_semantics<parallel>, #tpu.dimension_semantics<parallel>], iteration_bounds = array<i64: 2, 1>, scalar_prefetch = 0 : i64, scratch_operands = 0 : i64, tpu.core_type = #tpu.core_type<tc>, window_params = [{transform_indices = @transform_0, window_bounds = array<i64: 1, 2, 256>}, {transform_indices = @transform_1, window_bounds = array<i64: 1, 2, 256>}, {transform_indices = @transform_2, window_bounds = array<i64: 1, 8, 256>}, {pipeline_mode = #tpu.pipeline_mode<synchronous>, transform_indices = @transform_3, window_bounds = array<i64: 2, 2>}, {pipeline_mode = #tpu.pipeline_mode<synchronous>, transform_indices = @transform_4, window_bounds = array<i64: 2, 1>}, {pipeline_mode = #tpu.pipeline_mode<synchronous>, transform_indices = @transform_5, window_bounds = array<i64: 8, 2>}, {pipeline_mode = #tpu.pipeline_mode<synchronous>, transform_indices = @transform_6, window_bounds = array<i64: 8, 1>}, {transform_indices = @transform_7, window_bounds = array<i64: 1, 8, 256>}]} {
    %c0 = arith.constant 0 : index
    %c0_0 = arith.constant 0 : index
    %0 = vector.load %arg5[%c0, %c0_0] : memref<2x2xbf16, #tpu.memory_space<vmem>>, vector<2x2xbf16>
    %c0_1 = arith.constant 0 : index
    %c0_2 = arith.constant 0 : index
    %c0_3 = arith.constant 0 : index
    %1 = vector.load %arg2[%c0_1, %c0_2, %c0_3] : memref<1x2x256xbf16, #tpu.memory_space<vmem>>, vector<1x2x256xbf16>
    %2 = vector.shape_cast %1 : vector<1x2x256xbf16> to vector<2x256xbf16>
    %cst = arith.constant dense<0.000000e+00> : vector<2x256xf32>
    %3 = tpu.matmul %0, %2, %cst {dimension_numbers = #tpu.dot_dimension_numbers<[1], [0], [0], [1], [0, 0, 1, 1], [], []>} : vector<2x2xbf16>, vector<2x256xbf16>, vector<2x256xf32> -> vector<2x256xf32>
    %c0_4 = arith.constant 0 : index
    %c0_5 = arith.constant 0 : index
    %4 = vector.load %arg6[%c0_4, %c0_5] : memref<2x1xf32, #tpu.memory_space<vmem>>, vector<2x1xf32>
    %5 = vector.broadcast %4 : vector<2x1xf32> to vector<2x256xf32>
    %6 = arith.addf %3, %5 : vector<2x256xf32>
    %c0_6 = arith.constant 0 : index
    %c0_7 = arith.constant 0 : index
    %c0_8 = arith.constant 0 : index
    %7 = vector.load %arg3[%c0_6, %c0_7, %c0_8] : memref<1x2x256xbf16, #tpu.memory_space<vmem>>, vector<1x2x256xbf16>
    %8 = vector.shape_cast %7 : vector<1x2x256xbf16> to vector<2x256xbf16>
    %9 = arith.extf %8 : vector<2x256xbf16> to vector<2x256xf32>
    %10 = arith.addf %9, %6 : vector<2x256xf32>
    %c0_9 = arith.constant 0 : index
    %c0_10 = arith.constant 0 : index
    %11 = vector.load %arg7[%c0_9, %c0_10] : memref<8x2xbf16, #tpu.memory_space<vmem>>, vector<8x2xbf16>
    %12 = arith.truncf %10 : vector<2x256xf32> to vector<2x256xbf16>
    %cst_11 = arith.constant dense<0.000000e+00> : vector<8x256xf32>
    %13 = tpu.matmul %11, %12, %cst_11 {dimension_numbers = #tpu.dot_dimension_numbers<[1], [0], [0], [1], [0, 0, 1, 1], [], []>} : vector<8x2xbf16>, vector<2x256xbf16>, vector<8x256xf32> -> vector<8x256xf32>
    %c0_12 = arith.constant 0 : index
    %c0_13 = arith.constant 0 : index
    %14 = vector.load %arg8[%c0_12, %c0_13] : memref<8x1xf32, #tpu.memory_space<vmem>>, vector<8x1xf32>
    %15 = vector.broadcast %14 : vector<8x1xf32> to vector<8x256xf32>
    %16 = arith.addf %13, %15 : vector<8x256xf32>
    %c0_14 = arith.constant 0 : index
    %c0_15 = arith.constant 0 : index
    %c0_16 = arith.constant 0 : index
    %17 = vector.load %arg4[%c0_14, %c0_15, %c0_16] : memref<1x8x256xbf16, #tpu.memory_space<vmem>>, vector<1x8x256xbf16>
    %18 = vector.shape_cast %17 : vector<1x8x256xbf16> to vector<8x256xbf16>
    %19 = arith.extf %18 : vector<8x256xbf16> to vector<8x256xf32>
    %20 = arith.negf %16 : vector<8x256xf32>
    %21 = math.exp %20 : vector<8x256xf32>
    %cst_17 = arith.constant 1.000000e+00 : f32
    %22 = vector.broadcast %cst_17 : f32 to vector<8x256xf32>
    %23 = arith.addf %22, %21 : vector<8x256xf32>
    %24 = arith.divf %22, %23 : vector<8x256xf32>
    %25 = arith.mulf %19, %24 : vector<8x256xf32>
    %c0_18 = arith.constant 0 : index
    %c0_19 = arith.constant 0 : index
    %c0_20 = arith.constant 0 : index
    %26 = vector.load %arg9[%c0_18, %c0_19, %c0_20] : memref<1x8x256xf32, #tpu.memory_space<vmem>>, vector<1x8x256xf32>
    %27 = vector.shape_cast %26 : vector<1x8x256xf32> to vector<8x256xf32>
    %28 = vector.shape_cast %25 : vector<8x256xf32> to vector<1x8x256xf32>
    tpu.vector_store %arg9[%c0_18, %c0_19, %c0_20], %28 {strides = array<i32>} : memref<1x8x256xf32, #tpu.memory_space<vmem>>, vector<1x8x256xf32>,
    return
  }
  func.func @transform_0(%arg0: i32, %arg1: i32) -> (i32, i32, i32) {
    %c0_i32 = arith.constant 0 : i32
    %c0_i32_0 = arith.constant 0 : i32
    return %arg0, %c0_i32, %arg1 : i32, i32, i32
  }
  func.func @transform_1(%arg0: i32, %arg1: i32) -> (i32, i32, i32) {
    %c0_i32 = arith.constant 0 : i32
    %c0_i32_0 = arith.constant 0 : i32
    return %arg0, %c0_i32, %arg1 : i32, i32, i32
  }
  func.func @transform_2(%arg0: i32, %arg1: i32) -> (i32, i32, i32) {
    %c0_i32 = arith.constant 0 : i32
    %c0_i32_0 = arith.constant 0 : i32
    return %arg0, %c0_i32, %arg1 : i32, i32, i32
  }
  func.func @transform_3(%arg0: i32, %arg1: i32) -> (i32, i32) {
    %c0_i32 = arith.constant 0 : i32
    %c0_i32_0 = arith.constant 0 : i32
    %c0_i32_1 = arith.constant 0 : i32
    return %c0_i32, %c0_i32_0 : i32, i32
  }
  func.func @transform_4(%arg0: i32, %arg1: i32) -> (i32, i32) {
    %c0_i32 = arith.constant 0 : i32
    %c0_i32_0 = arith.constant 0 : i32
    %c0_i32_1 = arith.constant 0 : i32
    return %c0_i32, %c0_i32_0 : i32, i32
  }
  func.func @transform_5(%arg0: i32, %arg1: i32) -> (i32, i32) {
    %c0_i32 = arith.constant 0 : i32
    %c0_i32_0 = arith.constant 0 : i32
    %c0_i32_1 = arith.constant 0 : i32
    return %c0_i32, %c0_i32_0 : i32, i32
  }
  func.func @transform_6(%arg0: i32, %arg1: i32) -> (i32, i32) {
    %c0_i32 = arith.constant 0 : i32
    %c0_i32_0 = arith.constant 0 : i32
    %c0_i32_1 = arith.constant 0 : i32
    return %c0_i32, %c0_i32_0 : i32, i32
  }
  func.func @transform_7(%arg0: i32, %arg1: i32) -> (i32, i32, i32) {
    %c0_i32 = arith.constant 0 : i32
    %c0_i32_0 = arith.constant 0 : i32
    return %arg0, %c0_i32, %arg1 : i32, i32, i32
  }
}

module attributes {stable_mosaic.version = 11 : i64} {
  func.func @_conv3x3_kernel(%arg0: i32, %arg1: i32, %arg2: memref<1x1x2x3x3xbf16, #tpu.memory_space<vmem>>, %arg3: memref<2x18xbf16, #tpu.memory_space<vmem>>, %arg4: memref<2x1xf32, #tpu.memory_space<vmem>>, %arg5: memref<1x2x1xbf16, #tpu.memory_space<vmem>>) attributes {dimension_semantics = [#tpu.dimension_semantics<parallel>, #tpu.dimension_semantics<parallel>], iteration_bounds = array<i64: 2, 1>, scalar_prefetch = 0 : i64, scratch_operands = 0 : i64, tpu.core_type = #tpu.core_type<tc>, window_params = [{transform_indices = @transform_0, window_bounds = array<i64: 1, 1, 2, 3, 3>}, {pipeline_mode = #tpu.pipeline_mode<synchronous>, transform_indices = @transform_1, window_bounds = array<i64: 2, 18>}, {pipeline_mode = #tpu.pipeline_mode<synchronous>, transform_indices = @transform_2, window_bounds = array<i64: 2, 1>}, {transform_indices = @transform_3, window_bounds = array<i64: 1, 2, 1>}]} {
    %c0 = arith.constant 0 : index
    %c0_0 = arith.constant 0 : index
    %c0_1 = arith.constant 0 : index
    %c0_2 = arith.constant 0 : index
    %c0_3 = arith.constant 0 : index
    %0 = vector.load %arg2[%c0, %c0_0, %c0_1, %c0_2, %c0_3] : memref<1x1x2x3x3xbf16, #tpu.memory_space<vmem>>, vector<1x1x2x3x3xbf16>
    %1 = vector.shape_cast %0 : vector<1x1x2x3x3xbf16> to vector<2x3x3xbf16>
    %2 = vector.extract_strided_slice %1 {offsets = [0, 0, 0], sizes = [2, 1, 1], strides = [1, 1, 1]} : vector<2x3x3xbf16> to vector<2x1x1xbf16>
    %3 = vector.extract_strided_slice %1 {offsets = [0, 0, 1], sizes = [2, 1, 1], strides = [1, 1, 1]} : vector<2x3x3xbf16> to vector<2x1x1xbf16>
    %4 = vector.extract_strided_slice %1 {offsets = [0, 0, 2], sizes = [2, 1, 1], strides = [1, 1, 1]} : vector<2x3x3xbf16> to vector<2x1x1xbf16>
    %5 = vector.extract_strided_slice %1 {offsets = [0, 1, 0], sizes = [2, 1, 1], strides = [1, 1, 1]} : vector<2x3x3xbf16> to vector<2x1x1xbf16>
    %6 = vector.extract_strided_slice %1 {offsets = [0, 1, 1], sizes = [2, 1, 1], strides = [1, 1, 1]} : vector<2x3x3xbf16> to vector<2x1x1xbf16>
    %7 = vector.extract_strided_slice %1 {offsets = [0, 1, 2], sizes = [2, 1, 1], strides = [1, 1, 1]} : vector<2x3x3xbf16> to vector<2x1x1xbf16>
    %8 = vector.extract_strided_slice %1 {offsets = [0, 2, 0], sizes = [2, 1, 1], strides = [1, 1, 1]} : vector<2x3x3xbf16> to vector<2x1x1xbf16>
    %9 = vector.extract_strided_slice %1 {offsets = [0, 2, 1], sizes = [2, 1, 1], strides = [1, 1, 1]} : vector<2x3x3xbf16> to vector<2x1x1xbf16>
    %10 = vector.extract_strided_slice %1 {offsets = [0, 2, 2], sizes = [2, 1, 1], strides = [1, 1, 1]} : vector<2x3x3xbf16> to vector<2x1x1xbf16>
    %11 = tpu.concatenate %2, %3, %4, %5, %6, %7, %8, %9, %10 in 0 : vector<2x1x1xbf16>, vector<2x1x1xbf16>, vector<2x1x1xbf16>, vector<2x1x1xbf16>, vector<2x1x1xbf16>, vector<2x1x1xbf16>, vector<2x1x1xbf16>, vector<2x1x1xbf16>, vector<2x1x1xbf16> -> vector<18x1x1xbf16>
    %12 = vector.shape_cast %11 : vector<18x1x1xbf16> to vector<18x1xbf16>
    %c0_4 = arith.constant 0 : index
    %c0_5 = arith.constant 0 : index
    %13 = vector.load %arg3[%c0_4, %c0_5] : memref<2x18xbf16, #tpu.memory_space<vmem>>, vector<2x18xbf16>
    %cst = arith.constant dense<0.000000e+00> : vector<2x1xf32>
    %14 = tpu.matmul %13, %12, %cst {dimension_numbers = #tpu.dot_dimension_numbers<[1], [0], [0], [1], [0, 0, 1, 1], [], []>} : vector<2x18xbf16>, vector<18x1xbf16>, vector<2x1xf32> -> vector<2x1xf32>
    %c0_6 = arith.constant 0 : index
    %c0_7 = arith.constant 0 : index
    %15 = vector.load %arg4[%c0_6, %c0_7] : memref<2x1xf32, #tpu.memory_space<vmem>>, vector<2x1xf32>
    %16 = arith.addf %14, %15 : vector<2x1xf32>
    %cst_8 = arith.constant 0.000000e+00 : f32
    %17 = vector.broadcast %cst_8 : f32 to vector<2x1xf32>
    %18 = arith.maximumf %16, %17 : vector<2x1xf32>
    %19 = arith.truncf %18 : vector<2x1xf32> to vector<2x1xbf16>
    %c0_9 = arith.constant 0 : index
    %c0_10 = arith.constant 0 : index
    %c0_11 = arith.constant 0 : index
    %20 = vector.load %arg5[%c0_9, %c0_10, %c0_11] : memref<1x2x1xbf16, #tpu.memory_space<vmem>>, vector<1x2x1xbf16>
    %21 = vector.shape_cast %20 : vector<1x2x1xbf16> to vector<2x1xbf16>
    %22 = vector.shape_cast %19 : vector<2x1xbf16> to vector<1x2x1xbf16>
    tpu.vector_store %arg5[%c0_9, %c0_10, %c0_11], %22 {strides = array<i32>} : memref<1x2x1xbf16, #tpu.memory_space<vmem>>, vector<1x2x1xbf16>,
    return
  }
  func.func @transform_0(%arg0: i32, %arg1: i32) -> (i32, i32, i32, i32, i32) {
    %c0_i32 = arith.constant 0 : i32
    %c0_i32_0 = arith.constant 0 : i32
    %c0_i32_1 = arith.constant 0 : i32
    %c0_i32_2 = arith.constant 0 : i32
    return %arg0, %arg1, %c0_i32, %c0_i32_0, %c0_i32_1 : i32, i32, i32, i32, i32
  }
  func.func @transform_1(%arg0: i32, %arg1: i32) -> (i32, i32) {
    %c0_i32 = arith.constant 0 : i32
    %c0_i32_0 = arith.constant 0 : i32
    %c0_i32_1 = arith.constant 0 : i32
    return %c0_i32, %c0_i32_0 : i32, i32
  }
  func.func @transform_2(%arg0: i32, %arg1: i32) -> (i32, i32) {
    %c0_i32 = arith.constant 0 : i32
    %c0_i32_0 = arith.constant 0 : i32
    %c0_i32_1 = arith.constant 0 : i32
    return %c0_i32, %c0_i32_0 : i32, i32
  }
  func.func @transform_3(%arg0: i32, %arg1: i32) -> (i32, i32, i32) {
    %c0_i32 = arith.constant 0 : i32
    %c0_i32_0 = arith.constant 0 : i32
    return %arg0, %c0_i32, %arg1 : i32, i32, i32
  }
}

</mosaic_0001>

<bundles_post_ra>
// kernel: rfdb_forward.13
= control target key start
LH: loop header
LB: loop body
LE: loop exit
PB: predicated region body
PF: predicated region fallthrough
CT: control target
= control target key end

     0   :  { %s440_s12 = smov 0   ;;  %s442_s13 = smov 0   ;;  %s479_s0 = inlined_call_operand.vmem [shape: bf16[2,18,49], index: 0, kind: input, shape index: {}]   ;;  %s480_s1 = inlined_call_operand.vmem [shape: bf16[2,18], index: 1, kind: input, shape index: {}]   ;;  %s481_s2 = inlined_call_operand.vmem [shape: f32[2,1], index: 2, kind: input, shape index: {}]   ;;  %s482_s3 = inlined_call_operand.vmem [shape: bf16[2,2,49], index: 3, kind: output, shape index: {}]  }
   0x1   :  { %s444_s14 = smov 0  }
   0x2 LB: > { %s25_s15 = sadd.s32 1, %s411_s13  ;;  %p344_p0 = scmp.ge.s32.totalorder %s415_s14, 1  ;;  %s415_s14 = sphi %s444_s14, %s13_s14   ;;  %s411_s13 = sphi %s442_s13, %s484_s13   ;;  %s407_s12 = sphi %s440_s12, %s483_s12  }
   0x3   : > { %p27_p1 = scmp.ge.s32.totalorder %s25_s15, 2  ;;  %p156_p2 = scmp.lt.s32.totalorder %s415_s14, 3 }
   0x5   : > { %s486_s15 = smov (%p27_p1, %s25_s15), 0  ;;  %p157_p3 = pnand %p344_p0, %p156_p2 }
   0x6   : > { %p184_p4 = scmp.lt.s32.totalorder (!%p157_p3), %s407_s12, 1 }
   0x7   : > { %160 = sbr.rel (%p157_p3) target bundleno = 224 (0xe0), region = 32 }
   0xc   : > { %v417_v0 = vmov 0.0   ;;  %vm418_vm0 = vmmov 0   ;;  %v203_v1 = vld [vmem:[%s481_s2] sm:$0x3]  ;;  %s488_s12 = smov (!%p184_p4, %s407_s12), 1  ;;  %v419_v2 = vmov 0  }
   0xd   : > { %354 = vmatprep.subr.bf16.mxu0 %v417_v0  ;;  %358 = vmatprep.mubr.msk.bf16.mxu0 %vm418_vm0, %v417_v0  ;;  %s362_s18 = smul.u32 12, %s488_s12  ;;  %vm222_vm1 = vcmask 1040384   ;;  %v199_v6 = vld [vmem:[%s480_s1] sm:$0x1]  ;;  %vm218_vm2 = vcmask 146432   ;;  %s197_s26 = scalar_lea.vmem %s482_s3, %s488_s12  ;;  %vm267_vm3 = vcmask 393216  }
   0xe   : > { %390 = vset.pattern.permute.xlu0 %v419_v2 }
   0xf   : > { %206 = vperm.xlu0 %390, %v203_v1   ;;  %s191_s21 = scalar_lea.vmem %s479_s0, %s362_s18 }
  0x10   : > { %v391_v3 = vld [vmem:[%s191_s21 + $0x8] ss:$0 sps:$4 sm:$0x11]   ;;  %v392_v5 = vld [vmem:[%s191_s21] sm:$0xff]  }
  0x11   : > { %v224_v4 = vsel %vm222_vm1, %v391_v3, 0 }
  0x12   : > { %355 = vmatpush3.bf16.msra.mxu0 %v224_v4 }
  0x13   : > { %356 = vmatprep.subr.bf16.mxu0 %v417_v0 }
  0x16   : > { %357 = vmatpush3.bf16.msra.mxu0 %v392_v5 }
  0x19   : > { %359 = vmatmul.mubr.msk.bf16.vlgmr.msra.gmra.mxu0 %vm218_vm2, %v199_v6 }
  0x8a   : > { %v207_v7 = vpop.permute.xlu0 %206 }
  0xd9   : > { %v260_v8 = vpop.f32.mrf.mxu0 }
  0xda   : > { %v261_v9 = vadd.f32 %v260_v8, %v207_v7 }
  0xdb   : > { %v360_v10 = vpop.f32.mrf.mxu0 }
  0xdc   : > { %v266_v11 = vpack.c.bf16 %v261_v9, %v261_v9 }
  0xdd   : > { %v263_v12 = vpop.f32.mrf.mxu0 }
  0xde   : > { %268 = vst.msk [vmem:[%s197_s26] sm:$0x1] %vm267_vm3, %v266_v11 }
  0xdf   : > { %v361_v13 = vpop.f32.mrf.mxu0 }
  0xe0 PF: > { %s13_s14 = sadd.s32 1, %s415_s14   ;;  %s483_s12 = smov %s411_s13 }
  0xe1   : > { %p10_p5 = scmp.ge.s32.totalorder %s13_s14, 4   ;;  %s484_s13 = smov %s486_s15 }
  0xe3   :  { %12 = sbr.rel (!%p10_p5) target bundleno = 2 (0x2), region = 62 }

// kernel: rfdb_forward.12
= control target key start
LH: loop header
LB: loop body
LE: loop exit
PB: predicated region body
PF: predicated region fallthrough
CT: control target
= control target key end

     0   :  { %s4089_s17 = smov 0   ;;  %s4091_s18 = smov 0   ;;  %s6108_s0 = inlined_call_operand.vmem [shape: bf16[2,1,8,18,18], index: 0, kind: input, shape index: {}]   ;;  %s6109_s1 = inlined_call_operand.vmem [shape: bf16[2,4,256], index: 1, kind: input, shape index: {}]   ;;  %s6110_s2 = inlined_call_operand.vmem [shape: bf16[2,4,256], index: 2, kind: input, shape index: {}]   ;;  %s6111_s3 = inlined_call_operand.vmem [shape: bf16[2,4,256], index: 3, kind: input, shape index: {}]   ;;  %s6112_s4 = inlined_call_operand.vmem [shape: bf16[4,72], index: 4, kind: input, shape index: {}]   ;;  %s6113_s5 = inlined_call_operand.vmem [shape: f32[4,1], index: 5, kind: input, shape index: {}]   ;;  %s6114_s6 = inlined_call_operand.vmem [shape: bf16[8,16], index: 6, kind: input, shape index: {}]   ;;  %s6115_s7 = inlined_call_operand.vmem [shape: f32[8,1], index: 7, kind: input, shape index: {}]   ;;  %s6116_s8 = inlined_call_operand.vmem [shape: bf16[2,8], index: 8, kind: input, shape index: {}]   ;;  %s6117_s9 = inlined_call_operand.vmem [shape: f32[2,1], index: 9, kind: input, shape index: {}]   ;;  %s6118_s10 = inlined_call_operand.vmem [shape: bf16[2,8,256], index: 10, kind: output, shape index: {0}]   ;;  %s6119_s11 = inlined_call_operand.vmem [shape: bf16[2,2,256], index: 11, kind: output, shape index: {1}]  }
   0x1   :  { %s4093_s19 = smov 0  }
   0x2 LB: > { %s34_s20 = sadd.s32 1, %s4010_s18  ;;  %p3811_p0 = scmp.ge.s32.totalorder %s4014_s19, 1  ;;  %s4014_s19 = sphi %s4093_s19, %s22_s19   ;;  %s4010_s18 = sphi %s4091_s18, %s6308_s18   ;;  %s4006_s17 = sphi %s4089_s17, %s6307_s17  }
   0x3   : > { %p36_p1 = scmp.ge.s32.totalorder %s34_s20, 2  ;;  %p413_p2 = scmp.lt.s32.totalorder %s4014_s19, 3 }
   0x5   : > { %s6310_s20 = smov (%p36_p1, %s34_s20), 0  ;;  %p414_p3 = pnand %p3811_p0, %p413_p2 }
   0x7   : > { %417 = sbr.rel (%p414_p3) target bundleno = 1106 (0x452), region = 60 }
   0xc   : > { %p496_p4 = scmp.lt.s32.totalorder %s4006_s17, 1  ;;  %v1181_v0 = vlaneseq  ;;  %vm1006_vm0 = vcmask 1042432   ;;  %vm1007_vm1 = vcmask 1046532   ;;  %v4016_v6 = vmov 1983009808   ;;  %s4018_s25 = smov 126  }
   0xd   : > { %vm4115_vm2 = vmor %vm1006_vm0, %vm1007_vm1  ;;  %v1179_v7 = vunpack.c.l.s4 %v4016_v6  ;;  %v4017_v16 = vmov 1934713408   ;;  %vm691_vm3 = vsmask.f32 3328  ;;  %vm692_vm4 = vsmask.f32 7440 }
   0xe   : > { %s6312_s17 = smov (!%p496_p4, %s4006_s17), 1  ;;  %v4119_v2 = vshrl.u32 %v1181_v0, 7  ;;  %v4144_v17 = vunpack.c.l.s4 %v4017_v16  ;;  %vm4376_vm5 = vmor %vm691_vm3, %vm692_vm4  ;;  %s4019_s26 = smov 127   ;;  %vm3197_vm6 = vcmask 130048   ;;  %vm3213_vm7 = vcmask 261120  }
   0xf   : > { %s3927_s21 = smul.u32 96, %s6312_s17  ;;  %v1180_v29 = vunpack.c.0.s8 %v1179_v7  ;;  %s4021_s27 = smov 16   ;;  %vm3224_vm8 = vcmask 392192   ;;  %vm3235_vm9 = vcmask 523264   ;;  %vm3246_vm10 = vcmask 654336  }
  0x10   : > { %6170 = vst [vmem:[#allocation2_spill] sm:$0xff] %v4119_v2  ;;  %v1197_v49 = vunpack.c.0.s8 %v4144_v17  ;;  %s4022_s28 = smov 32   ;;  %s4023_s29 = smov 48   ;;  %vm3257_vm11 = vcmask 785408   ;;  %vm3268_vm12 = vcmask 916480   ;;  %vm3373_vm13 = vcmask 1043456  }
  0x11   : > { %s4113_s24 = scalar_lea.vmem %s6108_s0, %s3927_s21  ;;  %v4205_v46 = vsub.s32 %v1180_v29, %v4119_v2  ;;  %s4024_s30 = smov 64   ;;  %vm3369_vm14 = vcmask 588800   ;;  %vm3462_vm15 = vcmask 1041408   ;;  %vm3540_vm3 = vcmask 64512  }
  0x12   : > { %v4122_v3 = vld [vmem:[%s4113_s24 + $0xc] sm:$0xf]  ;;  %v4125_v4 = vld [vmem:[%s4113_s24 + $0x10] sm:$0xf]  ;;  %v4128_v5 = vld [vmem:[%s4113_s24] sm:$0xf] }
  0x13   : > { %6171 = vst [vmem:[#allocation3_spill] sm:$0xff] %v4122_v3  ;;  %6172 = vst [vmem:[#allocation4_spill] sm:$0xff] %v4125_v4  ;;  %v3823_v8 = vrot.slane %v4122_v3, 9  ;;  %v1018_v9 = vrot.slane %v4125_v4, 5  ;;  %v4133_v10 = vld [vmem:[%s4113_s24 + $0x4] sm:$0xf] }
  0x14   : > { %6173 = vst [vmem:[#allocation5_spill] sm:$0xff] %v4133_v10  ;;  %v3822_v11 = vrot.slane %v4128_v5, 9  ;;  %v728_v12 = vshll.u32 %v4125_v4, 16  ;;  %v1011_v13 = vrot.slane %v4133_v10, 5  ;;  %v4139_v14 = vld [vmem:[%s4113_s24 + $0x14] sm:$0x1] }
  0x15   : > { %v4142_v15 = vld [vmem:[%s4113_s24 + $0x18] sm:$0xf]  ;;  %v732_v18 = vshrl.u32 %v4125_v4, 16  ;;  %v4149_v19 = vsel %vm4115_vm2, %v3823_v8, %v1018_v9  ;;  %v1020_v20 = vrot.slane %v1018_v9, 4  ;;  %v1021_v21 = vrot.slane %v4139_v14, 5  ;;  %s4025_s12 = smov 80  }
  0x16   : > { %v4153_v22 = vld [vmem:[%s4113_s24 + $0x1c] sm:$0xf]  ;;  %v3824_v23 = vrot.slane %v4142_v15, 9  ;;  %1133 = vrot.lane.b32.xlu1 %v4149_v19, %s4018_s25  ;;  %v4160_v24 = vsel %vm4115_vm2, %v3822_v11, %v1011_v13  ;;  %v4164_v26 = vld [vmem:[%s4113_s24 + $0x20] sm:$0x1]  ;;  %v1013_v28 = vrot.slane %v1011_v13, 4 }
  0x17   : > { %6174 = vst [vmem:[#allocation6_spill] sm:$0xff] %v4153_v22  ;;  %v1025_v25 = vrot.slane %v4153_v22, 5  ;;  %v4167_v27 = vld [vmem:[%s4113_s24 + $0x24] sm:$0xf]  ;;  %1129 = vrot.lane.b32.xlu0 %v4160_v24, %s4018_s25  ;;  %v4173_v30 = vsel %vm4115_vm2, %v1020_v20, %v1021_v21  ;;  %v1028_v31 = vrot.slane %v4164_v26, 5  ;;  %v4199_v43 = vrot.slane %v728_v12, 5 }
  0x18   : > { %v4177_v32 = vld [vmem:[%s4113_s24 + $0x28] sm:$0xf]  ;;  %v3825_v33 = vrot.slane %v4167_v27, 9  ;;  %v4181_v34 = vld [vmem:[%s4113_s24 + $0x2c] sm:$0x1]  ;;  %s4026_s13 = smov 96  }
  0x19   : > { %6175 = vst [vmem:[#allocation7_spill] sm:$0xff] %v4177_v32  ;;  %v4185_v35 = vsel %vm4115_vm2, %v3824_v23, %v1025_v25  ;;  %v1027_v36 = vrot.slane %v1025_v25, 4  ;;  %v1032_v37 = vrot.slane %v4177_v32, 5  ;;  %v1035_v38 = vrot.slane %v4181_v34, 5  ;;  %v4190_v39 = vld [vmem:[%s4113_s24 + $0x8] sm:$0x1] }
  0x1a   : > { %v1014_v40 = vrot.slane %v4190_v39, 5  ;;  %v4194_v41 = vld [vmem:[%s4113_s24 + $0x34] sm:$0xf]  ;;  %v4197_v42 = vld [vmem:[%s4113_s24 + $0x38] sm:$0x1]  ;;  %1135 = vrot.lane.b32.xlu1 %v4173_v30, %s4018_s25  ;;  %s4027_s14 = smov 112  }
  0x1b   : > { %6176 = vst [vmem:[#allocation8_spill] sm:$0xff] %v4194_v41  ;;  %v1034_v44 = vrot.slane %v1032_v37, 4  ;;  %v1039_v45 = vrot.slane %v4194_v41, 5  ;;  %v4208_v47 = vld [vmem:[%s4113_s24 + $0x30] sm:$0xf]  ;;  %1137 = vrot.lane.b32.xlu0 %v4185_v35, %s4018_s25  ;;  %v4218_v50 = vsel %vm4115_vm2, %v1027_v36, %v1028_v31  ;;  %v1042_v51 = vrot.slane %v4197_v42, 5 }
  0x1c   : > { %v4211_v48 = vld [vmem:[%s4113_s24 + $0x40] sm:$0xf]  ;;  %v3826_v52 = vrot.slane %v4208_v47, 9  ;;  %v4223_v53 = vld [vmem:[%s4113_s24 + $0x44] sm:$0x1]  ;;  %v4228_v55 = vsel %vm4115_vm2, %v3825_v33, %v1032_v37  ;;  %v4232_v56 = vsel %vm4115_vm2, %v1013_v28, %v1014_v40  ;;  %v734_v36 = vrot.slane %v732_v18, 4 }
  0x1d   : > { %6177 = vst [vmem:[#allocation9_spill] sm:$0xff] %v4211_v48  ;;  %v1046_v54 = vrot.slane %v4211_v48, 5  ;;  %v1041_v57 = vrot.slane %v1039_v45, 4  ;;  %v1049_v58 = vrot.slane %v4223_v53, 5  ;;  %v4236_v59 = vld [vmem:[%s4113_s24 + $0x3c] sm:$0xf]  ;;  %v4254_v7 = vsel %vm4115_vm2, %v1034_v44, %v1035_v38 }
  0x1e   : > { %v4239_v60 = vld [vmem:[%s4113_s24 + $0x4c] sm:$0xf]  ;;  %v4243_v61 = vsel %vm4115_vm2, %v3826_v52, %v1039_v45  ;;  %v3827_v63 = vrot.slane %v4236_v59, 9  ;;  %v4247_v0 = vld [vmem:[%s4113_s24 + $0x50] sm:$0x1]  ;;  %1139 = vrot.lane.b32.xlu1 %v4218_v50, %s4018_s25  ;;  %s3922_s23 = sshll.u32 %s6312_s17, 2 }
  0x1f   : > { %v1048_v62 = vrot.slane %v1046_v54, 4  ;;  %v1053_v6 = vrot.slane %v4239_v60, 5  ;;  %v4258_v8 = vsel %vm4115_vm2, %v1041_v57, %v1042_v51  ;;  %v1585_v9 = vcombine.low %v4160_v24, %v4243_v61  ;;  %v4264_v12 = vld [vmem:[%s4113_s24 + $0x48] sm:$0xf]  ;;  %v4267_v13 = vld [vmem:[%s4113_s24 + $0x58] sm:$0xf]  ;;  %1141 = vrot.lane.b32.xlu0 %v4228_v55, %s4018_s25 }
  0x20   : > { %v1056_v11 = vrot.slane %v4247_v0, 5  ;;  %v2197_v16 = vcombine.low %v4232_v56, %v4258_v8  ;;  %v4279_v21 = vsel %vm4115_vm2, %v3827_v63, %v1046_v54  ;;  %v4282_v25 = vld [vmem:[%s4113_s24 + $0x5c] sm:$0x1]  ;;  %v3828_v31 = vrot.slane %v4264_v12, 9  ;;  %v4290_v33 = vld [vmem:[%s4113_s24 + $0x54] sm:$0xf] }
  0x21   : > { %v4275_v20 = vsel %vm4115_vm2, %v1048_v62, %v1049_v58  ;;  %v1055_v23 = vrot.slane %v1053_v6, 4  ;;  %v1619_v29 = vcombine.low %v4149_v19, %v4279_v21  ;;  %v4295_v37 = vrot.slane %v1585_v9, %v4205_v46 }
  0x22   : > { %v2231_v28 = vcombine.low %v4173_v30, %v4275_v20  ;;  %v1060_v40 = vrot.slane %v4267_v13, 5  ;;  %v1063_v44 = vrot.slane %v4282_v25, 5  ;;  %1143 = vrot.lane.b32.xlu1 %v4254_v7, %s4018_s25  ;;  %v2204_v45 = vrot.slane %v2197_v16, %v4205_v46 }
  0x23   : > { %6178 = vst [vmem:[#allocation10_spill] sm:$0xff] %v4295_v37  ;;  %v4299_v38 = vsel %vm4115_vm2, %v1055_v23, %v1056_v11  ;;  %v4313_v52 = vsel %vm4115_vm2, %v3828_v31, %v1053_v6  ;;  %1131 = vrot.lane.b32.xlu0 %v4232_v56, %s4018_s25  ;;  %v4318_v54 = vrot.slane %v1619_v29, %v4205_v46  ;;  %v3829_v62 = vrot.slane %v4290_v33, 9 }
  0x24   : > { %v4307_v51 = vrot.slane %v2231_v28, %v4205_v46  ;;  %v2205_v18 = vcombine.low %v4218_v50, %v4299_v38  ;;  %6179 = vst [vmem:[#allocation11_spill] sm:$0xff] %v4313_v52  ;;  %v1593_v57 = vcombine.low %v4185_v35, %v4313_v52  ;;  %v1062_v58 = vrot.slane %v1060_v40, 4 }
  0x25   : > { %v735_v9 = vor.u32 %v734_v36, %v4199_v43  ;;  %v738_v11 = vshll.u32 %v4139_v14, 16  ;;  %v704_v6 = vshll.u32 %v4133_v10, 16  ;;  %v4336_v28 = vsel %vm4115_vm2, %v3829_v62, %v1060_v40 }
  0x26   : > { %v2212_v63 = vrot.slane %v2205_v18, %v4205_v46  ;;  %v4328_v16 = vrot.slane %v1593_v57, %v4205_v46  ;;  %v4332_v23 = vsel %vm4115_vm2, %v1062_v58, %v1063_v44  ;;  %v708_v29 = vshrl.u32 %v4133_v10, 16  ;;  %1147 = vrot.lane.b32.xlu1 %v4258_v8, %s4018_s25 }
  0x27   : > { %v2239_v36 = vcombine.low %v4254_v7, %v4332_v23  ;;  %v1627_v18 = vcombine.low %v4228_v55, %v4336_v28  ;;  %1145 = vrot.lane.b32.xlu0 %v4243_v61, %s4018_s25  ;;  %v4351_v44 = vrot.slane %v704_v6, 5  ;;  %v4362_v58 = vsub.s32 %v1197_v49, %v4119_v2 }
  0x28   : > { %6180 = vst [vmem:[#allocation12_spill] sm:$0xff] %v4328_v16  ;;  %v2213_v31 = vcombine.low %v2204_v45, %v2212_v63  ;;  %v2214_v14 = vcombine.high %v2204_v45, %v2212_v63  ;;  %v1601_v1 = vcombine.low %v4295_v37, %v4328_v16  ;;  %v736_v62 = vrot.slane %v735_v9, 4 }
  0x29   : > { %v4354_v57 = vrot.slane %v2239_v36, %v4205_v46  ;;  %v4357_v45 = vrot.slane %v1627_v18, %v4205_v46  ;;  %v740_v63 = vrot.slane %v738_v11, 5  ;;  %v710_v10 = vrot.slane %v708_v29, 4 }
  0x2a   : > { %1151 = vrot.lane.b32.xlu1 %v4275_v20, %s4018_s25  ;;  %v714_v11 = vshll.u32 %v4190_v39, 16  ;;  %v776_v29 = vshll.u32 %v4177_v32, 16  ;;  %v780_v40 = vshrl.u32 %v4177_v32, 16  ;;  %v4385_v18 = vrot.slane %v2213_v31, %v4362_v58 }
  0x2b   : > { %1149 = vrot.lane.b32.xlu0 %v4279_v21, %s4018_s25  ;;  %v711_v9 = vor.u32 %v710_v10, %v4351_v44  ;;  %v4388_v17 = vrot.slane %v2214_v14, %v4362_v58  ;;  %v4391_v36 = vrot.slane %v1601_v1, %v4362_v58  ;;  %v4399_v39 = vsel %vm4376_vm5, %v736_v62, %v740_v63 }
  0x2c   : > { %6183 = vst [vmem:[#allocation13_spill] sm:$0xff] %v4385_v18  ;;  %v716_v2 = vrot.slane %v714_v11, 5  ;;  %v4393_v4 = vrot.slane %v776_v29, 5  ;;  %v782_v10 = vrot.slane %v780_v40, 4  ;;  %v786_v31 = vshll.u32 %v4181_v34, 16 }
  0x2d   : > { %6184 = vst [vmem:[#allocation14_spill] sm:$0xff] %v4388_v17  ;;  %6185 = vst [vmem:[#allocation15_spill] sm:$0xff] %v4391_v36  ;;  %v712_v6 = vrot.slane %v711_v9, 4  ;;  %v752_v14 = vshll.u32 %v4153_v22, 16  ;;  %v756_v32 = vshrl.u32 %v4153_v22, 16  ;;  %v762_v40 = vshll.u32 %v4164_v26, 16 }
  0x2e   : > { %1155 = vrot.lane.b32.xlu1 %v4299_v38, %s4018_s25  ;;  %v783_v1 = vor.u32 %v782_v10, %v4393_v4  ;;  %v824_v9 = vshll.u32 %v4211_v48, 16  ;;  %v828_v11 = vshrl.u32 %v4211_v48, 16  ;;  %v788_v34 = vrot.slane %v786_v31, 5 }
  0x2f   : > { %1153 = vrot.lane.b32.xlu0 %v4313_v52, %s4018_s25  ;;  %v4412_v62 = vsel %vm4376_vm5, %v712_v6, %v716_v2  ;;  %v4414_v63 = vrot.slane %v752_v14, 5  ;;  %v758_v29 = vrot.slane %v756_v32, 4  ;;  %v834_v10 = vshll.u32 %v4223_v53, 16 }
  0x30   : > { %v784_v22 = vrot.slane %v783_v1, 4  ;;  %v4416_v16 = vrot.slane %v824_v9, 5  ;;  %v830_v52 = vrot.slane %v828_v11, 4  ;;  %v800_v48 = vshll.u32 %v4194_v41, 16 }
  0x31   : > { %v759_v26 = vor.u32 %v758_v29, %v4414_v63  ;;  %v804_v2 = vshrl.u32 %v4194_v41, 16  ;;  %v810_v6 = vshll.u32 %v4197_v42, 16  ;;  %v764_v32 = vrot.slane %v762_v40, 5 }
  0x32   : > { %1159 = vrot.lane.b32.xlu1 %v4332_v23, %s4018_s25  ;;  %v831_v31 = vor.u32 %v830_v52, %v4416_v16  ;;  %v836_v14 = vrot.slane %v834_v10, 5  ;;  %v872_v53 = vshll.u32 %v4267_v13, 16  ;;  %v4431_v1 = vsel %vm4376_vm5, %v784_v22, %v788_v34 }
  0x33   : > { %1157 = vrot.lane.b32.xlu0 %v4336_v28, %s4018_s25  ;;  %v760_v9 = vrot.slane %v759_v26, 4  ;;  %v4433_v11 = vrot.slane %v800_v48, 5  ;;  %v806_v29 = vrot.slane %v804_v2, 4  ;;  %v876_v42 = vshrl.u32 %v4267_v13, 16 }
  0x34   : > { %v832_v41 = vrot.slane %v831_v31, 4  ;;  %v4435_v37 = vrot.slane %v872_v53, 5  ;;  %v882_v40 = vshll.u32 %v4282_v25, 16  ;;  %v812_v10 = vrot.slane %v810_v6, 5 }
  0x35   : > { %v807_v52 = vor.u32 %v806_v29, %v4433_v11  ;;  %v848_v22 = vshll.u32 %v4239_v60, 16  ;;  %v852_v48 = vshrl.u32 %v4239_v60, 16  ;;  %v4448_v34 = vsel %vm4376_vm5, %v760_v9, %v764_v32 }
  0x36   : > { %1087 = vrot.lane.b32.xlu1 %v4173_v30, %s4019_s26  ;;  %v4452_v25 = vsel %vm4376_vm5, %v832_v41, %v836_v14  ;;  %v878_v26 = vrot.slane %v876_v42, 4  ;;  %v858_v30 = vshll.u32 %v4247_v0, 16  ;;  %v884_v29 = vrot.slane %v882_v40, 5 }
  0x37   : > { %1083 = vrot.lane.b32.xlu0 %v4232_v56, %s4019_s26  ;;  %v2027_v2 = vcombine.low %v4399_v39, %v4452_v25  ;;  %v808_v6 = vrot.slane %v807_v52, 4  ;;  %v4457_v31 = vrot.slane %v848_v22, 5  ;;  %v854_v53 = vrot.slane %v852_v48, 4 }
  0x38   : > { %v879_v56 = vor.u32 %v878_v26, %v4435_v37  ;;  %v719_v32 = vshrl.u32 %v4122_v3, 16  ;;  %v722_v9 = vshll.u32 %v4122_v3, 16  ;;  %v860_v14 = vrot.slane %v858_v30, 5 }
  0x39   : > { %v4466_v41 = vsel %vm4376_vm5, %v808_v6, %v812_v10  ;;  %v855_v0 = vor.u32 %v854_v53, %v4457_v31  ;;  %v695_v42 = vshrl.u32 %v4128_v5, 16  ;;  %v698_v3 = vshll.u32 %v4128_v5, 16 }
  0x3a   : > { %1095 = vrot.lane.b32.xlu1 %v4254_v7, %s4019_s26  ;;  %v1993_v40 = vcombine.low %v4412_v62, %v4466_v41  ;;  %v880_v52 = vrot.slane %v879_v56, 4  ;;  %v721_v22 = vrot.slane %v719_v32, 4  ;;  %v724_v48 = vrot.slane %v722_v9, 5 }
  0x3b   : > { %1091 = vrot.lane.b32.xlu0 %v4218_v50, %s4019_s26  ;;  %v856_v26 = vrot.slane %v855_v0, 4  ;;  %v697_v7 = vrot.slane %v695_v42, 4  ;;  %v767_v10 = vshrl.u32 %v4167_v27, 16  ;;  %v4477_v6 = vrot.slane %v2027_v2, %v4205_v46 }
  0x3c   : > { %v4481_v30 = vsel %vm4376_vm5, %v880_v52, %v884_v29  ;;  %v725_v50 = vor.u32 %v724_v48, %v721_v22  ;;  %v770_v53 = vshll.u32 %v4167_v27, 16  ;;  %v700_v9 = vrot.slane %v698_v3, 5 }
  0x3d   : > { %v2035_v56 = vcombine.low %v4431_v1, %v4481_v30  ;;  %v4490_v32 = vsel %vm4376_vm5, %v856_v26, %v860_v14  ;;  %v769_v2 = vrot.slane %v767_v10, 4  ;;  %v4495_v29 = vrot.slane %v1993_v40, %v4205_v46 }
  0x3e   : > { %1103 = vrot.lane.b32.xlu1 %v4275_v20, %s4019_s26  ;;  %v2001_v0 = vcombine.low %v4448_v34, %v4490_v32  ;;  %v772_v42 = vrot.slane %v770_v53, 5  ;;  %v743_v20 = vshrl.u32 %v4142_v15, 16  ;;  %v726_v22 = vrot.slane %v725_v50, 4 }
  0x3f   : > { %1099 = vrot.lane.b32.xlu0 %v4258_v8, %s4019_s26  ;;  %v4501_v52 = vrot.slane %v2035_v56, %v4205_v46  ;;  %v701_v14 = vor.u32 %v700_v9, %v697_v7  ;;  %v746_v3 = vshll.u32 %v4142_v15, 16  ;;  %v815_v40 = vshrl.u32 %v4236_v59, 16 }
  0x40   : > { %v4505_v48 = vrot.slane %v2001_v0, %v4205_v46  ;;  %v773_v8 = vor.u32 %v772_v42, %v769_v2  ;;  %v745_v26 = vrot.slane %v743_v20, 4  ;;  %v6187_v56 = vcombine.low %v4307_v51, %v4354_v57 }
  0x41   : > { %v702_v50 = vrot.slane %v701_v14, 4  ;;  %v748_v7 = vrot.slane %v746_v3, 5  ;;  %v6189_v42 = vcombine.high %v4307_v51, %v4354_v57  ;;  %v6190_v14 = vcombine.low %v4318_v54, %v4357_v45 }
  0x42   : > { %6186 = vst [vmem:[#allocation16_spill] sm:$0xff] %v4505_v48  ;;  %1111 = vrot.lane.b32.xlu1 %v4332_v23, %s4019_s26  ;;  %v4518_v9 = vrot.slane %v6187_v56, %v4362_v58  ;;  %v774_v0 = vrot.slane %v773_v8, 4  ;;  %v817_v57 = vrot.slane %v815_v40, 4  ;;  %v839_v40 = vshrl.u32 %v4264_v12, 16 }
  0x43   : > { %1107 = vrot.lane.b32.xlu0 %v4299_v38, %s4019_s26  ;;  %v4530_v20 = vrot.slane %v6189_v42, %v4362_v58  ;;  %v4536_v3 = vrot.slane %v6190_v14, %v4362_v58  ;;  %v4541_v38 = vsel %vm4376_vm5, %v726_v22, %v4199_v43  ;;  %v749_v56 = vor.u32 %v748_v7, %v745_v26 }
  0x44   : > { %6188 = vst [vmem:[#allocation17_spill] sm:$0xff] %v4518_v9  ;;  %v4546_v8 = vsel %vm4376_vm5, %v702_v50, %v4351_v44  ;;  %v4551_v51 = vsel %vm4376_vm5, %v774_v0, %v4393_v4  ;;  %v818_v42 = vshll.u32 %v4236_v59, 16  ;;  %v791_v43 = vshrl.u32 %v4208_v47, 16 }
  0x45   : > { %6191 = vst [vmem:[#allocation18_spill] sm:$0xff] %v4536_v3  ;;  %v750_v14 = vrot.slane %v749_v56, 4  ;;  %v794_v22 = vshll.u32 %v4208_v47, 16  ;;  %v863_v26 = vshrl.u32 %v4290_v33, 16  ;;  %v866_v4 = vshll.u32 %v4290_v33, 16 }
  0x46   : > { %1085 = vrot.lane.b32.xlu1 %v4149_v19, %s4019_s26  ;;  %v820_v44 = vrot.slane %v818_v42, 5  ;;  %v842_v50 = vshll.u32 %v4264_v12, 16  ;;  %v793_v7 = vrot.slane %v791_v43, 4  ;;  %v841_v2 = vrot.slane %v839_v40, 4 }
  0x47   : > { %1081 = vrot.lane.b32.xlu0 %v4160_v24, %s4019_s26  ;;  %v4567_v19 = vsel %vm4376_vm5, %v750_v14, %v4414_v63  ;;  %v796_v0 = vrot.slane %v794_v22, 5  ;;  %v865_v56 = vrot.slane %v863_v26, 4  ;;  %v868_v10 = vrot.slane %v866_v4, 5 }
  0x48   : > { %v821_v23 = vor.u32 %v820_v44, %v817_v57  ;;  %v844_v53 = vrot.slane %v842_v50, 5  ;;  %v2716_v42 = vshrl.u32 %v4385_v18, 16  ;;  %v2717_v48 = vshrl.u32 %v4518_v9, 16 }
  0x49   : > { %v797_v24 = vor.u32 %v796_v0, %v793_v7  ;;  %v869_v14 = vor.u32 %v868_v10, %v865_v56  ;;  %v6141_v22 = vmov 0   ;;  %v2728_v7 = vshrl.u32 %v4388_v17, 16 }
  0x4a   : > { %1093 = vrot.lane.b32.xlu1 %v4228_v55, %s4019_s26  ;;  %v822_v63 = vrot.slane %v821_v23, 4  ;;  %v845_v43 = vor.u32 %v844_v53, %v841_v2  ;;  %v4577_v57 = vcombine.high %v4385_v18, %v6141_v22  ;;  %3410 = vmatprep.mubr.bf16.mxu0 %v6141_v22  ;;  %v4580_v55 = vpack.i.b16 %v2717_v48, %v2716_v42 }
  0x4b   : > { %1089 = vrot.lane.b32.xlu0 %v4185_v35, %s4019_s26  ;;  %v798_v26 = vrot.slane %v797_v24, 4  ;;  %v4584_v44 = vcombine.high %v4518_v9, %v6141_v22  ;;  %3522 = vmatprep.mubr.bf16.mxu1 %v6141_v22  ;;  %v870_v53 = vrot.slane %v869_v14, 4  ;;  %v2692_v49 = vshrl.u32 %v4391_v36, 16 }
  0x4c   : > { %3965 = vset.pattern.permute.xlu0 %v6141_v22  ;;  %v4593_v10 = vsel %vm4376_vm5, %v822_v63, %v4416_v16  ;;  %v846_v23 = vrot.slane %v845_v43, 4  ;;  %v2722_v48 = vshrl.u32 %v4577_v57, 16  ;;  %3966 = vset.pattern.permute.xlu1 %v6141_v22  ;;  %v2729_v42 = vshrl.u32 %v4530_v20, 16 }
  0x4d   : > { %v1415_v2 = vcombine.low %v4541_v38, %v4593_v10  ;;  %v4604_v4 = vsel %vm4376_vm5, %v798_v26, %v4433_v11  ;;  %v2723_v40 = vshrl.u32 %v4584_v44, 16  ;;  %v4649_v43 = vcombine.high %v4388_v17, %v6141_v22 }
  0x4e   : > { %1101 = vrot.lane.b32.xlu1 %v4279_v21, %s4019_s26  ;;  %v1381_v50 = vcombine.low %v4546_v8, %v4604_v4  ;;  %v4616_v21 = vsel %vm4376_vm5, %v870_v53, %v4435_v37  ;;  %v4621_v11 = vsel %vm4376_vm5, %v846_v23, %v4457_v31  ;;  %v2693_v31 = vshrl.u32 %v4536_v3, 16  ;;  %v6199_v53 = vld [vmem:[#allocation10_spill] sm:$0xff]  ;;  %v6200_v23 = vld [vmem:[#allocation12_spill] sm:$0xff] }
  0x4f   : > { %1097 = vrot.lane.b32.xlu0 %v4243_v61, %s4019_s26  ;;  %v4625_v0 = vrot.slane %v1415_v2, %v4205_v46  ;;  %v1423_v61 = vcombine.low %v4551_v51, %v4616_v21  ;;  %v1389_v56 = vcombine.low %v4567_v19, %v4621_v11  ;;  %v4631_v24 = vpack.i.b16 %v2723_v40, %v2722_v48 }
  0x50   : > { %v4634_v37 = vrot.slane %v1381_v50, %v4205_v46  ;;  %6197 = vst [vmem:[#allocation24_spill] sm:$0xff] %v4649_v43  ;;  %v4653_v26 = vcombine.high %v4530_v20, %v6141_v22  ;;  %v6201_v48 = vcombine.high %v6199_v53, %v6200_v23  ;;  %v4663_v40 = vpack.i.b16 %v2693_v31, %v2692_v49 }
  0x51   : > { %6192 = vst [vmem:[#allocation19_spill] sm:$0xff] %v4625_v0  ;;  %6193 = vst [vmem:[#allocation20_spill] sm:$0xff] %v4631_v24  ;;  %v4642_v63 = vrot.slane %v1423_v61, %v4205_v46  ;;  %v4645_v14 = vrot.slane %v1389_v56, %v4205_v46  ;;  %v4665_v50 = vpack.i.b16 %v2729_v42, %v2728_v7  ;;  %v2734_v31 = vshrl.u32 %v4649_v43, 16 }
  0x52   : > { %6194 = vst [vmem:[#allocation21_spill] sm:$0xff] %v4634_v37  ;;  %1109 = vrot.lane.b32.xlu1 %v4336_v28, %s4019_s26  ;;  %6198 = vst [vmem:[#allocation25_spill] sm:$0xff] %v4653_v26  ;;  %v4659_v2 = vrot.slane %v6201_v48, %v4362_v58  ;;  %v6203_v28 = vld [vmem:[#allocation11_spill] sm:$0xff]  ;;  %v6205_v23 = vcombine.high %v4318_v54, %v4357_v45  ;;  %v2735_v42 = vshrl.u32 %v4653_v26, 16  ;;  %vm3473_vm2 = vcmask 1045504  }
  0x53   : > { %6195 = vst [vmem:[#allocation22_spill] sm:$0xff] %v4642_v63  ;;  %6196 = vst [vmem:[#allocation23_spill] sm:$0xff] %v4645_v14  ;;  %1105 = vrot.lane.b32.xlu0 %v6203_v28, %s4019_s26  ;;  %v4693_v54 = vcombine.high %v4391_v36, %v6141_v22  ;;  %v4697_v45 = vcombine.high %v4536_v3, %v6141_v22 }
  0x54   : > { %6202 = vst [vmem:[#allocation10_spill] sm:$0xff] %v4659_v2  ;;  %6204 = vst [vmem:[#allocation12_spill] sm:$0xff] %v4665_v50  ;;  %v4679_v49 = vrot.slane %v6205_v23, %v4362_v58  ;;  %v4689_v48 = vpack.i.b16 %v2735_v42, %v2734_v31  ;;  %v2704_v23 = vshrl.u32 %v4659_v2, 16  ;;  %v4705_v61 = vcombine.high %v4659_v2, %v6141_v22 }
  0x55   : > { %v2698_v28 = vshrl.u32 %v4693_v54, 16  ;;  %v2699_v7 = vshrl.u32 %v4697_v45, 16 }
  0x56   : > { %6206 = vst [vmem:[#allocation11_spill] sm:$0xff] %v4679_v49  ;;  %908 = vrot.lane.b32.xlu1 %v4399_v39, %s4019_s26  ;;  %6207 = vst [vmem:[#allocation26_spill] sm:$0xff] %v4689_v48  ;;  %v2705_v35 = vshrl.u32 %v4679_v49, 16  ;;  %v4713_v42 = vcombine.high %v4679_v49, %v6141_v22  ;;  %v2710_v53 = vshrl.u32 %v4705_v61, 16 }
  0x57   : > { %904 = vrot.lane.b32.xlu0 %v4412_v62, %s4019_s26  ;;  %6208 = vst [vmem:[#allocation27_spill] sm:$0xff] %v4705_v61  ;;  %v4725_v2 = vpack.i.b16 %v2699_v7, %v2698_v28  ;;  %v6218_v28 = vld [vmem:[#allocation8_spill] sm:$0xff] }
  0x58   : > { %6209 = vst [vmem:[#allocation28_spill] sm:$0xff] %v4713_v42  ;;  %v4719_v16 = vpack.i.b16 %v2705_v35, %v2704_v23  ;;  %v2711_v31 = vshrl.u32 %v4713_v42, 16  ;;  %v6219_v35 = vld [vmem:[#allocation3_spill] sm:$0xff] }
  0x59   : > { %6211 = vst [vmem:[#allocation30_spill] sm:$0xff] %v4725_v2 }
  0x5a   : > { %916 = vrot.lane.b32.xlu1 %v4431_v1, %s4019_s26  ;;  %6210 = vst [vmem:[#allocation29_spill] sm:$0xff] %v4719_v16  ;;  %v4729_v22 = vpack.i.b16 %v2711_v31, %v2710_v53  ;;  %v6216_v53 = vld [vmem:[#allocation6_spill] sm:$0xff] }
  0x5b   : > { %912 = vrot.lane.b32.xlu0 %v4448_v34, %s4019_s26 }
  0x5c   : > { %6212 = vst [vmem:[#allocation31_spill] sm:$0xff] %v4729_v22 }
  0x5e   : > { %924 = vrot.lane.b32.xlu1 %v4452_v25, %s4019_s26 }
  0x5f   : > { %920 = vrot.lane.b32.xlu0 %v4466_v41, %s4019_s26 }
  0x62   : > { %932 = vrot.lane.b32.xlu1 %v4481_v30, %s4019_s26 }
  0x63   : > { %928 = vrot.lane.b32.xlu0 %v4490_v32, %s4019_s26 }
  0x66   : > { %956 = vrot.lane.b32.xlu1 %v4399_v39, %s4018_s25 }
  0x67   : > { %952 = vrot.lane.b32.xlu0 %v4412_v62, %s4018_s25 }
  0x6a   : > { %964 = vrot.lane.b32.xlu1 %v4431_v1, %s4018_s25 }
  0x6b   : > { %960 = vrot.lane.b32.xlu0 %v4448_v34, %s4018_s25 }
  0x6e   : > { %972 = vrot.lane.b32.xlu1 %v4452_v25, %s4018_s25 }
  0x6f   : > { %968 = vrot.lane.b32.xlu0 %v4466_v41, %s4018_s25 }
  0x72   : > { %980 = vrot.lane.b32.xlu1 %v4481_v30, %s4018_s25 }
  0x73   : > { %976 = vrot.lane.b32.xlu0 %v4490_v32, %s4018_s25 }
  0x76   : > { %906 = vrot.lane.b32.xlu1 %v4541_v38, %s4019_s26 }
  0x77   : > { %902 = vrot.lane.b32.xlu0 %v4546_v8, %s4019_s26 }
  0x7a   : > { %914 = vrot.lane.b32.xlu1 %v4551_v51, %s4019_s26 }
  0x7b   : > { %910 = vrot.lane.b32.xlu0 %v4567_v19, %s4019_s26 }
  0x7e   : > { %922 = vrot.lane.b32.xlu1 %v4593_v10, %s4019_s26 }
  0x7f   : > { %918 = vrot.lane.b32.xlu0 %v4604_v4, %s4019_s26 }
  0x82   : > { %930 = vrot.lane.b32.xlu1 %v4616_v21, %s4019_s26 }
  0x83   : > { %926 = vrot.lane.b32.xlu0 %v4621_v11, %s4019_s26 }
  0x86   : > { %954 = vrot.lane.b32.xlu1 %v4541_v38, %s4018_s25 }
  0x87   : > { %950 = vrot.lane.b32.xlu0 %v4546_v8, %s4018_s25  ;;  %v6213_v8 = vld [vmem:[#allocation4_spill] sm:$0xff] }
  0x88   : > { %v4777_v62 = vpop.permute.xlu1 %1133 }
  0x89   : > { %v4779_v1 = vpop.permute.xlu0 %1129 }
  0x8a   : > { %962 = vrot.lane.b32.xlu1 %v4551_v51, %s4018_s25  ;;  %v6214_v51 = vld [vmem:[#allocation5_spill] sm:$0xff] }
  0x8b   : > { %958 = vrot.lane.b32.xlu0 %v4567_v19, %s4018_s25 }
  0x8c   : > { %v4785_v34 = vpop.permute.xlu1 %1135 }
  0x8d   : > { %v4787_v25 = vpop.permute.xlu0 %1137 }
  0x8e   : > { %970 = vrot.lane.b32.xlu1 %v4593_v10, %s4018_s25 }
  0x8f   : > { %966 = vrot.lane.b32.xlu0 %v4604_v4, %s4018_s25  ;;  %v6215_v4 = vld [vmem:[#allocation7_spill] sm:$0xff] }
  0x90   : > { %v1140_v41 = vpop.permute.xlu1 %1139 }
  0x91   : > { %v4793_v30 = vpop.permute.xlu0 %1141 }
  0x92   : > { %978 = vrot.lane.b32.xlu1 %v4616_v21, %s4018_s25 }
  0x93   : > { %974 = vrot.lane.b32.xlu0 %v4621_v11, %s4018_s25  ;;  %v6217_v11 = vld [vmem:[#allocation9_spill] sm:$0xff] }
  0x94   : > { %v1144_v32 = vpop.permute.xlu1 %1143 }
  0x95   : > { %v1132_v38 = vpop.permute.xlu0 %1131 }
  0x96   : > { %649 = vrot.lane.b32.xlu1 %v6213_v8, %s4018_s25 }
  0x97   : > { %645 = vrot.lane.b32.xlu0 %v6214_v51, %s4018_s25 }
  0x98   : > { %v1148_v19 = vpop.permute.xlu1 %1147 }
  0x99   : > { %v1146_v10 = vpop.permute.xlu0 %1145  ;;  %v2333_v26 = vcombine.low %v1132_v38, %v1148_v19 }
  0x9a   : > { %657 = vrot.lane.b32.xlu1 %v6215_v4, %s4018_s25 }
  0x9b   : > { %653 = vrot.lane.b32.xlu0 %v6216_v53, %s4018_s25 }
  0x9c   : > { %v1152_v21 = vpop.permute.xlu1 %1151 }
  0x9d   : > { %v1150_v7 = vpop.permute.xlu0 %1149 }
  0x9e   : > { %665 = vrot.lane.b32.xlu1 %v6217_v11, %s4018_s25 }
  0x9f   : > { %661 = vrot.lane.b32.xlu0 %v6218_v28, %s4018_s25 }
  0xa0   : > { %v1156_v23 = vpop.permute.xlu1 %1155 }
  0xa1   : > { %v1154_v31 = vpop.permute.xlu0 %1153  ;;  %v2341_v48 = vcombine.low %v1140_v41, %v1156_v23  ;;  %v1721_v41 = vcombine.low %v4779_v1, %v1146_v10  ;;  %v6223_v10 = vcombine.high %v4477_v6, %v4501_v52 }
  0xa2   : > { %673 = vrot.lane.b32.xlu1 %v4267_v13, %s4018_s25  ;;  %v1729_v24 = vcombine.low %v4787_v25, %v1154_v31  ;;  %v2340_v25 = vrot.slane %v2333_v26, %v4205_v46 }
  0xa3   : > { %669 = vrot.lane.b32.xlu0 %v4239_v60, %s4018_s25  ;;  %v2348_v23 = vrot.slane %v2341_v48, %v4205_v46  ;;  %v6221_v48 = vcombine.high %v4634_v37, %v4645_v14 }
  0xa4   : > { %v1160_v56 = vpop.permute.xlu1 %1159 }
  0xa5   : > { %v1158_v39 = vpop.permute.xlu0 %1157  ;;  %v2375_v43 = vcombine.low %v1144_v32, %v1160_v56  ;;  %v1755_v56 = vcombine.low %v4777_v62, %v1150_v7  ;;  %v4884_v1 = vrot.slane %v6221_v48, %v4362_v58  ;;  %v1736_v62 = vrot.slane %v1729_v24, %v4205_v46 }
  0xa6   : > { %647 = vrot.lane.b32.xlu1 %v6219_v35, %s4018_s25  ;;  %v1728_v24 = vrot.slane %v1721_v41, %v4205_v46  ;;  %v2349_v7 = vcombine.low %v2340_v25, %v2348_v23 }
  0xa7   : > { %643 = vrot.lane.b32.xlu0 %v4128_v5, %s4018_s25  ;;  %v2382_v32 = vrot.slane %v2375_v43, %v4205_v46  ;;  %6222 = vst [vmem:[#allocation4_spill] sm:$0xff] %v4884_v1 }
  0xa8   : > { %v4819_v22 = vpop.permute.xlu1 %1087  ;;  %v1737_v31 = vcombine.low %v1728_v24, %v1736_v62  ;;  %v4919_v41 = vrot.slane %v2349_v7, %v4362_v58 }
  0xa9   : > { %v4821_v61 = vpop.permute.xlu0 %1083 }
  0xaa   : > { %655 = vrot.lane.b32.xlu1 %v4167_v27, %s4018_s25 }
  0xab   : > { %651 = vrot.lane.b32.xlu0 %v4142_v15, %s4018_s25 }
  0xac   : > { %v4827_v42 = vpop.permute.xlu1 %1095 }
  0xad   : > { %v4829_v36 = vpop.permute.xlu0 %1091 }
  0xae   : > { %663 = vrot.lane.b32.xlu1 %v4236_v59, %s4018_s25 }
  0xaf   : > { %659 = vrot.lane.b32.xlu0 %v4208_v47, %s4018_s25 }
  0xb0   : > { %v4835_v3 = vpop.permute.xlu1 %1103 }
  0xb1   : > { %v4837_v16 = vpop.permute.xlu0 %1099 }
  0xb2   : > { %671 = vrot.lane.b32.xlu1 %v4290_v33, %s4018_s25 }
  0xb3   : > { %667 = vrot.lane.b32.xlu0 %v4264_v12, %s4018_s25 }
  0xb4   : > { %v4843_v49 = vpop.permute.xlu1 %1111 }
  0xb5   : > { %v4845_v18 = vpop.permute.xlu0 %1107 }
  0xb6   : > { %601 = vrot.lane.b32.xlu1 %v6213_v8, %s4019_s26  ;;  %v2367_v8 = vcombine.low %v4785_v34, %v1152_v21 }
  0xb7   : > { %597 = vrot.lane.b32.xlu0 %v6214_v51, %s4019_s26  ;;  %v1763_v51 = vcombine.low %v4793_v30, %v1158_v39  ;;  %v6220_v39 = vcombine.high %v4625_v0, %v4642_v63 }
  0xb8   : > { %v4851_v9 = vpop.permute.xlu1 %1085  ;;  %v2374_v30 = vrot.slane %v2367_v8, %v4205_v46 }
  0xb9   : > { %v4853_v2 = vpop.permute.xlu0 %1081  ;;  %v4878_v34 = vrot.slane %v6220_v39, %v4362_v58  ;;  %v1770_v38 = vrot.slane %v1763_v51, %v4205_v46  ;;  %v2350_v39 = vcombine.high %v2340_v25, %v2348_v23  ;;  %v2560_v23 = vshrl.u32 %v4884_v1, 16 }
  0xba   : > { %609 = vrot.lane.b32.xlu1 %v6215_v4, %s4019_s26  ;;  %v4898_v4 = vrot.slane %v6223_v10, %v4362_v58  ;;  %v4932_v25 = vrot.slane %v1737_v31, %v4362_v58  ;;  %v2384_v31 = vcombine.high %v2374_v30, %v2382_v32 }
  0xbb   : > { %605 = vrot.lane.b32.xlu0 %v6216_v53, %s4019_s26  ;;  %v6225_v53 = vld [vmem:[#allocation16_spill] sm:$0xff] }
  0xbc   : > { %v4860_v50 = vpop.permute.xlu1 %1093  ;;  %6224 = vst [vmem:[#allocation5_spill] sm:$0xff] %v4898_v4  ;;  %v6226_v26 = vcombine.high %v4495_v29, %v6225_v53 }
  0xbd   : > { %v4864_v17 = vpop.permute.xlu0 %1089 }
  0xbe   : > { %617 = vrot.lane.b32.xlu1 %v6217_v11, %s4019_s26  ;;  %v4904_v21 = vrot.slane %v6226_v26, %v4362_v58  ;;  %v1762_v11 = vrot.slane %v1755_v56, %v4205_v46 }
  0xbf   : > { %613 = vrot.lane.b32.xlu0 %v6218_v28, %s4019_s26  ;;  %v2383_v28 = vcombine.low %v2374_v30, %v2382_v32  ;;  %v2273_v30 = vcombine.low %v4829_v36, %v4845_v18 }
  0xc0   : > { %v4888_v43 = vpop.permute.xlu1 %1101  ;;  %6227 = vst [vmem:[#allocation7_spill] sm:$0xff] %v4904_v21  ;;  %v1771_v48 = vcombine.low %v1762_v11, %v1770_v38  ;;  %v2584_v56 = vshrl.u32 %v4904_v21, 16  ;;  %v1772_v51 = vcombine.high %v1762_v11, %v1770_v38  ;;  %v2307_v38 = vcombine.low %v4827_v42, %v4843_v49 }
  0xc1   : > { %v4892_v19 = vpop.permute.xlu0 %1097  ;;  %v4926_v26 = vrot.slane %v2383_v28, %v4362_v58  ;;  %v2812_v49 = vshrl.u32 %v4919_v41, 16  ;;  %v2788_v42 = vshrl.u32 %v4932_v25, 16 }
  0xc2   : > { %625 = vrot.lane.b32.xlu1 %v4267_v13, %s4019_s26  ;;  %v1738_v13 = vcombine.high %v1728_v24, %v1736_v62  ;;  %v4940_v24 = vrot.slane %v2350_v39, %v4362_v58  ;;  %v4943_v28 = vrot.slane %v1771_v48, %v4362_v58  ;;  %v4982_v48 = vrot.slane %v1772_v51, %v4362_v58 }
  0xc3   : > { %621 = vrot.lane.b32.xlu0 %v4239_v60, %s4019_s26  ;;  %v2585_v60 = vshrl.u32 %v4898_v4, 16  ;;  %v2813_v11 = vshrl.u32 %v4926_v26, 16 }
  0xc4   : > { %v4912_v8 = vpop.permute.xlu1 %1109  ;;  %v2789_v36 = vshrl.u32 %v4943_v28, 16 }
  0xc5   : > { %v4916_v10 = vpop.permute.xlu0 %1105  ;;  %v4936_v62 = vpack.i.b16 %v2585_v60, %v2584_v56  ;;  %v6229_v56 = vmov 0   ;;  %v2814_v37 = vpack.i.b16 %v2813_v11, %v2812_v49 }
  0xc6   : > { %599 = vrot.lane.b32.xlu1 %v6219_v35, %s4019_s26  ;;  %v2561_v35 = vshrl.u32 %v4878_v34, 16  ;;  %v4954_v60 = vcombine.high %v4919_v41, %v6229_v56  ;;  %v4965_v32 = vcombine.high %v4904_v21, %v6229_v56  ;;  %v2399_v18 = vcombine.high %v4926_v26, %v6229_v56 }
  0xc7   : > { %595 = vrot.lane.b32.xlu0 %v4128_v5, %s4019_s26  ;;  %6228 = vst [vmem:[#allocation6_spill] sm:$0xff] %v4936_v62  ;;  %v4948_v5 = vrot.slane %v1738_v13, %v4362_v58  ;;  %v2299_v13 = vcombine.low %v4819_v22, %v4835_v3  ;;  %v5001_v22 = vrot.slane %v2307_v38, %v4205_v46 }
  0xc8   : > { %v4934_v7 = vpop.permute.xlu1 %908  ;;  %v4956_v62 = vpack.i.b16 %v2561_v35, %v2560_v23  ;;  %6231 = vst [vmem:[#allocation8_spill] sm:$0xff] %v4965_v32  ;;  %v4992_v35 = vrot.slane %v2384_v31, %v4362_v58  ;;  %v2818_v51 = vshrl.u32 %v4954_v60, 16  ;;  %v1787_v31 = vcombine.high %v4943_v28, %v6229_v56 }
  0xc9   : > { %v4945_v14 = vpop.permute.xlu0 %904  ;;  %v1661_v38 = vcombine.low %v4864_v17, %v4916_v10  ;;  %v5020_v11 = vrot.slane %v2299_v13, %v4205_v46  ;;  %v2790_v63 = vpack.i.b16 %v2789_v36, %v2788_v42  ;;  %v1687_v17 = vcombine.low %v4851_v9, %v4888_v43 }
  0xca   : > { %607 = vrot.lane.b32.xlu1 %v4167_v27, %s4019_s26  ;;  %6230 = vst [vmem:[#allocation9_spill] sm:$0xff] %v4956_v62  ;;  %v4969_v27 = vcombine.high %v4898_v4, %v6229_v56  ;;  %v2265_v62 = vcombine.low %v4821_v61, %v4837_v16  ;;  %v5010_v61 = vrot.slane %v2273_v30, %v4205_v46  ;;  %v2801_v30 = vshrl.u32 %v4982_v48, 16 }
  0xcb   : > { %603 = vrot.lane.b32.xlu0 %v4142_v15, %s4019_s26  ;;  %v4979_v15 = vcombine.high %v4932_v25, %v6229_v56  ;;  %v2817_v16 = vpack.i.b16 %v2399_v18, %v4954_v60  ;;  %v2315_v10 = vcombine.low %v5020_v11, %v5001_v22  ;;  %v3879_v60 = vcombine.low %v2814_v37, %v2814_v37 }
  0xcc   : > { %6232 = vst [vmem:[#allocation3_spill] sm:$0xff] %v4969_v27  ;;  %v4973_v39 = vpop.permute.xlu1 %916  ;;  %v5027_v0 = vrot.slane %v2265_v62, %v4205_v46  ;;  %v2795_v42 = vshrl.u32 %v1787_v31, 16  ;;  %v3839_v37 = vcombine.low %v2790_v63, %v2790_v63  ;;  %v5058_v13 = vcombine.high %v4878_v34, %v6229_v56 }
  0xcd   : > { %v4986_v23 = vpop.permute.xlu0 %912  ;;  %v2793_v62 = vpack.i.b16 %v1787_v31, %v4979_v15  ;;  %v5071_v63 = vpack.i.b16 %v4926_v26, %v4919_v41  ;;  %v2825_v36 = vshrl.u32 %v4992_v35, 16  ;;  %v2316_v4 = vcombine.high %v5020_v11, %v5001_v22 }
  0xce   : > { %615 = vrot.lane.b32.xlu1 %v4236_v59, %s4019_s26  ;;  %v1695_v59 = vcombine.low %v4860_v50, %v4912_v8  ;;  %v1653_v50 = vcombine.low %v4853_v2, %v4892_v19  ;;  %v2819_v8 = vshrl.u32 %v2399_v18, 16  ;;  %v2281_v9 = vcombine.low %v5027_v0, %v5010_v61 }
  0xcf   : > { %611 = vrot.lane.b32.xlu0 %v4208_v47, %s4019_s26  ;;  %v2794_v47 = vshrl.u32 %v4979_v15, 16  ;;  %v5046_v2 = vrot.slane %v1661_v38, %v4205_v46  ;;  %v5052_v19 = vcombine.high %v4884_v1, %v6229_v56  ;;  %v3884_v15 = vcombine.low %v2817_v16, %v2817_v16  ;;  %6234 = vst [vmem:[#allocation32_spill] sm:$0xff] %v5071_v63 }
  0xd0   : > { %v5016_v3 = vpop.permute.xlu1 %924  ;;  %v5043_v43 = vrot.slane %v1695_v59, %v4205_v46  ;;  %v5063_v18 = vrot.slane %v1687_v17, %v4205_v46  ;;  %v5066_v31 = vrot.slane %v1653_v50, %v4205_v46  ;;  %v5075_v16 = vpack.i.b16 %v4943_v28, %v4932_v25 }
  0xd1   : > { %v5022_v49 = vpop.permute.xlu0 %920  ;;  %6233 = vst [vmem:[#allocation16_spill] sm:$0xff] %v5052_v19  ;;  %v2820_v59 = vpack.i.b16 %v2819_v8, %v2818_v51  ;;  %v2590_v17 = vshrl.u32 %v4965_v32, 16  ;;  %v2591_v50 = vshrl.u32 %v4969_v27, 16  ;;  %v5086_v41 = vrot.slane %v2281_v9, %v4362_v58 }
  0xd2   : > { %623 = vrot.lane.b32.xlu1 %v4290_v33, %s4019_s26  ;;  %6235 = vst [vmem:[#allocation33_spill] sm:$0xff] %v5075_v16  ;;  %v1703_v26 = vcombine.low %v5063_v18, %v5043_v43  ;;  %v1669_v25 = vcombine.low %v5066_v31, %v5046_v2  ;;  %v3844_v8 = vcombine.low %v2793_v62, %v2793_v62 }
  0xd3   : > { %619 = vrot.lane.b32.xlu0 %v4264_v12, %s4019_s26  ;;  %v5097_v38 = vpack.i.b16 %v2591_v50, %v2590_v17  ;;  %v3889_v9 = vcombine.low %v2820_v59, %v2820_v59  ;;  %v2823_v16 = vpack.i.b16 %v4992_v35, %v4940_v24  ;;  %v2799_v63 = vpack.i.b16 %v4982_v48, %v4948_v5  ;;  %s513_s26 = scalar_lea.vmem %s6109_s1, %s3922_s23 }
  0xd4   : > { %v5048_v33 = vpop.permute.xlu1 %932  ;;  %v5112_v17 = vrot.slane %v1669_v25, %v4362_v58  ;;  %v2764_v50 = vshrl.u32 %v5086_v41, 16  ;;  %v6238_v25 = vcombine.low %v4477_v6, %v4501_v52 }
  0xd5   : > { %v5054_v12 = vpop.permute.xlu0 %928  ;;  %6236 = vst [vmem:[#allocation34_spill] sm:$0xff] %v5097_v38  ;;  %v3894_v6 = vcombine.low %v2823_v16, %v2823_v16  ;;  %v3854_v52 = vcombine.low %v2799_v63, %v2799_v63 }
  0xd6   : > { %3051 = vrot.lane.b32.xlu1 %v3879_v60, %s4021_s27  ;;  %v5083_v60 = vrot.slane %v2315_v10, %v4362_v58  ;;  %v2824_v10 = vshrl.u32 %v4940_v24, 16 }
  0xd7   : > { %2869 = vrot.lane.b32.xlu0 %v3839_v37, %s4021_s27  ;;  %v2796_v37 = vpack.i.b16 %v2795_v42, %v2794_v47  ;;  %v6237_v47 = vshrl.u32 %v4948_v5, 16  ;;  %v5109_v42 = vrot.slane %v1703_v26, %v4362_v58  ;;  %v1788_v26 = vcombine.high %v4982_v48, %v6229_v56 }
  0xd8   : > { %v5092_v28 = vpop.permute.xlu1 %956  ;;  %v2765_v59 = vshrl.u32 %v5083_v60, 16  ;;  %v5120_v21 = vpack.i.b16 %v2825_v36, %v2824_v10  ;;  %v6239_v48 = vcombine.low %v4495_v29, %v6225_v53 }
  0xd9   : > { %v5094_v51 = vpop.permute.xlu0 %952  ;;  %v2802_v62 = vpack.i.b16 %v2801_v30, %v6237_v47  ;;  %v3849_v38 = vcombine.low %v2796_v37, %v2796_v37  ;;  %v1754_v30 = vcombine.high %v4948_v5, %v6229_v56  ;;  %v5130_v47 = vrot.slane %v6238_v25, %v4362_v58 }
  0xda   : > { %3075 = vrot.lane.b32.xlu1 %v3884_v15, %s4022_s28  ;;  %v2282_v37 = vcombine.high %v5027_v0, %v5010_v61  ;;  %v2400_v5 = vcombine.high %v4992_v35, %v6229_v56  ;;  %v5143_v36 = vrot.slane %v6239_v48, %v4362_v58  ;;  %v2766_v0 = vpack.i.b16 %v2765_v59, %v2764_v50 }
  0xdb   : > { %2893 = vrot.lane.b32.xlu0 %v3844_v8, %s4022_s28  ;;  %v3859_v22 = vcombine.low %v2802_v62, %v2802_v62  ;;  %v2740_v61 = vshrl.u32 %v5112_v17, 16  ;;  %v2741_v10 = vshrl.u32 %v5109_v42, 16  ;;  %v2366_v35 = vcombine.high %v4940_v24, %v6229_v56 }
  0xdc   : > { %v5114_v15 = vpop.permute.xlu1 %964  ;;  %v3899_v29 = vcombine.low %v5120_v21, %v5120_v21  ;;  %v5156_v53 = vpack.i.b16 %v1788_v26, %v1754_v30  ;;  %v2806_v16 = vshrl.u32 %v1754_v30, 16  ;;  %v2807_v63 = vshrl.u32 %v1788_v26, 16 }
  0xdd   : > { %v5118_v8 = vpop.permute.xlu0 %960  ;;  %v5162_v62 = vrot.slane %v2282_v37, %v4362_v58  ;;  %v5165_v50 = vpack.i.b16 %v2400_v5, %v2366_v35  ;;  %v2566_v24 = vshrl.u32 %v5052_v19, 16  ;;  %v2297_v21 = vcombine.high %v5086_v41, %v6229_v56 }
  0xde   : > { %3099 = vrot.lane.b32.xlu1 %v3889_v9, %s4023_s29  ;;  %v2331_v59 = vcombine.high %v5083_v60, %v6229_v56  ;;  %v2567_v30 = vshrl.u32 %v5058_v13, 16  ;;  %v3878_v25 = vcombine.low %v4580_v55, %v2766_v0  ;;  %v2742_v37 = vpack.i.b16 %v2741_v10, %v2740_v61 }
  0xdf   : > { %2917 = vrot.lane.b32.xlu0 %v3849_v38, %s4023_s29  ;;  %v5159_v38 = vrot.slane %v2316_v4, %v4362_v58  ;;  %v2831_v4 = vshrl.u32 %v2400_v5, 16  ;;  %v2830_v48 = vshrl.u32 %v2366_v35, 16  ;;  %v5178_v19 = vpack.i.b16 %v2807_v63, %v2806_v16 }
  0xe0   : > { %v5146_v11 = vpop.permute.xlu1 %972  ;;  %v5181_v1 = vpack.i.b16 %v2567_v30, %v2566_v24  ;;  %v1704_v5 = vcombine.high %v5063_v18, %v5043_v43  ;;  %v3904_v55 = vcombine.low %v5165_v50, %v5165_v50  ;;  %v5190_v0 = vcombine.high %v5162_v62, %v6229_v56 }
  0xe1   : > { %v5152_v9 = vpop.permute.xlu0 %968  ;;  %v5194_v61 = vcombine.high %v5159_v38, %v6229_v56  ;;  %v2769_v10 = vpack.i.b16 %v2331_v59, %v2297_v21  ;;  %v5197_v35 = vpack.i.b16 %v2831_v4, %v2830_v48  ;;  %v2776_v43 = vshrl.u32 %v5162_v62, 16 }
  0xe2   : > { %3123 = vrot.lane.b32.xlu1 %v3894_v6, %s4024_s30  ;;  %v2777_v18 = vshrl.u32 %v5159_v38, 16  ;;  %v3838_v63 = vcombine.low %v4663_v40, %v2742_v37  ;;  %v1685_v24 = vcombine.high %v5112_v17, %v6229_v56  ;;  %v2771_v48 = vshrl.u32 %v2331_v59, 16  ;;  %v3988_v6 = vld [vmem:[%s4113_s24 + $0xc] sm:$0xf] }
  0xe3   : > { %2941 = vrot.lane.b32.xlu0 %v3854_v52, %s4024_s30  ;;  %v3864_v52 = vcombine.low %v5156_v53, %v5156_v53  ;;  %v1670_v53 = vcombine.high %v5066_v31, %v5046_v2  ;;  %v2775_v2 = vpack.i.b16 %v5159_v38, %v5162_v62  ;;  %v5217_v31 = vrot.slane %v1704_v5, %v4362_v58 }
  0xe4   : > { %v981_v26 = vpop.permute.xlu1 %980  ;;  %v2770_v40 = vshrl.u32 %v2297_v21, 16  ;;  %v2782_v37 = vshrl.u32 %v5190_v0, 16  ;;  %v2783_v27 = vshrl.u32 %v5194_v61, 16  ;;  %v2129_v38 = vcombine.low %v5094_v51, %v5152_v9 }
  0xe5   : > { %v977_v32 = vpop.permute.xlu0 %976  ;;  %v2171_v4 = vcombine.low %v5114_v15, %v981_v26  ;;  %v2103_v15 = vcombine.low %v4973_v39, %v5048_v33  ;;  %v5232_v62 = vrot.slane %v1670_v53, %v4362_v58  ;;  %v6240_v59 = vpack.i.b16 %v4584_v44, %v4577_v57 }
  0xe6   : > { %3049 = vrot.lane.b32.xlu1 %v3878_v25, %s4021_s27  ;;  %v2137_v30 = vcombine.low %v5118_v8, %v977_v32  ;;  %v2069_v32 = vcombine.low %v4986_v23, %v5054_v12  ;;  %v2163_v8 = vcombine.low %v5092_v28, %v5146_v11  ;;  %v5239_v26 = vpack.i.b16 %v2777_v18, %v2776_v43 }
  0xe7   : > { %2965 = vrot.lane.b32.xlu0 %v3859_v22, %s4025_s12  ;;  %v1719_v22 = vcombine.high %v5109_v42, %v6229_v56  ;;  %v3883_v39 = vcombine.low %v6240_v59, %v2769_v10  ;;  %v2095_v23 = vcombine.low %v4934_v7, %v5016_v3  ;;  %v2061_v12 = vcombine.low %v4945_v14, %v5022_v49 }
  0xe8   : > { %v5203_v16 = vpop.permute.xlu1 %906  ;;  %v5246_v28 = vrot.slane %v2171_v4, %v4205_v46  ;;  %v5249_v51 = vrot.slane %v2137_v30, %v4205_v46  ;;  %v2772_v57 = vpack.i.b16 %v2771_v48, %v2770_v40  ;;  %v2781_v44 = vpack.i.b16 %v5194_v61, %v5190_v0 }
  0xe9   : > { %v5212_v25 = vpop.permute.xlu0 %902  ;;  %v2745_v33 = vpack.i.b16 %v1719_v22, %v1685_v24  ;;  %v5258_v7 = vcombine.high %v5217_v31, %v6229_v56  ;;  %v5260_v3 = vpack.i.b16 %v2783_v27, %v2782_v37  ;;  %v5263_v14 = vrot.slane %v2103_v15, %v4205_v46  ;;  %v3991_v15 = vld [vmem:[%s4113_s24 + $0x54] sm:$0xf] }
  0xea   : > { %2867 = vrot.lane.b32.xlu1 %v3838_v63, %s4021_s27  ;;  %v5266_v49 = vrot.slane %v2069_v32, %v4205_v46  ;;  %v5269_v9 = vrot.slane %v2163_v8, %v4205_v46  ;;  %v6241_v27 = vpack.i.b16 %v4697_v45, %v4693_v54  ;;  %v2746_v61 = vshrl.u32 %v1685_v24, 16  ;;  %v6245_v8 = vld [vmem:[#allocation20_spill] sm:$0xff] }
  0xeb   : > { %3147 = vrot.lane.b32.xlu0 %v3899_v29, %s4025_s12  ;;  %v5272_v29 = vrot.slane %v2129_v38, %v4205_v46  ;;  %v2747_v10 = vshrl.u32 %v1719_v22, 16  ;;  %v5282_v43 = vcombine.high %v5232_v62, %v6229_v56  ;;  %v5285_v18 = vrot.slane %v2095_v23, %v4205_v46 }
  0xec   : > { %v5234_v21 = vpop.permute.xlu1 %914  ;;  %v3843_v0 = vcombine.low %v6241_v27, %v2745_v33  ;;  %v5288_v53 = vrot.slane %v2061_v12, %v4205_v46  ;;  %v3869_v45 = vcombine.low %v5178_v19, %v5178_v19  ;;  %v3909_v24 = vcombine.low %v5197_v35, %v5197_v35  ;;  %v6242_v19 = vld [vmem:[#allocation14_spill] sm:$0xff]  ;;  %v6244_v35 = vld [vmem:[#allocation12_spill] sm:$0xff] }
  0xed   : > { %v5251_v11 = vpop.permute.xlu0 %910  ;;  %v2145_v63 = vcombine.low %v5272_v29, %v5249_v51  ;;  %v2752_v22 = vshrl.u32 %v5232_v62, 16  ;;  %v2753_v4 = vshrl.u32 %v5217_v31, 16  ;;  %v2111_v30 = vcombine.low %v5285_v18, %v5263_v14 }
  0xee   : > { %3073 = vrot.lane.b32.xlu1 %v3883_v39, %s4022_s28  ;;  %v2077_v48 = vcombine.low %v5288_v53, %v5266_v49  ;;  %v6243_v40 = vpack.i.b16 %v4530_v20, %v6242_v19  ;;  %v3888_v38 = vcombine.low %v6245_v8, %v2772_v57  ;;  %v2748_v59 = vpack.i.b16 %v2747_v10, %v2746_v61 }
  0xef   : > { %2989 = vrot.lane.b32.xlu0 %v3864_v52, %s4026_s13  ;;  %v2179_v52 = vcombine.low %v5269_v9, %v5246_v28  ;;  %v2758_v39 = vshrl.u32 %v5282_v43, 16  ;;  %v2759_v33 = vshrl.u32 %v5258_v7, 16  ;;  %v5325_v50 = vrot.slane %v2145_v63, %v4362_v58 }
  0xf0   : > { %v5275_v5 = vpop.permute.xlu1 %922  ;;  %v5314_v37 = vcombine.low %v6243_v40, %v2775_v2  ;;  %v6247_v2 = vld [vmem:[#allocation24_spill] sm:$0xff]  ;;  %v2751_v61 = vpack.i.b16 %v5217_v31, %v5232_v62  ;;  %v5337_v10 = vpack.i.b16 %v2753_v4, %v2752_v22  ;;  %v2763_v63 = vpack.i.b16 %v5083_v60, %v5086_v41  ;;  %v6250_v62 = vld [vmem:[#allocation30_spill] sm:$0xff]  ;;  %v6251_v4 = vld [vmem:[#allocation17_spill] sm:$0xff] }
  0xf1   : > { %v5294_v54 = vpop.permute.xlu0 %918  ;;  %v5322_v23 = vrot.slane %v2179_v52, %v4362_v58  ;;  %v2757_v52 = vpack.i.b16 %v5258_v7, %v5282_v43  ;;  %v5347_v19 = vrot.slane %v2077_v48, %v4362_v58  ;;  %v3848_v7 = vcombine.low %v6250_v62, %v2748_v59  ;;  %v3976_v41 = vld [vmem:[%s4113_s24 + $0x4] sm:$0xf]  ;;  %v3977_v43 = vld [vmem:[%s4113_s24 + $0x34] sm:$0xf]  ;;  %v3981_v62 = vld [vmem:[%s4113_s24 + $0x40] sm:$0xf] }
  0xf2   : > { %2891 = vrot.lane.b32.xlu1 %v3843_v0, %s4022_s28  ;;  %v6249_v0 = vld [vmem:[#allocation26_spill] sm:$0xff]  ;;  %v5355_v60 = vpack.i.b16 %v2759_v33, %v2758_v39  ;;  %v1789_v22 = vcombine.low %v3976_v41, %v3977_v43  ;;  %v2112_v39 = vcombine.high %v5285_v18, %v5263_v14  ;;  %v2078_v33 = vcombine.high %v5288_v53, %v5266_v49  ;;  %v6255_v53 = vld [vmem:[#allocation11_spill] sm:$0xff] }
  0xf3   : > { %3171 = vrot.lane.b32.xlu0 %v3904_v55, %s4026_s13  ;;  %v6246_v55 = vld [vmem:[#allocation25_spill] sm:$0xff]  ;;  %v2669_v59 = vshrl.u32 %v5322_v23, 16  ;;  %v2620_v14 = vshrl.u32 %v5347_v19, 16  ;;  %v6260_v41 = vld [vmem:[#allocation15_spill] sm:$0xff] }
  0xf4   : > { %v931_v32 = vpop.permute.xlu1 %930  ;;  %v6248_v12 = vpack.i.b16 %v6246_v55, %v6247_v2  ;;  %v6256_v2 = vld [vmem:[#allocation10_spill] sm:$0xff] }
  0xf5   : > { %v927_v20 = vpop.permute.xlu0 %926  ;;  %v1491_v40 = vcombine.low %v5234_v21, %v931_v32 }
  0xf6   : > { %v5330_v27 = vcombine.low %v6248_v12, %v2781_v44  ;;  %3097 = vrot.lane.b32.xlu1 %v3888_v38, %s4023_s29  ;;  %v5344_v44 = vrot.slane %v2111_v30, %v4362_v58  ;;  %v1457_v8 = vcombine.low %v5251_v11, %v927_v20  ;;  %v6252_v30 = vld [vmem:[#allocation13_spill] sm:$0xff]  ;;  %v1483_v11 = vcombine.low %v5203_v16, %v5275_v5  ;;  %v3979_v5 = vld [vmem:[%s4113_s24 + $0x4c] sm:$0xf] }
  0xf7   : > { %3013 = vrot.lane.b32.xlu0 %v3869_v45, %s4027_s14  ;;  %v6253_v48 = vpack.i.b16 %v6251_v4, %v6252_v30  ;;  %v1449_v45 = vcombine.low %v5212_v25, %v5294_v54  ;;  %v2668_v38 = vshrl.u32 %v5325_v50, 16  ;;  %v3978_v16 = vld [vmem:[%s4113_s24 + $0x1c] sm:$0xf]  ;;  %v2739_v25 = vpack.i.b16 %v5109_v42, %v5112_v17  ;;  %v3990_v17 = vld [vmem:[%s4113_s24 + $0x24] sm:$0xf] }
  0xf8   : > { %v5352_v31 = vpop.permute.xlu1 %954  ;;  %v1797_v20 = vcombine.low %v3978_v16, %v3979_v5  ;;  %v5382_v54 = vrot.slane %v1491_v40, %v4205_v46  ;;  %v5385_v55 = vrot.slane %v1457_v8, %v4205_v46  ;;  %v2621_v49 = vshrl.u32 %v5344_v44, 16  ;;  %v6258_v42 = vld [vmem:[#allocation29_spill] sm:$0xff]  ;;  %v3980_v40 = vld [vmem:[%s4113_s24 + $0x10] sm:$0xf]  ;;  %v6259_v8 = vld [vmem:[#allocation18_spill] sm:$0xff] }
  0xf9   : > { %v5362_v21 = vcombine.low %v6253_v48, %v2763_v63  ;;  %v5368_v32 = vpop.permute.xlu0 %950  ;;  %v6257_v12 = vpack.i.b16 %v6255_v53, %v6256_v2  ;;  %v6261_v43 = vpack.i.b16 %v6259_v8, %v6260_v41  ;;  %v5405_v4 = vrot.slane %v1483_v11, %v4205_v46  ;;  %v6263_v16 = vld [vmem:[#allocation28_spill] sm:$0xff]  ;;  %v6264_v5 = vld [vmem:[#allocation27_spill] sm:$0xff]  ;;  %v3983_v8 = vld [vmem:[%s4113_s24 + $0x58] sm:$0xf] }
  0xfa   : > { %2915 = vrot.lane.b32.xlu1 %v3848_v7, %s4023_s29  ;;  %v1823_v7 = vcombine.low %v3980_v40, %v3981_v62  ;;  %v5408_v30 = vrot.slane %v1449_v45, %v4205_v46  ;;  %v6265_v53 = vpack.i.b16 %v6263_v16, %v6264_v5  ;;  %v5421_v11 = vrot.slane %v2078_v33, %v4362_v58  ;;  %v6266_v45 = vld [vmem:[#allocation31_spill] sm:$0xff]  ;;  %v3986_v16 = vld [vmem:[%s4113_s24 + $0x18] sm:$0xf] }
  0xfb   : > { %6254 = vst [vmem:[#allocation14_spill] sm:$0xff] %v5362_v21  ;;  %3195 = vrot.lane.b32.xlu0 %v3909_v24, %s4027_s14  ;;  %v3853_v63 = vcombine.low %v6257_v12, %v2751_v61  ;;  %v5402_v24 = vcombine.low %v6261_v43, %v2739_v25  ;;  %v2670_v61 = vpack.i.b16 %v2669_v59, %v2668_v38  ;;  %v3982_v62 = vld [vmem:[%s4113_s24 + $0x28] sm:$0xf]  ;;  %v3989_v25 = vld [vmem:[%s4113_s24 + $0x3c] sm:$0xf] }
  0xfc   : > { %v5390_v18 = vpop.permute.xlu1 %962  ;;  %v5415_v2 = vcombine.low %v6265_v53, %v2757_v52  ;;  %v5418_v12 = vrot.slane %v2112_v39, %v4362_v58  ;;  %v5427_v38 = vrot.slane %v1789_v22, %v4205_v46  ;;  %v1499_v52 = vcombine.low %v5405_v4, %v5382_v54  ;;  %v3987_v5 = vld [vmem:[%s4113_s24 + $0x48] sm:$0xf] }
  0xfd   : > { %6262 = vst [vmem:[#allocation12_spill] sm:$0xff] %v5402_v24  ;;  %v5410_v48 = vpop.permute.xlu0 %958  ;;  %v1465_v59 = vcombine.low %v5408_v30, %v5385_v55  ;;  %v2622_v39 = vpack.i.b16 %v2621_v49, %v2620_v14  ;;  %v5436_v33 = vrot.slane %v1797_v20, %v4205_v46  ;;  %v5440_v22 = vcombine.high %v5344_v44, %v6229_v56  ;;  %v3985_v14 = vld [vmem:[%s4113_s24 + $0x30] sm:$0xf] }
  0xfe   : > { %2939 = vrot.lane.b32.xlu1 %v3853_v63, %s4024_s30  ;;  %v5443_v40 = vrot.slane %v1823_v7, %v4205_v46  ;;  %v1831_v41 = vcombine.low %v3982_v62, %v3983_v8  ;;  %v1185_v53 = vcombine.low %v3986_v16, %v3987_v5  ;;  %v1211_v57 = vcombine.low %v3988_v6, %v3989_v25 }
  0xff   : > { %3121 = vrot.lane.b32.xlu0 %v5314_v37, %s4024_s30  ;;  %v3984_v37 = vld [vmem:[%s4113_s24] sm:$0xf]  ;;  %v3877_v20 = vcombine.low %v2622_v39, %v2670_v61  ;;  %v1219_v24 = vcombine.low %v3990_v17, %v3991_v15  ;;  %v6268_v7 = vcombine.low %v6244_v35, %v5239_v26  ;;  %v5461_v62 = vcombine.high %v5347_v19, %v6229_v56  ;;  %s3925_s24 = sshll.u32 %s6312_s17, 3 }
 0x100   : > { %v971_v63 = vpop.permute.xlu1 %970  ;;  %6267 = vst [vmem:[#allocation20_spill] sm:$0xff] %v5443_v40  ;;  %v1177_v49 = vcombine.low %v3984_v37, %v3985_v14  ;;  %v2632_v61 = vshrl.u32 %v5421_v11, 16  ;;  %v2633_v39 = vshrl.u32 %v5418_v12, 16  ;;  %v5467_v8 = vcombine.high %v5418_v12, %v6229_v56 }
 0x101   : > { %v967_v43 = vpop.permute.xlu0 %966  ;;  %v5470_v6 = vrot.slane %v1499_v52, %v4362_v58  ;;  %v5473_v15 = vrot.slane %v1465_v59, %v4362_v58  ;;  %v1551_v26 = vcombine.low %v5352_v31, %v971_v63  ;;  %v5479_v35 = vcombine.high %v5421_v11, %v6229_v56 }
 0x102   : > { %3145 = vrot.lane.b32.xlu1 %v6268_v7, %s4025_s12  ;;  %v1517_v17 = vcombine.low %v5368_v32, %v967_v43  ;;  %v2627_v37 = vshrl.u32 %v5440_v22, 16  ;;  %v5484_v14 = vrot.slane %v1831_v41, %v4205_v46  ;;  %v5487_v52 = vrot.slane %v1177_v49, %v4205_v46 }
 0x103   : > { %3047 = vrot.lane.b32.xlu0 %v3877_v20, %s4021_s27  ;;  %v5491_v63 = vrot.slane %v1185_v53, %v4205_v46  ;;  %v5494_v20 = vrot.slane %v1211_v57, %v4205_v46  ;;  %v5497_v32 = vrot.slane %v1219_v24, %v4205_v46  ;;  %v2180_v43 = vcombine.high %v5269_v9, %v5246_v28 }
 0x104   : > { %v979_v25 = vpop.permute.xlu1 %978  ;;  %v2146_v41 = vcombine.high %v5272_v29, %v5249_v51  ;;  %v2619_v57 = vpack.i.b16 %v5344_v44, %v5347_v19  ;;  %v1558_v16 = vrot.slane %v1551_v26, %v4205_v46  ;;  %v2667_v28 = vpack.i.b16 %v5322_v23, %v5325_v50 }
 0x105   : > { %v1559_v59 = vcombine.low %v5390_v18, %v979_v25  ;;  %v975_v31 = vpop.permute.xlu0 %974  ;;  %v6269_v18 = vcombine.low %v6258_v42, %v5337_v10  ;;  %v1524_v9 = vrot.slane %v1517_v17, %v4205_v46  ;;  %v2625_v10 = vpack.i.b16 %v5440_v22, %v5461_v62 }
 0x106   : > { %v1525_v49 = vcombine.low %v5410_v48, %v975_v31  ;;  %v1805_v44 = vcombine.low %v5427_v38, %v5436_v33  ;;  %v5526_v5 = vpack.i.b16 %v2633_v39, %v2632_v61  ;;  %v2626_v53 = vshrl.u32 %v5461_v62, 16 }
 0x107   : > { %2963 = vrot.lane.b32.xlu1 %v6269_v18, %s4025_s12  ;;  %v1566_v24 = vrot.slane %v1559_v59, %v4205_v46  ;;  %v1839_v7 = vcombine.low %v5443_v40, %v5484_v14  ;;  %v5532_v26 = vrot.slane %v2180_v43, %v4362_v58  ;;  %v5535_v17 = vrot.slane %v2146_v41, %v4362_v58 }
 0x108   : > { %v1532_v29 = vrot.slane %v1525_v49, %v4205_v46  ;;  %v5518_v48 = vpop.permute.xlu1 %649  ;;  %v1193_v25 = vcombine.low %v5487_v52, %v5491_v63  ;;  %v2597_v62 = vshrl.u32 %v5470_v6, 16  ;;  %v1227_v39 = vcombine.low %v5494_v20, %v5497_v32 }
 0x109   : > { %v1567_v19 = vcombine.low %v1558_v16, %v1566_v24  ;;  %v5524_v42 = vpop.permute.xlu0 %645  ;;  %v5545_v59 = vcombine.low %v2619_v57, %v2667_v28  ;;  %v1568_v31 = vcombine.high %v1558_v16, %v1566_v24  ;;  %v2596_v18 = vshrl.u32 %v5473_v15, 16 }
 0x10a   : > { %v1533_v22 = vcombine.low %v1524_v9, %v1532_v29  ;;  %v1534_v43 = vcombine.high %v1524_v9, %v1532_v29  ;;  %v2195_v40 = vcombine.high %v5322_v23, %v6229_v56  ;;  %v1466_v57 = vcombine.high %v5408_v30, %v5385_v55 }
 0x10b   : > { %3169 = vrot.lane.b32.xlu1 %v5330_v27, %s4026_s13  ;;  %v1575_v61 = vrot.slane %v1567_v19, %v4362_v58  ;;  %6270 = vst [vmem:[#allocation25_spill] sm:$0xff] %v5545_v59  ;;  %v1500_v27 = vcombine.high %v5405_v4, %v5382_v54  ;;  %v2161_v19 = vcombine.high %v5325_v50, %v6229_v56  ;;  %v2680_v54 = vshrl.u32 %v5535_v17, 16  ;;  %v6278_v59 = vld [vmem:[#allocation21_spill] sm:$0xff] }
 0x10c   : > { %v1541_v41 = vrot.slane %v1533_v22, %v4362_v58  ;;  %v658_v49 = vpop.permute.xlu1 %657  ;;  %v5559_v24 = vpack.i.b16 %v2627_v37, %v2626_v53  ;;  %v5562_v28 = vrot.slane %v1805_v44, %v4362_v58  ;;  %v2681_v4 = vshrl.u32 %v5532_v26, 16 }
 0x10d   : > { %v654_v51 = vpop.permute.xlu0 %653  ;;  %v2645_v21 = vshrl.u32 %v1575_v61, 16  ;;  %v5567_v50 = vrot.slane %v1839_v7, %v4362_v58  ;;  %v5570_v23 = vrot.slane %v1193_v25, %v4362_v58  ;;  %v5573_v55 = vrot.slane %v1568_v31, %v4362_v58 }
 0x10e   : > { %v2644_v16 = vshrl.u32 %v1541_v41, 16  ;;  %v5576_v30 = vrot.slane %v1534_v43, %v4362_v58  ;;  %v2598_v37 = vpack.i.b16 %v2597_v62, %v2596_v18  ;;  %v5579_v29 = vrot.slane %v1500_v27, %v4362_v58 }
 0x10f   : > { %2987 = vrot.lane.b32.xlu1 %v5415_v2, %s4026_s13  ;;  %v2673_v53 = vpack.i.b16 %v2195_v40, %v2161_v19  ;;  %v2675_v22 = vshrl.u32 %v2195_v40, 16  ;;  %v5582_v7 = vrot.slane %v1227_v39, %v4362_v58  ;;  %v5585_v25 = vrot.slane %v1466_v57, %v4362_v58 }
 0x110   : > { %v666_v2 = vpop.permute.xlu1 %665  ;;  %v2646_v9 = vpack.i.b16 %v2645_v21, %v2644_v16  ;;  %v6271_v31 = vcombine.low %v6249_v0, %v5260_v3  ;;  %v1549_v21 = vcombine.high %v1541_v41, %v6229_v56  ;;  %v1583_v62 = vcombine.high %v1575_v61, %v6229_v56 }
 0x111   : > { %v662_v44 = vpop.permute.xlu0 %661  ;;  %v1959_v18 = vcombine.low %v5518_v48, %v666_v2  ;;  %v5596_v40 = vcombine.high %v5473_v15, %v6229_v56  ;;  %v5600_v39 = vcombine.high %v5470_v6, %v6229_v56  ;;  %v2682_v27 = vpack.i.b16 %v2681_v4, %v2680_v54  ;;  %v6279_v48 = vld [vmem:[#allocation23_spill] sm:$0xff] }
 0x112   : > { %v3837_v43 = vcombine.low %v2598_v37, %v2646_v9  ;;  %v1925_v57 = vcombine.low %v5524_v42, %v662_v44  ;;  %v2655_v0 = vpack.i.b16 %v5573_v55, %v5576_v30  ;;  %v2643_v16 = vpack.i.b16 %v1575_v61, %v1541_v41 }
 0x113   : > { %3193 = vrot.lane.b32.xlu1 %v6271_v31, %s4027_s14  ;;  %v3882_v9 = vcombine.low %v2625_v10, %v2673_v53  ;;  %v2674_v31 = vshrl.u32 %v2161_v19, 16  ;;  %v6272_v42 = vcombine.low %v6266_v45, %v5355_v60  ;;  %v2607_v4 = vpack.i.b16 %v5579_v29, %v5585_v25 }
 0x114   : > { %2865 = vrot.lane.b32.xlu0 %v3837_v43, %s4021_s27  ;;  %v674_v3 = vpop.permute.xlu1 %673  ;;  %v2649_v61 = vpack.i.b16 %v1583_v62, %v1549_v21  ;;  %v6273_v41 = vpack.i.b16 %v5470_v6, %v5473_v15  ;;  %v5622_v10 = vrot.slane %v1959_v18, %v4205_v46  ;;  %v2657_v60 = vshrl.u32 %v5573_v55, 16 }
 0x115   : > { %v1967_v2 = vcombine.low %v658_v49, %v674_v3  ;;  %v670_v37 = vpop.permute.xlu0 %669  ;;  %v5631_v45 = vrot.slane %v1925_v57, %v4205_v46  ;;  %v3852_v15 = vcombine.low %v2607_v4, %v2655_v0  ;;  %v2656_v53 = vshrl.u32 %v5576_v30, 16 }
 0x116   : > { %v1933_v54 = vcombine.low %v654_v51, %v670_v37  ;;  %v5619_v49 = vcombine.low %v6273_v41, %v2643_v16  ;;  %v2601_v51 = vpack.i.b16 %v5600_v39, %v5596_v40  ;;  %v2676_v3 = vpack.i.b16 %v2675_v22, %v2674_v31 }
 0x117   : > { %3011 = vrot.lane.b32.xlu1 %v6272_v42, %s4027_s14  ;;  %v5625_v19 = vrot.slane %v1967_v2, %v4205_v46  ;;  %v2608_v16 = vshrl.u32 %v5585_v25, 16  ;;  %v2609_v57 = vshrl.u32 %v5579_v29, 16  ;;  %v2651_v0 = vshrl.u32 %v1583_v62, 16 }
 0x118   : > { %6274 = vst [vmem:[#allocation24_spill] sm:$0xff] %v5619_v49  ;;  %v5634_v44 = vrot.slane %v1933_v54, %v4205_v46  ;;  %3071 = vrot.lane.b32.xlu0 %v3882_v9, %s4022_s28  ;;  %v5637_v6 = vpop.permute.xlu1 %647  ;;  %v3842_v37 = vcombine.low %v2601_v51, %v2649_v61  ;;  %v2650_v9 = vshrl.u32 %v1549_v21, 16  ;;  %v3897_v42 = vcombine.low %v5526_v5, %v2682_v27  ;;  %v6275_v51 = vld [vmem:[#allocation19_spill] sm:$0xff]  ;;  %v6276_v5 = vld [vmem:[#allocation22_spill] sm:$0xff] }
 0x119   : > { %v1975_v43 = vcombine.low %v5622_v10, %v5625_v19  ;;  %v5642_v18 = vpop.permute.xlu0 %643  ;;  %v2162_v22 = vcombine.high %v5535_v17, %v6229_v56  ;;  %v2196_v31 = vcombine.high %v5532_v26, %v6229_v56  ;;  %v2658_v61 = vpack.i.b16 %v2657_v60, %v2656_v53 }
 0x11a   : > { %v1941_v2 = vcombine.low %v5631_v45, %v5634_v44  ;;  %v2602_v21 = vshrl.u32 %v5596_v40, 16  ;;  %v2603_v62 = vshrl.u32 %v5600_v39, 16  ;;  %v6277_v27 = vcombine.low %v6275_v51, %v6276_v5 }
 0x11b   : > { %2937 = vrot.lane.b32.xlu1 %v3852_v15, %s4024_s30  ;;  %v5650_v54 = vrot.slane %v1975_v43, %v4362_v58  ;;  %v3887_v60 = vcombine.low %v5559_v24, %v2676_v3  ;;  %v2610_v40 = vpack.i.b16 %v2609_v57, %v2608_v16  ;;  %v2652_v53 = vpack.i.b16 %v2651_v0, %v2650_v9 }
 0x11c   : > { %v5658_v4 = vrot.slane %v1941_v2, %v4362_v58  ;;  %2889 = vrot.lane.b32.xlu0 %v3842_v37, %s4022_s28  ;;  %v656_v41 = vpop.permute.xlu1 %655  ;;  %v5667_v15 = vrot.slane %v6277_v27, %v4362_v58  ;;  %v6280_v2 = vcombine.low %v6278_v59, %v6279_v48  ;;  %v2637_v39 = vpack.i.b16 %v5467_v8, %v5479_v35 }
 0x11d   : > { %v652_v43 = vpop.permute.xlu0 %651  ;;  %v2685_v37 = vpack.i.b16 %v2196_v31, %v2162_v22  ;;  %v6281_v51 = vshrl.u32 %v5143_v36, 16  ;;  %v6282_v5 = vshrl.u32 %v5130_v47, 16  ;;  %v2604_v24 = vpack.i.b16 %v2603_v62, %v2602_v21 }
 0x11e   : > { %v5673_v49 = vrot.slane %v6280_v2, %v4362_v58  ;;  %v1550_v3 = vcombine.high %v5576_v30, %v6229_v56  ;;  %v1584_v16 = vcombine.high %v5573_v55, %v6229_v56  ;;  %v2679_v9 = vpack.i.b16 %v5532_v26, %v5535_v17 }
 0x11f   : > { %3143 = vrot.lane.b32.xlu1 %v3897_v42, %s4025_s12  ;;  %v5683_v27 = vpack.i.b16 %v6282_v5, %v6281_v51  ;;  %v3857_v42 = vcombine.low %v2610_v40, %v2658_v61  ;;  %v5696_v0 = vcombine.high %v5579_v29, %v6229_v56  ;;  %v2686_v2 = vshrl.u32 %v2162_v22, 16 }
 0x120   : > { %3095 = vrot.lane.b32.xlu0 %v3887_v60, %s4023_s29  ;;  %v664_v48 = vpop.permute.xlu1 %663  ;;  %v2687_v51 = vshrl.u32 %v2196_v31, 16  ;;  %v2524_v60 = vshrl.u32 %v5658_v4, 16  ;;  %v3847_v61 = vcombine.low %v2604_v24, %v2652_v53  ;;  %v1482_v30 = vcombine.high %v5585_v25, %v6229_v56 }
 0x121   : > { %v660_v57 = vpop.permute.xlu0 %659  ;;  %v2525_v55 = vshrl.u32 %v5650_v54, 16  ;;  %v1347_v21 = vcombine.low %v5637_v6, %v664_v48  ;;  %v2631_v26 = vpack.i.b16 %v5418_v12, %v5421_v11  ;;  %v2548_v17 = vshrl.u32 %v5673_v49, 16 }
 0x122   : > { %v2549_v29 = vshrl.u32 %v5667_v15, 16  ;;  %v1313_v22 = vcombine.low %v5642_v18, %v660_v57  ;;  %v3902_v62 = vcombine.low %v2637_v39, %v2685_v37  ;;  %v2661_v40 = vpack.i.b16 %v1584_v16, %v1550_v3 }
 0x123   : > { %2961 = vrot.lane.b32.xlu1 %v3857_v42, %s4025_s12  ;;  %v2639_v25 = vshrl.u32 %v5467_v8, 16  ;;  %v3892_v42 = vcombine.low %v2631_v26, %v2679_v9  ;;  %v2638_v6 = vshrl.u32 %v5479_v35, 16  ;;  %v2688_v48 = vpack.i.b16 %v2687_v51, %v2686_v2 }
 0x124   : > { %2913 = vrot.lane.b32.xlu0 %v3847_v61, %s4023_s29  ;;  %v672_v31 = vpop.permute.xlu1 %671  ;;  %v2613_v11 = vpack.i.b16 %v5696_v0, %v1482_v30  ;;  %v2526_v24 = vpack.i.b16 %v2525_v55, %v2524_v60  ;;  %v2663_v18 = vshrl.u32 %v1584_v16, 16  ;;  %v1976_v57 = vcombine.high %v5622_v10, %v5625_v19 }
 0x125   : > { %v1355_v53 = vcombine.low %v656_v41, %v672_v31  ;;  %v668_v5 = vpop.permute.xlu0 %667  ;;  %v1942_v39 = vcombine.high %v5631_v45, %v5634_v44  ;;  %v1354_v8 = vrot.slane %v1347_v21, %v4205_v46  ;;  %v1320_v35 = vrot.slane %v1313_v22, %v4205_v46 }
 0x126   : > { %v1321_v12 = vcombine.low %v652_v43, %v668_v5  ;;  %v3862_v9 = vcombine.low %v2613_v11, %v2661_v40  ;;  %v2662_v16 = vshrl.u32 %v1550_v3, 16  ;;  %v2640_v19 = vpack.i.b16 %v2639_v25, %v2638_v6 }
 0x127   : > { %3167 = vrot.lane.b32.xlu1 %v3902_v62, %s4026_s13  ;;  %v1362_v41 = vrot.slane %v1355_v53, %v4205_v46  ;;  %v2615_v45 = vshrl.u32 %v5696_v0, 16  ;;  %v3876_v61 = vcombine.low %v2526_v24, %v5683_v27  ;;  %v2614_v55 = vshrl.u32 %v1482_v30, 16 }
 0x128   : > { %v1328_v43 = vrot.slane %v1321_v12, %v4205_v46  ;;  %3119 = vrot.lane.b32.xlu0 %v3892_v42, %s4024_s30  ;;  %v5723_v37 = vpop.permute.xlu1 %601  ;;  %v5731_v21 = vrot.slane %v1976_v57, %v4362_v58  ;;  %v5734_v26 = vrot.slane %v1942_v39, %v4362_v58  ;;  %v3907_v22 = vcombine.low %v2640_v19, %v2688_v48 }
 0x129   : > { %v1363_v2 = vcombine.low %v1354_v8, %v1362_v41  ;;  %v1364_v51 = vcombine.high %v1354_v8, %v1362_v41  ;;  %v5725_v10 = vpop.permute.xlu0 %597  ;;  %v2664_v30 = vpack.i.b16 %v2663_v18, %v2662_v16  ;;  %v2550_v53 = vpack.i.b16 %v2549_v29, %v2548_v17 }
 0x12a   : > { %v1329_v44 = vcombine.low %v1320_v35, %v1328_v43  ;;  %v1330_v60 = vcombine.high %v1320_v35, %v1328_v43  ;;  %v2025_v5 = vcombine.high %v5143_v36, %v6229_v56  ;;  %v2059_v42 = vcombine.high %v5130_v47, %v6229_v56 }
 0x12b   : > { %2985 = vrot.lane.b32.xlu1 %v3862_v9, %s4026_s13  ;;  %v5737_v3 = vrot.slane %v1363_v2, %v4362_v58  ;;  %v5740_v31 = vrot.slane %v1364_v51, %v4362_v58  ;;  %v1957_v6 = vcombine.high %v5658_v4, %v6229_v56  ;;  %v2616_v12 = vpack.i.b16 %v2615_v45, %v2614_v55 }
 0x12c   : > { %v5743_v0 = vrot.slane %v1329_v44, %v4362_v58  ;;  %v5746_v62 = vrot.slane %v1330_v60, %v4362_v58  ;;  %3045 = vrot.lane.b32.xlu0 %v3876_v61, %s4021_s27  ;;  %v610_v27 = vpop.permute.xlu1 %609  ;;  %v1991_v11 = vcombine.high %v5650_v54, %v6229_v56  ;;  %v2536_v24 = vshrl.u32 %v5734_v26, 16 }
 0x12d   : > { %v2501_v40 = vshrl.u32 %v5737_v3, 16  ;;  %v606_v25 = vpop.permute.xlu0 %605  ;;  %v2537_v17 = vshrl.u32 %v5731_v21, 16  ;;  %v3867_v57 = vcombine.low %v2616_v12, %v2664_v30  ;;  %v1413_v41 = vcombine.high %v5673_v49, %v6229_v56 }
 0x12e   : > { %v2500_v48 = vshrl.u32 %v5743_v0, 16  ;;  %v2499_v29 = vpack.i.b16 %v5737_v3, %v5743_v0  ;;  %v2511_v8 = vpack.i.b16 %v5740_v31, %v5746_v62  ;;  %v2577_v43 = vpack.i.b16 %v2059_v42, %v2025_v5 }
 0x12f   : > { %3191 = vrot.lane.b32.xlu1 %v3907_v22, %s4027_s14  ;;  %v1447_v9 = vcombine.high %v5667_v15, %v6229_v56  ;;  %v2578_v16 = vshrl.u32 %v2025_v5, 16  ;;  %v2579_v2 = vshrl.u32 %v2059_v42, 16  ;;  %v1379_v51 = vcombine.high %v5737_v3, %v6229_v56  ;;  %v6283_v5 = vld [vmem:[#allocation4_spill] sm:$0xff] }
 0x130   : > { %v618_v18 = vpop.permute.xlu1 %617  ;;  %v2502_v39 = vpack.i.b16 %v2501_v40, %v2500_v48  ;;  %v1345_v19 = vcombine.high %v5743_v0, %v6229_v56  ;;  %v2529_v44 = vpack.i.b16 %v1991_v11, %v1957_v6  ;;  %v2538_v61 = vpack.i.b16 %v2537_v17, %v2536_v24 }
 0x131   : > { %v614_v35 = vpop.permute.xlu0 %613  ;;  %v1891_v60 = vcombine.low %v5723_v37, %v618_v18  ;;  %v2513_v55 = vshrl.u32 %v5740_v31, 16  ;;  %v2512_v22 = vshrl.u32 %v5746_v62, 16  ;;  %v6284_v42 = vpack.i.b16 %v4878_v34, %v6283_v5 }
 0x132   : > { %v3836_v45 = vcombine.low %v2502_v39, %v2550_v53  ;;  %v1857_v30 = vcombine.low %v5725_v10, %v614_v35  ;;  %v2553_v53 = vpack.i.b16 %v1447_v9, %v1413_v41  ;;  %v2530_v39 = vshrl.u32 %v1957_v6, 16 }
 0x133   : > { %3009 = vrot.lane.b32.xlu1 %v3867_v57, %s4027_s14  ;;  %v3851_v48 = vcombine.low %v2511_v8, %v6284_v42  ;;  %v2531_v59 = vshrl.u32 %v1991_v11, 16  ;;  %v3881_v24 = vcombine.low %v2529_v44, %v2577_v43  ;;  %v2505_v17 = vpack.i.b16 %v1379_v51, %v1345_v19  ;;  %v6285_v8 = vld [vmem:[#allocation6_spill] sm:$0xff] }
 0x134   : > { %2863 = vrot.lane.b32.xlu0 %v3836_v45, %s4021_s27  ;;  %v626_v40 = vpop.permute.xlu1 %625  ;;  %v2580_v18 = vpack.i.b16 %v2579_v2, %v2578_v16  ;;  %v1958_v10 = vcombine.high %v5734_v26, %v6229_v56  ;;  %v5787_v35 = vrot.slane %v1891_v60, %v4205_v46  ;;  %v5795_v6 = vrot.slane %v1857_v30, %v4205_v46 }
 0x135   : > { %v1899_v12 = vcombine.low %v610_v27, %v626_v40  ;;  %v622_v57 = vpop.permute.xlu0 %621  ;;  %v1992_v27 = vcombine.high %v5731_v21, %v6229_v56  ;;  %v3896_v43 = vcombine.low %v2538_v61, %v6285_v8  ;;  %v2514_v16 = vpack.i.b16 %v2513_v55, %v2512_v22  ;;  %v6286_v22 = vld [vmem:[#allocation9_spill] sm:$0xff]  ;;  %v6288_v8 = vld [vmem:[#allocation8_spill] sm:$0xff] }
 0x136   : > { %v1865_v37 = vcombine.low %v606_v25, %v622_v57  ;;  %v2532_v44 = vpack.i.b16 %v2531_v59, %v2530_v39  ;;  %v2554_v60 = vshrl.u32 %v1413_v41, 16  ;;  %v2555_v40 = vshrl.u32 %v1447_v9, 16 }
 0x137   : > { %2935 = vrot.lane.b32.xlu1 %v3851_v48, %s4024_s30  ;;  %v5790_v34 = vrot.slane %v1899_v12, %v4205_v46  ;;  %v3841_v5 = vcombine.low %v2505_v17, %v2553_v53  ;;  %v2506_v42 = vshrl.u32 %v1345_v19, 16  ;;  %v2507_v48 = vshrl.u32 %v1379_v51, 16  ;;  %v6287_v17 = vld [vmem:[#allocation3_spill] sm:$0xff] }
 0x138   : > { %v5798_v25 = vrot.slane %v1865_v37, %v4205_v46  ;;  %3069 = vrot.lane.b32.xlu0 %v3881_v24, %s4022_s28  ;;  %v600_v11 = vpop.permute.xlu1 %599  ;;  %v2541_v61 = vpack.i.b16 %v1992_v27, %v1958_v10  ;;  %v1380_v55 = vcombine.high %v5740_v31, %v6229_v56  ;;  %v1346_v59 = vcombine.high %v5746_v62, %v6229_v56 }
 0x139   : > { %v1907_v2 = vcombine.low %v5787_v35, %v5790_v34  ;;  %v596_v45 = vpop.permute.xlu0 %595  ;;  %v3856_v57 = vcombine.low %v2514_v16, %v6286_v22  ;;  %v3886_v51 = vcombine.low %v2532_v44, %v2580_v18  ;;  %v2508_v53 = vpack.i.b16 %v2507_v48, %v2506_v42 }
 0x13a   : > { %v1873_v30 = vcombine.low %v5795_v6, %v5798_v25  ;;  %v2556_v39 = vpack.i.b16 %v2555_v40, %v2554_v60  ;;  %v2542_v37 = vshrl.u32 %v1958_v10, 16  ;;  %v2543_v24 = vshrl.u32 %v1992_v27, 16 }
 0x13b   : > { %3141 = vrot.lane.b32.xlu1 %v3896_v43, %s4025_s12  ;;  %v5808_v12 = vrot.slane %v1907_v2, %v4362_v58  ;;  %v6289_v43 = vpack.i.b16 %v6287_v17, %v6288_v8  ;;  %v2429_v18 = vshrl.u32 %v5567_v50, 16  ;;  %v1194_v10 = vcombine.high %v5487_v52, %v5491_v63  ;;  %v6290_v63 = vld [vmem:[#allocation16_spill] sm:$0xff] }
 0x13c   : > { %v5815_v41 = vrot.slane %v1873_v30, %v4362_v58  ;;  %2887 = vrot.lane.b32.xlu0 %v3841_v5, %s4022_s28  ;;  %v608_v9 = vpop.permute.xlu1 %607  ;;  %v2517_v30 = vpack.i.b16 %v1380_v55, %v1346_v59  ;;  %v2428_v5 = vshrl.u32 %v5562_v28, 16  ;;  %v3846_v60 = vcombine.low %v2508_v53, %v2556_v39 }
 0x13d   : > { %v604_v19 = vpop.permute.xlu0 %603  ;;  %v3901_v2 = vcombine.low %v2541_v61, %v6289_v43  ;;  %v2477_v27 = vshrl.u32 %v5808_v12, 16  ;;  %v2535_v40 = vpack.i.b16 %v5731_v21, %v5734_v26  ;;  %v2544_v48 = vpack.i.b16 %v2543_v24, %v2542_v37 }
 0x13e   : > { %v2475_v31 = vpack.i.b16 %v5808_v12, %v5815_v41  ;;  %v2476_v44 = vshrl.u32 %v5815_v41, 16  ;;  %v2519_v61 = vshrl.u32 %v1380_v55, 16  ;;  %v1228_v22 = vcombine.high %v5494_v20, %v5497_v32  ;;  %v6293_v20 = vld [vmem:[#allocation5_spill] sm:$0xff]  ;;  %v6294_v32 = vld [vmem:[#allocation7_spill] sm:$0xff] }
 0x13f   : > { %2959 = vrot.lane.b32.xlu1 %v3856_v57, %s4025_s12  ;;  %v2518_v8 = vshrl.u32 %v1346_v59, 16  ;;  %v6292_v53 = vpack.i.b16 %v5567_v50, %v5562_v28  ;;  %v2430_v37 = vpack.i.b16 %v2429_v18, %v2428_v5 }
 0x140   : > { %3093 = vrot.lane.b32.xlu0 %v3886_v51, %s4023_s29  ;;  %v616_v62 = vpop.permute.xlu1 %615  ;;  %v6291_v51 = vpack.i.b16 %v5058_v13, %v6290_v63  ;;  %v2478_v24 = vpack.i.b16 %v2477_v27, %v2476_v44  ;;  %v2404_v44 = vshrl.u32 %v5570_v23, 16 }
 0x141   : > { %v612_v16 = vpop.permute.xlu0 %611  ;;  %v1279_v42 = vcombine.low %v600_v11, %v616_v62  ;;  %v5844_v39 = vcombine.low %v6292_v53, %v2475_v31  ;;  %v1208_v62 = vrot.slane %v1194_v10, %v4362_v58  ;;  %v1242_v31 = vrot.slane %v1228_v22, %v4362_v58 }
 0x142   : > { %v1245_v57 = vcombine.low %v596_v45, %v612_v16  ;;  %v3861_v17 = vcombine.low %v2517_v30, %v6291_v51  ;;  %v6295_v45 = vpack.i.b16 %v6293_v20, %v6294_v32  ;;  %v2520_v16 = vpack.i.b16 %v2519_v61, %v2518_v8 }
 0x143   : > { %3165 = vrot.lane.b32.xlu1 %v3901_v2, %s4026_s13  ;;  %v1286_v13 = vrot.slane %v1279_v42, %v4205_v46  ;;  %v6296_v2 = vld [vmem:[#allocation34_spill] sm:$0xff]  ;;  %v2405_v10 = vshrl.u32 %v5582_v7, 16  ;;  %v3875_v42 = vcombine.low %v2430_v37, %v2478_v24  ;;  %v5867_v22 = vcombine.high %v5562_v28, %v6229_v56 }
 0x144   : > { %2911 = vrot.lane.b32.xlu0 %v3846_v60, %s4023_s29  ;;  %v624_v52 = vpop.permute.xlu1 %623  ;;  %v3891_v55 = vcombine.low %v2535_v40, %v6295_v45  ;;  %v3906_v30 = vcombine.low %v2544_v48, %v6296_v2  ;;  %v3866_v8 = vcombine.low %v2520_v16, %v5181_v1  ;;  %v2415_v53 = vpack.i.b16 %v1242_v31, %v1208_v62 }
 0x145   : > { %v1287_v21 = vcombine.low %v608_v9, %v624_v52  ;;  %v620_v26 = vpop.permute.xlu0 %619  ;;  %v1252_v9 = vrot.slane %v1245_v57, %v4205_v46  ;;  %v2416_v57 = vshrl.u32 %v1208_v62, 16  ;;  %v2417_v52 = vshrl.u32 %v1242_v31, 16 }
 0x146   : > { %v1253_v11 = vcombine.low %v604_v19, %v620_v26  ;;  %v1855_v20 = vcombine.high %v5567_v50, %v6229_v56  ;;  %v1923_v32 = vcombine.high %v5808_v12, %v6229_v56  ;;  %v1889_v45 = vcombine.high %v5815_v41, %v6229_v56 }
 0x147   : > { %2983 = vrot.lane.b32.xlu1 %v3861_v17, %s4026_s13  ;;  %v1294_v59 = vrot.slane %v1287_v21, %v4205_v46  ;;  %v2418_v24 = vpack.i.b16 %v2417_v52, %v2416_v57  ;;  %v1209_v12 = vcombine.high %v5570_v23, %v6229_v56  ;;  %v1243_v41 = vcombine.high %v5582_v7, %v6229_v56 }
 0x148   : > { %v1260_v19 = vrot.slane %v1253_v11, %v4205_v46  ;;  %3117 = vrot.lane.b32.xlu0 %v3891_v55, %s4024_s30  ;;  %v5857_v43 = vpop.permute.xlu1 %3051  ;;  %v2406_v11 = vpack.i.b16 %v2405_v10, %v2404_v44  ;;  %v2481_v10 = vpack.i.b16 %v1923_v32, %v1889_v45 }
 0x149   : > { %v1295_v5 = vcombine.low %v1286_v13, %v1294_v59  ;;  %v1296_v18 = vcombine.high %v1286_v13, %v1294_v59  ;;  %v5860_v27 = vpop.permute.xlu0 %2869  ;;  %v1210_v13 = vcombine.high %v1208_v62, %v6229_v56  ;;  %v1244_v59 = vcombine.high %v1242_v31, %v6229_v56 }
 0x14a   : > { %v1261_v60 = vcombine.low %v1252_v9, %v1260_v19  ;;  %v1262_v40 = vcombine.high %v1252_v9, %v1260_v19  ;;  %v2433_v62 = vpack.i.b16 %v1855_v20, %v5867_v22  ;;  %v2409_v52 = vpack.i.b16 %v1243_v41, %v1209_v12 }
 0x14b   : > { %3189 = vrot.lane.b32.xlu1 %v3906_v30, %s4027_s14  ;;  %v1303_v48 = vrot.slane %v1295_v5, %v4362_v58  ;;  %v1310_v61 = vrot.slane %v1296_v18, %v4362_v58 }
 0x14c   : > { %v1269_v63 = vrot.slane %v1261_v60, %v4362_v58  ;;  %v1276_v51 = vrot.slane %v1262_v40, %v4362_v58  ;;  %3043 = vrot.lane.b32.xlu0 %v3875_v42, %s4021_s27  ;;  %v5874_v17 = vpop.permute.xlu1 %3075  ;;  %v2421_v60 = vpack.i.b16 %v1244_v59, %v1210_v13  ;;  %v2422_v40 = vshrl.u32 %v1210_v13, 16 }
 0x14d   : > { %v2453_v21 = vshrl.u32 %v1303_v48, 16  ;;  %v2465_v28 = vshrl.u32 %v1310_v61, 16  ;;  %v5877_v26 = vpop.permute.xlu0 %2893  ;;  %v1312_v9 = vcombine.high %v1310_v61, %v6229_v56  ;;  %v1311_v31 = vcombine.high %v1303_v48, %v6229_v56 }
 0x14e   : > { %v2452_v55 = vshrl.u32 %v1269_v63, 16  ;;  %v2464_v37 = vshrl.u32 %v1276_v51, 16  ;;  %v2463_v1 = vpack.i.b16 %v1310_v61, %v1276_v51  ;;  %v1278_v2 = vcombine.high %v1276_v51, %v6229_v56 }
 0x14f   : > { %3007 = vrot.lane.b32.xlu1 %v3866_v8, %s4027_s14  ;;  %v1277_v18 = vcombine.high %v1269_v63, %v6229_v56  ;;  %v2423_v42 = vshrl.u32 %v1244_v59, 16  ;;  %v2451_v61 = vpack.i.b16 %v1303_v48, %v1269_v63  ;;  %v2471_v51 = vshrl.u32 %v1312_v9, 16 }
 0x150   : > { %v5889_v19 = vpop.permute.xlu1 %3099  ;;  %v2454_v50 = vpack.i.b16 %v2453_v21, %v2452_v55  ;;  %v3850_v16 = vcombine.low %v2415_v53, %v2463_v1  ;;  %v2466_v5 = vpack.i.b16 %v2465_v28, %v2464_v37  ;;  %v2434_v8 = vshrl.u32 %v5867_v22, 16 }
 0x151   : > { %v5896_v30 = vpop.permute.xlu0 %2917  ;;  %v2435_v53 = vshrl.u32 %v1855_v20, 16  ;;  %v2470_v55 = vshrl.u32 %v1278_v2, 16  ;;  %v6297_v37 = vpack.i.b16 %v5582_v7, %v5570_v23  ;;  %v3880_v48 = vcombine.low %v2433_v62, %v2481_v10  ;;  %v6298_v23 = vld [vmem:[#allocation20_spill] sm:$0xff] }
 0x152   : > { %v3835_v44 = vcombine.low %v2406_v11, %v2454_v50  ;;  %v3855_v28 = vcombine.low %v2418_v24, %v2466_v5  ;;  %v2469_v11 = vpack.i.b16 %v1312_v9, %v1278_v2  ;;  %v2457_v63 = vpack.i.b16 %v1311_v31, %v1277_v18 }
 0x153   : > { %2933 = vrot.lane.b32.xlu1 %v3850_v16, %s4024_s30  ;;  %v5911_v1 = vcombine.low %v6297_v37, %v2451_v61  ;;  %v2482_v13 = vshrl.u32 %v1889_v45, 16  ;;  %v2483_v59 = vshrl.u32 %v1923_v32, 16  ;;  %v2424_v50 = vpack.i.b16 %v2423_v42, %v2422_v40 }
 0x154   : > { %2861 = vrot.lane.b32.xlu0 %v3835_v44, %s4021_s27  ;;  %v5903_v57 = vpop.permute.xlu1 %3123  ;;  %v2410_v16 = vshrl.u32 %v1209_v12, 16  ;;  %v2436_v20 = vpack.i.b16 %v2435_v53, %v2434_v8  ;;  %v2411_v24 = vshrl.u32 %v1243_v41, 16  ;;  %v1806_v9 = vcombine.high %v5427_v38, %v5436_v33  ;;  %s543_s27 = scalar_lea.vmem %s6118_s10, %s3925_s24 }
 0x155   : > { %v5906_v21 = vpop.permute.xlu0 %2941  ;;  %v1840_v7 = vcombine.high %v6298_v23, %v5484_v14  ;;  %v1908_v45 = vcombine.high %v5787_v35, %v5790_v34  ;;  %v1874_v32 = vcombine.high %v5795_v6, %v5798_v25  ;;  %v3860_v12 = vcombine.low %v2421_v60, %v2469_v11 }
 0x156   : > { %v2472_v5 = vpack.i.b16 %v2471_v51, %v2470_v55  ;;  %v3840_v62 = vcombine.low %v2409_v52, %v2457_v63  ;;  %v2484_v44 = vpack.i.b16 %v2483_v59, %v2482_v13  ;;  %v2458_v10 = vshrl.u32 %v1277_v18, 16  ;;  %v6299_v55 = vld [vmem:[#allocation32_spill] sm:$0xff] }
 0x157   : > { %2957 = vrot.lane.b32.xlu1 %v3855_v28, %s4025_s12  ;;  %v2459_v41 = vshrl.u32 %v1311_v31, 16  ;;  %v2412_v35 = vpack.i.b16 %v2411_v24, %v2410_v16  ;;  %v1820_v34 = vrot.slane %v1806_v9, %v4362_v58  ;;  %v1854_v6 = vrot.slane %v1840_v7, %v4362_v58 }
 0x158   : > { %3067 = vrot.lane.b32.xlu0 %v3880_v48, %s4022_s28  ;;  %v5915_v22 = vpop.permute.xlu1 %3049  ;;  %v3865_v14 = vcombine.low %v2424_v50, %v2472_v5  ;;  %v1922_v25 = vrot.slane %v1908_v45, %v4362_v58  ;;  %v1888_v60 = vrot.slane %v1874_v32, %v4362_v58  ;;  %v3885_v40 = vcombine.low %v2436_v20, %v2484_v44  ;;  %v6300_v48 = vld [vmem:[#allocation33_spill] sm:$0xff] }
 0x159   : > { %v5925_v2 = vpop.permute.xlu0 %2965  ;;  %v2460_v18 = vpack.i.b16 %v2459_v41, %v2458_v10  ;;  %v2439_v61 = vpack.i.b16 %v1854_v6, %v1820_v34  ;;  %v2440_v52 = vshrl.u32 %v1820_v34, 16  ;;  %v2441_v51 = vshrl.u32 %v1854_v6, 16 }
 0x15a   : > { %v2489_v8 = vshrl.u32 %v1922_v25, 16  ;;  %v2488_v53 = vshrl.u32 %v1888_v60, 16  ;;  %v2487_v11 = vpack.i.b16 %v1922_v25, %v1888_v60  ;;  %v3874_v58 = vcombine.low %v6299_v55, %v6299_v55 }
 0x15b   : > { %2981 = vrot.lane.b32.xlu1 %v3860_v12, %s4026_s13  ;;  %v3845_v28 = vcombine.low %v2412_v35, %v2460_v18  ;;  %v1822_v37 = vcombine.high %v1820_v34, %v6229_v56  ;;  %v3834_v63 = vcombine.low %v6300_v48, %v6300_v48  ;;  %v1856_v59 = vcombine.high %v1854_v6, %v6229_v56 }
 0x15c   : > { %2885 = vrot.lane.b32.xlu0 %v3840_v62, %s4022_s28  ;;  %v5929_v38 = vpop.permute.xlu1 %2867  ;;  %v1924_v50 = vcombine.high %v1922_v25, %v6229_v56  ;;  %v1890_v16 = vcombine.high %v1888_v60, %v6229_v56  ;;  %v3890_v9 = vcombine.low %v2439_v61, %v2487_v11  ;;  %v2442_v23 = vpack.i.b16 %v2441_v51, %v2440_v52 }
 0x15d   : > { %v3148_v33 = vpop.permute.xlu0 %3147  ;;  %v3212_v24 = vsel %vm3197_vm6, %v3834_v63, %v5860_v27  ;;  %v2490_v7 = vpack.i.b16 %v2489_v8, %v2488_v53  ;;  %v2446_v32 = vshrl.u32 %v1822_v37, 16  ;;  %v3297_v12 = vsel %vm3197_vm6, %v3874_v58, %v5857_v43  ;;  %v3363_v53 = vld [vmem:[%s6113_s5] sm:$0xf] }
 0x15e   : > { %v3223_v45 = vsel %vm3213_vm7, %v3212_v24, %v5877_v26  ;;  %v2445_v44 = vpack.i.b16 %v1856_v59, %v1822_v37  ;;  %v2447_v27 = vshrl.u32 %v1856_v59, 16  ;;  %v3307_v10 = vsel %vm3213_vm7, %v3297_v12, %v5874_v17  ;;  %v6301_v58 = vld [vmem:[#allocation14_spill] sm:$0xff] }
 0x15f   : > { %3005 = vrot.lane.b32.xlu1 %v3865_v14, %s4027_s14  ;;  %v3234_v5 = vsel %vm3224_vm8, %v3223_v45, %v5896_v30  ;;  %v2493_v14 = vpack.i.b16 %v1924_v50, %v1890_v16  ;;  %v2495_v35 = vshrl.u32 %v1924_v50, 16  ;;  %v3317_v43 = vsel %vm3224_vm8, %v3307_v10, %v5889_v19 }
 0x160   : > { %3091 = vrot.lane.b32.xlu0 %v3885_v40, %s4023_s29  ;;  %v5937_v31 = vpop.permute.xlu1 %3073  ;;  %v3245_v26 = vsel %vm3235_vm9, %v3234_v5, %v5906_v21  ;;  %v3895_v34 = vcombine.low %v2442_v23, %v2490_v7  ;;  %v2494_v6 = vshrl.u32 %v1890_v16, 16  ;;  %v3327_v25 = vsel %vm3235_vm9, %v3317_v43, %v5903_v57  ;;  %v6303_v43 = vld [vmem:[#allocation25_spill] sm:$0xff] }
 0x161   : > { %v2990_v42 = vpop.permute.xlu0 %2989  ;;  %v3256_v30 = vsel %vm3246_vm10, %v3245_v26, %v5925_v2  ;;  %v3337_v17 = vsel %vm3246_vm10, %v3327_v25, %v3148_v33  ;;  %v3900_v61 = vcombine.low %v2445_v44, %v2493_v14  ;;  %v2448_v52 = vpack.i.b16 %v2447_v27, %v2446_v32 }
 0x162   : > { %v3267_v60 = vsel %vm3257_vm11, %v3256_v30, %v2990_v42  ;;  %v2496_v51 = vpack.i.b16 %v2495_v35, %v2494_v6  ;;  %v3294_v37 = vsel %vm3197_vm6, %v6301_v58, %v5915_v22 }
 0x163   : > { %v3305_v48 = vsel %vm3213_vm7, %v3294_v37, %v5937_v31 }
 0x164   : > { %2909 = vrot.lane.b32.xlu0 %v3845_v28, %s4023_s29  ;;  %v5945_v13 = vpop.permute.xlu1 %2891  ;;  %v3905_v42 = vcombine.low %v2448_v52, %v2496_v51  ;;  %s523_s29 = scalar_lea.vmem %s6110_s2, %s3922_s23 }
 0x165   : > { %v3172_v20 = vpop.permute.xlu0 %3171 }
 0x166   : > { %v3347_v19 = vsel %vm3257_vm11, %v3337_v17, %v3172_v20  ;;  %v6302_v20 = vld [vmem:[#allocation12_spill] sm:$0xff] }
 0x167   : > { %v3209_v24 = vsel %vm3197_vm6, %v6302_v20, %v5929_v38  ;;  %v6304_v17 = vld [vmem:[#allocation24_spill] sm:$0xff] }
 0x168   : > { %3115 = vrot.lane.b32.xlu0 %v3890_v9, %s4024_s30  ;;  %v3098_v62 = vpop.permute.xlu1 %3097  ;;  %v3221_v23 = vsel %vm3213_vm7, %v3209_v24, %v5945_v13  ;;  %s3821_s30 = sshll.u32 %s6312_s17, 1 }
 0x169   : > { %v3014_v41 = vpop.permute.xlu0 %3013  ;;  %v3315_v59 = vsel %vm3224_vm8, %v3305_v48, %v3098_v62 }
 0x16a   : > { %v3282_v40 = vsel %vm3268_vm12, %v3267_v60, %v3014_v41 }
 0x16b   : > { %v3374_v57 = vsel %vm3373_vm13, %v3282_v40, 0 }
 0x16c   : > { %3139 = vrot.lane.b32.xlu0 %v3895_v34, %s4025_s12  ;;  %v2916_v21 = vpop.permute.xlu1 %2915 }
 0x16d   : > { %v3196_v18 = vpop.permute.xlu0 %3195  ;;  %v3232_v31 = vsel %vm3224_vm8, %v3221_v23, %v2916_v21 }
 0x16e   : > { %v3361_v2 = vsel %vm3268_vm12, %v3347_v19, %v3196_v18 }
 0x16f   : > { %3910 = vmatprep.subr.msk.bf16.mxu0 %vm3373_vm13, %v3361_v2 }
 0x170   : > { %3385 = vmatpush1.bf16.msra.mxu0 %v3374_v57  ;;  %3163 = vrot.lane.b32.xlu0 %v3900_v61, %s4026_s13  ;;  %v2940_v33 = vpop.permute.xlu1 %2939  ;;  %s533_s13 = scalar_lea.vmem %s6111_s3, %s3922_s23 }
 0x171   : > { %v3122_v11 = vpop.permute.xlu0 %3121  ;;  %v3243_v32 = vsel %vm3235_vm9, %v3232_v31, %v2940_v33 }
 0x172   : > { %v3325_v50 = vsel %vm3235_vm9, %v3315_v59, %v3122_v11  ;;  %v2547_v59 = vpack.i.b16 %v5667_v15, %v5673_v49 }
 0x174   : > { %3187 = vrot.lane.b32.xlu0 %v3905_v42, %s4027_s14  ;;  %v3146_v8 = vpop.permute.xlu1 %3145  ;;  %v3831_v24 = vcombine.low %v2499_v29, %v2547_v59  ;;  %s552_s14 = scalar_lea.vmem %s6119_s11, %s3821_s30 }
 0x175   : > { %v3048_v16 = vpop.permute.xlu0 %3047  ;;  %v3335_v9 = vsel %vm3246_vm10, %v3325_v50, %v3146_v8 }
 0x176   : > { %v3291_v30 = vsel %vm3197_vm6, %v6303_v43, %v3048_v16  ;;  %v2571_v16 = vpack.i.b16 %v5130_v47, %v5143_v36 }
 0x178   : > { %3366 = vperm.xlu0 %3965, %v3363_v53  }
 0x179   : > { %v2964_v28 = vpop.permute.xlu1 %2963 }
 0x17a   : > { %v3254_v5 = vsel %vm3246_vm10, %v3243_v32, %v2964_v28 }
 0x17d   : > { %v3170_v55 = vpop.permute.xlu1 %3169 }
 0x17e   : > { %v3345_v22 = vsel %vm3257_vm11, %v3335_v9, %v3170_v55 }
 0x181   : > { %v2988_v63 = vpop.permute.xlu1 %2987 }
 0x182   : > { %v3265_v38 = vsel %vm3257_vm11, %v3254_v5, %v2988_v63 }
 0x185   : > { %v3194_v7 = vpop.permute.xlu1 %3193 }
 0x186   : > { %v3358_v45 = vsel %vm3268_vm12, %v3345_v22, %v3194_v7  ;;  %v2866_v12 = vpop.permute.xlu0 %2865  ;;  %v6305_v22 = vpack.i.b16 %v5650_v54, %v5658_v4 }
 0x187   : > { %3386 = vmatprep.subr.bf16.mxu0 %v3358_v45  ;;  %v3206_v21 = vsel %vm3197_vm6, %v6304_v17, %v2866_v12 }
 0x188   : > { %v3871_v7 = vcombine.low %v6305_v22, %v2571_v16 }
 0x189   : > { %v3012_v62 = vpop.permute.xlu1 %3011 }
 0x18a   : > { %v3279_v44 = vsel %vm3268_vm12, %v3265_v38, %v3012_v62  ;;  %v3072_v27 = vpop.permute.xlu0 %3071 }
 0x18b   : > { %3387 = vmatpush1.bf16.msra.mxu0 %v3279_v44  ;;  %v3303_v6 = vsel %vm3213_vm7, %v3291_v30, %v3072_v27 }
 0x18d   : > { %v2938_v13 = vpop.permute.xlu1 %2937 }
 0x18e   : > { %v2890_v10 = vpop.permute.xlu0 %2889 }
 0x18f   : > { %v3219_v19 = vsel %vm3213_vm7, %v3206_v21, %v2890_v10 }
 0x191   : > { %v3144_v26 = vpop.permute.xlu1 %3143 }
 0x192   : > { %v3096_v41 = vpop.permute.xlu0 %3095 }
 0x193   : > { %v3313_v25 = vsel %vm3224_vm8, %v3303_v6, %v3096_v41 }
 0x195   : > { %v2962_v14 = vpop.permute.xlu1 %2961 }
 0x196   : > { %v2914_v35 = vpop.permute.xlu0 %2913 }
 0x197   : > { %v3230_v2 = vsel %vm3224_vm8, %v3219_v19, %v2914_v35 }
 0x198   : > { %v3241_v52 = vsel %vm3235_vm9, %v3230_v2, %v2938_v13 }
 0x199   : > { %v3168_v34 = vpop.permute.xlu1 %3167  ;;  %v3252_v8 = vsel %vm3246_vm10, %v3241_v52, %v2962_v14 }
 0x19a   : > { %v3120_v60 = vpop.permute.xlu0 %3119 }
 0x19b   : > { %v3323_v40 = vsel %vm3235_vm9, %v3313_v25, %v3120_v60 }
 0x19c   : > { %v3333_v61 = vsel %vm3246_vm10, %v3323_v40, %v3144_v26 }
 0x19d   : > { %v2986_v18 = vpop.permute.xlu1 %2985  ;;  %v3343_v57 = vsel %vm3257_vm11, %v3333_v61, %v3168_v34 }
 0x19e   : > { %v3046_v42 = vpop.permute.xlu0 %3045  ;;  %v3263_v53 = vsel %vm3257_vm11, %v3252_v8, %v2986_v18 }
 0x19f   : > { %v3288_v15 = vsel %vm3197_vm6, %v3871_v7, %v3046_v42 }
 0x1a1   : > { %v3192_v51 = vpop.permute.xlu1 %3191 }
 0x1a2   : > { %v3355_v33 = vsel %vm3268_vm12, %v3343_v57, %v3192_v51 }
 0x1a3   : > { %3388 = vmatprep.subr.bf16.mxu0 %v3355_v33 }
 0x1a5   : > { %v3010_v28 = vpop.permute.xlu1 %3009 }
 0x1a6   : > { %v3276_v11 = vsel %vm3268_vm12, %v3263_v53, %v3010_v28  ;;  %v2864_v55 = vpop.permute.xlu0 %2863  ;;  %v3362_v28 = vld [vmem:[%s6112_s4] sm:$0x3] }
 0x1a7   : > { %3389 = vmatpush1.bf16.msra.mxu0 %v3276_v11  ;;  %v3203_v23 = vsel %vm3197_vm6, %v3831_v24, %v2864_v55  ;;  %v3912_v11 = vld.sshfl [vmem:[%s513_s26] sm:$0x33 pattern:$0x76325410] }
 0x1a8   : > { %v3913_v55 = vld.sshfl [vmem:[%s533_s13] sm:$0x33 pattern:$0x76325410] }
 0x1a9   : > { %v2936_v58 = vpop.permute.xlu1 %2935 }
 0x1aa   : > { %v3070_v37 = vpop.permute.xlu0 %3069 }
 0x1ab   : > { %v3301_v36 = vsel %vm3213_vm7, %v3288_v15, %v3070_v37  ;;  %v3457_v37 = vcombine.low %v3913_v55, %v3913_v55 }
 0x1ad   : > { %v3142_v48 = vpop.permute.xlu1 %3141 }
 0x1ae   : > { %v2888_v63 = vpop.permute.xlu0 %2887 }
 0x1af   : > { %v3217_v31 = vsel %vm3213_vm7, %v3203_v23, %v2888_v63  ;;  %v3534_v23 = vld [vmem:[%s6117_s9] sm:$0x3] }
 0x1b1   : > { %v2960_v50 = vpop.permute.xlu1 %2959 }
 0x1b2   : > { %v3094_v20 = vpop.permute.xlu0 %3093 }
 0x1b3   : > { %v3311_v3 = vsel %vm3224_vm8, %v3301_v36, %v3094_v20 }
 0x1b5   : > { %v3166_v9 = vpop.permute.xlu1 %3165 }
 0x1b6   : > { %v2912_v45 = vpop.permute.xlu0 %2911 }
 0x1b7   : > { %v3228_v49 = vsel %vm3224_vm8, %v3217_v31, %v2912_v45 }
 0x1b8   : > { %v3239_v0 = vsel %vm3235_vm9, %v3228_v49, %v2936_v58  ;;  %v3975_v58 = vld [vmem:[%s523_s29] ss:$0 sps:$4 sm:$0xff]  }
 0x1b9   : > { %v2984_v47 = vpop.permute.xlu1 %2983  ;;  %v3250_v12 = vsel %vm3246_vm10, %v3239_v0, %v2960_v50  ;;  %v3447_v63 = vrot.slane %v3975_v58, %v4205_v46 }
 0x1ba   : > { %v3118_v29 = vpop.permute.xlu0 %3117  ;;  %v3261_v62 = vsel %vm3257_vm11, %v3250_v12, %v2984_v47 }
 0x1bb   : > { %v3321_v32 = vsel %vm3235_vm9, %v3311_v3, %v3118_v29  ;;  %v3448_v59 = vcombine.high %v3447_v63, %v3447_v63  ;;  %v3465_v50 = vsel %vm3462_vm15, %v3912_v11, %v3447_v63 }
 0x1bc   : > { %v3331_v54 = vsel %vm3246_vm10, %v3321_v32, %v3142_v48  ;;  %v3438_v48 = vcombine.high %v3912_v11, %v3912_v11  ;;  %v3470_v16 = vsel %vm3373_vm13, %v3465_v50, %v3457_v37 }
 0x1bd   : > { %v3190_v4 = vpop.permute.xlu1 %3189  ;;  %v3341_v5 = vsel %vm3257_vm11, %v3331_v54, %v3166_v9  ;;  %v3481_v9 = vld [vmem:[%s6115_s7] sm:$0xff] }
 0x1be   : > { %v3352_v38 = vsel %vm3268_vm12, %v3341_v5, %v3190_v4  ;;  %v3044_v13 = vpop.permute.xlu0 %3043  ;;  %v3468_v20 = vsel %vm3462_vm15, %v3438_v48, %v3448_v59  ;;  %3484 = vperm.xlu1 %3966, %v3481_v9  }
 0x1bf   : > { %3390 = vmatprep.subr.bf16.mxu0 %v3352_v38  ;;  %v3285_v40 = vsel %vm3197_vm6, %v5844_v39, %v3044_v13  ;;  %v3472_v24 = vsel %vm3373_vm13, %v3468_v20, %v3913_v55  ;;  %v3480_v38 = vld [vmem:[%s6114_s6] sm:$0xf] }
 0x1c1   : > { %v3008_v44 = vpop.permute.xlu1 %3007 }
 0x1c2   : > { %v3273_v27 = vsel %vm3268_vm12, %v3261_v62, %v3008_v44  ;;  %3537 = vperm.xlu1 %3966, %v3534_v23  }
 0x1c3   : > { %3391 = vmatpush1.bf16.msra.mxu0 %v3273_v27 }
 0x1c5   : > { %v2934_v35 = vpop.permute.xlu1 %2933 }
 0x1c6   : > { %v2862_v10 = vpop.permute.xlu0 %2861 }
 0x1c7   : > { %v3200_v30 = vsel %vm3197_vm6, %v5911_v1, %v2862_v10 }
 0x1c9   : > { %v2958_v6 = vpop.permute.xlu1 %2957 }
 0x1ca   : > { %v3068_v26 = vpop.permute.xlu0 %3067 }
 0x1cb   : > { %v3299_v18 = vsel %vm3213_vm7, %v3285_v40, %v3068_v26 }
 0x1cd   : > { %v2982_v19 = vpop.permute.xlu1 %2981 }
 0x1ce   : > { %v2886_v41 = vpop.permute.xlu0 %2885 }
 0x1cf   : > { %v3215_v25 = vsel %vm3213_vm7, %v3200_v30, %v2886_v41  ;;  %v3531_v30 = vld [vmem:[%s6116_s8] sm:$0x1] }
 0x1d1   : > { %v3006_v8 = vpop.permute.xlu1 %3005 }
 0x1d2   : > { %v3092_v14 = vpop.permute.xlu0 %3091 }
 0x1d3   : > { %v3309_v1 = vsel %vm3224_vm8, %v3299_v18, %v3092_v14  ;;  %v6306_v18 = vld [vmem:[#allocation2_spill] sm:$0xff] }
 0x1d6   : > { %v2910_v43 = vpop.permute.xlu0 %2909 }
 0x1d7   : > { %v3226_v60 = vsel %vm3224_vm8, %v3215_v25, %v2910_v43 }
 0x1d8   : > { %v3237_v21 = vsel %vm3235_vm9, %v3226_v60, %v2934_v35 }
 0x1d9   : > { %v3248_v61 = vsel %vm3246_vm10, %v3237_v21, %v2958_v6 }
 0x1da   : > { %v3116_v34 = vpop.permute.xlu0 %3115  ;;  %v3259_v57 = vsel %vm3257_vm11, %v3248_v61, %v2982_v19 }
 0x1db   : > { %v3319_v52 = vsel %vm3235_vm9, %v3309_v1, %v3116_v34  ;;  %v3270_v53 = vsel %vm3268_vm12, %v3259_v57, %v3006_v8  ;;  %v4028_v34 = vmov 1966171168  }
 0x1dc   : > { %v3604_v6 = vunpack.c.l.s4 %v4028_v34 }
 0x1de   : > { %v3140_v17 = vpop.permute.xlu0 %3139  ;;  %v3605_v25 = vunpack.c.0.s8 %v3604_v6 }
 0x1df   : > { %v3329_v51 = vsel %vm3246_vm10, %v3319_v52, %v3140_v17 }
 0x1e2   : > { %v3164_v2 = vpop.permute.xlu0 %3163 }
 0x1e3   : > { %v3339_v33 = vsel %vm3257_vm11, %v3329_v51, %v3164_v2  ;;  %v3608_v2 = vsub.s32 %v3605_v25, %v6306_v18 }
 0x1e6   : > { %v3188_v42 = vpop.permute.xlu0 %3187 }
 0x1e7   : > { %v3349_v39 = vsel %vm3268_vm12, %v3339_v33, %v3188_v42 }
 0x1e8   : > { %3392 = vmatprep.subr.bf16.mxu0 %v3349_v39 }
 0x1e9   : > { %3393 = vmatpush1.bf16.msra.mxu0 %v3270_v53 }
 0x1ec   : > { %3911 = vmatmul.mubr.msk.bf16.vlgmr.msra.gmra.mxu0 %vm3369_vm14, %v3362_v28 }
 0x1f3   : > { %v3367_v22 = vpop.permute.xlu0 %3366 }
 0x239   : > { %v3485_v62 = vpop.permute.xlu1 %3484 }
 0x23d   : > { %v3538_v17 = vpop.permute.xlu1 %3537 }
 0x2ac   : > { %v3412_v7 = vpop.f32.mrf.mxu0 }
 0x2ad   : > { %v3413_v46 = vadd.f32 %v3412_v7, %v3367_v22 }
 0x2ae   : > { %v3414_v31 = vpop.f32.mrf.mxu0 }
 0x2af   : > { %vm3419_vm0 = vcmp.ge.f32.partialorder %v3413_v46, 0.0  ;;  %v3421_v45 = vmul.f32 0.05, %v3413_v46  ;;  %v3415_v49 = vadd.f32 %v3414_v31, %v3367_v22 }
 0x2b0   : > { %v3416_v15 = vpop.f32.mrf.mxu0 }
 0x2b1   : > { %v3423_v47 = vsel %vm3419_vm0, %v3413_v46, %v3421_v45  ;;  %vm3420_vm1 = vcmp.ge.f32.partialorder %v3415_v49, 0.0  ;;  %v3422_v36 = vmul.f32 0.05, %v3415_v49 }
 0x2b2   : > { %v3428_v3 = vpack.c.bf16 %v3423_v47, %v3423_v47  ;;  %v3417_v0 = vpop.f32.mrf.mxu0 }
 0x2b3   : > { %v3424_v29 = vsel %vm3420_vm1, %v3415_v49, %v3422_v36 }
 0x2b4   : > { %v3429_v32 = vpack.c.bf16 %v3424_v29, %v3424_v29  ;;  %v3460_v54 = vrot.slane %v3428_v3, 2 }
 0x2b6   : > { %v3461_v4 = vrot.slane %v3429_v32, 2  ;;  %v3475_v5 = vsel %vm3473_vm2, %v3470_v16, %v3460_v54 }
 0x2b8   : > { %v3478_v12 = vsel %vm3473_vm2, %v3472_v24, %v3461_v4 }
 0x2b9   : > { %3504 = vmatprep.subr.bf16.mxu1 %v3478_v12 }
 0x2ba   : > { %3505 = vmatpush1.bf16.msra.mxu1 %v3475_v5 }
 0x2bd   : > { %3914 = vmatmul.mubr.msk.bf16.vlgmr.msra.gmra.mxu1 %vm3197_vm6, %v3480_v38 }
 0x2be   : > { %3582 = vmatprep.mubr.bf16.mxu1 %v6229_v56 }
 0x37d   : > { %v3524_v44 = vpop.f32.mrf.mxu1 }
 0x37e   : > { %v3525_v27 = vadd.f32 %v3524_v44, %v3485_v62 }
 0x37f   : > { %v3526_v13 = vpop.f32.mrf.mxu1 }
 0x380   : > { %v3532_v10 = vpack.c.bf16 %v3525_v27, %v3525_v27  ;;  %v3527_v26 = vadd.f32 %v3526_v13, %v3485_v62 }
 0x381   : > { %v3528_v41 = vpop.f32.mrf.mxu1 }
 0x382   : > { %v3533_v14 = vpack.c.bf16 %v3527_v26, %v3527_v26  ;;  %v3926_v35 = vpack.c.bf16 %v3527_v26, %v3525_v27  ;;  %v3545_v56 = vsel %vm3373_vm13, %v3532_v10, 0 }
 0x383   : > { %v3529_v43 = vpop.f32.mrf.mxu1 }
 0x384   : > { %3597 = vst [vmem:[%s543_s27] sm:$0xff] %v3926_v35  ;;  %3915 = vmatprep.subr.msk.bf16.mxu1 %vm3373_vm13, %v3533_v14 }
 0x385   : > { %3565 = vmatpush1.bf16.msra.mxu1 %v3545_v56 }
 0x388   : > { %3916 = vmatmul.mubr.msk.bf16.vlgmr.msra.gmra.mxu1 %vm3540_vm3, %v3531_v30 }
 0x448   : > { %v3584_v60 = vpop.f32.mrf.mxu1 }
 0x449   : > { %v3585_v40 = vadd.f32 %v3584_v60, %v3538_v17 }
 0x44a   : > { %v3586_v21 = vpop.f32.mrf.mxu1 }
 0x44b   : > { %v3587_v19 = vadd.f32 %v3586_v21, %v3538_v17 }
 0x44c   : > { %v3588_v61 = vpop.f32.mrf.mxu1 }
 0x44d   : > { %v3918_v1 = vpack.c.bf16 %v3587_v19, %v3585_v40 }
 0x44e   : > { %v3589_v52 = vpop.f32.mrf.mxu1 }
 0x44f   : > { %v3609_v51 = vrot.slane %v3918_v1, %v3608_v2 }
 0x451   : > { %3919 = vst.sshfl [vmem:[%s552_s14] sm:$0x5 pattern:$0x73625140] %v3609_v51 }
 0x452 PF: > { %s22_s19 = sadd.s32 1, %s4014_s19   ;;  %s6307_s17 = smov %s4010_s18 }
 0x453   : > { %p19_p5 = scmp.ge.s32.totalorder %s22_s19, 4   ;;  %s6308_s18 = smov %s6310_s20 }
 0x455   :  { %21 = sbr.rel (!%p19_p5) target bundleno = 2 (0x2), region = 111 }

// kernel: rfdb_forward.9
= control target key start
LH: loop header
LB: loop body
LE: loop exit
PB: predicated region body
PF: predicated region fallthrough
CT: control target
= control target key end

     0   :  { %s3745_s21 = smov 0   ;;  %s3747_s22 = smov 0   ;;  %s5826_s0 = inlined_call_operand.vmem [shape: bf16[2,1,8,18,18], index: 0, kind: input, shape index: {}]   ;;  %s5827_s1 = inlined_call_operand.vmem [shape: bf16[8,72], index: 1, kind: input, shape index: {}]   ;;  %s5828_s2 = inlined_call_operand.vmem [shape: f32[8,1], index: 2, kind: input, shape index: {}]   ;;  %s5829_s3 = inlined_call_operand.vmem [shape: bf16[4,8], index: 3, kind: input, shape index: {}]   ;;  %s5830_s4 = inlined_call_operand.vmem [shape: f32[4,1], index: 4, kind: input, shape index: {}]   ;;  %s5831_s5 = inlined_call_operand.vmem [shape: bf16[2,8,256], index: 5, kind: output, shape index: {0}]   ;;  %s5832_s6 = inlined_call_operand.vmem [shape: bf16[2,4,256], index: 6, kind: output, shape index: {1}]  }
   0x1   :  { %s3749_s23 = smov 0  }
   0x2 LB: > { %s29_s24 = sadd.s32 1, %s3692_s22  ;;  %p3491_p0 = scmp.ge.s32.totalorder %s3696_s23, 1  ;;  %s3696_s23 = sphi %s3749_s23, %s17_s23   ;;  %s3692_s22 = sphi %s3747_s22, %s6098_s22   ;;  %s3688_s21 = sphi %s3745_s21, %s6097_s21  }
   0x3   : > { %p31_p1 = scmp.ge.s32.totalorder %s29_s24, 2  ;;  %p237_p2 = scmp.lt.s32.totalorder %s3696_s23, 3 }
   0x5   : > { %s6100_s24 = smov (%p31_p1, %s29_s24), 0  ;;  %p238_p3 = pnand %p3491_p0, %p237_p2 }
   0x7   : > { %241 = sbr.rel (%p238_p3) target bundleno = 723 (0x2d3), region = 40 }
   0xc   : > { %p284_p4 = scmp.lt.s32.totalorder %s3688_s21, 1  ;;  %v940_v0 = vlaneseq  ;;  %vm765_vm0 = vcmask 1042432   ;;  %vm766_vm1 = vcmask 1046532   ;;  %v3698_v1 = vmov 1983009808   ;;  %s3699_s29 = smov 127  }
   0xd   : > { %v938_v2 = vunpack.c.l.s4 %v3698_v1  ;;  %vm3803_vm2 = vmor %vm765_vm0, %vm766_vm1  ;;  %v3700_v30 = vmov 1934713408   ;;  %s3701_s30 = smov 126   ;;  %vm450_vm3 = vsmask.f32 3328  ;;  %s3703_s7 = smov 16  }
   0xe   : > { %s6102_s21 = smov (!%p284_p4, %s3688_s21), 1  ;;  %v3771_v3 = vshrl.u32 %v940_v0, 7  ;;  %v3831_v31 = vunpack.c.l.s4 %v3700_v30  ;;  %vm451_vm4 = vsmask.f32 7440  ;;  %s3704_s8 = smov 32   ;;  %vm2956_vm6 = vcmask 130048  }
   0xf   : > { %s3611_s25 = smul.u32 96, %s6102_s21  ;;  %v939_v21 = vunpack.c.0.s8 %v938_v2  ;;  %vm4041_vm5 = vmor %vm450_vm3, %vm451_vm4  ;;  %s3705_s9 = smov 48   ;;  %vm2972_vm7 = vcmask 261120   ;;  %vm2983_vm8 = vcmask 392192   ;;  %vm2994_vm9 = vcmask 523264  }
  0x10   : > { %s3706_s10 = smov 64   ;;  %s3707_s11 = smov 80   ;;  %vm3005_vm10 = vcmask 654336   ;;  %vm3016_vm11 = vcmask 785408   ;;  %vm3027_vm12 = vcmask 916480   ;;  %vm3132_vm13 = vcmask 1043456  }
  0x11   : > { %s3769_s28 = scalar_lea.vmem %s5826_s0, %s3611_s25  ;;  %v3854_v42 = vsub.s32 %v939_v21, %v3771_v3  ;;  %s3708_s12 = smov 96   ;;  %vm3128_vm14 = vcmask 588800   ;;  %vm3278_vm15 = vcmask 64512  }
  0x12   : > { %v3774_v4 = vld [vmem:[%s3769_s28 + $0xc] sm:$0xf]  ;;  %v3777_v5 = vld [vmem:[%s3769_s28] sm:$0xf]  ;;  %v3780_v6 = vld [vmem:[%s3769_s28 + $0x10] sm:$0xf] }
  0x13   : > { %5904 = vst [vmem:[#allocation2_spill] sm:$0xff] %v3777_v5  ;;  %5905 = vst [vmem:[#allocation3_spill] sm:$0xff] %v3780_v6  ;;  %358 = vrot.lane.b32.xlu1 %v3774_v4, %s3699_s29  ;;  %354 = vrot.lane.b32.xlu0 %v3777_v5, %s3699_s29  ;;  %v3787_v7 = vld [vmem:[%s3769_s28 + $0x4] sm:$0xf]  ;;  %v3790_v8 = vld [vmem:[%s3769_s28 + $0x8] sm:$0x1] }
  0x14   : > { %5906 = vst [vmem:[#allocation4_spill] sm:$0xff] %v3787_v7  ;;  %v3497_v9 = vrot.slane %v3777_v5, 9  ;;  %v777_v10 = vrot.slane %v3780_v6, 5  ;;  %v770_v11 = vrot.slane %v3787_v7, 5  ;;  %v773_v12 = vrot.slane %v3790_v8, 5  ;;  %s3709_s13 = smov 112  }
  0x15   : > { %v3797_v13 = vld [vmem:[%s3769_s28 + $0x14] sm:$0x1]  ;;  %v3498_v14 = vrot.slane %v3774_v4, 9  ;;  %v487_v15 = vshll.u32 %v3780_v6, 16  ;;  %v3809_v19 = vld [vmem:[%s3769_s28 + $0x1c] sm:$0xf] }
  0x16   : > { %v779_v17 = vrot.slane %v777_v10, 4  ;;  %v780_v18 = vrot.slane %v3797_v13, 5  ;;  %5909 = vst [vmem:[#allocation5_spill] sm:$0xff] %v3809_v19  ;;  %v3812_v20 = vld [vmem:[%s3769_s28 + $0x20] sm:$0x1]  ;;  %v772_v22 = vrot.slane %v770_v11, 4  ;;  %v3839_v33 = vsel %vm3803_vm2, %v3497_v9, %v770_v11 }
  0x17   : > { %v784_v23 = vrot.slane %v3809_v19, 5  ;;  %v3816_v24 = vld [vmem:[%s3769_s28 + $0x18] sm:$0xf]  ;;  %v3819_v25 = vld [vmem:[%s3769_s28 + $0x28] sm:$0xf]  ;;  %360 = vrot.lane.b32.xlu1 %v3780_v6, %s3699_s29  ;;  %356 = vrot.lane.b32.xlu0 %v3787_v7, %s3699_s29  ;;  %v787_v26 = vrot.slane %v3812_v20, 5  ;;  %v3862_v44 = vsel %vm3803_vm2, %v3498_v14, %v777_v10 }
  0x18   : > { %5910 = vst [vmem:[#allocation6_spill] sm:$0xff] %v3816_v24  ;;  %5911 = vst [vmem:[#allocation7_spill] sm:$0xff] %v3819_v25  ;;  %v3499_v27 = vrot.slane %v3816_v24, 9  ;;  %v3828_v28 = vld [vmem:[%s3769_s28 + $0x2c] sm:$0x1]  ;;  %v791_v29 = vrot.slane %v3819_v25, 5  ;;  %v3835_v32 = vsel %vm3803_vm2, %v772_v22, %v773_v12  ;;  %v3858_v43 = vsel %vm3803_vm2, %v779_v17, %v780_v18 }
  0x19   : > { %v786_v34 = vrot.slane %v784_v23, 4  ;;  %v794_v35 = vrot.slane %v3828_v28, 5  ;;  %v3843_v36 = vld [vmem:[%s3769_s28 + $0x24] sm:$0xf]  ;;  %v3846_v37 = vld [vmem:[%s3769_s28 + $0x34] sm:$0xf] }
  0x1a   : > { %5912 = vst [vmem:[#allocation8_spill] sm:$0xff] %v3843_v36  ;;  %5913 = vst [vmem:[#allocation9_spill] sm:$0xff] %v3846_v37  ;;  %v793_v38 = vrot.slane %v791_v29, 4  ;;  %v3500_v39 = vrot.slane %v3843_v36, 9  ;;  %v3850_v40 = vld [vmem:[%s3769_s28 + $0x38] sm:$0x1]  ;;  %v3883_v50 = vsel %vm3803_vm2, %v3499_v27, %v784_v23 }
  0x1b   : > { %v798_v41 = vrot.slane %v3846_v37, 5  ;;  %v801_v45 = vrot.slane %v3850_v40, 5  ;;  %v3866_v46 = vld [vmem:[%s3769_s28 + $0x30] sm:$0xf]  ;;  %v3869_v47 = vld [vmem:[%s3769_s28 + $0x40] sm:$0xf]  ;;  %890 = vrot.lane.b32.xlu1 %v3835_v32, %s3701_s30  ;;  %888 = vrot.lane.b32.xlu0 %v3839_v33, %s3701_s30  ;;  %v3879_v49 = vsel %vm3803_vm2, %v786_v34, %v787_v26 }
  0x1c   : > { %5914 = vst [vmem:[#allocation10_spill] sm:$0xff] %v3869_v47  ;;  %v3871_v48 = vrot.slane %v487_v15, 5  ;;  %v3501_v52 = vrot.slane %v3866_v46, 9  ;;  %v3887_v53 = vld [vmem:[%s3769_s28 + $0x44] sm:$0x1]  ;;  %v3894_v55 = vsel %vm3803_vm2, %v793_v38, %v794_v35  ;;  %v805_v56 = vrot.slane %v3869_v47, 5 }
  0x1d   : > { %v800_v51 = vrot.slane %v798_v41, 4  ;;  %v3890_v54 = vld [vmem:[%s3769_s28 + $0x3c] sm:$0xf]  ;;  %v808_v57 = vrot.slane %v3887_v53, 5  ;;  %v3900_v59 = vld [vmem:[%s3769_s28 + $0x4c] sm:$0xf]  ;;  %v3942_v22 = vsel %vm3803_vm2, %v3500_v39, %v791_v29 }
  0x1e   : > { %v3502_v58 = vrot.slane %v3890_v54, 9  ;;  %v3908_v61 = vsel %vm3803_vm2, %v3501_v52, %v798_v41  ;;  %v3911_v62 = vld [vmem:[%s3769_s28 + $0x50] sm:$0x1]  ;;  %v812_v63 = vrot.slane %v3900_v59, 5  ;;  %v3915_v0 = vld [vmem:[%s3769_s28 + $0x48] sm:$0xf] }
  0x1f   : > { %v3904_v60 = vsel %vm3803_vm2, %v800_v51, %v801_v45  ;;  %5915 = vst [vmem:[#allocation11_spill] sm:$0xff] %v3908_v61  ;;  %v491_v1 = vshrl.u32 %v3780_v6, 16  ;;  %v1344_v9 = vcombine.low %v3839_v33, %v3908_v61  ;;  %v807_v10 = vrot.slane %v805_v56, 4  ;;  %v3927_v12 = vld [vmem:[%s3769_s28 + $0x58] sm:$0xf]  ;;  %894 = vrot.lane.b32.xlu1 %v3858_v43, %s3701_s30  ;;  %892 = vrot.lane.b32.xlu0 %v3862_v44, %s3701_s30  ;;  %s3608_s26 = sshll.u32 %s6102_s21, 3 }
  0x20   : > { %v1956_v2 = vcombine.low %v3835_v32, %v3904_v60  ;;  %v3924_v11 = vsel %vm3803_vm2, %v3502_v58, %v805_v56  ;;  %v814_v15 = vrot.slane %v812_v63, 4  ;;  %v815_v17 = vrot.slane %v3911_v62, 5  ;;  %v3938_v21 = vld [vmem:[%s3769_s28 + $0x5c] sm:$0x1]  ;;  %v3953_v30 = vld [vmem:[%s3769_s28 + $0x54] sm:$0xf] }
  0x21   : > { %5916 = vst [vmem:[#allocation12_spill] sm:$0xff] %v3924_v11  ;;  %v1378_v14 = vcombine.low %v3862_v44, %v3924_v11  ;;  %v3503_v18 = vrot.slane %v3915_v0, 9  ;;  %v3949_v26 = vsel %vm3803_vm2, %v807_v10, %v808_v57  ;;  %v819_v27 = vrot.slane %v3927_v12, 5 }
  0x22   : > { %v3945_v23 = vrot.slane %v1956_v2, %v3854_v42  ;;  %v3956_v34 = vrot.slane %v1344_v9, %v3854_v42  ;;  %v1990_v35 = vcombine.low %v3858_v43, %v3949_v26  ;;  %v3962_v29 = vsel %vm3803_vm2, %v814_v15, %v815_v17 }
  0x23   : > { %v3966_v38 = vsel %vm3803_vm2, %v3503_v18, %v812_v63  ;;  %v1964_v39 = vcombine.low %v3879_v49, %v3962_v29  ;;  %v821_v45 = vrot.slane %v819_v27, 4  ;;  %v822_v51 = vrot.slane %v3938_v21, 5  ;;  %898 = vrot.lane.b32.xlu1 %v3879_v49, %s3701_s30  ;;  %896 = vrot.lane.b32.xlu0 %v3883_v50, %s3701_s30 }
  0x24   : > { %5917 = vst [vmem:[#allocation13_spill] sm:$0xff] %v3966_v38  ;;  %v1352_v41 = vcombine.low %v3883_v50, %v3966_v38  ;;  %v3978_v52 = vrot.slane %v1990_v35, %v3854_v42  ;;  %v3504_v56 = vrot.slane %v3953_v30, 9  ;;  %v493_v57 = vrot.slane %v491_v1, 4 }
  0x25   : > { %v497_v58 = vshll.u32 %v3797_v13, 16  ;;  %v3983_v63 = vrot.slane %v1964_v39, %v3854_v42  ;;  %v3990_v9 = vsel %vm3803_vm2, %v821_v45, %v822_v51  ;;  %v463_v10 = vshll.u32 %v3787_v7, 16 }
  0x26   : > { %v3986_v2 = vrot.slane %v1352_v41, %v3854_v42  ;;  %v1998_v15 = vcombine.low %v3894_v55, %v3990_v9  ;;  %v3997_v1 = vsel %vm3803_vm2, %v3504_v56, %v819_v27  ;;  %v494_v13 = vor.u32 %v493_v57, %v3871_v48 }
  0x27   : > { %v467_v17 = vshrl.u32 %v3787_v7, 16  ;;  %902 = vrot.lane.b32.xlu1 %v3894_v55, %s3701_s30  ;;  %900 = vrot.lane.b32.xlu0 %v3942_v22, %s3701_s30  ;;  %v4014_v16 = vrot.slane %v1378_v14, %v3854_v42  ;;  %v1386_v45 = vcombine.low %v3942_v22, %v3997_v1  ;;  %v956_v51 = vunpack.c.0.s8 %v3831_v31 }
  0x28   : > { %v4017_v27 = vrot.slane %v1998_v15, %v3854_v42  ;;  %v499_v56 = vrot.slane %v497_v58, 5  ;;  %v4022_v57 = vrot.slane %v463_v10, 5  ;;  %v495_v15 = vrot.slane %v494_v13, 4 }
  0x29   : > { %v4029_v39 = vrot.slane %v1386_v45, %v3854_v42  ;;  %v469_v35 = vrot.slane %v467_v17, 4  ;;  %v473_v18 = vshll.u32 %v3790_v8, 16  ;;  %v535_v7 = vshll.u32 %v3819_v25, 16 }
  0x2a   : > { %v539_v31 = vshrl.u32 %v3819_v25, 16  ;;  %v545_v8 = vshll.u32 %v3828_v28, 16  ;;  %v4052_v41 = vsub.s32 %v956_v51, %v3771_v3  ;;  %v511_v58 = vshll.u32 %v3809_v19, 16 }
  0x2b   : > { %5918 = vst [vmem:[#allocation14_spill] sm:$0xff] %v4029_v39  ;;  %906 = vrot.lane.b32.xlu1 %v3904_v60, %s3701_s30  ;;  %904 = vrot.lane.b32.xlu0 %v3908_v61, %s3701_s30  ;;  %v470_v17 = vor.u32 %v469_v35, %v4022_v57  ;;  %v475_v45 = vrot.slane %v473_v18, 5  ;;  %v4049_v14 = vrot.slane %v535_v7, 5  ;;  %v4057_v6 = vsel %vm4041_vm5, %v495_v15, %v499_v56 }
  0x2c   : > { %v541_v25 = vrot.slane %v539_v31, 4  ;;  %v515_v28 = vshrl.u32 %v3809_v19, 16  ;;  %v521_v13 = vshll.u32 %v3812_v20, 16  ;;  %v4066_v7 = vrot.slane %v511_v58, 5 }
  0x2d   : > { %v471_v61 = vrot.slane %v470_v17, 4  ;;  %v583_v18 = vshll.u32 %v3869_v47, 16  ;;  %v587_v35 = vshrl.u32 %v3869_v47, 16  ;;  %v547_v56 = vrot.slane %v545_v8, 5 }
  0x2e   : > { %v542_v3 = vor.u32 %v541_v25, %v4049_v14  ;;  %v517_v20 = vrot.slane %v515_v28, 4  ;;  %v593_v15 = vshll.u32 %v3887_v53, 16  ;;  %v559_v25 = vshll.u32 %v3846_v37, 16 }
  0x2f   : > { %910 = vrot.lane.b32.xlu1 %v3949_v26, %s3701_s30  ;;  %908 = vrot.lane.b32.xlu0 %v3924_v11, %s3701_s30  ;;  %v4072_v51 = vsel %vm4041_vm5, %v471_v61, %v475_v45  ;;  %v4075_v17 = vrot.slane %v583_v18, 5  ;;  %v589_v19 = vrot.slane %v587_v35, 4  ;;  %v523_v11 = vrot.slane %v521_v13, 5 }
  0x30   : > { %v543_v31 = vrot.slane %v542_v3, 4  ;;  %v518_v58 = vor.u32 %v517_v20, %v4066_v7  ;;  %v563_v39 = vshrl.u32 %v3846_v37, 16  ;;  %v569_v47 = vshll.u32 %v3850_v40, 16 }
  0x31   : > { %v590_v53 = vor.u32 %v589_v19, %v4075_v17  ;;  %v595_v61 = vrot.slane %v593_v15, 5  ;;  %v4086_v8 = vrot.slane %v559_v25, 5  ;;  %v631_v45 = vshll.u32 %v3927_v12, 16 }
  0x32   : > { %v4091_v13 = vsel %vm4041_vm5, %v543_v31, %v547_v56  ;;  %v519_v28 = vrot.slane %v518_v58, 4  ;;  %v565_v3 = vrot.slane %v563_v39, 4  ;;  %v635_v40 = vshrl.u32 %v3927_v12, 16 }
  0x33   : > { %914 = vrot.lane.b32.xlu1 %v3962_v29, %s3701_s30  ;;  %912 = vrot.lane.b32.xlu0 %v3966_v38, %s3701_s30  ;;  %v591_v18 = vrot.slane %v590_v53, 4  ;;  %v4094_v35 = vrot.slane %v631_v45, 5  ;;  %v641_v20 = vshll.u32 %v3938_v21, 16  ;;  %v607_v19 = vshll.u32 %v3900_v59, 16 }
  0x34   : > { %v566_v15 = vor.u32 %v565_v3, %v4086_v8  ;;  %v571_v25 = vrot.slane %v569_v47, 5  ;;  %v637_v37 = vrot.slane %v635_v40, 4  ;;  %v611_v38 = vshrl.u32 %v3900_v59, 16 }
  0x35   : > { %v4106_v39 = vsel %vm4041_vm5, %v591_v18, %v595_v61  ;;  %v643_v56 = vrot.slane %v641_v20, 5  ;;  %v4108_v21 = vrot.slane %v607_v19, 5  ;;  %v617_v31 = vshll.u32 %v3911_v62, 16 }
  0x36   : > { %v1786_v47 = vcombine.low %v4057_v6, %v4106_v39  ;;  %v567_v58 = vrot.slane %v566_v15, 4  ;;  %v638_v53 = vor.u32 %v637_v37, %v4094_v35  ;;  %v613_v45 = vrot.slane %v611_v38, 4 }
  0x37   : > { %918 = vrot.lane.b32.xlu1 %v3990_v9, %s3701_s30  ;;  %916 = vrot.lane.b32.xlu0 %v3997_v1, %s3701_s30  ;;  %v4116_v3 = vsel %vm4041_vm5, %v519_v28, %v523_v11  ;;  %v478_v40 = vshrl.u32 %v3774_v4, 16  ;;  %v481_v61 = vshll.u32 %v3774_v4, 16  ;;  %v454_v18 = vshrl.u32 %v3777_v5, 16 }
  0x38   : > { %v4123_v62 = vsel %vm4041_vm5, %v567_v58, %v571_v25  ;;  %v639_v20 = vrot.slane %v638_v53, 4  ;;  %v614_v19 = vor.u32 %v613_v45, %v4108_v21  ;;  %v619_v15 = vrot.slane %v617_v31, 5 }
  0x39   : > { %v1752_v37 = vcombine.low %v4072_v51, %v4123_v62  ;;  %v480_v11 = vrot.slane %v478_v40, 4  ;;  %v483_v38 = vrot.slane %v481_v61, 5  ;;  %v456_v28 = vrot.slane %v454_v18, 4 }
  0x3a   : > { %v4134_v25 = vsel %vm4041_vm5, %v639_v20, %v643_v56  ;;  %v615_v58 = vrot.slane %v614_v19, 4  ;;  %v457_v53 = vshll.u32 %v3777_v5, 16  ;;  %v526_v31 = vshrl.u32 %v3843_v36, 16 }
  0x3b   : > { %846 = vrot.lane.b32.xlu1 %v3858_v43, %s3699_s29  ;;  %842 = vrot.lane.b32.xlu0 %v3835_v32, %s3699_s29  ;;  %v4139_v43 = vrot.slane %v1786_v47, %v3854_v42  ;;  %v1794_v32 = vcombine.low %v4091_v13, %v4134_v25  ;;  %v484_v45 = vor.u32 %v483_v38, %v480_v11  ;;  %v529_v40 = vshll.u32 %v3843_v36, 16 }
  0x3c   : > { %v4146_v61 = vsel %vm4041_vm5, %v615_v58, %v619_v15  ;;  %v459_v56 = vrot.slane %v457_v53, 5  ;;  %v528_v18 = vrot.slane %v526_v31, 4  ;;  %v502_v20 = vshrl.u32 %v3816_v24, 16 }
  0x3d   : > { %5921 = vst [vmem:[#allocation15_spill] sm:$0xff] %v4139_v43  ;;  %v4154_v47 = vrot.slane %v1752_v37, %v3854_v42  ;;  %v4157_v19 = vrot.slane %v1794_v32, %v3854_v42  ;;  %v1760_v15 = vcombine.low %v4116_v3, %v4146_v61  ;;  %v531_v11 = vrot.slane %v529_v40, 5 }
  0x3e   : > { %v460_v38 = vor.u32 %v459_v56, %v456_v28  ;;  %v504_v58 = vrot.slane %v502_v20, 4  ;;  %v505_v53 = vshll.u32 %v3816_v24, 16  ;;  %v574_v31 = vshrl.u32 %v3890_v54, 16 }
  0x3f   : > { %854 = vrot.lane.b32.xlu1 %v3894_v55, %s3699_s29  ;;  %850 = vrot.lane.b32.xlu0 %v3879_v49, %s3699_s29  ;;  %5922 = vst [vmem:[#allocation16_spill] sm:$0xff] %v4154_v47  ;;  %5923 = vst [vmem:[#allocation17_spill] sm:$0xff] %v4157_v19  ;;  %v5924_v49 = vcombine.low %v3945_v23, %v3983_v63  ;;  %v4174_v40 = vrot.slane %v1760_v15, %v3854_v42  ;;  %v485_v28 = vrot.slane %v484_v45, 4 }
  0x40   : > { %v461_v56 = vrot.slane %v460_v38, 4  ;;  %v532_v20 = vor.u32 %v531_v11, %v528_v18  ;;  %v507_v24 = vrot.slane %v505_v53, 5  ;;  %v5926_v36 = vcombine.high %v3945_v23, %v3983_v63 }
  0x41   : > { %v4167_v55 = vrot.slane %v5924_v49, %v4052_v41  ;;  %5925 = vst [vmem:[#allocation18_spill] sm:$0xff] %v4174_v40  ;;  %v576_v49 = vrot.slane %v574_v31, 4  ;;  %v577_v45 = vshll.u32 %v3890_v54, 16  ;;  %v5928_v18 = vcombine.low %v3978_v52, %v4017_v27 }
  0x42   : > { %v4180_v5 = vrot.slane %v5926_v36, %v4052_v41  ;;  %v533_v23 = vrot.slane %v532_v20, 4  ;;  %v550_v53 = vshrl.u32 %v3866_v46, 16  ;;  %v553_v31 = vshll.u32 %v3866_v46, 16 }
  0x43   : > { %862 = vrot.lane.b32.xlu1 %v3949_v26, %s3699_s29  ;;  %858 = vrot.lane.b32.xlu0 %v3904_v60, %s3699_s29  ;;  %v4193_v11 = vrot.slane %v5928_v18, %v4052_v41  ;;  %v508_v26 = vor.u32 %v507_v24, %v504_v58  ;;  %v5929_v60 = vcombine.high %v3978_v52, %v4017_v27  ;;  %v579_v38 = vrot.slane %v577_v45, 5 }
  0x44   : > { %5927 = vst [vmem:[#allocation19_spill] sm:$0xff] %v4180_v5  ;;  %v4208_v18 = vsel %vm4041_vm5, %v485_v28, %v3871_v48  ;;  %v4213_v24 = vsel %vm4041_vm5, %v461_v56, %v4022_v57  ;;  %v4218_v52 = vsel %vm4041_vm5, %v533_v23, %v4049_v14  ;;  %v622_v27 = vshrl.u32 %v3953_v30, 16 }
  0x45   : > { %v4201_v63 = vrot.slane %v5929_v60, %v4052_v41  ;;  %v580_v48 = vor.u32 %v579_v38, %v576_v49  ;;  %v552_v58 = vrot.slane %v550_v53, 4  ;;  %v555_v28 = vrot.slane %v553_v31, 5 }
  0x46   : > { %v625_v20 = vshll.u32 %v3953_v30, 16  ;;  %v509_v57 = vrot.slane %v508_v26, 4  ;;  %v624_v56 = vrot.slane %v622_v27, 4  ;;  %v598_v45 = vshrl.u32 %v3915_v0, 16 }
  0x47   : > { %870 = vrot.lane.b32.xlu1 %v3990_v9, %s3699_s29  ;;  %866 = vrot.lane.b32.xlu0 %v3962_v29, %s3699_s29  ;;  %v601_v14 = vshll.u32 %v3915_v0, 16  ;;  %v581_v23 = vrot.slane %v580_v48, 4  ;;  %v556_v60 = vor.u32 %v555_v28, %v552_v58  ;;  %v2475_v9 = vshrl.u32 %v4167_v55, 16 }
  0x48   : > { %v627_v15 = vrot.slane %v625_v20, 5  ;;  %v600_v37 = vrot.slane %v598_v45, 4  ;;  %v2476_v29 = vshrl.u32 %v4193_v11, 16  ;;  %v5853_v49 = vmov 0  }
  0x49   : > { %v603_v32 = vrot.slane %v601_v14, 5  ;;  %3169 = vmatprep.mubr.bf16.mxu0 %v5853_v49  ;;  %3318 = vmatprep.mubr.bf16.mxu1 %v5853_v49  ;;  %v4239_v26 = vsel %vm4041_vm5, %v581_v23, %v4075_v17  ;;  %v557_v38 = vrot.slane %v556_v60, 4  ;;  %v4243_v31 = vcombine.high %v4167_v55, %v5853_v49 }
  0x4a   : > { %v628_v53 = vor.u32 %v627_v15, %v624_v56  ;;  %v1174_v27 = vcombine.low %v4208_v18, %v4239_v26  ;;  %v4247_v58 = vpack.i.b16 %v2476_v29, %v2475_v9  ;;  %3648 = vset.pattern.permute.xlu0 %v5853_v49  ;;  %3649 = vset.pattern.permute.xlu1 %v5853_v49  ;;  %v2487_v45 = vshrl.u32 %v4180_v5, 16 }
  0x4b   : > { %844 = vrot.lane.b32.xlu1 %v3862_v44, %s3699_s29  ;;  %840 = vrot.lane.b32.xlu0 %v3839_v33, %s3699_s29  ;;  %v604_v48 = vor.u32 %v603_v32, %v600_v37  ;;  %v4251_v33 = vcombine.high %v4193_v11, %v5853_v49  ;;  %v4257_v44 = vsel %vm4041_vm5, %v509_v57, %v4066_v7  ;;  %v2481_v37 = vshrl.u32 %v4243_v31, 16 }
  0x4c   : > { %v4262_v17 = vsel %vm4041_vm5, %v557_v38, %v4086_v8  ;;  %v629_v15 = vrot.slane %v628_v53, 4  ;;  %v4267_v32 = vrot.slane %v1174_v27, %v3854_v42  ;;  %v4303_v9 = vcombine.high %v4180_v5, %v5853_v49  ;;  %v5936_v38 = vld [vmem:[#allocation14_spill] sm:$0xff] }
  0x4d   : > { %v1140_v28 = vcombine.low %v4213_v24, %v4262_v17  ;;  %v605_v20 = vrot.slane %v604_v48, 4  ;;  %v2482_v57 = vshrl.u32 %v4251_v33, 16  ;;  %v4307_v29 = vcombine.high %v4201_v63, %v5853_v49 }
  0x4e   : > { %5930 = vst [vmem:[#allocation20_spill] sm:$0xff] %v4267_v32  ;;  %v4280_v8 = vsel %vm4041_vm5, %v629_v15, %v4094_v35  ;;  %v2488_v35 = vshrl.u32 %v4201_v63, 16  ;;  %5932 = vst [vmem:[#allocation22_spill] sm:$0xff] %v4303_v9  ;;  %v5934_v10 = vcombine.low %v3956_v34, %v3986_v2  ;;  %v5937_v53 = vcombine.low %v4014_v16, %v5936_v38 }
  0x4f   : > { %852 = vrot.lane.b32.xlu1 %v3942_v22, %s3699_s29  ;;  %848 = vrot.lane.b32.xlu0 %v3883_v50, %s3699_s29  ;;  %v4287_v14 = vrot.slane %v1140_v28, %v3854_v42  ;;  %v1182_v22 = vcombine.low %v4218_v52, %v4280_v8  ;;  %v4294_v50 = vsel %vm4041_vm5, %v605_v20, %v4108_v21  ;;  %v5942_v28 = vld [vmem:[#allocation11_spill] sm:$0xff] }
  0x50   : > { %v1148_v23 = vcombine.low %v4257_v44, %v4294_v50  ;;  %v4299_v60 = vpack.i.b16 %v2482_v57, %v2481_v37  ;;  %5933 = vst [vmem:[#allocation23_spill] sm:$0xff] %v4307_v29  ;;  %v4313_v21 = vrot.slane %v5934_v10, %v4052_v41  ;;  %v4319_v27 = vrot.slane %v5937_v53, %v4052_v41  ;;  %v5941_v37 = vld [vmem:[#allocation12_spill] sm:$0xff] }
  0x51   : > { %5931 = vst [vmem:[#allocation21_spill] sm:$0xff] %v4287_v14  ;;  %v4322_v48 = vrot.slane %v1182_v22, %v3854_v42  ;;  %v4324_v15 = vpack.i.b16 %v2488_v35, %v2487_v45  ;;  %v2493_v10 = vshrl.u32 %v4303_v9, 16  ;;  %v2494_v53 = vshrl.u32 %v4307_v29, 16 }
  0x52   : > { %5935 = vst [vmem:[#allocation24_spill] sm:$0xff] %v4313_v21  ;;  %5938 = vst [vmem:[#allocation14_spill] sm:$0xff] %v4319_v27  ;;  %v4331_v20 = vrot.slane %v1148_v23, %v3854_v42  ;;  %v2451_v57 = vshrl.u32 %v4313_v21, 16  ;;  %v2452_v45 = vshrl.u32 %v4319_v27, 16  ;;  %v5946_v35 = vcombine.high %v3956_v34, %v3986_v2 }
  0x53   : > { %5939 = vst [vmem:[#allocation25_spill] sm:$0xff] %v4322_v48  ;;  %5940 = vst [vmem:[#allocation26_spill] sm:$0xff] %v4324_v15  ;;  %860 = vrot.lane.b32.xlu1 %v5941_v37, %s3699_s29  ;;  %856 = vrot.lane.b32.xlu0 %v5942_v28, %s3699_s29  ;;  %v4345_v37 = vpack.i.b16 %v2494_v53, %v2493_v10  ;;  %v5945_v28 = vld [vmem:[#allocation13_spill] sm:$0xff]  ;;  %v5948_v10 = vcombine.high %v4014_v16, %v5936_v38 }
  0x54   : > { %5943 = vst [vmem:[#allocation12_spill] sm:$0xff] %v4331_v20  ;;  %v4353_v56 = vpack.i.b16 %v2452_v45, %v2451_v57  ;;  %v4359_v7 = vrot.slane %v5946_v35, %v4052_v41  ;;  %v4373_v57 = vcombine.high %v4313_v21, %v5853_v49  ;;  %v4377_v34 = vcombine.high %v4319_v27, %v5853_v49 }
  0x55   : > { %5944 = vst [vmem:[#allocation11_spill] sm:$0xff] %v4345_v37 }
  0x56   : > { %5947 = vst [vmem:[#allocation13_spill] sm:$0xff] %v4359_v7  ;;  %v2463_v38 = vshrl.u32 %v4359_v7, 16  ;;  %v4387_v45 = vcombine.high %v4359_v7, %v5853_v49 }
  0x57   : > { %868 = vrot.lane.b32.xlu1 %v3997_v1, %s3699_s29  ;;  %864 = vrot.lane.b32.xlu0 %v5945_v28, %s3699_s29  ;;  %v4365_v1 = vrot.slane %v5948_v10, %v4052_v41  ;;  %v2457_v28 = vshrl.u32 %v4373_v57, 16  ;;  %v2458_v10 = vshrl.u32 %v4377_v34, 16 }
  0x58   : > { %5950 = vst [vmem:[#allocation28_spill] sm:$0xff] %v4387_v45  ;;  %v2469_v2 = vshrl.u32 %v4387_v45, 16  ;;  %v5966_v45 = vld [vmem:[#allocation6_spill] sm:$0xff] }
  0x59   : > { %5949 = vst [vmem:[#allocation27_spill] sm:$0xff] %v4365_v1  ;;  %v2464_v53 = vshrl.u32 %v4365_v1, 16  ;;  %v4395_v35 = vcombine.high %v4365_v1, %v5853_v49  ;;  %v4405_v22 = vpack.i.b16 %v2458_v10, %v2457_v28  ;;  %v5961_v10 = vld [vmem:[#allocation5_spill] sm:$0xff] }
  0x5b   : > { %667 = vrot.lane.b32.xlu1 %v4057_v6, %s3699_s29  ;;  %663 = vrot.lane.b32.xlu0 %v4072_v51, %s3699_s29  ;;  %5951 = vst [vmem:[#allocation29_spill] sm:$0xff] %v4395_v35  ;;  %v4399_v16 = vpack.i.b16 %v2464_v53, %v2463_v38  ;;  %v2470_v23 = vshrl.u32 %v4395_v35, 16  ;;  %v5959_v53 = vld [vmem:[#allocation4_spill] sm:$0xff] }
  0x5d   : > { %5952 = vst [vmem:[#allocation30_spill] sm:$0xff] %v4399_v16  ;;  %v4411_v49 = vpack.i.b16 %v2470_v23, %v2469_v2  ;;  %v5958_v2 = vld [vmem:[#allocation3_spill] sm:$0xff] }
  0x5f   : > { %675 = vrot.lane.b32.xlu1 %v4091_v13, %s3699_s29  ;;  %671 = vrot.lane.b32.xlu0 %v4116_v3, %s3699_s29  ;;  %5953 = vst [vmem:[#allocation31_spill] sm:$0xff] %v4411_v49  ;;  %v5965_v49 = vld [vmem:[#allocation8_spill] sm:$0xff] }
  0x63   : > { %683 = vrot.lane.b32.xlu1 %v4106_v39, %s3699_s29  ;;  %679 = vrot.lane.b32.xlu0 %v4123_v62, %s3699_s29 }
  0x67   : > { %691 = vrot.lane.b32.xlu1 %v4134_v25, %s3699_s29  ;;  %687 = vrot.lane.b32.xlu0 %v4146_v61, %s3699_s29 }
  0x6b   : > { %715 = vrot.lane.b32.xlu1 %v4057_v6, %s3701_s30  ;;  %711 = vrot.lane.b32.xlu0 %v4072_v51, %s3701_s30  ;;  %v5963_v6 = vld [vmem:[#allocation9_spill] sm:$0xff] }
  0x6f   : > { %723 = vrot.lane.b32.xlu1 %v4091_v13, %s3701_s30  ;;  %719 = vrot.lane.b32.xlu0 %v4116_v3, %s3701_s30 }
  0x73   : > { %731 = vrot.lane.b32.xlu1 %v4106_v39, %s3701_s30  ;;  %727 = vrot.lane.b32.xlu0 %v4123_v62, %s3701_s30 }
  0x77   : > { %739 = vrot.lane.b32.xlu1 %v4134_v25, %s3701_s30  ;;  %735 = vrot.lane.b32.xlu0 %v4146_v61, %s3701_s30 }
  0x7b   : > { %665 = vrot.lane.b32.xlu1 %v4208_v18, %s3699_s29  ;;  %661 = vrot.lane.b32.xlu0 %v4213_v24, %s3699_s29 }
  0x7f   : > { %673 = vrot.lane.b32.xlu1 %v4218_v52, %s3699_s29  ;;  %669 = vrot.lane.b32.xlu0 %v4257_v44, %s3699_s29 }
  0x83   : > { %681 = vrot.lane.b32.xlu1 %v4239_v26, %s3699_s29  ;;  %677 = vrot.lane.b32.xlu0 %v4262_v17, %s3699_s29 }
  0x85   : > { %v4449_v51 = vpop.permute.xlu1 %358  ;;  %v4451_v13 = vpop.permute.xlu0 %354 }
  0x86   : > { %5954 = vst [vmem:[#allocation32_spill] sm:$0xff] %v4449_v51  ;;  %5955 = vst [vmem:[#allocation33_spill] sm:$0xff] %v4451_v13  ;;  %v5964_v51 = vld [vmem:[#allocation2_spill] sm:$0xff] }
  0x87   : > { %689 = vrot.lane.b32.xlu1 %v4280_v8, %s3699_s29  ;;  %685 = vrot.lane.b32.xlu0 %v4294_v50, %s3699_s29 }
  0x89   : > { %v4457_v39 = vpop.permute.xlu1 %360  ;;  %v4459_v3 = vpop.permute.xlu0 %356 }
  0x8a   : > { %5956 = vst [vmem:[#allocation34_spill] sm:$0xff] %v4457_v39  ;;  %5957 = vst [vmem:[#allocation35_spill] sm:$0xff] %v4459_v3 }
  0x8b   : > { %713 = vrot.lane.b32.xlu1 %v4208_v18, %s3701_s30  ;;  %709 = vrot.lane.b32.xlu0 %v4213_v24, %s3701_s30 }
  0x8d   : > { %v4465_v62 = vpop.permute.xlu1 %890  ;;  %v4467_v25 = vpop.permute.xlu0 %888 }
  0x8f   : > { %721 = vrot.lane.b32.xlu1 %v4218_v52, %s3701_s30  ;;  %717 = vrot.lane.b32.xlu0 %v4257_v44, %s3701_s30 }
  0x91   : > { %v4473_v61 = vpop.permute.xlu1 %894  ;;  %v4475_v23 = vpop.permute.xlu0 %892 }
  0x93   : > { %729 = vrot.lane.b32.xlu1 %v4239_v26, %s3701_s30  ;;  %725 = vrot.lane.b32.xlu0 %v4262_v17, %s3701_s30  ;;  %v5960_v17 = vld [vmem:[#allocation7_spill] sm:$0xff] }
  0x95   : > { %v899_v18 = vpop.permute.xlu1 %898  ;;  %v897_v24 = vpop.permute.xlu0 %896 }
  0x97   : > { %737 = vrot.lane.b32.xlu1 %v4280_v8, %s3701_s30  ;;  %733 = vrot.lane.b32.xlu0 %v4294_v50, %s3701_s30  ;;  %v5962_v50 = vld [vmem:[#allocation10_spill] sm:$0xff] }
  0x99   : > { %v903_v52 = vpop.permute.xlu1 %902  ;;  %v901_v44 = vpop.permute.xlu0 %900 }
  0x9b   : > { %408 = vrot.lane.b32.xlu1 %v5958_v2, %s3701_s30  ;;  %404 = vrot.lane.b32.xlu0 %v5959_v53, %s3701_s30 }
  0x9d   : > { %v907_v26 = vpop.permute.xlu1 %906  ;;  %v905_v28 = vpop.permute.xlu0 %904 }
  0x9e   : > { %v2092_v15 = vcombine.low %v4465_v62, %v907_v26  ;;  %v1480_v7 = vcombine.low %v4467_v25, %v905_v28  ;;  %v5969_v25 = vcombine.high %v4287_v14, %v4331_v20 }
  0x9f   : > { %416 = vrot.lane.b32.xlu1 %v5960_v17, %s3701_s30  ;;  %412 = vrot.lane.b32.xlu0 %v5961_v10, %s3701_s30 }
  0xa1   : > { %v911_v8 = vpop.permute.xlu1 %910  ;;  %v909_v36 = vpop.permute.xlu0 %908 }
  0xa2   : > { %v2126_v5 = vcombine.low %v4473_v61, %v911_v8 }
  0xa3   : > { %424 = vrot.lane.b32.xlu1 %v5962_v50, %s3701_s30  ;;  %420 = vrot.lane.b32.xlu0 %v5963_v6, %s3701_s30 }
  0xa4   : > { %v4574_v26 = vrot.slane %v2126_v5, %v3854_v42 }
  0xa5   : > { %v915_v2 = vpop.permute.xlu1 %914  ;;  %v913_v38 = vpop.permute.xlu0 %912 }
  0xa6   : > { %v2100_v16 = vcombine.low %v899_v18, %v915_v2  ;;  %v1488_v9 = vcombine.low %v897_v24, %v913_v38  ;;  %v1514_v18 = vcombine.low %v4475_v23, %v909_v36  ;;  %v4555_v36 = vrot.slane %v5969_v25, %v4052_v41 }
  0xa7   : > { %432 = vrot.lane.b32.xlu1 %v3927_v12, %s3701_s30  ;;  %428 = vrot.lane.b32.xlu0 %v3900_v59, %s3701_s30  ;;  %v4565_v23 = vrot.slane %v2092_v15, %v3854_v42 }
  0xa8   : > { %v4538_v38 = vrot.slane %v2100_v16, %v3854_v42  ;;  %v4541_v24 = vrot.slane %v1488_v9, %v3854_v42  ;;  %5970 = vst [vmem:[#allocation4_spill] sm:$0xff] %v4555_v36 }
  0xa9   : > { %v919_v53 = vpop.permute.xlu1 %918  ;;  %v917_v13 = vpop.permute.xlu0 %916 }
  0xaa   : > { %v2134_v29 = vcombine.low %v903_v52, %v919_v53  ;;  %v1522_v1 = vcombine.low %v901_v44, %v917_v13  ;;  %v5967_v13 = vcombine.high %v4267_v32, %v4322_v48  ;;  %v4568_v52 = vrot.slane %v1480_v7, %v3854_v42 }
  0xab   : > { %406 = vrot.lane.b32.xlu1 %v3774_v4, %s3701_s30  ;;  %402 = vrot.lane.b32.xlu0 %v5964_v51, %s3701_s30  ;;  %v2108_v28 = vcombine.low %v4565_v23, %v4538_v38 }
  0xac   : > { %v4549_v62 = vrot.slane %v5967_v13, %v4052_v41  ;;  %v4558_v16 = vrot.slane %v2134_v29, %v3854_v42  ;;  %v4571_v44 = vrot.slane %v1522_v1, %v3854_v42  ;;  %v4579_v29 = vrot.slane %v1514_v18, %v3854_v42 }
  0xad   : > { %v4505_v3 = vpop.permute.xlu1 %846  ;;  %v4507_v39 = vpop.permute.xlu0 %842  ;;  %v1496_v15 = vcombine.low %v4568_v52, %v4541_v24  ;;  %v2116_v8 = vrot.slane %v2108_v28, %v4052_v41 }
  0xae   : > { %5968 = vst [vmem:[#allocation3_spill] sm:$0xff] %v4549_v62  ;;  %v2142_v7 = vcombine.low %v4574_v26, %v4558_v16 }
  0xaf   : > { %414 = vrot.lane.b32.xlu1 %v5965_v49, %s3701_s30  ;;  %410 = vrot.lane.b32.xlu0 %v5966_v45, %s3701_s30 }
  0xb0   : > { %v2150_v53 = vrot.slane %v2142_v7, %v4052_v41 }
  0xb1   : > { %v4513_v35 = vpop.permute.xlu1 %854  ;;  %v4515_v37 = vpop.permute.xlu0 %850 }
  0xb3   : > { %422 = vrot.lane.b32.xlu1 %v3890_v54, %s3701_s30  ;;  %418 = vrot.lane.b32.xlu0 %v3866_v46, %s3701_s30 }
  0xb5   : > { %v4521_v4 = vpop.permute.xlu1 %862  ;;  %v4523_v51 = vpop.permute.xlu0 %858 }
  0xb7   : > { %430 = vrot.lane.b32.xlu1 %v3953_v30, %s3701_s30  ;;  %426 = vrot.lane.b32.xlu0 %v3915_v0, %s3701_s30  ;;  %s3609_s30 = sshll.u32 %s6102_s21, 2 }
  0xb9   : > { %v871_v21 = vpop.permute.xlu1 %870  ;;  %v4529_v27 = vpop.permute.xlu0 %866 }
  0xba   : > { %v2032_v7 = vcombine.low %v4515_v37, %v4529_v27  ;;  %v2058_v37 = vcombine.low %v4505_v3, %v4521_v4  ;;  %v2319_v3 = vshrl.u32 %v4555_v36, 16 }
  0xbb   : > { %368 = vrot.lane.b32.xlu1 %v5960_v17, %s3699_s29  ;;  %364 = vrot.lane.b32.xlu0 %v5961_v10, %s3699_s29  ;;  %v1530_v10 = vcombine.low %v4579_v29, %v4571_v44  ;;  %v5974_v17 = vmov 0  }
  0xbc   : > { %v2158_v32 = vcombine.high %v2150_v53, %v5974_v17  ;;  %v4657_v4 = vrot.slane %v2032_v7, %v3854_v42 }
  0xbd   : > { %v4560_v9 = vpop.permute.xlu1 %844  ;;  %v4562_v61 = vpop.permute.xlu0 %840  ;;  %v4619_v28 = vrot.slane %v1530_v10, %v4052_v41  ;;  %v4632_v10 = vcombine.high %v2116_v8, %v5974_v17 }
  0xbf   : > { %376 = vrot.lane.b32.xlu1 %v5962_v50, %s3699_s29  ;;  %372 = vrot.lane.b32.xlu0 %v5963_v6, %s3699_s29  ;;  %v4599_v50 = vrot.slane %v1496_v15, %v4052_v41  ;;  %v5971_v6 = vcombine.high %v4154_v47, %v4174_v40  ;;  %v2066_v15 = vcombine.low %v4513_v35, %v871_v21  ;;  %v2572_v35 = vshrl.u32 %v2150_v53, 16 }
  0xc0   : > { %v2548_v14 = vshrl.u32 %v4619_v28, 16  ;;  %v1546_v47 = vcombine.high %v4619_v28, %v5974_v17 }
  0xc1   : > { %v4589_v5 = vpop.permute.xlu1 %852  ;;  %v849_v1 = vpop.permute.xlu0 %848  ;;  %v4607_v2 = vrot.slane %v5971_v6, %v4052_v41  ;;  %v2571_v6 = vshrl.u32 %v2116_v8, 16 }
  0xc3   : > { %384 = vrot.lane.b32.xlu1 %v3927_v12, %s3699_s29  ;;  %380 = vrot.lane.b32.xlu0 %v3900_v59, %s3699_s29  ;;  %5972 = vst [vmem:[#allocation7_spill] sm:$0xff] %v4607_v2  ;;  %v5973_v12 = vcombine.high %v4139_v43, %v4157_v19  ;;  %v2143_v59 = vcombine.high %v4574_v26, %v4558_v16  ;;  %v2343_v27 = vshrl.u32 %v4607_v2, 16 }
  0xc4   : > { %v1531_v16 = vcombine.high %v4579_v29, %v4571_v44  ;;  %v4650_v26 = vrot.slane %v2066_v15, %v3854_v42  ;;  %v2320_v44 = vshrl.u32 %v4549_v62, 16  ;;  %v2573_v40 = vpack.i.b16 %v2572_v35, %v2571_v6 }
  0xc5   : > { %v4610_v18 = vpop.permute.xlu1 %860  ;;  %v857_v13 = vpop.permute.xlu0 %856  ;;  %v4616_v25 = vrot.slane %v5973_v12, %v4052_v41  ;;  %v2547_v12 = vshrl.u32 %v4599_v50, 16  ;;  %v2576_v6 = vpack.i.b16 %v2158_v32, %v4632_v10 }
  0xc6   : > { %v1446_v7 = vcombine.low %v4560_v9, %v4610_v18 }
  0xc7   : > { %366 = vrot.lane.b32.xlu1 %v5965_v49, %s3699_s29  ;;  %362 = vrot.lane.b32.xlu0 %v5966_v45, %s3699_s29  ;;  %v4638_v49 = vcombine.high %v4599_v50, %v5974_v17  ;;  %v2024_v45 = vcombine.low %v4507_v39, %v4523_v51  ;;  %v2344_v48 = vshrl.u32 %v4616_v25, 16  ;;  %v4691_v35 = vcombine.high %v4616_v25, %v5974_v17 }
  0xc9   : > { %v869_v20 = vpop.permute.xlu1 %868  ;;  %v865_v21 = vpop.permute.xlu0 %864  ;;  %v4661_v51 = vpack.i.b16 %v2344_v48, %v2343_v27  ;;  %v4679_v48 = vrot.slane %v2024_v45, %v3854_v42  ;;  %v4711_v45 = vpack.i.b16 %v2150_v53, %v2116_v8  ;;  %v2553_v8 = vshrl.u32 %v4638_v49, 16 }
  0xca   : > { %v1420_v39 = vcombine.low %v849_v1, %v865_v21  ;;  %v1454_v29 = vcombine.low %v4589_v5, %v869_v20  ;;  %v4673_v1 = vcombine.high %v4607_v2, %v5974_v17  ;;  %v1412_v20 = vcombine.low %v4562_v61, %v857_v13 }
  0xcb   : > { %374 = vrot.lane.b32.xlu1 %v3890_v54, %s3699_s29  ;;  %370 = vrot.lane.b32.xlu0 %v3866_v46, %s3699_s29  ;;  %5975 = vst [vmem:[#allocation5_spill] sm:$0xff] %v4661_v51  ;;  %v4676_v46 = vrot.slane %v2058_v37, %v3854_v42  ;;  %v2549_v5 = vpack.i.b16 %v2548_v14, %v2547_v12  ;;  %5978 = vst [vmem:[#allocation2_spill] sm:$0xff] %v4711_v45 }
  0xcc   : > { %5976 = vst [vmem:[#allocation10_spill] sm:$0xff] %v4673_v1  ;;  %v4687_v21 = vpack.i.b16 %v2320_v44, %v2319_v3  ;;  %v2040_v14 = vcombine.low %v4679_v48, %v4657_v4  ;;  %v4698_v61 = vrot.slane %v1420_v39, %v3854_v42  ;;  %v4703_v9 = vrot.slane %v1454_v29, %v3854_v42 }
  0xcd   : > { %v4665_v15 = vpop.permute.xlu1 %667  ;;  %v4667_v54 = vpop.permute.xlu0 %663  ;;  %v2074_v27 = vcombine.low %v4676_v46, %v4650_v26  ;;  %v3554_v12 = vcombine.low %v2573_v40, %v2573_v40  ;;  %v4714_v3 = vrot.slane %v1412_v20, %v3854_v42  ;;  %v3514_v39 = vcombine.low %v2549_v5, %v2549_v5 }
  0xce   : > { %5977 = vst [vmem:[#allocation9_spill] sm:$0xff] %v4687_v21  ;;  %v1497_v44 = vcombine.high %v4568_v52, %v4541_v24  ;;  %v4720_v29 = vrot.slane %v1446_v7, %v3854_v42  ;;  %v2577_v40 = vshrl.u32 %v4632_v10, 16  ;;  %v2157_v53 = vrot.slane %v2143_v59, %v4052_v41 }
  0xcf   : > { %382 = vrot.lane.b32.xlu1 %v3953_v30, %s3699_s29  ;;  %378 = vrot.lane.b32.xlu0 %v3915_v0, %s3699_s29  ;;  %v2578_v30 = vshrl.u32 %v2158_v32, 16  ;;  %v2552_v0 = vpack.i.b16 %v1546_v47, %v4638_v49  ;;  %v2554_v32 = vshrl.u32 %v1546_v47, 16  ;;  %v4727_v20 = vrot.slane %v2074_v27, %v4052_v41  ;;  %s301_s29 = scalar_lea.vmem %s5831_s5, %s3608_s26 }
  0xd0   : > { %v4730_v47 = vrot.slane %v2040_v14, %v4052_v41  ;;  %v1428_v24 = vcombine.low %v4714_v3, %v4698_v61  ;;  %v1545_v52 = vrot.slane %v1531_v16, %v4052_v41  ;;  %v1462_v10 = vcombine.low %v4720_v29, %v4703_v9 }
  0xd1   : > { %v4705_v18 = vpop.permute.xlu1 %675  ;;  %v4707_v13 = vpop.permute.xlu0 %671  ;;  %v3559_v59 = vcombine.low %v2576_v6, %v2576_v6  ;;  %v2579_v7 = vpack.i.b16 %v2578_v30, %v2577_v40  ;;  %v5979_v27 = vcombine.high %v4565_v23, %v4538_v38  ;;  %v2555_v37 = vpack.i.b16 %v2554_v32, %v2553_v8 }
  0xd2   : > { %v4749_v16 = vrot.slane %v1428_v24, %v4052_v41  ;;  %v2523_v6 = vshrl.u32 %v4730_v47, 16  ;;  %v2524_v30 = vshrl.u32 %v4727_v20, 16  ;;  %v4755_v38 = vrot.slane %v1462_v10, %v4052_v41 }
  0xd3   : > { %2810 = vrot.lane.b32.xlu1 %v3554_v12, %s3703_s7  ;;  %2628 = vrot.lane.b32.xlu0 %v3514_v39, %s3703_s7  ;;  %v2123_v14 = vrot.slane %v5979_v27, %v4052_v41  ;;  %v3519_v12 = vcombine.low %v2552_v0, %v2552_v0  ;;  %v1511_v39 = vrot.slane %v1497_v44, %v4052_v41  ;;  %v2560_v24 = vshrl.u32 %v1545_v52, 16 }
  0xd4   : > { %v3564_v32 = vcombine.low %v2579_v7, %v2579_v7  ;;  %v4763_v40 = vpack.i.b16 %v4619_v28, %v4599_v50  ;;  %v3524_v8 = vcombine.low %v2555_v37, %v2555_v37  ;;  %v4771_v10 = vcombine.high %v4549_v62, %v5974_v17 }
  0xd5   : > { %v4738_v5 = vpop.permute.xlu1 %683  ;;  %v4740_v49 = vpop.permute.xlu0 %679  ;;  %v2582_v45 = vpack.i.b16 %v2157_v53, %v2123_v14  ;;  %v2558_v44 = vpack.i.b16 %v1545_v52, %v1511_v39  ;;  %v2559_v27 = vshrl.u32 %v1511_v39, 16  ;;  %v2583_v7 = vshrl.u32 %v2123_v14, 16 }
  0xd6   : > { %5980 = vst [vmem:[#allocation8_spill] sm:$0xff] %v4763_v40  ;;  %v2525_v28 = vpack.i.b16 %v2524_v30, %v2523_v6  ;;  %v2499_v37 = vshrl.u32 %v4749_v16, 16  ;;  %v2350_v62 = vshrl.u32 %v4691_v35, 16  ;;  %v1547_v30 = vcombine.high %v1545_v52, %v5974_v17 }
  0xd7   : > { %2834 = vrot.lane.b32.xlu1 %v3559_v59, %s3704_s8  ;;  %2652 = vrot.lane.b32.xlu0 %v3519_v12, %s3704_s8  ;;  %v4767_v59 = vcombine.high %v4555_v36, %v5974_v17  ;;  %v2584_v12 = vshrl.u32 %v2157_v53, 16  ;;  %v3569_v50 = vcombine.low %v2582_v45, %v2582_v45  ;;  %v2500_v36 = vshrl.u32 %v4755_v38, 16 }
  0xd8   : > { %v3529_v45 = vcombine.low %v2558_v44, %v2558_v44  ;;  %v2561_v6 = vpack.i.b16 %v2560_v24, %v2559_v27  ;;  %v4789_v19 = vcombine.high %v2157_v53, %v5974_v17  ;;  %v2090_v44 = vcombine.high %v4727_v20, %v5974_v17 }
  0xd9   : > { %v4757_v23 = vpop.permute.xlu1 %691  ;;  %v4759_v0 = vpop.permute.xlu0 %687  ;;  %v2585_v40 = vpack.i.b16 %v2584_v12, %v2583_v7  ;;  %v1513_v24 = vcombine.high %v1511_v39, %v5974_v17  ;;  %v4801_v52 = vcombine.high %v2123_v14, %v5974_v17  ;;  %v2501_v7 = vpack.i.b16 %v2500_v36, %v2499_v37 }
  0xda   : > { %v2041_v39 = vcombine.high %v4679_v48, %v4657_v4  ;;  %v1478_v4 = vcombine.high %v4755_v38, %v5974_v17 }
  0xdb   : > { %2858 = vrot.lane.b32.xlu1 %v3564_v32, %s3705_s9  ;;  %2676 = vrot.lane.b32.xlu0 %v3524_v8, %s3705_s9  ;;  %v2349_v32 = vshrl.u32 %v4673_v1, 16  ;;  %v2056_v1 = vcombine.high %v4730_v47, %v5974_v17  ;;  %v2564_v12 = vpack.i.b16 %v1547_v30, %v1513_v24  ;;  %v2075_v8 = vcombine.high %v4676_v46, %v4650_v26 }
  0xdc   : > { %v3574_v14 = vcombine.low %v2585_v40, %v2585_v40  ;;  %v2565_v37 = vshrl.u32 %v1513_v24, 16  ;;  %v1444_v26 = vcombine.high %v4749_v16, %v5974_v17  ;;  %v2589_v46 = vshrl.u32 %v4801_v52, 16 }
  0xdd   : > { %v4778_v21 = vpop.permute.xlu1 %715  ;;  %v4780_v51 = vpop.permute.xlu0 %711  ;;  %v4792_v43 = vpack.i.b16 %v2350_v62, %v2349_v32  ;;  %v3534_v62 = vcombine.low %v2561_v6, %v2561_v6  ;;  %v4806_v32 = vpack.i.b16 %v4789_v19, %v4801_v52  ;;  %v2529_v36 = vshrl.u32 %v2056_v1, 16 }
  0xde   : > { %v3539_v48 = vcombine.low %v2564_v12, %v2564_v12  ;;  %v1862_v24 = vcombine.low %v4705_v18, %v4757_v23  ;;  %v1828_v52 = vcombine.low %v4707_v13, %v4759_v0  ;;  %v2325_v13 = vshrl.u32 %v4767_v59, 16 }
  0xdf   : > { %2882 = vrot.lane.b32.xlu1 %v3569_v50, %s3706_s10  ;;  %2700 = vrot.lane.b32.xlu0 %v3529_v45, %s3706_s10  ;;  %v3553_v50 = vcombine.low %v4247_v58, %v2525_v28  ;;  %v2566_v45 = vshrl.u32 %v1547_v30, 16  ;;  %v2528_v58 = vpack.i.b16 %v2090_v44, %v2056_v1  ;;  %v2530_v28 = vshrl.u32 %v2090_v44, 16 }
  0xe0   : > { %v3513_v30 = vcombine.low %v4353_v56, %v2501_v7  ;;  %v3579_v40 = vcombine.low %v4806_v32, %v4806_v32  ;;  %v2590_v1 = vshrl.u32 %v4789_v19, 16  ;;  %v4826_v44 = vrot.slane %v2075_v8, %v4052_v41 }
  0xe1   : > { %v724_v53 = vpop.permute.xlu1 %723  ;;  %v720_v27 = vpop.permute.xlu0 %719  ;;  %v4829_v56 = vrot.slane %v2041_v39, %v4052_v41  ;;  %v5981_v19 = vpack.i.b16 %v4251_v33, %v4243_v31  ;;  %v2531_v12 = vpack.i.b16 %v2530_v28, %v2529_v36  ;;  %v1463_v32 = vcombine.high %v4720_v29, %v4703_v9 }
  0xe2   : > { %v2326_v0 = vshrl.u32 %v4771_v10, 16  ;;  %v1429_v33 = vcombine.high %v4714_v3, %v4698_v61  ;;  %v4853_v9 = vrot.slane %v1862_v24, %v3854_v42  ;;  %v4856_v29 = vrot.slane %v1828_v52, %v3854_v42 }
  0xe3   : > { %2808 = vrot.lane.b32.xlu1 %v3553_v50, %s3703_s7  ;;  %2724 = vrot.lane.b32.xlu0 %v3534_v62, %s3707_s11  ;;  %v4822_v50 = vpack.i.b16 %v2566_v45, %v2565_v37  ;;  %v3558_v8 = vcombine.low %v5981_v19, %v2528_v58  ;;  %v2504_v45 = vpack.i.b16 %v1478_v4, %v1444_v26  ;;  %v2506_v58 = vshrl.u32 %v1478_v4, 16 }
  0xe4   : > { %v4859_v39 = vpack.i.b16 %v2326_v0, %v2325_v13  ;;  %v2522_v36 = vpack.i.b16 %v4727_v20, %v4730_v47  ;;  %v3563_v24 = vcombine.low %v4299_v60, %v2531_v12  ;;  %v2057_v19 = vcombine.high %v4829_v56, %v5974_v17  ;;  %v5988_v0 = vld [vmem:[#allocation19_spill] sm:$0xff] }
  0xe5   : > { %v732_v6 = vpop.permute.xlu1 %731  ;;  %v728_v2 = vpop.permute.xlu0 %727  ;;  %v3544_v4 = vcombine.low %v4822_v50, %v4822_v50 }
  0xe6   : > { %v1922_v7 = vcombine.low %v4778_v21, %v732_v6  ;;  %v1888_v62 = vcombine.low %v4780_v51, %v728_v2  ;;  %v1854_v2 = vcombine.low %v4665_v15, %v4738_v5  ;;  %v1820_v51 = vcombine.low %v4667_v54, %v4740_v49  ;;  %5982 = vst [vmem:[#allocation6_spill] sm:$0xff] %v4859_v39 }
  0xe7   : > { %2626 = vrot.lane.b32.xlu1 %v3513_v30, %s3703_s7  ;;  %2906 = vrot.lane.b32.xlu0 %v3574_v14, %s3707_s11  ;;  %v2505_v14 = vshrl.u32 %v1444_v26, 16 }
  0xe8   : > { %v4862_v15 = vrot.slane %v1922_v7, %v3854_v42  ;;  %v4865_v54 = vrot.slane %v1888_v62, %v3854_v42  ;;  %v4884_v28 = vrot.slane %v1854_v2, %v3854_v42  ;;  %v4887_v37 = vrot.slane %v1820_v51, %v3854_v42 }
  0xe9   : > { %v740_v18 = vpop.permute.xlu1 %739  ;;  %v736_v23 = vpop.permute.xlu0 %735  ;;  %v2507_v52 = vpack.i.b16 %v2506_v58, %v2505_v14  ;;  %v2535_v7 = vshrl.u32 %v4829_v56, 16  ;;  %v2536_v62 = vshrl.u32 %v4826_v44, 16  ;;  %v5989_v2 = vpack.i.b16 %v4201_v63, %v5988_v0 }
  0xea   : > { %v1930_v21 = vcombine.low %v724_v53, %v740_v18  ;;  %v1896_v31 = vcombine.low %v720_v27, %v736_v23  ;;  %v5983_v53 = vpack.i.b16 %v4377_v34, %v4373_v57  ;;  %v2591_v57 = vpack.i.b16 %v2590_v1, %v2589_v46 }
  0xeb   : > { %2832 = vrot.lane.b32.xlu1 %v3558_v8, %s3704_s8  ;;  %2748 = vrot.lane.b32.xlu0 %v3539_v48, %s3708_s12  ;;  %v5984_v34 = vpack.i.b16 %v4193_v11, %v4167_v55  ;;  %v1870_v20 = vcombine.low %v4884_v28, %v4853_v9  ;;  %v1836_v47 = vcombine.low %v4887_v37, %v4856_v29  ;;  %v2541_v14 = vshrl.u32 %v2057_v19, 16 }
  0xec   : > { %v4868_v5 = vrot.slane %v1930_v21, %v3854_v42  ;;  %v4871_v61 = vrot.slane %v1896_v31, %v3854_v42  ;;  %v3518_v27 = vcombine.low %v5983_v53, %v2504_v45  ;;  %v2534_v48 = vpack.i.b16 %v4826_v44, %v4829_v56 }
  0xed   : > { %v4874_v3 = vpop.permute.xlu1 %665  ;;  %v4876_v49 = vpop.permute.xlu0 %661  ;;  %v4897_v26 = vcombine.low %v5984_v34, %v2522_v36  ;;  %v4909_v46 = vrot.slane %v1463_v32, %v4052_v41  ;;  %v4912_v55 = vrot.slane %v1429_v33, %v4052_v41  ;;  %v2091_v8 = vcombine.high %v4826_v44, %v5974_v17 }
  0xee   : > { %v1938_v6 = vcombine.low %v4862_v15, %v4868_v5  ;;  %v1904_v30 = vcombine.low %v4865_v54, %v4871_v61  ;;  %v4933_v60 = vrot.slane %v1870_v20, %v4052_v41  ;;  %v4936_v12 = vrot.slane %v1836_v47, %v4052_v41 }
  0xef   : > { %2650 = vrot.lane.b32.xlu1 %v3518_v27, %s3704_s8  ;;  %5985 = vst [vmem:[#allocation36_spill] sm:$0xff] %v4897_v26  ;;  %2930 = vrot.lane.b32.xlu0 %v3579_v40, %s3708_s12  ;;  %v3584_v32 = vcombine.low %v2591_v57, %v2591_v57  ;;  %v3523_v45 = vcombine.low %v4405_v22, %v2507_v52  ;;  %v2511_v36 = vshrl.u32 %v4912_v55, 16  ;;  %v2512_v34 = vshrl.u32 %v4909_v46, 16 }
  0xf0   : > { %v4920_v40 = vrot.slane %v1938_v6, %v4052_v41  ;;  %v4923_v50 = vrot.slane %v1904_v30, %v4052_v41  ;;  %v2510_v56 = vpack.i.b16 %v4909_v46, %v4912_v55  ;;  %v4948_v44 = vcombine.high %v4912_v55, %v5974_v17 }
  0xf1   : > { %v4914_v11 = vpop.permute.xlu1 %673  ;;  %v4916_v1 = vpop.permute.xlu0 %669  ;;  %v4952_v13 = vcombine.high %v4909_v46, %v5974_v17  ;;  %v3568_v51 = vcombine.low %v5989_v2, %v2534_v48  ;;  %v2537_v21 = vpack.i.b16 %v2536_v62, %v2535_v7  ;;  %v1871_v33 = vcombine.high %v4884_v28, %v4853_v9  ;;  %v3658_v48 = vld [vmem:[%s3769_s28 + $0x4] sm:$0xf]  ;;  %v3660_v7 = vld [vmem:[%s3769_s28 + $0x1c] sm:$0xf]  ;;  %v3661_v62 = vld [vmem:[%s3769_s28 + $0x4c] sm:$0xf] }
  0xf2   : > { %5986 = vst [vmem:[#allocation37_spill] sm:$0xff] %v4920_v40  ;;  %5987 = vst [vmem:[#allocation38_spill] sm:$0xff] %v4923_v50  ;;  %v2427_v31 = vshrl.u32 %v4923_v50, 16  ;;  %v2428_v22 = vshrl.u32 %v4920_v40, 16  ;;  %v1837_v53 = vcombine.high %v4887_v37, %v4856_v29  ;;  %v2540_v27 = vpack.i.b16 %v2091_v8, %v2057_v19  ;;  %v5990_v29 = vld [vmem:[#allocation27_spill] sm:$0xff]  ;;  %v5991_v37 = vld [vmem:[#allocation13_spill] sm:$0xff] }
  0xf3   : > { %2856 = vrot.lane.b32.xlu1 %v3563_v24, %s3705_s9  ;;  %2772 = vrot.lane.b32.xlu0 %v3544_v4, %s3709_s13  ;;  %v2379_v63 = vshrl.u32 %v4936_v12, 16  ;;  %v2380_v58 = vshrl.u32 %v4933_v60, 16  ;;  %v2542_v9 = vshrl.u32 %v2091_v8, 16  ;;  %v5992_v30 = vpack.i.b16 %v5990_v29, %v5991_v37  ;;  %v3659_v24 = vld [vmem:[%s3769_s28 + $0x34] sm:$0xf]  ;;  %v5993_v8 = vld [vmem:[#allocation15_spill] sm:$0xff] }
  0xf4   : > { %v2517_v20 = vshrl.u32 %v4948_v44, 16  ;;  %v2518_v47 = vshrl.u32 %v4952_v13, 16  ;;  %v2429_v4 = vpack.i.b16 %v2428_v22, %v2427_v31  ;;  %v1548_v52 = vcombine.low %v3658_v48, %v3659_v24  ;;  %v5997_v2 = vld [vmem:[#allocation16_spill] sm:$0xff]  ;;  %v5998_v31 = vld [vmem:[#allocation18_spill] sm:$0xff] }
  0xf5   : > { %v4939_v18 = vpop.permute.xlu1 %681  ;;  %v4941_v23 = vpop.permute.xlu0 %677  ;;  %v3528_v57 = vcombine.low %v5992_v30, %v2510_v56  ;;  %v1556_v55 = vcombine.low %v3660_v7, %v3661_v62  ;;  %v2498_v19 = vpack.i.b16 %v4755_v38, %v4749_v16  ;;  %v4987_v46 = vrot.slane %v1871_v33, %v4052_v41  ;;  %v6001_v16 = vld [vmem:[#allocation26_spill] sm:$0xff]  ;;  %v6003_v33 = vld [vmem:[#allocation24_spill] sm:$0xff]  ;;  %v6006_v62 = vld [vmem:[#allocation23_spill] sm:$0xff] }
  0xf6   : > { %v4990_v0 = vrot.slane %v1837_v53, %v4052_v41  ;;  %v5999_v22 = vcombine.low %v5997_v2, %v5998_v31  ;;  %v3573_v38 = vcombine.low %v6001_v16, %v2537_v21  ;;  %v5001_v37 = vpack.i.b16 %v2380_v58, %v2379_v63  ;;  %v6002_v30 = vld [vmem:[#allocation14_spill] sm:$0xff]  ;;  %v6012_v16 = vld [vmem:[#allocation11_spill] sm:$0xff] }
  0xf7   : > { %2674 = vrot.lane.b32.xlu1 %v3523_v45, %s3705_s9  ;;  %2954 = vrot.lane.b32.xlu0 %v3584_v32, %s3709_s13  ;;  %v5994_v32 = vld [vmem:[#allocation17_spill] sm:$0xff]  ;;  %v6004_v48 = vpack.i.b16 %v6002_v30, %v6003_v33  ;;  %v2513_v7 = vpack.i.b16 %v2512_v34, %v2511_v36  ;;  %v5017_v21 = vpack.i.b16 %v2542_v9, %v2541_v14  ;;  %v6011_v31 = vld [vmem:[#allocation30_spill] sm:$0xff]  ;;  %v6014_v33 = vld [vmem:[#allocation28_spill] sm:$0xff] }
  0xf8   : > { %v5995_v45 = vcombine.low %v5993_v8, %v5994_v32  ;;  %v4997_v29 = vrot.slane %v5999_v22, %v4052_v41  ;;  %v6007_v8 = vld [vmem:[#allocation22_spill] sm:$0xff]  ;;  %v3552_v63 = vcombine.low %v5001_v37, %v2429_v4  ;;  %v5020_v58 = vpack.i.b16 %v2518_v47, %v2517_v20  ;;  %v3662_v20 = vld [vmem:[%s3769_s28 + $0x10] sm:$0xf]  ;;  %v6013_v30 = vld [vmem:[#allocation29_spill] sm:$0xff] }
  0xf9   : > { %v690_v28 = vpop.permute.xlu1 %689  ;;  %v686_v6 = vpop.permute.xlu0 %685  ;;  %v5006_v24 = vcombine.low %v6004_v48, %v2498_v19  ;;  %v6008_v32 = vpack.i.b16 %v6006_v62, %v6007_v8  ;;  %v5023_v19 = vrot.slane %v1548_v52, %v3854_v42  ;;  %v5026_v36 = vrot.slane %v1556_v55, %v3854_v42  ;;  %v3663_v47 = vld [vmem:[%s3769_s28 + $0x40] sm:$0xf]  ;;  %v6016_v8 = vld [vmem:[#allocation31_spill] sm:$0xff] }
  0xfa   : > { %v4984_v56 = vrot.slane %v5995_v45, %v4052_v41  ;;  %6000 = vst [vmem:[#allocation27_spill] sm:$0xff] %v4997_v29  ;;  %v1216_v34 = vcombine.low %v4916_v1, %v686_v6  ;;  %v1852_v14 = vcombine.high %v4936_v12, %v5974_v17  ;;  %v1886_v9 = vcombine.high %v4933_v60, %v5974_v17 }
  0xfb   : > { %2698 = vrot.lane.b32.xlu1 %v3528_v57, %s3706_s10  ;;  %2880 = vrot.lane.b32.xlu0 %v3568_v51, %s3706_s10  ;;  %6005 = vst [vmem:[#allocation13_spill] sm:$0xff] %v5006_v24  ;;  %v3578_v45 = vcombine.low %v6008_v32, %v2540_v27  ;;  %v2516_v51 = vpack.i.b16 %v4952_v13, %v4948_v44  ;;  %6009 = vst [vmem:[#allocation15_spill] sm:$0xff] %v5023_v19  ;;  %v2391_v44 = vshrl.u32 %v4990_v0, 16  ;;  %v3673_v24 = vld [vmem:[%s3769_s28 + $0x54] sm:$0xf] }
  0xfc   : > { %5996 = vst [vmem:[#allocation19_spill] sm:$0xff] %v4984_v56  ;;  %6010 = vst [vmem:[#allocation17_spill] sm:$0xff] %v5026_v36  ;;  %v1250_v27 = vcombine.low %v4914_v11, %v690_v28  ;;  %v2392_v13 = vshrl.u32 %v4987_v46, 16  ;;  %v1582_v4 = vcombine.low %v3662_v20, %v3663_v47  ;;  %v3664_v11 = vld [vmem:[%s3769_s28 + $0x28] sm:$0xf]  ;;  %v1242_v6 = vcombine.low %v4874_v3, %v4939_v18 }
  0xfd   : > { %v5008_v53 = vpop.permute.xlu1 %713  ;;  %v5010_v57 = vpop.permute.xlu0 %709  ;;  %v3665_v28 = vld [vmem:[%s3769_s28 + $0x58] sm:$0xf]  ;;  %v1208_v52 = vcombine.low %v4876_v49, %v4941_v23  ;;  %v3533_v22 = vcombine.low %v6011_v31, %v2513_v7  ;;  %v6015_v48 = vpack.i.b16 %v6013_v30, %v6014_v33  ;;  %v5056_v3 = vcombine.high %v4990_v0, %v5974_v17  ;;  %v3667_v31 = vld [vmem:[%s3769_s28 + $0x30] sm:$0xf]  ;;  %v3669_v33 = vld [vmem:[%s3769_s28 + $0x48] sm:$0xf] }
  0xfe   : > { %v1590_v1 = vcombine.low %v3664_v11, %v3665_v28  ;;  %v5060_v49 = vcombine.high %v4987_v46, %v5974_v17  ;;  %v1257_v18 = vrot.slane %v1250_v27, %v3854_v42  ;;  %v1223_v23 = vrot.slane %v1216_v34, %v3854_v42  ;;  %v3666_v28 = vld [vmem:[%s3769_s28] sm:$0xf]  ;;  %v3668_v30 = vld [vmem:[%s3769_s28 + $0x18] sm:$0xf] }
  0xff   : > { %2904 = vrot.lane.b32.xlu1 %v3573_v38, %s3707_s11  ;;  %2806 = vrot.lane.b32.xlu0 %v3552_v63, %s3703_s7  ;;  %v3538_v62 = vcombine.low %v6015_v48, %v2516_v51  ;;  %v5065_v7 = vpack.i.b16 %v2392_v13, %v2391_v44  ;;  %v2385_v63 = vshrl.u32 %v1852_v14, 16  ;;  %v2386_v20 = vshrl.u32 %v1886_v9, 16  ;;  %v3671_v51 = vld [vmem:[%s3769_s28 + $0x3c] sm:$0xf]  ;;  %v3672_v38 = vld [vmem:[%s3769_s28 + $0x24] sm:$0xf] }
 0x100   : > { %v5070_v47 = vrot.slane %v1582_v4, %v3854_v42  ;;  %v5073_v27 = vrot.slane %v1590_v1, %v3854_v42  ;;  %v1249_v34 = vrot.slane %v1242_v6, %v3854_v42  ;;  %v1215_v44 = vrot.slane %v1208_v52, %v3854_v42  ;;  %v3670_v1 = vld [vmem:[%s3769_s28 + $0xc] sm:$0xf] }
 0x101   : > { %v722_v55 = vpop.permute.xlu1 %721  ;;  %v718_v2 = vpop.permute.xlu0 %717  ;;  %v944_v48 = vcombine.low %v3668_v30, %v3669_v33  ;;  %v5081_v32 = vpack.i.b16 %v1886_v9, %v1852_v14  ;;  %v5085_v4 = vpack.i.b16 %v5060_v49, %v5056_v3  ;;  %v970_v6 = vcombine.low %v3670_v1, %v3671_v51 }
 0x102   : > { %6017 = vst [vmem:[#allocation16_spill] sm:$0xff] %v5070_v47  ;;  %6018 = vst [vmem:[#allocation18_spill] sm:$0xff] %v5073_v27  ;;  %v978_v52 = vcombine.low %v3672_v38, %v3673_v24  ;;  %v1939_v26 = vcombine.high %v4862_v15, %v4868_v5  ;;  %v1224_v30 = vcombine.low %v1215_v44, %v1223_v23 }
 0x103   : > { %2722 = vrot.lane.b32.xlu1 %v3533_v22, %s3707_s11  ;;  %v936_v22 = vcombine.low %v3666_v28, %v3667_v31  ;;  %v1905_v28 = vcombine.high %v4865_v54, %v4871_v61  ;;  %v1258_v31 = vcombine.low %v1249_v34, %v1257_v18  ;;  %v5098_v33 = vpack.i.b16 %v2386_v20, %v2385_v63 }
 0x104   : > { %v1598_v51 = vcombine.low %v5070_v47, %v5073_v27  ;;  %v1259_v24 = vcombine.high %v1249_v34, %v1257_v18  ;;  %v1225_v38 = vcombine.high %v1215_v44, %v1223_v23  ;;  %v5106_v54 = vrot.slane %v944_v48, %v3854_v42 }
 0x105   : > { %v730_v13 = vpop.permute.xlu1 %729  ;;  %v726_v11 = vpop.permute.xlu0 %725  ;;  %v5103_v5 = vrot.slane %v936_v22, %v3854_v42  ;;  %v5115_v63 = vrot.slane %v1939_v26, %v4052_v41  ;;  %v5118_v18 = vrot.slane %v1905_v28, %v4052_v41  ;;  %v5121_v23 = vrot.slane %v1258_v31, %v4052_v41 }
 0x106   : > { %v1310_v14 = vcombine.low %v5008_v53, %v730_v13  ;;  %v1276_v9 = vcombine.low %v5010_v57, %v726_v11  ;;  %6020 = vst [vmem:[#allocation14_spill] sm:$0xff] %v5106_v54  ;;  %v5109_v53 = vrot.slane %v970_v6, %v3854_v42  ;;  %v5112_v57 = vrot.slane %v978_v52, %v3854_v42 }
 0x107   : > { %2928 = vrot.lane.b32.xlu1 %v3578_v45, %s3708_s12  ;;  %6019 = vst [vmem:[#allocation26_spill] sm:$0xff] %v5103_v5  ;;  %v5124_v20 = vrot.slane %v1224_v30, %v4052_v41  ;;  %v5132_v44 = vrot.slane %v1259_v24, %v4052_v41  ;;  %v5135_v13 = vrot.slane %v1225_v38, %v4052_v41  ;;  %v2439_v24 = vshrl.u32 %v5118_v18, 16 }
 0x108   : > { %6021 = vst [vmem:[#allocation24_spill] sm:$0xff] %v5109_v53  ;;  %6022 = vst [vmem:[#allocation23_spill] sm:$0xff] %v5112_v57  ;;  %v6024_v30 = vcombine.low %v6012_v16, %v5017_v21  ;;  %v986_v48 = vcombine.low %v5109_v53, %v5112_v57 }
 0x109   : > { %v738_v1 = vpop.permute.xlu1 %737  ;;  %v734_v15 = vpop.permute.xlu0 %733 }
 0x10a   : > { %v1318_v61 = vcombine.low %v722_v55, %v738_v1  ;;  %v1284_v45 = vcombine.low %v718_v2, %v734_v15  ;;  %v1317_v55 = vrot.slane %v1310_v14, %v3854_v42  ;;  %v1283_v2 = vrot.slane %v1276_v9, %v3854_v42 }
 0x10b   : > { %2746 = vrot.lane.b32.xlu1 %v3538_v62, %s3708_s12  ;;  %v5143_v62 = vpack.i.b16 %v4933_v60, %v4936_v12  ;;  %v2355_v14 = vshrl.u32 %v5124_v20, 16  ;;  %v2356_v9 = vshrl.u32 %v5121_v23, 16  ;;  %v2440_v60 = vshrl.u32 %v5115_v63, 16 }
 0x10c   : > { %v1325_v34 = vrot.slane %v1318_v61, %v3854_v42  ;;  %v1291_v26 = vrot.slane %v1284_v45, %v3854_v42  ;;  %v1920_v61 = vcombine.high %v4923_v50, %v5974_v17  ;;  %v1954_v45 = vcombine.high %v4920_v40, %v5974_v17 }
 0x10d   : > { %v5137_v11 = vpop.permute.xlu1 %408  ;;  %v5139_v22 = vpop.permute.xlu0 %404  ;;  %6023 = vst [vmem:[#allocation22_spill] sm:$0xff] %v5143_v62  ;;  %v5202_v50 = vpack.i.b16 %v2356_v9, %v2355_v14  ;;  %v2367_v14 = vshrl.u32 %v5135_v13, 16  ;;  %v2368_v9 = vshrl.u32 %v5132_v44, 16 }
 0x10e   : > { %v1326_v6 = vcombine.low %v1317_v55, %v1325_v34  ;;  %v1327_v52 = vcombine.high %v1317_v55, %v1325_v34  ;;  %v1292_v28 = vcombine.low %v1283_v2, %v1291_v26  ;;  %v1293_v31 = vcombine.high %v1283_v2, %v1291_v26 }
 0x10f   : > { %2952 = vrot.lane.b32.xlu1 %v6024_v30, %s3709_s13  ;;  %v6027_v55 = vcombine.low %v5023_v19, %v5026_v36  ;;  %v5176_v34 = vrot.slane %v1598_v51, %v4052_v41  ;;  %v5180_v26 = vpack.i.b16 %v5132_v44, %v5135_v13  ;;  %v5191_v30 = vcombine.high %v5118_v18, %v5974_v17 }
 0x110   : > { %v5156_v12 = vrot.slane %v1326_v6, %v4052_v41  ;;  %v5159_v38 = vrot.slane %v1327_v52, %v4052_v41  ;;  %v5162_v1 = vrot.slane %v1292_v28, %v4052_v41  ;;  %v1307_v21 = vrot.slane %v1293_v31, %v4052_v41  ;;  %6030 = vst [vmem:[#allocation28_spill] sm:$0xff] %v5202_v50 }
 0x111   : > { %v417_v16 = vpop.permute.xlu1 %416  ;;  %v413_v15 = vpop.permute.xlu0 %412  ;;  %v5173_v2 = vrot.slane %v6027_v55, %v4052_v41  ;;  %6028 = vst [vmem:[#allocation29_spill] sm:$0xff] %v5180_v26  ;;  %v6029_v31 = vcombine.low %v6016_v8, %v5020_v58  ;;  %v5195_v51 = vcombine.high %v5115_v63, %v5974_v17  ;;  %v952_v55 = vcombine.low %v5103_v5, %v5106_v54 }
 0x112   : > { %6025 = vst [vmem:[#allocation30_spill] sm:$0xff] %v5156_v12  ;;  %6026 = vst [vmem:[#allocation11_spill] sm:$0xff] %v5162_v1  ;;  %v2414_v6 = vpack.i.b16 %v5159_v38, %v1307_v21  ;;  %v2403_v52 = vshrl.u32 %v5162_v1, 16  ;;  %v2404_v28 = vshrl.u32 %v5156_v12, 16  ;;  %v2441_v8 = vpack.i.b16 %v2440_v60, %v2439_v24 }
 0x113   : > { %2770 = vrot.lane.b32.xlu1 %v6029_v31, %s3709_s13  ;;  %v2432_v47 = vpack.i.b16 %v1954_v45, %v1920_v61  ;;  %v2415_v27 = vshrl.u32 %v1307_v21, 16  ;;  %v2416_v19 = vshrl.u32 %v5159_v38, 16  ;;  %v2433_v36 = vshrl.u32 %v1920_v61, 16 }
 0x114   : > { %v3527_v62 = vcombine.low %v5180_v26, %v2414_v6  ;;  %v2405_v58 = vpack.i.b16 %v2404_v28, %v2403_v52  ;;  %v1308_v5 = vcombine.high %v5162_v1, %v5974_v17  ;;  %v1342_v53 = vcombine.high %v5156_v12, %v5974_v17 }
 0x115   : > { %v425_v31 = vpop.permute.xlu1 %424  ;;  %v421_v40 = vpop.permute.xlu0 %420  ;;  %v2434_v6 = vshrl.u32 %v1954_v45, 16  ;;  %v1240_v24 = vcombine.high %v5124_v20, %v5974_v17  ;;  %v1274_v60 = vcombine.high %v5121_v23, %v5974_v17  ;;  %v5221_v45 = vrot.slane %v952_v55, %v4052_v41 }
 0x116   : > { %v3512_v39 = vcombine.low %v5202_v50, %v2405_v58  ;;  %v1718_v61 = vcombine.low %v5137_v11, %v425_v31  ;;  %v1684_v52 = vcombine.low %v5139_v22, %v421_v40  ;;  %v3572_v26 = vcombine.low %v5065_v7, %v2441_v8 }
 0x117   : > { %2696 = vrot.lane.b32.xlu1 %v3527_v62, %s3706_s10  ;;  %v5224_v62 = vrot.slane %v986_v48, %v4052_v41  ;;  %v3557_v50 = vcombine.low %v5081_v32, %v2432_v47  ;;  %v2417_v57 = vpack.i.b16 %v2416_v19, %v2415_v27  ;;  %v2444_v11 = vpack.i.b16 %v5195_v51, %v5191_v30 }
 0x118   : > { %2624 = vrot.lane.b32.xlu0 %v3512_v39, %s3703_s7  ;;  %v2408_v22 = vpack.i.b16 %v1342_v53, %v1308_v5  ;;  %v2435_v39 = vpack.i.b16 %v2434_v6, %v2433_v36  ;;  %v5231_v55 = vpack.i.b16 %v2368_v9, %v2367_v14  ;;  %v5233_v48 = vpack.i.b16 %v1274_v60, %v1240_v24 }
 0x119   : > { %v433_v28 = vpop.permute.xlu1 %432  ;;  %v429_v58 = vpop.permute.xlu0 %428  ;;  %v5236_v54 = vcombine.high %v1307_v21, %v5974_v17  ;;  %v5240_v47 = vpack.i.b16 %v5121_v23, %v5124_v20  ;;  %v5243_v19 = vrot.slane %v1718_v61, %v3854_v42  ;;  %v5246_v27 = vrot.slane %v1684_v52, %v3854_v42 }
 0x11a   : > { %v1726_v31 = vcombine.low %v417_v16, %v433_v28  ;;  %v1692_v40 = vcombine.low %v413_v15, %v429_v58  ;;  %v3532_v23 = vcombine.low %v5231_v55, %v2417_v57  ;;  %v1343_v20 = vcombine.high %v5159_v38, %v5974_v17 }
 0x11b   : > { %2902 = vrot.lane.b32.xlu1 %v3572_v26, %s3707_s11  ;;  %6031 = vst [vmem:[#allocation31_spill] sm:$0xff] %v5240_v47  ;;  %v2409_v26 = vshrl.u32 %v1308_v5, 16  ;;  %v2410_v9 = vshrl.u32 %v1342_v53, 16  ;;  %v3577_v57 = vcombine.low %v5085_v4, %v2444_v11  ;;  %v1241_v38 = vcombine.high %v5135_v13, %v5974_v17 }
 0x11c   : > { %v5249_v36 = vrot.slane %v1726_v31, %v3854_v42  ;;  %v5252_v16 = vrot.slane %v1692_v40, %v3854_v42  ;;  %2830 = vrot.lane.b32.xlu0 %v3557_v50, %s3704_s8  ;;  %v3517_v50 = vcombine.low %v5233_v48, %v2408_v22  ;;  %v1275_v5 = vcombine.high %v5132_v44, %v5974_v17  ;;  %v6035_v44 = vld [vmem:[#allocation20_spill] sm:$0xff] }
 0x11d   : > { %v5255_v21 = vpop.permute.xlu1 %406  ;;  %v5257_v15 = vpop.permute.xlu0 %402  ;;  %v2445_v61 = vshrl.u32 %v5191_v30, 16  ;;  %v2361_v53 = vshrl.u32 %v1240_v24, 16  ;;  %v2362_v58 = vshrl.u32 %v1274_v60, 16  ;;  %v2420_v11 = vpack.i.b16 %v1343_v20, %v5236_v54 }
 0x11e   : > { %v1734_v6 = vcombine.low %v5243_v19, %v5249_v36  ;;  %v1700_v14 = vcombine.low %v5246_v27, %v5252_v16  ;;  %v2446_v13 = vshrl.u32 %v5195_v51, 16  ;;  %v3562_v22 = vcombine.low %v5098_v33, %v2435_v39  ;;  %v6036_v39 = vld [vmem:[#allocation25_spill] sm:$0xff] }
 0x11f   : > { %2720 = vrot.lane.b32.xlu1 %v3532_v23, %s3707_s11  ;;  %v2411_v23 = vpack.i.b16 %v2410_v9, %v2409_v26  ;;  %v2397_v24 = vshrl.u32 %v5056_v3, 16  ;;  %v2398_v60 = vshrl.u32 %v5060_v49, 16  ;;  %v5296_v51 = vpack.i.b16 %v2362_v58, %v2361_v53 }
 0x120   : > { %v5277_v52 = vrot.slane %v1734_v6, %v4052_v41  ;;  %v5280_v28 = vrot.slane %v1700_v14, %v4052_v41  ;;  %2648 = vrot.lane.b32.xlu0 %v3517_v50, %s3704_s8  ;;  %v5291_v6 = vpack.i.b16 %v1275_v5, %v1241_v38  ;;  %v2331_v14 = vshrl.u32 %v4997_v29, 16 }
 0x121   : > { %v415_v31 = vpop.permute.xlu1 %414  ;;  %v411_v40 = vpop.permute.xlu0 %410  ;;  %v2332_v50 = vshrl.u32 %v4984_v56, 16  ;;  %v2421_v8 = vshrl.u32 %v5236_v54, 16  ;;  %v2422_v3 = vshrl.u32 %v1343_v20, 16  ;;  %v3522_v49 = vcombine.low %v5296_v51, %v2411_v23 }
 0x122   : > { %6032 = vst [vmem:[#allocation39_spill] sm:$0xff] %v5277_v52  ;;  %6033 = vst [vmem:[#allocation40_spill] sm:$0xff] %v5280_v28  ;;  %v3537_v9 = vcombine.low %v5291_v6, %v2420_v11  ;;  %v2438_v53 = vpack.i.b16 %v5115_v63, %v5118_v18  ;;  %v2283_v58 = vshrl.u32 %v5280_v28, 16  ;;  %v6037_v47 = vcombine.low %v6035_v44, %v6036_v39  ;;  %v6040_v44 = vld [vmem:[#allocation12_spill] sm:$0xff] }
 0x123   : > { %2926 = vrot.lane.b32.xlu1 %v3577_v57, %s3708_s12  ;;  %6034 = vst [vmem:[#allocation41_spill] sm:$0xff] %v5291_v6  ;;  %v2447_v57 = vpack.i.b16 %v2446_v13, %v2445_v61  ;;  %v5316_v54 = vpack.i.b16 %v2398_v60, %v2397_v24  ;;  %v2373_v20 = vshrl.u32 %v1241_v38, 16  ;;  %v2374_v61 = vshrl.u32 %v1275_v5, 16  ;;  %v6039_v13 = vld [vmem:[#allocation21_spill] sm:$0xff] }
 0x124   : > { %2854 = vrot.lane.b32.xlu0 %v3562_v22, %s3705_s9  ;;  %v2284_v22 = vshrl.u32 %v5277_v52, 16  ;;  %v5313_v1 = vrot.slane %v6037_v47, %v4052_v41  ;;  %v1735_v11 = vcombine.high %v5243_v19, %v5249_v36  ;;  %v1701_v63 = vcombine.high %v5246_v27, %v5252_v16 }
 0x125   : > { %v423_v26 = vpop.permute.xlu1 %422  ;;  %v419_v30 = vpop.permute.xlu0 %418  ;;  %v5326_v47 = vpack.i.b16 %v4987_v46, %v4990_v0  ;;  %v6041_v23 = vcombine.low %v6039_v13, %v6040_v44  ;;  %v3582_v36 = vcombine.low %v5316_v54, %v2447_v57  ;;  %v2423_v27 = vpack.i.b16 %v2422_v3, %v2421_v8 }
 0x126   : > { %6038 = vst [vmem:[#allocation20_spill] sm:$0xff] %v5313_v1  ;;  %v1106_v18 = vcombine.low %v5255_v21, %v423_v26  ;;  %v1072_v5 = vcombine.low %v5257_v15, %v419_v30  ;;  %v2285_v60 = vpack.i.b16 %v2284_v22, %v2283_v58  ;;  %v2333_v39 = vpack.i.b16 %v2332_v50, %v2331_v14 }
 0x127   : > { %2744 = vrot.lane.b32.xlu1 %v3537_v9, %s3708_s12  ;;  %v5332_v38 = vrot.slane %v6041_v23, %v4052_v41  ;;  %v3567_v24 = vcombine.low %v5326_v47, %v2438_v53  ;;  %v5338_v0 = vpack.i.b16 %v2374_v61, %v2373_v20  ;;  %v5341_v26 = vrot.slane %v1735_v11, %v4052_v41 }
 0x128   : > { %2672 = vrot.lane.b32.xlu0 %v3522_v49, %s3705_s9  ;;  %v5344_v15 = vrot.slane %v1701_v63, %v4052_v41  ;;  %v1113_v30 = vrot.slane %v1106_v18, %v3854_v42  ;;  %v3551_v53 = vcombine.low %v2285_v60, %v2333_v39  ;;  %v2308_v58 = vshrl.u32 %v5313_v1, 16 }
 0x129   : > { %6042 = vst [vmem:[#allocation25_spill] sm:$0xff] %v5332_v38  ;;  %v431_v19 = vpop.permute.xlu1 %430  ;;  %v427_v21 = vpop.permute.xlu0 %426  ;;  %6043 = vst [vmem:[#allocation21_spill] sm:$0xff] %v5338_v0  ;;  %v3542_v50 = vcombine.low %v5338_v0, %v2423_v27  ;;  %v2307_v9 = vshrl.u32 %v5332_v38, 16  ;;  %v5357_v61 = vcombine.high %v4997_v29, %v5974_v17  ;;  %v5361_v11 = vcombine.high %v4984_v56, %v5974_v17  ;;  %v6050_v29 = vld [vmem:[#allocation35_spill] sm:$0xff]  ;;  %v6054_v0 = vld [vmem:[#allocation10_spill] sm:$0xff] }
 0x12a   : > { %v1114_v16 = vcombine.low %v415_v31, %v431_v19  ;;  %v1080_v46 = vcombine.low %v411_v40, %v427_v21  ;;  %v1079_v31 = vrot.slane %v1072_v5, %v3854_v42  ;;  %v2295_v13 = vshrl.u32 %v5344_v15, 16 }
 0x12b   : > { %2950 = vrot.lane.b32.xlu1 %v3582_v36, %s3709_s13  ;;  %v2296_v44 = vshrl.u32 %v5341_v26, 16  ;;  %v1750_v21 = vcombine.high %v5277_v52, %v5974_v17  ;;  %v2309_v39 = vpack.i.b16 %v2308_v58, %v2307_v9  ;;  %v6049_v58 = vld [vmem:[#allocation34_spill] sm:$0xff] }
 0x12c   : > { %v1121_v8 = vrot.slane %v1114_v16, %v3854_v42  ;;  %2878 = vrot.lane.b32.xlu0 %v3567_v24, %s3706_s10  ;;  %v1087_v40 = vrot.slane %v1080_v46, %v3854_v42  ;;  %v1716_v16 = vcombine.high %v5280_v28, %v5974_v17 }
 0x12d   : > { %v369_v14 = vpop.permute.xlu1 %368  ;;  %v365_v49 = vpop.permute.xlu0 %364  ;;  %v2297_v46 = vpack.i.b16 %v2296_v44, %v2295_v13 }
 0x12e   : > { %v1122_v57 = vcombine.low %v1113_v30, %v1121_v8  ;;  %v1123_v3 = vcombine.high %v1113_v30, %v1121_v8  ;;  %v1088_v22 = vcombine.low %v1079_v31, %v1087_v40  ;;  %v1089_v20 = vcombine.high %v1079_v31, %v1087_v40 }
 0x12f   : > { %2768 = vrot.lane.b32.xlu1 %v3542_v50, %s3709_s13  ;;  %v2336_v30 = vpack.i.b16 %v5361_v11, %v5357_v61  ;;  %v5384_v8 = vcombine.high %v5332_v38, %v5974_v17  ;;  %v5388_v31 = vcombine.high %v5313_v1, %v5974_v17  ;;  %v6046_v50 = vld [vmem:[#allocation3_spill] sm:$0xff]  ;;  %v2288_v52 = vpack.i.b16 %v1750_v21, %v1716_v16 }
 0x130   : > { %v5364_v63 = vrot.slane %v1122_v57, %v4052_v41  ;;  %v1137_v18 = vrot.slane %v1123_v3, %v4052_v41  ;;  %2804 = vrot.lane.b32.xlu0 %v3551_v53, %s3703_s7  ;;  %v5371_v23 = vrot.slane %v1088_v22, %v4052_v41  ;;  %v1103_v5 = vrot.slane %v1089_v20, %v4052_v41  ;;  %v6047_v57 = vld [vmem:[#allocation4_spill] sm:$0xff] }
 0x131   : > { %v377_v19 = vpop.permute.xlu1 %376  ;;  %v373_v36 = vpop.permute.xlu0 %372  ;;  %v6048_v3 = vpack.i.b16 %v6046_v50, %v6047_v57  ;;  %v2289_v50 = vshrl.u32 %v1716_v16, 16  ;;  %v2290_v57 = vshrl.u32 %v1750_v21, 16  ;;  %v6052_v21 = vld [vmem:[#allocation9_spill] sm:$0xff] }
 0x132   : > { %6044 = vst [vmem:[#allocation12_spill] sm:$0xff] %v5364_v63  ;;  %6045 = vst [vmem:[#allocation42_spill] sm:$0xff] %v5371_v23  ;;  %v2260_v27 = vshrl.u32 %v5364_v63, 16  ;;  %v2270_v24 = vpack.i.b16 %v1137_v18, %v1103_v5  ;;  %v2259_v60 = vshrl.u32 %v5371_v23, 16  ;;  %v2271_v20 = vshrl.u32 %v1103_v5, 16 }
 0x133   : > { %v2272_v9 = vshrl.u32 %v1137_v18, 16  ;;  %v1650_v13 = vcombine.low %v6049_v58, %v377_v19  ;;  %v1138_v56 = vcombine.high %v5364_v63, %v5974_v17  ;;  %v1616_v38 = vcombine.low %v6050_v29, %v373_v36  ;;  %v6053_v63 = vld [vmem:[#allocation32_spill] sm:$0xff] }
 0x134   : > { %v3526_v53 = vcombine.low %v2270_v24, %v6048_v3  ;;  %v2261_v22 = vpack.i.b16 %v2260_v27, %v2259_v60  ;;  %v1104_v24 = vcombine.high %v5371_v23, %v5974_v17  ;;  %v6051_v27 = vld [vmem:[#allocation5_spill] sm:$0xff]  ;;  %v2312_v19 = vpack.i.b16 %v5388_v31, %v5384_v8 }
 0x135   : > { %v385_v40 = vpop.permute.xlu1 %384  ;;  %v381_v28 = vpop.permute.xlu0 %380  ;;  %v3571_v60 = vcombine.low %v2297_v46, %v6051_v27  ;;  %v2273_v36 = vpack.i.b16 %v2272_v9, %v2271_v20  ;;  %v2337_v3 = vshrl.u32 %v5357_v61, 16  ;;  %v5426_v58 = vcombine.high %v1103_v5, %v5974_v17 }
 0x136   : > { %v1658_v44 = vcombine.low %v369_v14, %v385_v40  ;;  %v1624_v1 = vcombine.low %v365_v49, %v381_v28  ;;  %2694 = vrot.lane.b32.xlu1 %v3526_v53, %s3706_s10  ;;  %v3511_v12 = vcombine.low %v2261_v22, %v2309_v39  ;;  %v1717_v14 = vcombine.high %v5344_v15, %v5974_v17 }
 0x137   : > { %v1751_v40 = vcombine.high %v5341_v26, %v5974_v17  ;;  %v2338_v53 = vshrl.u32 %v5361_v11, 16  ;;  %v5419_v22 = vrot.slane %v1650_v13, %v3854_v42  ;;  %v2264_v20 = vpack.i.b16 %v1138_v56, %v1104_v24 }
 0x138   : > { %v5408_v29 = vrot.slane %v1658_v44, %v3854_v42  ;;  %v5411_v28 = vrot.slane %v1624_v1, %v3854_v42  ;;  %2622 = vrot.lane.b32.xlu0 %v3511_v12, %s3703_s7  ;;  %v5422_v1 = vrot.slane %v1616_v38, %v3854_v42  ;;  %v3556_v12 = vcombine.low %v2288_v52, %v2336_v30 }
 0x139   : > { %v367_v49 = vpop.permute.xlu1 %366  ;;  %v363_v46 = vpop.permute.xlu0 %362  ;;  %v2300_v9 = vpack.i.b16 %v1751_v40, %v1717_v14  ;;  %v3531_v38 = vcombine.low %v2273_v36, %v6052_v21  ;;  %v5435_v13 = vcombine.high %v1137_v18, %v5974_v17  ;;  %v2339_v30 = vpack.i.b16 %v2338_v53, %v2337_v3  ;;  %v6056_v53 = vld [vmem:[#allocation33_spill] sm:$0xff] }
 0x13a   : > { %2900 = vrot.lane.b32.xlu1 %v3571_v60, %s3707_s11  ;;  %v1666_v16 = vcombine.low %v5419_v22, %v5408_v29  ;;  %v1632_v61 = vcombine.low %v5422_v1, %v5411_v28  ;;  %v2313_v44 = vshrl.u32 %v5384_v8, 16  ;;  %v2314_v5 = vshrl.u32 %v5388_v31, 16 }
 0x13b   : > { %v3516_v27 = vcombine.low %v2264_v20, %v2312_v19  ;;  %v2291_v60 = vpack.i.b16 %v2290_v57, %v2289_v50  ;;  %v2265_v39 = vshrl.u32 %v1104_v24, 16  ;;  %v2266_v23 = vshrl.u32 %v1138_v56, 16 }
 0x13c   : > { %2828 = vrot.lane.b32.xlu0 %v3556_v12, %s3704_s8  ;;  %v6055_v36 = vpack.i.b16 %v4691_v35, %v6054_v0  ;;  %v2301_v18 = vshrl.u32 %v1717_v14, 16  ;;  %v2302_v6 = vshrl.u32 %v1751_v40, 16  ;;  %v1674_v3 = vrot.slane %v1666_v16, %v4052_v41 }
 0x13d   : > { %v375_v11 = vpop.permute.xlu1 %374  ;;  %v371_v52 = vpop.permute.xlu0 %370  ;;  %v1640_v8 = vrot.slane %v1632_v61, %v4052_v41  ;;  %v2276_v56 = vpack.i.b16 %v5435_v13, %v5426_v58  ;;  %v3561_v35 = vcombine.low %v2291_v60, %v2339_v30  ;;  %v2267_v0 = vpack.i.b16 %v2266_v23, %v2265_v39 }
 0x13e   : > { %2718 = vrot.lane.b32.xlu1 %v3531_v38, %s3707_s11  ;;  %v1038_v12 = vcombine.low %v6053_v63, %v375_v11  ;;  %v3576_v21 = vcombine.low %v2300_v9, %v6055_v36  ;;  %v1004_v31 = vcombine.low %v6056_v53, %v371_v52  ;;  %v2315_v14 = vpack.i.b16 %v2314_v5, %v2313_v44 }
 0x13f   : > { %v2303_v20 = vpack.i.b16 %v2302_v6, %v2301_v18  ;;  %v2234_v11 = vpack.i.b16 %v1674_v3, %v1640_v8  ;;  %v2294_v38 = vpack.i.b16 %v5341_v26, %v5344_v15  ;;  %v2187_v6 = vshrl.u32 %v5173_v2, 16 }
 0x140   : > { %2646 = vrot.lane.b32.xlu0 %v3516_v27, %s3704_s8  ;;  %v1045_v40 = vrot.slane %v1038_v12, %v3854_v42  ;;  %v1011_v9 = vrot.slane %v1004_v31, %v3854_v42  ;;  %v2188_v52 = vshrl.u32 %v5176_v34, 16  ;;  %v2235_v30 = vshrl.u32 %v1640_v8, 16 }
 0x141   : > { %v383_v19 = vpop.permute.xlu1 %382  ;;  %v379_v63 = vpop.permute.xlu0 %378  ;;  %v3521_v5 = vcombine.low %v2267_v0, %v2315_v14  ;;  %v3581_v15 = vcombine.low %v2303_v20, %v4792_v43  ;;  %v2277_v12 = vshrl.u32 %v5426_v58, 16  ;;  %v2278_v36 = vshrl.u32 %v5435_v13, 16  ;;  %v6061_v13 = vld [vmem:[#allocation14_spill] sm:$0xff] }
 0x142   : > { %v1046_v24 = vcombine.low %v367_v49, %v383_v19  ;;  %v1012_v50 = vcombine.low %v363_v46, %v379_v63  ;;  %2924 = vrot.lane.b32.xlu1 %v3576_v21, %s3708_s12  ;;  %v6057_v49 = vpack.i.b16 %v4771_v10, %v4767_v59  ;;  %v6058_v10 = vpack.i.b16 %v5176_v34, %v5173_v2 }
 0x143   : > { %v2189_v18 = vpack.i.b16 %v2188_v52, %v2187_v6  ;;  %v2163_v53 = vshrl.u32 %v5221_v45, 16  ;;  %v2164_v31 = vshrl.u32 %v5224_v62, 16  ;;  %v3594_v58 = vcombine.low %v5001_v37, %v5001_v37 }
 0x144   : > { %v1053_v57 = vrot.slane %v1046_v24, %v3854_v42  ;;  %v1019_v16 = vrot.slane %v1012_v50, %v3854_v42  ;;  %2852 = vrot.lane.b32.xlu0 %v3561_v35, %s3705_s9  ;;  %v3536_v46 = vcombine.low %v2276_v56, %v6057_v49  ;;  %v2236_v42 = vshrl.u32 %v1674_v3, 16  ;;  %v6059_v24 = vld [vmem:[#allocation7_spill] sm:$0xff]  ;;  %v6062_v35 = vld [vmem:[#allocation26_spill] sm:$0xff] }
 0x145   : > { %v5456_v61 = vpop.permute.xlu1 %2810  ;;  %v5461_v39 = vpop.permute.xlu0 %2628  ;;  %v5472_v27 = vcombine.low %v6058_v10, %v2234_v11  ;;  %v6060_v63 = vpack.i.b16 %v4616_v25, %v6059_v24  ;;  %v953_v0 = vcombine.high %v6062_v35, %v6061_v13  ;;  %v6063_v11 = vld [vmem:[#allocation23_spill] sm:$0xff]  ;;  %v2165_v25 = vpack.i.b16 %v2164_v31, %v2163_v53 }
 0x146   : > { %v1054_v23 = vcombine.low %v1045_v40, %v1053_v57  ;;  %v1020_v44 = vcombine.low %v1011_v9, %v1019_v16  ;;  %2742 = vrot.lane.b32.xlu1 %v3536_v46, %s3708_s12  ;;  %v2237_v43 = vpack.i.b16 %v2236_v42, %v2235_v30  ;;  %v1055_v14 = vcombine.high %v1045_v40, %v1053_v57 }
 0x147   : > { %v3566_v50 = vcombine.low %v2294_v38, %v6060_v63  ;;  %v1021_v20 = vcombine.high %v1011_v9, %v1019_v16  ;;  %v2279_v46 = vpack.i.b16 %v2278_v36, %v2277_v12  ;;  %v1580_v38 = vcombine.high %v5173_v2, %v5974_v17 }
 0x148   : > { %v1062_v59 = vrot.slane %v1054_v23, %v4052_v41  ;;  %v1028_v60 = vrot.slane %v1020_v44, %v4052_v41  ;;  %2670 = vrot.lane.b32.xlu0 %v3521_v5, %s3705_s9  ;;  %v6064_v23 = vld [vmem:[#allocation24_spill] sm:$0xff]  ;;  %v1614_v37 = vcombine.high %v5176_v34, %v5974_v17  ;;  %v1682_v40 = vcombine.high %v1674_v3, %v5974_v17  ;;  %v6065_v3 = vld [vmem:[#allocation6_spill] sm:$0xff] }
 0x149   : > { %v5476_v26 = vpop.permute.xlu1 %2834  ;;  %v5481_v21 = vpop.permute.xlu0 %2652  ;;  %v987_v6 = vcombine.high %v6064_v23, %v6063_v11  ;;  %v1648_v57 = vcombine.high %v1640_v8, %v5974_v17  ;;  %v3550_v9 = vcombine.low %v2189_v18, %v2237_v43  ;;  %v5508_v42 = vrot.slane %v953_v0, %v4052_v41 }
 0x14a   : > { %v2212_v19 = vshrl.u32 %v1062_v59, 16  ;;  %v2211_v56 = vshrl.u32 %v1028_v60, 16  ;;  %2948 = vrot.lane.b32.xlu1 %v3581_v15, %s3709_s13  ;;  %v2210_v30 = vpack.i.b16 %v1062_v59, %v1028_v60  ;;  %v5511_v44 = vrot.slane %v1055_v14, %v4052_v41 }
 0x14b   : > { %v5514_v2 = vrot.slane %v1021_v20, %v4052_v41  ;;  %v3541_v8 = vcombine.low %v2279_v46, %v6065_v3  ;;  %v1001_v5 = vrot.slane %v987_v6, %v4052_v41  ;;  %v2192_v15 = vpack.i.b16 %v1614_v37, %v1580_v38 }
 0x14c   : > { %2876 = vrot.lane.b32.xlu0 %v3566_v50, %s3706_s10  ;;  %v2213_v16 = vpack.i.b16 %v2212_v19, %v2211_v56  ;;  %v5525_v12 = vcombine.high %v5221_v45, %v5974_v17  ;;  %v5529_v36 = vcombine.high %v5224_v62, %v5974_v17  ;;  %v6066_v18 = vpack.i.b16 %v5224_v62, %v5221_v45 }
 0x14d   : > { %v5494_v49 = vpop.permute.xlu1 %2858  ;;  %v5498_v52 = vpop.permute.xlu0 %2676  ;;  %v5537_v31 = vcombine.high %v1062_v59, %v5974_v17  ;;  %v5540_v19 = vcombine.high %v1028_v60, %v5974_v17  ;;  %v2240_v24 = vpack.i.b16 %v1682_v40, %v1648_v57  ;;  %v3588_v50 = vcombine.low %v5233_v48, %v5233_v48 }
 0x14e   : > { %3200 = vrot.lane.b32.xlu1 %v3594_v58, %s3703_s7  ;;  %v5534_v53 = vcombine.low %v6066_v18, %v2210_v30  ;;  %v3510_v56 = vcombine.low %v2165_v25, %v2213_v16  ;;  %v2174_v45 = vpack.i.b16 %v1001_v5, %v5508_v42  ;;  %v2222_v62 = vpack.i.b16 %v5511_v44, %v5514_v2  ;;  %v6068_v16 = vld [vmem:[#allocation8_spill] sm:$0xff] }
 0x14f   : > { %v2168_v60 = vpack.i.b16 %v5529_v36, %v5525_v12  ;;  %v2193_v43 = vshrl.u32 %v1580_v38, 16  ;;  %v2194_v58 = vshrl.u32 %v1614_v37, 16  ;;  %v3555_v13 = vcombine.low %v2192_v15, %v2240_v24 }
 0x150   : > { %2802 = vrot.lane.b32.xlu0 %v3550_v9, %s3703_s7  ;;  %v2216_v35 = vpack.i.b16 %v5537_v31, %v5540_v19  ;;  %v2241_v0 = vshrl.u32 %v1648_v57, 16  ;;  %v2242_v48 = vshrl.u32 %v1682_v40, 16  ;;  %v2175_v14 = vshrl.u32 %v5508_v42, 16  ;;  %v6067_v57 = vld [vmem:[#allocation2_spill] sm:$0xff] }
 0x151   : > { %v5517_v34 = vpop.permute.xlu1 %2882  ;;  %v5521_v10 = vpop.permute.xlu0 %2700  ;;  %v2224_v20 = vshrl.u32 %v5511_v44, 16  ;;  %v2223_v46 = vshrl.u32 %v5514_v2, 16  ;;  %v3525_v23 = vcombine.low %v2174_v45, %v2222_v62  ;;  %v2176_v6 = vshrl.u32 %v1001_v5, 16  ;;  %v6069_v62 = vld [vmem:[#allocation17_spill] sm:$0xff] }
 0x152   : > { %2766 = vrot.lane.b32.xlu1 %v3541_v8, %s3709_s13  ;;  %v3515_v38 = vcombine.low %v2168_v60, %v2216_v35  ;;  %v2195_v37 = vpack.i.b16 %v2194_v58, %v2193_v43  ;;  %v2243_v40 = vpack.i.b16 %v2242_v48, %v2241_v0  ;;  %v3549_v9 = vcombine.low %v6067_v57, %v6067_v57  ;;  %v6070_v60 = vld [vmem:[#allocation15_spill] sm:$0xff]  ;;  %v6071_v58 = vld [vmem:[#allocation18_spill] sm:$0xff] }
 0x153   : > { %v3509_v30 = vcombine.low %v6068_v16, %v6068_v16  ;;  %v3589_v8 = vcombine.low %v5296_v51, %v5296_v51  ;;  %v2177_v15 = vpack.i.b16 %v2176_v6, %v2175_v14  ;;  %v2225_v18 = vpack.i.b16 %v2224_v20, %v2223_v46  ;;  %v6073_v14 = vld [vmem:[#allocation28_spill] sm:$0xff] }
 0x154   : > { %2620 = vrot.lane.b32.xlu0 %v3510_v56, %s3703_s7  ;;  %v2169_v56 = vshrl.u32 %v5525_v12, 16  ;;  %v1667_v24 = vcombine.high %v5419_v22, %v5408_v29  ;;  %v2170_v45 = vshrl.u32 %v5529_v36, 16  ;;  %v1565_v43 = vcombine.high %v6070_v60, %v6069_v62 }
 0x155   : > { %v5544_v63 = vpop.permute.xlu1 %2808  ;;  %v5551_v59 = vpop.permute.xlu0 %2724  ;;  %v1633_v0 = vcombine.high %v5422_v1, %v5411_v28  ;;  %v3560_v51 = vcombine.low %v2195_v37, %v2243_v40  ;;  %v2217_v12 = vshrl.u32 %v5540_v19, 16  ;;  %v2218_v48 = vshrl.u32 %v5537_v31, 16  ;;  %v6074_v37 = vld [vmem:[#allocation29_spill] sm:$0xff] }
 0x156   : > { %3182 = vrot.lane.b32.xlu1 %v3588_v50, %s3704_s8  ;;  %v5591_v29 = vcombine.high %v5508_v42, %v5974_v17  ;;  %v5594_v22 = vcombine.high %v1001_v5, %v5974_v17  ;;  %v5598_v36 = vcombine.high %v5511_v44, %v5974_v17  ;;  %v1037_v28 = vcombine.high %v5514_v2, %v5974_v17 }
 0x157   : > { %v3530_v31 = vcombine.low %v2177_v15, %v2225_v18  ;;  %v3587_v42 = vcombine.low %v6073_v14, %v6073_v14  ;;  %v2171_v20 = vpack.i.b16 %v2170_v45, %v2169_v56  ;;  %v1579_v5 = vrot.slane %v1565_v43, %v4052_v41 }
 0x158   : > { %2826 = vrot.lane.b32.xlu0 %v3555_v13, %s3704_s8  ;;  %v6072_v13 = vld [vmem:[#allocation16_spill] sm:$0xff]  ;;  %v1681_v44 = vrot.slane %v1667_v24, %v4052_v41  ;;  %v1647_v2 = vrot.slane %v1633_v0, %v4052_v41  ;;  %v2219_v6 = vpack.i.b16 %v2218_v48, %v2217_v12  ;;  %v3590_v40 = vcombine.low %v6074_v37, %v6074_v37 }
 0x159   : > { %v5562_v11 = vpop.permute.xlu1 %2626  ;;  %v5564_v25 = vpop.permute.xlu0 %2906  ;;  %v1599_v35 = vcombine.high %v6072_v13, %v6071_v58  ;;  %v2180_v57 = vpack.i.b16 %v5594_v22, %v5591_v29  ;;  %v3056_v16 = vsel %vm2956_vm6, %v3549_v9, %v5456_v61  ;;  %v2181_v61 = vshrl.u32 %v5591_v29, 16 }
 0x15a   : > { %2692 = vrot.lane.b32.xlu1 %v3525_v23, %s3706_s10  ;;  %v2971_v23 = vsel %vm2956_vm6, %v3509_v30, %v5461_v39  ;;  %v2228_v30 = vpack.i.b16 %v5598_v36, %v1037_v28  ;;  %v3520_v56 = vcombine.low %v2171_v20, %v2219_v6  ;;  %v2246_v24 = vpack.i.b16 %v1681_v44, %v1647_v2 }
 0x15b   : > { %v5609_v46 = vrot.slane %v1599_v35, %v4052_v41  ;;  %v2182_v45 = vshrl.u32 %v5594_v22, 16  ;;  %v2229_v62 = vshrl.u32 %v1037_v28, 16  ;;  %v2230_v58 = vshrl.u32 %v5598_v36, 16 }
 0x15c   : > { %2644 = vrot.lane.b32.xlu0 %v3515_v38, %s3704_s8  ;;  %v2982_v38 = vsel %vm2972_vm7, %v2971_v23, %v5481_v21  ;;  %v3066_v21 = vsel %vm2972_vm7, %v3056_v16, %v5476_v26  ;;  %v2199_v35 = vshrl.u32 %v1579_v5, 16  ;;  %v2248_v0 = vshrl.u32 %v1681_v44, 16 }
 0x15d   : > { %v5572_v3 = vpop.permute.xlu1 %2832  ;;  %v2749_v50 = vpop.permute.xlu0 %2748  ;;  %v2993_v41 = vsel %vm2983_vm8, %v2982_v38, %v5498_v52  ;;  %v2198_v18 = vpack.i.b16 %v5609_v46, %v1579_v5  ;;  %v3076_v52 = vsel %vm2983_vm8, %v3066_v21, %v5494_v49  ;;  %v3591_v22 = vcombine.low %v5231_v55, %v5231_v55  ;;  %v6075_v21 = vld [vmem:[#allocation36_spill] sm:$0xff] }
 0x15e   : > { %3185 = vrot.lane.b32.xlu1 %v3589_v8, %s3705_s9  ;;  %v3004_v8 = vsel %vm2994_vm9, %v2993_v41, %v5521_v10  ;;  %v3086_v26 = vsel %vm2994_vm9, %v3076_v52, %v5517_v34  ;;  %v2183_v36 = vpack.i.b16 %v2182_v45, %v2181_v61  ;;  %v2231_v28 = vpack.i.b16 %v2230_v58, %v2229_v62 }
 0x15f   : > { %v3015_v9 = vsel %vm3005_vm10, %v3004_v8, %v5551_v59  ;;  %v3096_v60 = vsel %vm3005_vm10, %v3086_v26, %v5564_v25  ;;  %v3535_v59 = vcombine.low %v2180_v57, %v2228_v30  ;;  %v3565_v12 = vcombine.low %v2198_v18, %v2246_v24  ;;  %v6076_v24 = vld [vmem:[#allocation13_spill] sm:$0xff] }
 0x160   : > { %2850 = vrot.lane.b32.xlu0 %v3560_v51, %s3705_s9  ;;  %v3026_v10 = vsel %vm3016_vm11, %v3015_v9, %v2749_v50  ;;  %v2200_v50 = vshrl.u32 %v5609_v46, 16  ;;  %v2247_v51 = vshrl.u32 %v1647_v2, 16  ;;  %v3540_v20 = vcombine.low %v2183_v36, %v2231_v28 }
 0x161   : > { %v5603_v1 = vpop.permute.xlu1 %2650  ;;  %v2931_v19 = vpop.permute.xlu0 %2930  ;;  %v1581_v23 = vcombine.high %v1579_v5, %v5974_v17  ;;  %v1683_v6 = vcombine.high %v1681_v44, %v5974_v17  ;;  %v1649_v38 = vcombine.high %v1647_v2, %v5974_v17  ;;  %v1615_v37 = vcombine.high %v5609_v46, %v5974_v17 }
 0x162   : > { %2716 = vrot.lane.b32.xlu1 %v3530_v31, %s3707_s11  ;;  %v3106_v13 = vsel %vm3016_vm11, %v3096_v60, %v2931_v19  ;;  %v3595_v31 = vcombine.low %v5081_v32, %v5081_v32  ;;  %v2201_v19 = vpack.i.b16 %v2200_v50, %v2199_v35  ;;  %v2249_v14 = vpack.i.b16 %v2248_v0, %v2247_v51  ;;  %v6077_v50 = vld [vmem:[#allocation41_spill] sm:$0xff] }
 0x163   : > { %v3596_v5 = vcombine.low %v5098_v33, %v5098_v33  ;;  %v2204_v44 = vpack.i.b16 %v1615_v37, %v1581_v23  ;;  %v2252_v57 = vpack.i.b16 %v1683_v6, %v1649_v38  ;;  %v3600_v16 = vcombine.low %v5316_v54, %v5316_v54 }
 0x164   : > { %3179 = vrot.lane.b32.xlu0 %v3587_v42, %s3703_s7  ;;  %v3570_v55 = vcombine.low %v2201_v19, %v2249_v14  ;;  %v2205_v17 = vshrl.u32 %v1581_v23, 16  ;;  %v2206_v41 = vshrl.u32 %v1615_v37, 16  ;;  %v2253_v30 = vshrl.u32 %v1649_v38, 16  ;;  %v6080_v19 = vld [vmem:[#allocation11_spill] sm:$0xff]  ;;  %v6083_v38 = vld [vmem:[#allocation37_spill] sm:$0xff] }
 0x165   : > { %v5627_v39 = vpop.permute.xlu1 %2856  ;;  %v2773_v15 = vpop.permute.xlu0 %2772  ;;  %v3575_v46 = vcombine.low %v2204_v44, %v2252_v57  ;;  %v3053_v8 = vsel %vm2956_vm6, %v6075_v21, %v5544_v63  ;;  %v3597_v52 = vcombine.low %v5326_v47, %v5326_v47  ;;  %v2968_v63 = vsel %vm2956_vm6, %v6076_v24, %v5562_v11 }
 0x166   : > { %3188 = vrot.lane.b32.xlu1 %v3590_v40, %s3706_s10  ;;  %v3041_v43 = vsel %vm3027_vm12, %v3026_v10, %v2773_v15  ;;  %v3599_v40 = vcombine.low %v5085_v4, %v5085_v4  ;;  %v2254_v4 = vshrl.u32 %v1683_v6, 16  ;;  %v3064_v15 = vsel %vm2972_vm7, %v3053_v8, %v5572_v3 }
 0x167   : > { %v3133_v48 = vsel %vm3132_vm13, %v3041_v43, 0  ;;  %v3074_v54 = vsel %vm2983_vm8, %v3064_v15, %v5627_v39  ;;  %v2207_v9 = vpack.i.b16 %v2206_v41, %v2205_v17  ;;  %v2980_v3 = vsel %vm2972_vm7, %v2968_v63, %v5603_v1 }
 0x168   : > { %2668 = vrot.lane.b32.xlu0 %v3520_v56, %s3705_s9  ;;  %v2255_v56 = vpack.i.b16 %v2254_v4, %v2253_v30  ;;  %v3592_v0 = vcombine.low %v6077_v50, %v6077_v50  ;;  %v6095_v50 = vld [vmem:[#allocation40_spill] sm:$0xff] }
 0x169   : > { %v5648_v49 = vpop.permute.xlu1 %2674  ;;  %v2955_v34 = vpop.permute.xlu0 %2954 }
 0x16a   : > { %2740 = vrot.lane.b32.xlu1 %v3535_v59, %s3708_s12  ;;  %v3120_v25 = vsel %vm3027_vm12, %v3106_v13, %v2955_v34  ;;  %v2991_v45 = vsel %vm2983_vm8, %v2980_v3, %v5648_v49  ;;  %v3580_v60 = vcombine.low %v2207_v9, %v2255_v56  ;;  %v3598_v49 = vcombine.low %v5065_v7, %v5065_v7  ;;  %v3272_v34 = vld [vmem:[%s5830_s4] sm:$0xf] }
 0x16b   : > { %3585 = vmatprep.subr.msk.bf16.mxu0 %vm3132_vm13, %v3120_v25 }
 0x16c   : > { %3144 = vmatpush1.bf16.msra.mxu0 %v3133_v48  ;;  %2874 = vrot.lane.b32.xlu0 %v3565_v12, %s3706_s10  ;;  %v6078_v12 = vld [vmem:[#allocation21_spill] sm:$0xff] }
 0x16d   : > { %v2699_v29 = vpop.permute.xlu1 %2698  ;;  %v2881_v33 = vpop.permute.xlu0 %2880  ;;  %v3593_v48 = vcombine.low %v6078_v12, %v6078_v12 }
 0x16e   : > { %3191 = vrot.lane.b32.xlu1 %v3591_v22, %s3707_s11  ;;  %v3084_v61 = vsel %vm2994_vm9, %v3074_v54, %v2881_v33  ;;  %v3002_v62 = vsel %vm2994_vm9, %v2991_v45, %v2699_v29  ;;  %v3122_v22 = vld [vmem:[%s5828_s2] sm:$0xff] }
 0x170   : > { %3203 = vrot.lane.b32.xlu0 %v3595_v31, %s3704_s8  ;;  %v6079_v31 = vld [vmem:[#allocation30_spill] sm:$0xff] }
 0x171   : > { %v2905_v42 = vpop.permute.xlu1 %2904  ;;  %v2807_v43 = vpop.permute.xlu0 %2806  ;;  %v6081_v14 = vpack.i.b16 %v6079_v31, %v6080_v19 }
 0x172   : > { %2764 = vrot.lane.b32.xlu1 %v3540_v20, %s3709_s13  ;;  %v3094_v26 = vsel %vm3005_vm10, %v3084_v61, %v2905_v42  ;;  %v6082_v42 = vld [vmem:[#allocation31_spill] sm:$0xff] }
 0x173   : > { %v3507_v20 = vcombine.low %v6082_v42, %v6081_v14 }
 0x174   : > { %2898 = vrot.lane.b32.xlu0 %v3570_v55, %s3707_s11  ;;  %v6084_v55 = vld [vmem:[#allocation38_spill] sm:$0xff] }
 0x175   : > { %v2723_v32 = vpop.permute.xlu1 %2722  ;;  %v6085_v37 = vpack.i.b16 %v6083_v38, %v6084_v55 }
 0x176   : > { %3215 = vrot.lane.b32.xlu1 %v3599_v40, %s3708_s12  ;;  %v3013_v11 = vsel %vm3005_vm10, %v3002_v62, %v2723_v32  ;;  %v6086_v32 = vld [vmem:[#allocation22_spill] sm:$0xff]  ;;  %v6089_v62 = vld [vmem:[#allocation27_spill] sm:$0xff] }
 0x177   : > { %v3547_v40 = vcombine.low %v6086_v32, %v6085_v37 }
 0x178   : > { %3206 = vrot.lane.b32.xlu0 %v3596_v5, %s3705_s9  ;;  %s311_s9 = scalar_lea.vmem %s5832_s6, %s3609_s30 }
 0x179   : > { %v2929_v2 = vpop.permute.xlu1 %2928 }
 0x17a   : > { %3218 = vrot.lane.b32.xlu1 %v3600_v16, %s3709_s13  ;;  %v3104_v10 = vsel %vm3016_vm11, %v3094_v26, %v2929_v2  ;;  %v3050_v2 = vsel %vm2956_vm6, %v3547_v40, %v2807_v43  ;;  %v6092_v43 = vld [vmem:[#allocation42_spill] sm:$0xff] }
 0x17c   : > { %2922 = vrot.lane.b32.xlu0 %v3575_v46, %s3708_s12 }
 0x17d   : > { %v2747_v18 = vpop.permute.xlu1 %2746 }
 0x17e   : > { %v3024_v59 = vsel %vm3016_vm11, %v3013_v11, %v2747_v18  ;;  %3275 = vperm.xlu1 %3649, %v3272_v34  }
 0x180   : > { %3209 = vrot.lane.b32.xlu0 %v3597_v52, %s3706_s10 }
 0x181   : > { %v2953_v39 = vpop.permute.xlu1 %2952 }
 0x182   : > { %v3117_v47 = vsel %vm3027_vm12, %v3104_v10, %v2953_v39  ;;  %v6087_v10 = vld [vmem:[#allocation25_spill] sm:$0xff]  ;;  %v6088_v39 = vld [vmem:[#allocation20_spill] sm:$0xff] }
 0x183   : > { %3145 = vmatprep.subr.bf16.mxu0 %v3117_v47  ;;  %v2306_v45 = vpack.i.b16 %v6088_v39, %v6087_v10 }
 0x184   : > { %2946 = vrot.lane.b32.xlu0 %v3580_v60, %s3709_s13  ;;  %v6090_v60 = vld [vmem:[#allocation19_spill] sm:$0xff] }
 0x185   : > { %v2771_v1 = vpop.permute.xlu1 %2770  ;;  %v2330_v11 = vpack.i.b16 %v6090_v60, %v6089_v62 }
 0x186   : > { %v3038_v58 = vsel %vm3027_vm12, %v3024_v59, %v2771_v1  ;;  %v6091_v1 = vld [vmem:[#allocation12_spill] sm:$0xff] }
 0x187   : > { %3146 = vmatpush1.bf16.msra.mxu0 %v3038_v58  ;;  %v6093_v58 = vpack.i.b16 %v6091_v1, %v6092_v43 }
 0x188   : > { %3212 = vrot.lane.b32.xlu0 %v3598_v49, %s3707_s11 }
 0x189   : > { %v2697_v13 = vpop.permute.xlu1 %2696  ;;  %v3506_v49 = vcombine.low %v6093_v58, %v2306_v45 }
 0x18a   : > { %v2625_v35 = vpop.permute.xlu0 %2624 }
 0x18b   : > { %v2965_v23 = vsel %vm2956_vm6, %v3507_v20, %v2625_v35  ;;  %v6094_v35 = vld [vmem:[#allocation39_spill] sm:$0xff] }
 0x18c   : > { %3194 = vrot.lane.b32.xlu0 %v3592_v0, %s3708_s12  ;;  %v6096_v0 = vpack.i.b16 %v6094_v35, %v6095_v50  ;;  %v3121_v50 = vld [vmem:[%s5827_s1] sm:$0xf] }
 0x18d   : > { %v2903_v51 = vpop.permute.xlu1 %2902 }
 0x18e   : > { %v2831_v25 = vpop.permute.xlu0 %2830 }
 0x18f   : > { %v3062_v17 = vsel %vm2972_vm7, %v3050_v2, %v2831_v25 }
 0x190   : > { %3197 = vrot.lane.b32.xlu0 %v3593_v48, %s3709_s13 }
 0x191   : > { %v2721_v7 = vpop.permute.xlu1 %2720 }
 0x192   : > { %v2649_v29 = vpop.permute.xlu0 %2648 }
 0x193   : > { %v2978_v5 = vsel %vm2972_vm7, %v2965_v23, %v2649_v29 }
 0x194   : > { %3125 = vperm.xlu0 %3648, %v3122_v22  }
 0x195   : > { %v2927_v36 = vpop.permute.xlu1 %2926 }
 0x196   : > { %v2855_v28 = vpop.permute.xlu0 %2854 }
 0x197   : > { %v3072_v41 = vsel %vm2983_vm8, %v3062_v17, %v2855_v28 }
 0x199   : > { %v2745_v6 = vpop.permute.xlu1 %2744 }
 0x19a   : > { %v2673_v44 = vpop.permute.xlu0 %2672 }
 0x19b   : > { %v2989_v57 = vsel %vm2983_vm8, %v2978_v5, %v2673_v44 }
 0x19c   : > { %v3000_v16 = vsel %vm2994_vm9, %v2989_v57, %v2697_v13 }
 0x19d   : > { %v2951_v46 = vpop.permute.xlu1 %2950  ;;  %v3011_v4 = vsel %vm3005_vm10, %v3000_v16, %v2721_v7 }
 0x19e   : > { %v2879_v30 = vpop.permute.xlu0 %2878  ;;  %v3022_v18 = vsel %vm3016_vm11, %v3011_v4, %v2745_v6 }
 0x19f   : > { %v3082_v21 = vsel %vm2994_vm9, %v3072_v41, %v2879_v30 }
 0x1a0   : > { %v3092_v8 = vsel %vm3005_vm10, %v3082_v21, %v2903_v51  ;;  %v3546_v51 = vcombine.low %v6096_v0, %v2330_v11 }
 0x1a1   : > { %v2769_v33 = vpop.permute.xlu1 %2768  ;;  %v3102_v15 = vsel %vm3016_vm11, %v3092_v8, %v2927_v36 }
 0x1a2   : > { %v3114_v54 = vsel %vm3027_vm12, %v3102_v15, %v2951_v46  ;;  %v3035_v61 = vsel %vm3027_vm12, %v3022_v18, %v2769_v33  ;;  %v2805_v52 = vpop.permute.xlu0 %2804 }
 0x1a3   : > { %3147 = vmatprep.subr.bf16.mxu0 %v3114_v54  ;;  %v3047_v7 = vsel %vm2956_vm6, %v3546_v51, %v2805_v52 }
 0x1a4   : > { %3148 = vmatpush1.bf16.msra.mxu0 %v3035_v61 }
 0x1a8   : > { %v2695_v9 = vpop.permute.xlu1 %2694 }
 0x1aa   : > { %v2623_v56 = vpop.permute.xlu0 %2622 }
 0x1ab   : > { %v2962_v34 = vsel %vm2956_vm6, %v3506_v49, %v2623_v56 }
 0x1ac   : > { %v2901_v24 = vpop.permute.xlu1 %2900 }
 0x1ae   : > { %v2829_v63 = vpop.permute.xlu0 %2828 }
 0x1af   : > { %v3060_v22 = vsel %vm2972_vm7, %v3047_v7, %v2829_v63 }
 0x1b0   : > { %v2719_v26 = vpop.permute.xlu1 %2718 }
 0x1b2   : > { %v2647_v3 = vpop.permute.xlu0 %2646 }
 0x1b3   : > { %v2976_v25 = vsel %vm2972_vm7, %v2962_v34, %v2647_v3 }
 0x1b4   : > { %v2925_v47 = vpop.permute.xlu1 %2924 }
 0x1b6   : > { %v2853_v59 = vpop.permute.xlu0 %2852 }
 0x1b7   : > { %v3070_v36 = vsel %vm2983_vm8, %v3060_v22, %v2853_v59 }
 0x1b8   : > { %v2743_v13 = vpop.permute.xlu1 %2742 }
 0x1ba   : > { %v2671_v12 = vpop.permute.xlu0 %2670 }
 0x1bb   : > { %v2987_v48 = vsel %vm2983_vm8, %v2976_v25, %v2671_v12 }
 0x1bc   : > { %v2949_v29 = vpop.permute.xlu1 %2948  ;;  %v2998_v28 = vsel %vm2994_vm9, %v2987_v48, %v2695_v9 }
 0x1bd   : > { %v3009_v6 = vsel %vm3005_vm10, %v2998_v28, %v2719_v26 }
 0x1be   : > { %v2877_v31 = vpop.permute.xlu0 %2876  ;;  %v3020_v40 = vsel %vm3016_vm11, %v3009_v6, %v2743_v13 }
 0x1bf   : > { %v3080_v19 = vsel %vm2994_vm9, %v3070_v36, %v2877_v31 }
 0x1c0   : > { %v3090_v14 = vsel %vm3005_vm10, %v3080_v19, %v2901_v24  ;;  %v3201_v20 = vpop.permute.xlu1 %3200 }
 0x1c1   : > { %v3100_v23 = vsel %vm3016_vm11, %v3090_v14, %v2925_v47 }
 0x1c2   : > { %v2803_v38 = vpop.permute.xlu0 %2802  ;;  %v3111_v55 = vsel %vm3027_vm12, %v3100_v23, %v2949_v29 }
 0x1c3   : > { %3149 = vmatprep.subr.bf16.mxu0 %v3111_v55  ;;  %v3044_v3 = vsel %vm2956_vm6, %v5472_v27, %v2803_v38  ;;  %v3238_v27 = vsel %vm2956_vm6, %v6086_v32, %v3201_v20  ;;  %v3271_v20 = vld [vmem:[%s5829_s3] sm:$0x3] }
 0x1c4   : > { %v2767_v37 = vpop.permute.xlu1 %2766 }
 0x1c5   : > { %v3032_v5 = vsel %vm3027_vm12, %v3020_v40, %v2767_v37 }
 0x1c6   : > { %3150 = vmatpush1.bf16.msra.mxu0 %v3032_v5  ;;  %v2621_v44 = vpop.permute.xlu0 %2620 }
 0x1c7   : > { %v2959_v9 = vsel %vm2956_vm6, %v5534_v53, %v2621_v44 }
 0x1c8   : > { %v3183_v57 = vpop.permute.xlu1 %3182 }
 0x1ca   : > { %v2827_v2 = vpop.permute.xlu0 %2826 }
 0x1cb   : > { %v3058_v39 = vsel %vm2972_vm7, %v3044_v3, %v2827_v2 }
 0x1cc   : > { %v2693_v16 = vpop.permute.xlu1 %2692 }
 0x1ce   : > { %v2645_v17 = vpop.permute.xlu0 %2644 }
 0x1cf   : > { %v2974_v56 = vsel %vm2972_vm7, %v2959_v9, %v2645_v17 }
 0x1d0   : > { %v3186_v46 = vpop.permute.xlu1 %3185 }
 0x1d2   : > { %v2851_v41 = vpop.permute.xlu0 %2850 }
 0x1d3   : > { %v3068_v47 = vsel %vm2983_vm8, %v3058_v39, %v2851_v41 }
 0x1d4   : > { %v2717_v4 = vpop.permute.xlu1 %2716 }
 0x1d6   : > { %v3180_v30 = vpop.permute.xlu0 %3179 }
 0x1d7   : > { %v3222_v43 = vsel %vm2956_vm6, %v6082_v42, %v3180_v30 }
 0x1d8   : > { %v3189_v8 = vpop.permute.xlu1 %3188  ;;  %v3224_v32 = vsel %vm2972_vm7, %v3222_v43, %v3183_v57 }
 0x1d9   : > { %v3226_v48 = vsel %vm2983_vm8, %v3224_v32, %v3186_v46 }
 0x1da   : > { %v2669_v21 = vpop.permute.xlu0 %2668  ;;  %v3228_v22 = vsel %vm2994_vm9, %v3226_v48, %v3189_v8 }
 0x1db   : > { %v2985_v24 = vsel %vm2983_vm8, %v2974_v56, %v2669_v21 }
 0x1dc   : > { %v2741_v18 = vpop.permute.xlu1 %2740  ;;  %v2996_v10 = vsel %vm2994_vm9, %v2985_v24, %v2693_v16 }
 0x1dd   : > { %v3007_v62 = vsel %vm3005_vm10, %v2996_v10, %v2717_v4 }
 0x1de   : > { %v2875_v33 = vpop.permute.xlu0 %2874  ;;  %v3018_v58 = vsel %vm3016_vm11, %v3007_v62, %v2741_v18 }
 0x1df   : > { %v3078_v53 = vsel %vm2994_vm9, %v3068_v47, %v2875_v33 }
 0x1e0   : > { %v3192_v61 = vpop.permute.xlu1 %3191 }
 0x1e1   : > { %v3230_v36 = vsel %vm3005_vm10, %v3228_v22, %v3192_v61 }
 0x1e2   : > { %v3204_v15 = vpop.permute.xlu0 %3203 }
 0x1e3   : > { %v3240_v13 = vsel %vm2972_vm7, %v3238_v27, %v3204_v15 }
 0x1e4   : > { %v2765_v26 = vpop.permute.xlu1 %2764 }
 0x1e5   : > { %v3029_v34 = vsel %vm3027_vm12, %v3018_v58, %v2765_v26 }
 0x1e6   : > { %v2899_v54 = vpop.permute.xlu0 %2898 }
 0x1e7   : > { %v3088_v60 = vsel %vm3005_vm10, %v3078_v53, %v2899_v54 }
 0x1e8   : > { %v3216_v11 = vpop.permute.xlu1 %3215 }
 0x1ea   : > { %v3207_v52 = vpop.permute.xlu0 %3206 }
 0x1eb   : > { %v3242_v35 = vsel %vm2983_vm8, %v3240_v13, %v3207_v52 }
 0x1ec   : > { %v3219_v25 = vpop.permute.xlu1 %3218 }
 0x1ee   : > { %v2923_v63 = vpop.permute.xlu0 %2922 }
 0x1ef   : > { %v3098_v59 = vsel %vm3016_vm11, %v3088_v60, %v2923_v63 }
 0x1f2   : > { %v3210_v45 = vpop.permute.xlu0 %3209 }
 0x1f3   : > { %v3244_v42 = vsel %vm2994_vm9, %v3242_v35, %v3210_v45 }
 0x1f6   : > { %v2947_v1 = vpop.permute.xlu0 %2946 }
 0x1f7   : > { %v3108_v49 = vsel %vm3027_vm12, %v3098_v59, %v2947_v1 }
 0x1f8   : > { %3151 = vmatprep.subr.bf16.mxu0 %v3108_v49 }
 0x1f9   : > { %3152 = vmatpush1.bf16.msra.mxu0 %v3029_v34  ;;  %v3276_v21 = vpop.permute.xlu1 %3275 }
 0x1fa   : > { %v3213_v0 = vpop.permute.xlu0 %3212 }
 0x1fb   : > { %v3246_v51 = vsel %vm3005_vm10, %v3244_v42, %v3213_v0 }
 0x1fc   : > { %3586 = vmatmul.mubr.msk.bf16.vlgmr.msra.gmra.mxu0 %vm3128_vm14, %v3121_v50  ;;  %v3248_v12 = vsel %vm3016_vm11, %v3246_v51, %v3216_v11 }
 0x1fd   : > { %v3250_v7 = vsel %vm3027_vm12, %v3248_v12, %v3219_v25 }
 0x1fe   : > { %3602 = vmatprep.subr.msk.bf16.mxu1 %vm3132_vm13, %v3250_v7  ;;  %v3195_v29 = vpop.permute.xlu0 %3194  ;;  %v3253_v40 = vunpack.c.l.bf16 %v3250_v7 }
 0x1ff   : > { %v3232_v28 = vsel %vm3016_vm11, %v3230_v36, %v3195_v29 }
 0x202   : > { %v3198_v31 = vpop.permute.xlu0 %3197 }
 0x203   : > { %v3234_v19 = vsel %vm3027_vm12, %v3232_v28, %v3198_v31 }
 0x204   : > { %v3282_v14 = vsel %vm3132_vm13, %v3234_v19, 0  ;;  %v3252_v38 = vunpack.c.l.bf16 %v3234_v19 }
 0x205   : > { %3301 = vmatpush1.bf16.msra.mxu1 %v3282_v14 }
 0x208   : > { %3603 = vmatmul.mubr.msk.bf16.vlgmr.msra.gmra.mxu1 %vm3278_vm15, %v3271_v20 }
 0x20f   : > { %v3126_v23 = vpop.permute.xlu0 %3125 }
 0x2bc   : > { %v3171_v6 = vpop.f32.mrf.mxu0 }
 0x2bd   : > { %v3172_v55 = vadd.f32 %v3171_v6, %v3126_v23 }
 0x2be   : > { %v3173_v37 = vpop.f32.mrf.mxu0 }
 0x2bf   : > { %v3254_v5 = vadd.f32 %v3252_v38, %v3172_v55  ;;  %v3174_v44 = vadd.f32 %v3173_v37, %v3126_v23 }
 0x2c0   : > { %v3175_v57 = vpop.f32.mrf.mxu0 }
 0x2c1   : > { %v3258_v2 = vmul.f32 0.05, %v3254_v5  ;;  %v3255_v16 = vadd.f32 %v3253_v40, %v3174_v44  ;;  %vm3256_vm0 = vcmp.ge.f32.partialorder %v3254_v5, 0.0 }
 0x2c2   : > { %v3176_v17 = vpop.f32.mrf.mxu0 }
 0x2c3   : > { %vm3257_vm1 = vcmp.ge.f32.partialorder %v3255_v16, 0.0  ;;  %v3259_v46 = vmul.f32 0.05, %v3255_v16  ;;  %v3260_v41 = vsel %vm3256_vm0, %v3254_v5, %v3258_v2 }
 0x2c5   : > { %v3261_v30 = vsel %vm3257_vm1, %v3255_v16, %v3259_v46 }
 0x2c6   : > { %v3610_v4 = vpack.c.bf16 %v3261_v30, %v3260_v41 }
 0x2c8   : > { %3270 = vst [vmem:[%s301_s29] sm:$0xff] %v3610_v4  ;;  %v3320_v8 = vpop.f32.mrf.mxu1 }
 0x2c9   : > { %v3321_v33 = vadd.f32 %v3320_v8, %v3276_v21 }
 0x2ca   : > { %v3322_v15 = vpop.f32.mrf.mxu1 }
 0x2cb   : > { %v3329_v18 = vmul.f32 0.05, %v3321_v33  ;;  %v3323_v54 = vadd.f32 %v3322_v15, %v3276_v21  ;;  %vm3327_vm2 = vcmp.ge.f32.partialorder %v3321_v33, 0.0 }
 0x2cc   : > { %v3324_v61 = vpop.f32.mrf.mxu1 }
 0x2cd   : > { %vm3328_vm3 = vcmp.ge.f32.partialorder %v3323_v54, 0.0  ;;  %v3330_v52 = vmul.f32 0.05, %v3323_v54  ;;  %v3331_v56 = vsel %vm3327_vm2, %v3321_v33, %v3329_v18 }
 0x2ce   : > { %v3325_v9 = vpop.f32.mrf.mxu1 }
 0x2cf   : > { %v3332_v24 = vsel %vm3328_vm3, %v3323_v54, %v3330_v52 }
 0x2d0   : > { %v3604_v63 = vpack.c.bf16 %v3332_v24, %v3331_v56 }
 0x2d2   : > { %3605 = vst.sshfl [vmem:[%s311_s9] sm:$0x33 pattern:$0x76325410] %v3604_v63 }
 0x2d3 PF: > { %s17_s23 = sadd.s32 1, %s3696_s23   ;;  %s6097_s21 = smov %s3692_s22 }
 0x2d4   : > { %p14_p5 = scmp.ge.s32.totalorder %s17_s23, 4   ;;  %s6098_s22 = smov %s6100_s24 }
 0x2d6   :  { %16 = sbr.rel (!%p14_p5) target bundleno = 2 (0x2), region = 82 }

// kernel: rfdb_forward.16
= control target key start
LH: loop header
LB: loop body
LE: loop exit
PB: predicated region body
PF: predicated region fallthrough
CT: control target
= control target key end

     0   :  { %s655_s12 = smov 0   ;;  %s657_s13 = smov 0   ;;  %s744_s0 = inlined_call_operand.vmem [shape: bf16[2,1,2,3,3], index: 0, kind: input, shape index: {}]   ;;  %s745_s1 = inlined_call_operand.vmem [shape: bf16[2,18], index: 1, kind: input, shape index: {}]   ;;  %s746_s2 = inlined_call_operand.vmem [shape: f32[2,1], index: 2, kind: input, shape index: {}]   ;;  %s747_s3 = inlined_call_operand.vmem [shape: bf16[2,2,1], index: 3, kind: output, shape index: {}]  }
   0x1   :  { %s659_s14 = smov 0  }
   0x2 LB: > { %s25_s15 = sadd.s32 1, %s624_s13  ;;  %p559_p0 = scmp.ge.s32.totalorder %s628_s14, 1  ;;  %s628_s14 = sphi %s659_s14, %s13_s14   ;;  %s624_s13 = sphi %s657_s13, %s749_s13   ;;  %s620_s12 = sphi %s655_s12, %s748_s12  }
   0x3   : > { %p27_p1 = scmp.ge.s32.totalorder %s25_s15, 2  ;;  %p157_p2 = scmp.lt.s32.totalorder %s628_s14, 3 }
   0x5   : > { %s751_s15 = smov (%p27_p1, %s25_s15), 0  ;;  %p158_p3 = pnand %p559_p0, %p157_p2 }
   0x6   : > { %p186_p4 = scmp.lt.s32.totalorder (!%p158_p3), %s620_s12, 1  ;;  %s631_s20 = smov (!%p158_p3), 126  }
   0x7   : > { %161 = sbr.rel (%p158_p3) target bundleno = 363 (0x16b), region = 32  ;;  %s632_s21 = smov (!%p158_p3), 127  }
   0xc   : > { %v249_v0 = vlaneseq  ;;  %v630_v1 = vmov 1983009808   ;;  %s753_s12 = smov (!%p186_p4, %s620_s12), 1  ;;  %vm391_vm0 = vcmask 1041409   ;;  %v633_v23 = vmov 0.0  }
   0xd   : > { %v247_v2 = vunpack.c.l.s4 %v630_v1  ;;  %s565_s16 = sshll.u32 %s753_s12, 2  ;;  %569 = vmatprep.subr.bf16.mxu0 %v633_v23  ;;  %vm634_vm1 = vmmov 0   ;;  %vm394_vm2 = vcmask 1042434   ;;  %vm397_vm3 = vcmask 1043459   ;;  %s200_s28 = scalar_lea.vmem %s747_s3, %s753_s12 }
   0xe   : > { %v250_v3 = vshrl.u32 %v249_v0, 7  ;;  %s194_s19 = scalar_lea.vmem %s744_s0, %s565_s16  ;;  %573 = vmatprep.mubr.msk.bf16.mxu0 %vm634_vm1, %v633_v23  ;;  %vm400_vm4 = vcmask 1044484   ;;  %vm403_vm5 = vcmask 1045509   ;;  %vm434_vm6 = vcmask 1040384  }
   0xf   : > { %v248_v4 = vunpack.c.0.s8 %v247_v2  ;;  %v202_v6 = vld [vmem:[%s194_s19] sm:$0x3]  ;;  %v203_v7 = vld [vmem:[%s194_s19 + $0x2] sm:$0x3]  ;;  %vm406_vm7 = vcmask 1046534   ;;  %vm409_vm8 = vcmask 1047559  }
  0x10   : > { %210 = vrot.lane.b32.xlu1 %v202_v6, %s631_s20  ;;  %206 = vrot.lane.b32.xlu0 %v202_v6, %s632_s21  ;;  %v234_v9 = vrot.slane %v203_v7, 7  ;;  %v220_v10 = vshrl.u32 %v203_v7, 16  ;;  %v215_v11 = vshrl.u32 %v202_v6, 16  ;;  %v232_v22 = vrot.slane %v202_v6, 7 }
  0x11   : > { %v679_v5 = vsub.s32 %v248_v4, %v250_v3  ;;  %vm430_vm9 = vcmask 146432   ;;  %vm479_vm10 = vcmask 0  }
  0x12   : > { %v235_v13 = vrot.slane %v234_v9, 2  ;;  %v222_v14 = vrot.slane %v220_v10, 6  ;;  %v217_v15 = vrot.slane %v215_v11, 6  ;;  %v233_v24 = vrot.slane %v232_v22, 2 }
  0x13   : > { %v252_v8 = vrot.slane %v202_v6, %v679_v5  ;;  %v259_v12 = vrot.slane %v203_v7, %v679_v5 }
  0x14   : > { %242 = vrot.lane.b32.xlu1 %v235_v13, %s631_s20  ;;  %208 = vrot.lane.b32.xlu0 %v203_v7, %s632_s21  ;;  %v223_v18 = vrot.slane %v222_v14, 2  ;;  %v218_v19 = vrot.slane %v217_v15, 2  ;;  %v343_v29 = vrot.slane %v235_v13, %v679_v5  ;;  %v336_v32 = vrot.slane %v233_v24, %v679_v5 }
  0x15   : > { %v372_v16 = vunpack.c.l.b16 %v252_v8  ;;  %v373_v17 = vunpack.c.l.b16 %v259_v12 }
  0x16   : > { %v385_v35 = vunpack.c.l.b16 %v343_v29  ;;  %v301_v38 = vrot.slane %v223_v18, %v679_v5  ;;  %v294_v39 = vrot.slane %v218_v19, %v679_v5  ;;  %v384_v44 = vunpack.c.l.b16 %v336_v32 }
  0x17   : > { %v390_v20 = vrot.slane %v373_v17, 7 }
  0x18   : > { %226 = vrot.lane.b32.xlu0 %v223_v18, %s632_s21  ;;  %228 = vrot.lane.b32.xlu1 %v218_v19, %s631_s20  ;;  %v419_v49 = vrot.slane %v385_v35, 3  ;;  %v379_v52 = vunpack.c.l.b16 %v301_v38  ;;  %v378_v53 = vunpack.c.l.b16 %v294_v39  ;;  %v417_v60 = vrot.slane %v384_v44, 4  ;;  %v245_v38 = vld [vmem:[%s746_s2] sm:$0x3] }
  0x19   : > { %v686_v21 = vsel %vm391_vm0, %v390_v20, %v372_v16 }
  0x1a   : > { %v408_v17 = vrot.slane %v379_v52, 1 }
  0x1c   : > { %230 = vrot.lane.b32.xlu0 %v223_v18, %s631_s20  ;;  %224 = vrot.lane.b32.xlu1 %v218_v19, %s632_s21 }
  0x20   : > { %240 = vrot.lane.b32.xlu0 %v233_v24, %s631_s20  ;;  %212 = vrot.lane.b32.xlu1 %v203_v7, %s631_s20 }
  0x24   : > { %236 = vrot.lane.b32.xlu0 %v233_v24, %s632_s21  ;;  %238 = vrot.lane.b32.xlu1 %v235_v13, %s632_s21  ;;  %v405_v13 = vrot.slane %v378_v53, 2 }
  0x82   : > { %v211_v25 = vpop.permute.xlu1 %210  ;;  %v207_v26 = vpop.permute.xlu0 %206 }
  0x83   : > { %v266_v30 = vrot.slane %v207_v26, %v679_v5  ;;  %v280_v45 = vrot.slane %v211_v25, %v679_v5 }
  0x85   : > { %v374_v40 = vunpack.c.l.b16 %v266_v30  ;;  %v376_v61 = vunpack.c.l.b16 %v280_v45 }
  0x86   : > { %v243_v27 = vpop.permute.xlu1 %242  ;;  %v209_v28 = vpop.permute.xlu0 %208 }
  0x87   : > { %v273_v31 = vrot.slane %v209_v28, %v679_v5  ;;  %v371_v41 = vrot.slane %v243_v27, %v679_v5  ;;  %v393_v54 = vrot.slane %v374_v40, 6  ;;  %v399_v14 = vrot.slane %v376_v61, 4 }
  0x89   : > { %v375_v42 = vunpack.c.l.b16 %v273_v31  ;;  %v389_v55 = vunpack.c.l.b16 %v371_v41  ;;  %v395_v7 = vsel %vm394_vm2, %v393_v54, %v686_v21 }
  0x8a   : > { %v227_v33 = vpop.permute.xlu0 %226  ;;  %v229_v34 = vpop.permute.xlu1 %228 }
  0x8b   : > { %v315_v36 = vrot.slane %v227_v33, %v679_v5  ;;  %v322_v37 = vrot.slane %v229_v34, %v679_v5  ;;  %v396_v56 = vrot.slane %v375_v42, 5  ;;  %v425_v6 = vrot.slane %v389_v55, 7 }
  0x8d   : > { %v381_v43 = vunpack.c.l.b16 %v315_v36  ;;  %v382_v46 = vunpack.c.l.b16 %v322_v37  ;;  %v398_v11 = vsel %vm397_vm3, %v396_v56, %v395_v7  ;;  %v244_v37 = vld [vmem:[%s745_s1] sm:$0x1] }
  0x8e   : > { %v231_v47 = vpop.permute.xlu0 %230  ;;  %v225_v48 = vpop.permute.xlu1 %224  ;;  %v401_v25 = vsel %vm400_vm4, %v399_v14, %v398_v11 }
  0x8f   : > { %v329_v50 = vrot.slane %v231_v47, %v679_v5  ;;  %v308_v51 = vrot.slane %v225_v48, %v679_v5  ;;  %v411_v57 = vrot.slane %v381_v43, 7  ;;  %v413_v62 = vrot.slane %v382_v46, 6 }
  0x91   : > { %v383_v58 = vunpack.c.l.b16 %v329_v50  ;;  %v380_v59 = vunpack.c.l.b16 %v308_v51 }
  0x92   : > { %v241_v63 = vpop.permute.xlu0 %240  ;;  %v213_v0 = vpop.permute.xlu1 %212 }
  0x93   : > { %v415_v1 = vrot.slane %v383_v58, 5  ;;  %v364_v2 = vrot.slane %v241_v63, %v679_v5  ;;  %v287_v3 = vrot.slane %v213_v0, %v679_v5  ;;  %v412_v4 = vsel %vm391_vm0, %v411_v57, %v380_v59 }
  0x94   : > { %v414_v8 = vsel %vm394_vm2, %v413_v62, %v412_v4 }
  0x95   : > { %v388_v9 = vunpack.c.l.b16 %v364_v2  ;;  %v377_v10 = vunpack.c.l.b16 %v287_v3  ;;  %v416_v12 = vsel %vm397_vm3, %v415_v1, %v414_v8 }
  0x96   : > { %v237_v15 = vpop.permute.xlu0 %236  ;;  %v239_v16 = vpop.permute.xlu1 %238  ;;  %v418_v18 = vsel %vm400_vm4, %v417_v60, %v416_v12 }
  0x97   : > { %v402_v19 = vrot.slane %v377_v10, 3  ;;  %v350_v20 = vrot.slane %v237_v15, %v679_v5  ;;  %v357_v21 = vrot.slane %v239_v16, %v679_v5  ;;  %v426_v22 = vsel %vm391_vm0, %v425_v6, %v388_v9 }
  0x98   : > { %v428_v24 = vpack.c.b16 %v426_v22, %v426_v22  ;;  %v420_v26 = vsel %vm403_vm5, %v419_v49, %v418_v18 }
  0x99   : > { %v386_v27 = vunpack.c.l.b16 %v350_v20  ;;  %v387_v28 = vunpack.c.l.b16 %v357_v21  ;;  %v404_v29 = vsel %vm403_vm5, %v402_v19, %v401_v25 }
  0x9a   : > { %v436_v30 = vsel %vm434_vm6, %v428_v24, 0  ;;  %v407_v31 = vsel %vm406_vm7, %v405_v13, %v404_v29 }
  0x9b   : > { %v421_v32 = vrot.slane %v386_v27, 2  ;;  %v423_v33 = vrot.slane %v387_v28, 1  ;;  %570 = vmatpush3.bf16.msra.mxu0 %v436_v30  ;;  %v410_v5 = vsel %vm409_vm8, %v408_v17, %v407_v31 }
  0x9c   : > { %571 = vmatprep.subr.bf16.mxu0 %v633_v23 }
  0x9d   : > { %v422_v34 = vsel %vm406_vm7, %v421_v32, %v420_v26 }
  0x9e   : > { %v424_v35 = vsel %vm409_vm8, %v423_v33, %v422_v34 }
  0x9f   : > { %v427_v36 = vpack.c.b16 %v424_v35, %v410_v5 }
  0xa1   : > { %572 = vmatpush3.bf16.msra.mxu0 %v427_v36 }
  0xa4   : > { %574 = vmatmul.mubr.msk.bf16.vlgmr.msra.gmra.mxu0 %vm430_vm9, %v244_v37 }
 0x164   : > { %v472_v39 = vpop.f32.mrf.mxu0 }
 0x165   : > { %v473_v40 = vadd.f32 %v472_v39, %v245_v38 }
 0x166   : > { %v575_v23 = vpop.f32.mrf.mxu0 }
 0x167   : > { %v478_v41 = vpack.c.bf16 %v473_v40, %v473_v40 }
 0x168   : > { %v475_v42 = vpop.f32.mrf.mxu0 }
 0x169   : > { %480 = vst.msk [vmem:[%s200_s28] sm:$0x1] %vm479_vm10, %v478_v41 }
 0x16a   : > { %v576_v43 = vpop.f32.mrf.mxu0 }
 0x16b PF: > { %s13_s14 = sadd.s32 1, %s628_s14   ;;  %s748_s12 = smov %s624_s13 }
 0x16c   : > { %p10_p5 = scmp.ge.s32.totalorder %s13_s14, 4   ;;  %s749_s13 = smov %s751_s15 }
 0x16e   :  { %12 = sbr.rel (!%p10_p5) target bundleno = 2 (0x2), region = 62 }

// kernel: rfdb_forward.17
= control target key start
LH: loop header
LB: loop body
LE: loop exit
PB: predicated region body
PF: predicated region fallthrough
CT: control target
= control target key end

     0   :  { %s813_s24 = smov 0   ;;  %s815_s25 = smov 0   ;;  %s875_s0 = inlined_call_operand.vmem [shape: bf16[2,2,256], index: 0, kind: input, shape index: {}]   ;;  %s876_s1 = inlined_call_operand.vmem [shape: bf16[2,2,256], index: 1, kind: input, shape index: {}]   ;;  %s877_s2 = inlined_call_operand.vmem [shape: bf16[2,8,256], index: 2, kind: input, shape index: {}]   ;;  %s878_s3 = inlined_call_operand.vmem [shape: bf16[2,2], index: 3, kind: input, shape index: {}]   ;;  %s879_s4 = inlined_call_operand.vmem [shape: f32[2,1], index: 4, kind: input, shape index: {}]   ;;  %s880_s5 = inlined_call_operand.vmem [shape: bf16[8,2], index: 5, kind: input, shape index: {}]   ;;  %s881_s6 = inlined_call_operand.vmem [shape: f32[8,1], index: 6, kind: input, shape index: {}]   ;;  %s882_s7 = inlined_call_operand.vmem [shape: f32[2,8,256], index: 7, kind: output, shape index: {}]  }
   0x1   :  { %s817_s26 = smov 0  }
   0x2 LB: > { %s29_s27 = sadd.s32 1, %s764_s25  ;;  %p692_p0 = scmp.ge.s32.totalorder %s768_s26, 1  ;;  %s768_s26 = sphi %s817_s26, %s17_s26   ;;  %s764_s25 = sphi %s815_s25, %s884_s25   ;;  %s760_s24 = sphi %s813_s24, %s883_s24  }
   0x3   : > { %p31_p1 = scmp.ge.s32.totalorder %s29_s27, 2  ;;  %p290_p2 = scmp.lt.s32.totalorder %s768_s26, 3 }
   0x5   : > { %s886_s27 = smov (%p31_p1, %s29_s27), 0  ;;  %p291_p3 = pnand %p692_p0, %p290_p2 }
   0x6   : > { %p347_p4 = scmp.lt.s32.totalorder (!%p291_p3), %s760_s24, 1 }
   0x7   : > { %294 = sbr.rel (%p291_p3) target bundleno = 470 (0x1d6), region = 48 }
   0xc   : > { %v405_v0 = vlaneseq  ;;  %v770_v1 = vmov 1966171168   ;;  %v771_v3 = vmov 0   ;;  %v387_v4 = vld [vmem:[%s879_s4] sm:$0x3]  ;;  %s888_s24 = smov (!%p347_p4, %s760_s24), 1 }
   0xd   : > { %v403_v2 = vunpack.c.l.s4 %v770_v1  ;;  %459 = vmatprep.mubr.bf16.mxu0 %v771_v3  ;;  %737 = vset.pattern.permute.xlu0 %v771_v3  ;;  %v496_v7 = vld [vmem:[%s881_s6] sm:$0xff]  ;;  %s693_s9 = sshll.u32 %s888_s24, 1  ;;  %vm420_vm0 = vcmask 1040384   ;;  %vm416_vm1 = vcmask 15360   ;;  %v772_v15 = vmov 1983009808  }
   0xe   : > { %v406_v5 = vshrl.u32 %v405_v0, 7  ;;  %390 = vperm.xlu0 %737, %v387_v4   ;;  %543 = vmatprep.mubr.bf16.mxu1 %v771_v3  ;;  %s353_s12 = scalar_lea.vmem %s875_s0, %s693_s9  ;;  %v385_v14 = vld [vmem:[%s878_s3] sm:$0x1]  ;;  %v474_v16 = vunpack.c.l.s4 %v772_v15  ;;  %s362_s17 = scalar_lea.vmem %s876_s1, %s693_s9 }
   0xf   : > { %v404_v6 = vunpack.c.0.s8 %v403_v2  ;;  %v699_v9 = vld.sshfl [vmem:[%s353_s12] sm:$0x11 pattern:$0x75316420]  ;;  %s708_s20 = sshll.u32 %s888_s24, 3  ;;  %s709_s28 = sshll.u32 %s888_s24, 4 }
  0x10   : > { %v401_v10 = vcombine.high %v699_v9, %v699_v9  ;;  %v475_v17 = vunpack.c.0.s8 %v474_v16  ;;  %v468_v19 = vld [vmem:[%s362_s17] sm:$0x3]  ;;  %s372_s23 = scalar_lea.vmem %s877_s2, %s708_s20  ;;  %s382_s8 = scalar_lea.vmem %s882_s7, %s709_s28 }
  0x11   : > { %v407_v8 = vsub.s32 %v404_v6, %v406_v5  ;;  %v469_v26 = vunpack.c.l.bf16 %v468_v19  ;;  %v482_v36 = vld [vmem:[%s880_s5] sm:$0xf] }
  0x12   : > { %499 = vperm.xlu0 %737, %v496_v7   ;;  %v478_v24 = vsub.s32 %v475_v17, %v406_v5  ;;  %v552_v50 = vld [vmem:[%s372_s23] sm:$0xff] }
  0x13   : > { %v408_v11 = vrot.slane %v699_v9, %v407_v8  ;;  %v415_v12 = vrot.slane %v401_v10, %v407_v8  ;;  %v553_v51 = vunpack.c.l.bf16 %v552_v50  ;;  %v554_v52 = vunpack.c.h.bf16 %v552_v50 }
  0x15   : > { %v422_v13 = vsel %vm420_vm0, %v408_v11, 0  ;;  %700 = vmatprep.subr.msk.bf16.mxu0 %vm420_vm0, %v415_v12 }
  0x16   : > { %442 = vmatpush1.bf16.msra.mxu0 %v422_v13 }
  0x19   : > { %701 = vmatmul.mubr.msk.bf16.vlgmr.msra.gmra.mxu0 %vm416_vm1, %v385_v14 }
  0x89   : > { %v391_v20 = vpop.permute.xlu0 %390 }
  0x8d   : > { %v500_v37 = vpop.permute.xlu0 %499 }
  0xd9   : > { %v461_v18 = vpop.f32.mrf.mxu0 }
  0xda   : > { %v462_v22 = vadd.f32 %v461_v18, %v391_v20 }
  0xdb   : > { %v463_v21 = vpop.f32.mrf.mxu0 }
  0xdc   : > { %v464_v23 = vadd.f32 %v463_v21, %v391_v20 }
  0xdd   : > { %v465_v25 = vpop.f32.mrf.mxu0 }
  0xde   : > { %v472_v27 = vcombine.low %v462_v22, %v464_v23 }
  0xdf   : > { %v466_v28 = vpop.f32.mrf.mxu0 }
  0xe0   : > { %v479_v29 = vrot.slane %v472_v27, %v478_v24 }
  0xe2   : > { %v481_v30 = vadd.f32 %v479_v29, %v469_v26 }
  0xe4   : > { %v490_v31 = vrot.slane %v481_v30, %v478_v24 }
  0xe6   : > { %v491_v32 = vcombine.high %v490_v31, %v490_v31  ;;  %v494_v33 = vpack.c.bf16 %v490_v31, %v490_v31 }
  0xe8   : > { %v495_v34 = vpack.c.bf16 %v491_v32, %v491_v32  ;;  %v506_v35 = vsel %vm420_vm0, %v494_v33, 0 }
  0xea   : > { %702 = vmatprep.subr.msk.bf16.mxu1 %vm420_vm0, %v495_v34 }
  0xeb   : > { %526 = vmatpush1.bf16.msra.mxu1 %v506_v35 }
  0xee   : > { %703 = vmatmul.mubr.msk.bf16.vlgmr.msra.gmra.mxu1 %vm416_vm1, %v482_v36 }
 0x1ae   : > { %v545_v38 = vpop.f32.mrf.mxu1 }
 0x1af   : > { %v546_v39 = vadd.f32 %v545_v38, %v500_v37 }
 0x1b0   : > { %v547_v40 = vpop.f32.mrf.mxu1 }
 0x1b1   : > { %v704_v41 = vmul.f32 -1.442695, %v546_v39  ;;  %v548_v42 = vadd.f32 %v547_v40, %v500_v37 }
 0x1b2   : > { %v549_v43 = vpop.f32.mrf.mxu1 }
 0x1b3   : > { %738 = vpow2.f32 %v704_v41  ;;  %v705_v44 = vmul.f32 -1.442695, %v548_v42 }
 0x1b4   : > { %v550_v45 = vpop.f32.mrf.mxu1 }
 0x1b5   : > { %740 = vpow2.f32 %v705_v44 }
 0x1c0   : > { %v739_v46 = vpop.eup %738 }
 0x1c1   : > { %v561_v47 = vadd.f32 1.0, %v739_v46 }
 0x1c2   : > { %v741_v48 = vpop.eup %740 }
 0x1c3   : > { %742 = vrcp.f32 %v561_v47  ;;  %v562_v49 = vadd.f32 1.0, %v741_v48 }
 0x1c5   : > { %744 = vrcp.f32 %v562_v49 }
 0x1d0   : > { %v743_v53 = vpop.eup %742 }
 0x1d1   : > { %v567_v54 = vmul.f32 %v743_v53, %v553_v51 }
 0x1d2   : > { %v745_v55 = vpop.eup %744 }
 0x1d3   : > { %569 = vst [vmem:[%s382_s8] sm:$0xff] %v567_v54  ;;  %v568_v56 = vmul.f32 %v745_v55, %v554_v52 }
 0x1d5   : > { %570 = vst [vmem:[%s382_s8 + $0x8] sm:$0xff] %v568_v56 }
 0x1d6 PF: > { %s17_s26 = sadd.s32 1, %s768_s26   ;;  %s883_s24 = smov %s764_s25 }
 0x1d7   : > { %p14_p5 = scmp.ge.s32.totalorder %s17_s26, 4   ;;  %s884_s25 = smov %s886_s27 }
 0x1d9   :  { %16 = sbr.rel (!%p14_p5) target bundleno = 2 (0x2), region = 84 }

// kernel: rfdb_forward.14
= control target key start
LH: loop header
LB: loop body
LE: loop exit
PB: predicated region body
PF: predicated region fallthrough
CT: control target
= control target key end

     0   :  { %s656_s12 = smov 0   ;;  %s658_s13 = smov 0   ;;  %s745_s0 = inlined_call_operand.vmem [shape: bf16[2,1,2,3,3], index: 0, kind: input, shape index: {}]   ;;  %s746_s1 = inlined_call_operand.vmem [shape: bf16[2,18], index: 1, kind: input, shape index: {}]   ;;  %s747_s2 = inlined_call_operand.vmem [shape: f32[2,1], index: 2, kind: input, shape index: {}]   ;;  %s748_s3 = inlined_call_operand.vmem [shape: bf16[2,2,1], index: 3, kind: output, shape index: {}]  }
   0x1   :  { %s660_s14 = smov 0  }
   0x2 LB: > { %s25_s15 = sadd.s32 1, %s625_s13  ;;  %p560_p0 = scmp.ge.s32.totalorder %s629_s14, 1  ;;  %s629_s14 = sphi %s660_s14, %s13_s14   ;;  %s625_s13 = sphi %s658_s13, %s750_s13   ;;  %s621_s12 = sphi %s656_s12, %s749_s12  }
   0x3   : > { %p27_p1 = scmp.ge.s32.totalorder %s25_s15, 2  ;;  %p157_p2 = scmp.lt.s32.totalorder %s629_s14, 3 }
   0x5   : > { %s752_s15 = smov (%p27_p1, %s25_s15), 0  ;;  %p158_p3 = pnand %p560_p0, %p157_p2 }
   0x6   : > { %p186_p4 = scmp.lt.s32.totalorder (!%p158_p3), %s621_s12, 1  ;;  %s632_s20 = smov (!%p158_p3), 126  }
   0x7   : > { %161 = sbr.rel (%p158_p3) target bundleno = 364 (0x16c), region = 32  ;;  %s633_s21 = smov (!%p158_p3), 127  }
   0xc   : > { %v249_v0 = vlaneseq  ;;  %v631_v1 = vmov 1983009808   ;;  %s754_s12 = smov (!%p186_p4, %s621_s12), 1  ;;  %vm391_vm0 = vcmask 1041409   ;;  %v634_v23 = vmov 0.0  }
   0xd   : > { %v247_v2 = vunpack.c.l.s4 %v631_v1  ;;  %s566_s16 = sshll.u32 %s754_s12, 2  ;;  %570 = vmatprep.subr.bf16.mxu0 %v634_v23  ;;  %vm635_vm1 = vmmov 0   ;;  %vm394_vm2 = vcmask 1042434   ;;  %vm397_vm3 = vcmask 1043459   ;;  %s200_s28 = scalar_lea.vmem %s748_s3, %s754_s12 }
   0xe   : > { %v250_v3 = vshrl.u32 %v249_v0, 7  ;;  %s194_s19 = scalar_lea.vmem %s745_s0, %s566_s16  ;;  %574 = vmatprep.mubr.msk.bf16.mxu0 %vm635_vm1, %v634_v23  ;;  %vm400_vm4 = vcmask 1044484   ;;  %vm403_vm5 = vcmask 1045509   ;;  %vm434_vm6 = vcmask 1040384  }
   0xf   : > { %v248_v4 = vunpack.c.0.s8 %v247_v2  ;;  %v202_v6 = vld [vmem:[%s194_s19] sm:$0x3]  ;;  %v203_v7 = vld [vmem:[%s194_s19 + $0x2] sm:$0x3]  ;;  %vm406_vm7 = vcmask 1046534   ;;  %vm409_vm8 = vcmask 1047559  }
  0x10   : > { %210 = vrot.lane.b32.xlu1 %v202_v6, %s632_s20  ;;  %206 = vrot.lane.b32.xlu0 %v202_v6, %s633_s21  ;;  %v234_v9 = vrot.slane %v203_v7, 7  ;;  %v220_v10 = vshrl.u32 %v203_v7, 16  ;;  %v215_v11 = vshrl.u32 %v202_v6, 16  ;;  %v232_v22 = vrot.slane %v202_v6, 7 }
  0x11   : > { %v680_v5 = vsub.s32 %v248_v4, %v250_v3  ;;  %vm430_vm9 = vcmask 146432   ;;  %vm480_vm10 = vcmask 0  }
  0x12   : > { %v235_v13 = vrot.slane %v234_v9, 2  ;;  %v222_v14 = vrot.slane %v220_v10, 6  ;;  %v217_v15 = vrot.slane %v215_v11, 6  ;;  %v233_v24 = vrot.slane %v232_v22, 2 }
  0x13   : > { %v252_v8 = vrot.slane %v202_v6, %v680_v5  ;;  %v259_v12 = vrot.slane %v203_v7, %v680_v5 }
  0x14   : > { %242 = vrot.lane.b32.xlu1 %v235_v13, %s632_s20  ;;  %208 = vrot.lane.b32.xlu0 %v203_v7, %s633_s21  ;;  %v223_v18 = vrot.slane %v222_v14, 2  ;;  %v218_v19 = vrot.slane %v217_v15, 2  ;;  %v343_v29 = vrot.slane %v235_v13, %v680_v5  ;;  %v336_v32 = vrot.slane %v233_v24, %v680_v5 }
  0x15   : > { %v372_v16 = vunpack.c.l.b16 %v252_v8  ;;  %v373_v17 = vunpack.c.l.b16 %v259_v12 }
  0x16   : > { %v385_v35 = vunpack.c.l.b16 %v343_v29  ;;  %v301_v38 = vrot.slane %v223_v18, %v680_v5  ;;  %v294_v39 = vrot.slane %v218_v19, %v680_v5  ;;  %v384_v44 = vunpack.c.l.b16 %v336_v32 }
  0x17   : > { %v390_v20 = vrot.slane %v373_v17, 7 }
  0x18   : > { %226 = vrot.lane.b32.xlu0 %v223_v18, %s633_s21  ;;  %228 = vrot.lane.b32.xlu1 %v218_v19, %s632_s20  ;;  %v419_v49 = vrot.slane %v385_v35, 3  ;;  %v379_v52 = vunpack.c.l.b16 %v301_v38  ;;  %v378_v53 = vunpack.c.l.b16 %v294_v39  ;;  %v417_v60 = vrot.slane %v384_v44, 4  ;;  %v245_v38 = vld [vmem:[%s747_s2] sm:$0x3] }
  0x19   : > { %v687_v21 = vsel %vm391_vm0, %v390_v20, %v372_v16 }
  0x1a   : > { %v408_v17 = vrot.slane %v379_v52, 1 }
  0x1c   : > { %230 = vrot.lane.b32.xlu0 %v223_v18, %s632_s20  ;;  %224 = vrot.lane.b32.xlu1 %v218_v19, %s633_s21 }
  0x20   : > { %240 = vrot.lane.b32.xlu0 %v233_v24, %s632_s20  ;;  %212 = vrot.lane.b32.xlu1 %v203_v7, %s632_s20 }
  0x24   : > { %236 = vrot.lane.b32.xlu0 %v233_v24, %s633_s21  ;;  %238 = vrot.lane.b32.xlu1 %v235_v13, %s633_s21  ;;  %v405_v13 = vrot.slane %v378_v53, 2 }
  0x82   : > { %v211_v25 = vpop.permute.xlu1 %210  ;;  %v207_v26 = vpop.permute.xlu0 %206 }
  0x83   : > { %v266_v30 = vrot.slane %v207_v26, %v680_v5  ;;  %v280_v45 = vrot.slane %v211_v25, %v680_v5 }
  0x85   : > { %v374_v40 = vunpack.c.l.b16 %v266_v30  ;;  %v376_v61 = vunpack.c.l.b16 %v280_v45 }
  0x86   : > { %v243_v27 = vpop.permute.xlu1 %242  ;;  %v209_v28 = vpop.permute.xlu0 %208 }
  0x87   : > { %v273_v31 = vrot.slane %v209_v28, %v680_v5  ;;  %v371_v41 = vrot.slane %v243_v27, %v680_v5  ;;  %v393_v54 = vrot.slane %v374_v40, 6  ;;  %v399_v14 = vrot.slane %v376_v61, 4 }
  0x89   : > { %v375_v42 = vunpack.c.l.b16 %v273_v31  ;;  %v389_v55 = vunpack.c.l.b16 %v371_v41  ;;  %v395_v7 = vsel %vm394_vm2, %v393_v54, %v687_v21 }
  0x8a   : > { %v227_v33 = vpop.permute.xlu0 %226  ;;  %v229_v34 = vpop.permute.xlu1 %228 }
  0x8b   : > { %v315_v36 = vrot.slane %v227_v33, %v680_v5  ;;  %v322_v37 = vrot.slane %v229_v34, %v680_v5  ;;  %v396_v56 = vrot.slane %v375_v42, 5  ;;  %v425_v6 = vrot.slane %v389_v55, 7 }
  0x8d   : > { %v381_v43 = vunpack.c.l.b16 %v315_v36  ;;  %v382_v46 = vunpack.c.l.b16 %v322_v37  ;;  %v398_v11 = vsel %vm397_vm3, %v396_v56, %v395_v7  ;;  %v244_v37 = vld [vmem:[%s746_s1] sm:$0x1] }
  0x8e   : > { %v231_v47 = vpop.permute.xlu0 %230  ;;  %v225_v48 = vpop.permute.xlu1 %224  ;;  %v401_v25 = vsel %vm400_vm4, %v399_v14, %v398_v11 }
  0x8f   : > { %v329_v50 = vrot.slane %v231_v47, %v680_v5  ;;  %v308_v51 = vrot.slane %v225_v48, %v680_v5  ;;  %v411_v57 = vrot.slane %v381_v43, 7  ;;  %v413_v62 = vrot.slane %v382_v46, 6 }
  0x91   : > { %v383_v58 = vunpack.c.l.b16 %v329_v50  ;;  %v380_v59 = vunpack.c.l.b16 %v308_v51 }
  0x92   : > { %v241_v63 = vpop.permute.xlu0 %240  ;;  %v213_v0 = vpop.permute.xlu1 %212 }
  0x93   : > { %v415_v1 = vrot.slane %v383_v58, 5  ;;  %v364_v2 = vrot.slane %v241_v63, %v680_v5  ;;  %v287_v3 = vrot.slane %v213_v0, %v680_v5  ;;  %v412_v4 = vsel %vm391_vm0, %v411_v57, %v380_v59 }
  0x94   : > { %v414_v8 = vsel %vm394_vm2, %v413_v62, %v412_v4 }
  0x95   : > { %v388_v9 = vunpack.c.l.b16 %v364_v2  ;;  %v377_v10 = vunpack.c.l.b16 %v287_v3  ;;  %v416_v12 = vsel %vm397_vm3, %v415_v1, %v414_v8 }
  0x96   : > { %v237_v15 = vpop.permute.xlu0 %236  ;;  %v239_v16 = vpop.permute.xlu1 %238  ;;  %v418_v18 = vsel %vm400_vm4, %v417_v60, %v416_v12 }
  0x97   : > { %v402_v19 = vrot.slane %v377_v10, 3  ;;  %v350_v20 = vrot.slane %v237_v15, %v680_v5  ;;  %v357_v21 = vrot.slane %v239_v16, %v680_v5  ;;  %v426_v22 = vsel %vm391_vm0, %v425_v6, %v388_v9 }
  0x98   : > { %v428_v24 = vpack.c.b16 %v426_v22, %v426_v22  ;;  %v420_v26 = vsel %vm403_vm5, %v419_v49, %v418_v18 }
  0x99   : > { %v386_v27 = vunpack.c.l.b16 %v350_v20  ;;  %v387_v28 = vunpack.c.l.b16 %v357_v21  ;;  %v404_v29 = vsel %vm403_vm5, %v402_v19, %v401_v25 }
  0x9a   : > { %v436_v30 = vsel %vm434_vm6, %v428_v24, 0  ;;  %v407_v31 = vsel %vm406_vm7, %v405_v13, %v404_v29 }
  0x9b   : > { %v421_v32 = vrot.slane %v386_v27, 2  ;;  %v423_v33 = vrot.slane %v387_v28, 1  ;;  %571 = vmatpush3.bf16.msra.mxu0 %v436_v30  ;;  %v410_v5 = vsel %vm409_vm8, %v408_v17, %v407_v31 }
  0x9c   : > { %572 = vmatprep.subr.bf16.mxu0 %v634_v23 }
  0x9d   : > { %v422_v34 = vsel %vm406_vm7, %v421_v32, %v420_v26 }
  0x9e   : > { %v424_v35 = vsel %vm409_vm8, %v423_v33, %v422_v34 }
  0x9f   : > { %v427_v36 = vpack.c.b16 %v424_v35, %v410_v5 }
  0xa1   : > { %573 = vmatpush3.bf16.msra.mxu0 %v427_v36 }
  0xa4   : > { %575 = vmatmul.mubr.msk.bf16.vlgmr.msra.gmra.mxu0 %vm430_vm9, %v244_v37 }
 0x164   : > { %v472_v39 = vpop.f32.mrf.mxu0 }
 0x165   : > { %v473_v40 = vadd.f32 %v472_v39, %v245_v38 }
 0x166   : > { %v576_v41 = vpop.f32.mrf.mxu0 }
 0x167   : > { %v478_v42 = vmax.f32 %v473_v40, 0.0 }
 0x168   : > { %v475_v23 = vpop.f32.mrf.mxu0 }
 0x169   : > { %v479_v43 = vpack.c.bf16 %v478_v42, %v478_v42 }
 0x16a   : > { %v577_v44 = vpop.f32.mrf.mxu0 }
 0x16b   : > { %481 = vst.msk [vmem:[%s200_s28] sm:$0x1] %vm480_vm10, %v479_v43 }
 0x16c PF: > { %s13_s14 = sadd.s32 1, %s629_s14   ;;  %s749_s12 = smov %s625_s13 }
 0x16d   : > { %p10_p5 = scmp.ge.s32.totalorder %s13_s14, 4   ;;  %s750_s13 = smov %s752_s15 }
 0x16f   :  { %12 = sbr.rel (!%p10_p5) target bundleno = 2 (0x2), region = 62 }

</bundles_post_ra>
